<compile_context>
chip_gen: v7x
topology: tpu7x:2x2x1
jax: 0.10.0
libtpu: 0.0.40
codegen_flags: <defaults>
</compile_context>

<pallas_src>
import jax
import jax.numpy as jnp
from jax.experimental import pallas as pl
from jax.experimental.pallas import tpu as pltpu

NEG_SLOPE = 0.01  # F.leaky_relu default negative_slope
HIDDEN = 1024
OUT_PAD = 128     # lane-dense output width (real output dim is 3)


def _leaky_relu(x):
    return jnp.where(x > 0, x, NEG_SLOPE * x)


def part_decoder_kernel(fp_ref, pp_ref, w2_ref, b2_ref, w3_ref, b3_ref, o_ref):
    # fp_ref: (1, 1, H) f32   feat @ W1[:F]            (per-batch row)
    # pp_ref: (tn, H)   f32   pc   @ W1[F:] + b1       (per-point tile)
    # w2_ref: (H, H)    bf16 ; b2_ref: (1, H)    f32
    # w3_ref: (H, 128)  bf16 (zero-padded cols 3..127); b3_ref: (1, 128) f32
    # o_ref : (1, tn, 128) f32
    h1 = _leaky_relu(fp_ref[0] + pp_ref[...])                       # (tn, H) f32
    h2 = jnp.dot(h1.astype(jnp.bfloat16), w2_ref[...],
                 preferred_element_type=jnp.float32) + b2_ref[...]  # (tn, H) f32
    h2 = _leaky_relu(h2)
    out = jnp.dot(h2.astype(jnp.bfloat16), w3_ref[...],
                  preferred_element_type=jnp.float32) + b3_ref[...]  # (tn, 128) f32
    o_ref[0] = out.astype(o_ref.dtype)


def part_decoder(feat, pc, params, *, tn=256):
    """feat: [B, F], pc: [N, 3] -> [B, N, 3] (matches PartDecoder.forward)."""
    B, F = feat.shape
    N = pc.shape[0]
    w1, b1, w2, b2, w3, b3 = params
    H = w1.shape[1]
    O = w3.shape[1]  # 3

    # --- layer-1 linearity split (tiny matmuls, done once in the wrapper) ---
    # cat([feat, pc], -1) @ W1 + b1 == feat @ W1[:F]  +  (pc @ W1[F:] + b1)
    feat_proj = (feat.astype(jnp.float32) @ w1[:F]).reshape(B, 1, H)
    pc_proj = (pc.astype(jnp.float32) @ w1[F:] + b1).astype(jnp.float32)

    # pad the point axis to a multiple of the row tile
    n_tiles = -(-N // tn)
    Npad = n_tiles * tn
    if Npad != N:
        pc_proj = jnp.pad(pc_proj, ((0, Npad - N), (0, 0)))

    # lane-dense output: pad W3 / b3 to 128 columns
    w3p = jnp.zeros((H, OUT_PAD), jnp.float32).at[:, :O].set(w3)
    b3p = jnp.zeros((1, OUT_PAD), jnp.float32).at[:, :O].set(b3.reshape(-1))

    # bf16 MXU operands, f32 accumulation / biases
    w2_b = w2.astype(jnp.bfloat16)
    w3_b = w3p.astype(jnp.bfloat16)
    b2_r = b2.reshape(1, H).astype(jnp.float32)

    out = pl.pallas_call(
        part_decoder_kernel,
        out_shape=jax.ShapeDtypeStruct((B, Npad, OUT_PAD), jnp.float32),
        grid_spec=pltpu.PrefetchScalarGridSpec(
            num_scalar_prefetch=0,
            grid=(B, n_tiles),
            in_specs=[
                pl.BlockSpec((1, 1, H), lambda b, j: (b, 0, 0)),      # feat_proj row
                pl.BlockSpec((tn, H), lambda b, j: (j, 0)),           # pc_proj tile
                pl.BlockSpec((H, H), lambda b, j: (0, 0)),            # w2 (resident)
                pl.BlockSpec((1, H), lambda b, j: (0, 0)),            # b2
                pl.BlockSpec((H, OUT_PAD), lambda b, j: (0, 0)),      # w3 (padded, resident)
                pl.BlockSpec((1, OUT_PAD), lambda b, j: (0, 0)),      # b3 (padded)
            ],
            out_specs=pl.BlockSpec((1, tn, OUT_PAD), lambda b, j: (b, j, 0)),
        ),
        compiler_params=pltpu.CompilerParams(
            dimension_semantics=("parallel", "parallel"),
        ),
    )(feat_proj, pc_proj, w2_b, b2_r, w3_b, b3p)

    return out[:, :N, :O]


def init_params(key, feat_len, hidden=HIDDEN):
    """Deterministic init mimicking nn.Linear (uniform(-1/sqrt(fan_in), 1/sqrt(fan_in)))."""
    dims = [(feat_len + 3, hidden), (hidden, hidden), (hidden, 3)]
    params = []
    for (fan_in, fan_out) in dims:
        key, kw, kb = jax.random.split(key, 3)
        bound = 1.0 / jnp.sqrt(fan_in)
        w = jax.random.uniform(kw, (fan_in, fan_out), jnp.float32, -bound, bound)
        b = jax.random.uniform(kb, (fan_out,), jnp.float32, -bound, bound)
        params += [w, b]
    return tuple(params)


def part_decoder_ref(feat, pc, params):
    """Pure-JAX (f32) reference of the PyTorch forward."""
    w1, b1, w2, b2, w3, b3 = params
    B, F = feat.shape
    N = pc.shape[0]
    net = jnp.concatenate(
        [
            jnp.broadcast_to(feat[:, None, :], (B, N, F)),
            jnp.broadcast_to(pc[None, :, :], (B, N, 3)),
        ],
        axis=-1,
    )
    net = _leaky_relu(net @ w1 + b1)
    net = _leaky_relu(net @ w2 + b2)
    return net @ w3 + b3


if __name__ == "__main__":
    feat_len = 32
    B, N = 2, 200  # exercises the N-padding path (tn=256 -> Npad=256)

    key = jax.random.PRNGKey(0)
    kf, kp, kparams = jax.random.split(key, 3)
    feat = jax.random.normal(kf, (B, feat_len), jnp.float32)
    pc = jax.random.normal(kp, (N, 3), jnp.float32)
    params = init_params(kparams, feat_len)

    out = part_decoder(feat, pc, params)
    out = jax.block_until_ready(out)

    ref = part_decoder_ref(feat, pc, params)
    assert out.shape == (B, N, 3)
    # bf16 MXU operands with f32 accumulation -> loosened tolerance (precision tradeoff)
    assert jnp.allclose(out, ref, atol=3e-2, rtol=3e-2), (
        float(jnp.max(jnp.abs(out - ref)))
    )

    print("KERNEL_OK")
</pallas_src>

<mosaic_0001>
module attributes {stable_mosaic.version = 11 : i64} {
  func.func @part_decoder_kernel(%arg0: i32, %arg1: i32, %arg2: memref<1x1x1024xf32, #tpu.memory_space<vmem>>, %arg3: memref<256x1024xf32, #tpu.memory_space<vmem>>, %arg4: memref<1024x1024xbf16, #tpu.memory_space<vmem>>, %arg5: memref<1x1024xf32, #tpu.memory_space<vmem>>, %arg6: memref<1024x128xbf16, #tpu.memory_space<vmem>>, %arg7: memref<1x128xf32, #tpu.memory_space<vmem>>, %arg8: memref<1x256x128xf32, #tpu.memory_space<vmem>>) attributes {dimension_semantics = [#tpu.dimension_semantics<parallel>, #tpu.dimension_semantics<parallel>], iteration_bounds = array<i64: 2, 1>, scalar_prefetch = 0 : i64, scratch_operands = 0 : i64, tpu.core_type = #tpu.core_type<tc>, window_params = [{transform_indices = @transform_0, window_bounds = array<i64: 1, 1, 1024>}, {transform_indices = @transform_1, window_bounds = array<i64: 256, 1024>}, {pipeline_mode = #tpu.pipeline_mode<synchronous>, transform_indices = @transform_2, window_bounds = array<i64: 1024, 1024>}, {pipeline_mode = #tpu.pipeline_mode<synchronous>, transform_indices = @transform_3, window_bounds = array<i64: 1, 1024>}, {pipeline_mode = #tpu.pipeline_mode<synchronous>, transform_indices = @transform_4, window_bounds = array<i64: 1024, 128>}, {pipeline_mode = #tpu.pipeline_mode<synchronous>, transform_indices = @transform_5, window_bounds = array<i64: 1, 128>}, {transform_indices = @transform_6, window_bounds = array<i64: 1, 256, 128>}]} {
    %c0 = arith.constant 0 : index
    %c0_0 = arith.constant 0 : index
    %c0_1 = arith.constant 0 : index
    %0 = vector.load %arg2[%c0, %c0_0, %c0_1] : memref<1x1x1024xf32, #tpu.memory_space<vmem>>, vector<1x1x1024xf32>
    %1 = vector.shape_cast %0 : vector<1x1x1024xf32> to vector<1x1024xf32>
    %c0_2 = arith.constant 0 : index
    %c0_3 = arith.constant 0 : index
    %2 = vector.load %arg3[%c0_2, %c0_3] : memref<256x1024xf32, #tpu.memory_space<vmem>>, vector<256x1024xf32>
    %3 = vector.broadcast %1 : vector<1x1024xf32> to vector<256x1024xf32>
    %4 = arith.addf %3, %2 : vector<256x1024xf32>
    %cst = arith.constant 0.000000e+00 : f32
    %5 = vector.broadcast %cst : f32 to vector<256x1024xf32>
    %6 = arith.cmpf ogt, %4, %5 : vector<256x1024xf32>
    %cst_4 = arith.constant 0.00999999977 : f32
    %7 = vector.broadcast %cst_4 : f32 to vector<256x1024xf32>
    %8 = arith.mulf %7, %4 : vector<256x1024xf32>
    %9 = arith.select %6, %4, %8 : vector<256x1024xi1>, vector<256x1024xf32>
    %10 = arith.truncf %9 : vector<256x1024xf32> to vector<256x1024xbf16>
    %c0_5 = arith.constant 0 : index
    %c0_6 = arith.constant 0 : index
    %11 = vector.load %arg4[%c0_5, %c0_6] : memref<1024x1024xbf16, #tpu.memory_space<vmem>>, vector<1024x1024xbf16>
    %cst_7 = arith.constant dense<0.000000e+00> : vector<256x1024xf32>
    %12 = tpu.matmul %10, %11, %cst_7 {dimension_numbers = #tpu.dot_dimension_numbers<[1], [0], [0], [1], [0, 0, 1, 1], [], []>} : vector<256x1024xbf16>, vector<1024x1024xbf16>, vector<256x1024xf32> -> vector<256x1024xf32>
    %c0_8 = arith.constant 0 : index
    %c0_9 = arith.constant 0 : index
    %13 = vector.load %arg5[%c0_8, %c0_9] : memref<1x1024xf32, #tpu.memory_space<vmem>>, vector<1x1024xf32>
    %14 = vector.broadcast %13 : vector<1x1024xf32> to vector<256x1024xf32>
    %15 = arith.addf %12, %14 : vector<256x1024xf32>
    %cst_10 = arith.constant 0.000000e+00 : f32
    %16 = vector.broadcast %cst_10 : f32 to vector<256x1024xf32>
    %17 = arith.cmpf ogt, %15, %16 : vector<256x1024xf32>
    %cst_11 = arith.constant 0.00999999977 : f32
    %18 = vector.broadcast %cst_11 : f32 to vector<256x1024xf32>
    %19 = arith.mulf %18, %15 : vector<256x1024xf32>
    %20 = arith.select %17, %15, %19 : vector<256x1024xi1>, vector<256x1024xf32>
    %21 = arith.truncf %20 : vector<256x1024xf32> to vector<256x1024xbf16>
    %c0_12 = arith.constant 0 : index
    %c0_13 = arith.constant 0 : index
    %22 = vector.load %arg6[%c0_12, %c0_13] : memref<1024x128xbf16, #tpu.memory_space<vmem>>, vector<1024x128xbf16>
    %cst_14 = arith.constant dense<0.000000e+00> : vector<256x128xf32>
    %23 = tpu.matmul %21, %22, %cst_14 {dimension_numbers = #tpu.dot_dimension_numbers<[1], [0], [0], [1], [0, 0, 1, 1], [], []>} : vector<256x1024xbf16>, vector<1024x128xbf16>, vector<256x128xf32> -> vector<256x128xf32>
    %c0_15 = arith.constant 0 : index
    %c0_16 = arith.constant 0 : index
    %24 = vector.load %arg7[%c0_15, %c0_16] : memref<1x128xf32, #tpu.memory_space<vmem>>, vector<1x128xf32>
    %25 = vector.broadcast %24 : vector<1x128xf32> to vector<256x128xf32>
    %26 = arith.addf %23, %25 : vector<256x128xf32>
    %c0_17 = arith.constant 0 : index
    %c0_18 = arith.constant 0 : index
    %c0_19 = arith.constant 0 : index
    %27 = vector.load %arg8[%c0_17, %c0_18, %c0_19] : memref<1x256x128xf32, #tpu.memory_space<vmem>>, vector<1x256x128xf32>
    %28 = vector.shape_cast %27 : vector<1x256x128xf32> to vector<256x128xf32>
    %29 = vector.shape_cast %26 : vector<256x128xf32> to vector<1x256x128xf32>
    tpu.vector_store %arg8[%c0_17, %c0_18, %c0_19], %29 {strides = array<i32>} : memref<1x256x128xf32, #tpu.memory_space<vmem>>, vector<1x256x128xf32>,
    return
  }
  func.func @transform_0(%arg0: i32, %arg1: i32) -> (i32, i32, i32) {
    %c0_i32 = arith.constant 0 : i32
    %c0_i32_0 = arith.constant 0 : i32
    %c0_i32_1 = arith.constant 0 : i32
    return %arg0, %c0_i32, %c0_i32_0 : i32, i32, i32
  }
  func.func @transform_1(%arg0: i32, %arg1: i32) -> (i32, i32) {
    %c0_i32 = arith.constant 0 : i32
    %c0_i32_0 = arith.constant 0 : i32
    return %arg1, %c0_i32 : i32, i32
  }
  func.func @transform_2(%arg0: i32, %arg1: i32) -> (i32, i32) {
    %c0_i32 = arith.constant 0 : i32
    %c0_i32_0 = arith.constant 0 : i32
    %c0_i32_1 = arith.constant 0 : i32
    return %c0_i32, %c0_i32_0 : i32, i32
  }
  func.func @transform_3(%arg0: i32, %arg1: i32) -> (i32, i32) {
    %c0_i32 = arith.constant 0 : i32
    %c0_i32_0 = arith.constant 0 : i32
    %c0_i32_1 = arith.constant 0 : i32
    return %c0_i32, %c0_i32_0 : i32, i32
  }
  func.func @transform_4(%arg0: i32, %arg1: i32) -> (i32, i32) {
    %c0_i32 = arith.constant 0 : i32
    %c0_i32_0 = arith.constant 0 : i32
    %c0_i32_1 = arith.constant 0 : i32
    return %c0_i32, %c0_i32_0 : i32, i32
  }
  func.func @transform_5(%arg0: i32, %arg1: i32) -> (i32, i32) {
    %c0_i32 = arith.constant 0 : i32
    %c0_i32_0 = arith.constant 0 : i32
    %c0_i32_1 = arith.constant 0 : i32
    return %c0_i32, %c0_i32_0 : i32, i32
  }
  func.func @transform_6(%arg0: i32, %arg1: i32) -> (i32, i32, i32) {
    %c0_i32 = arith.constant 0 : i32
    %c0_i32_0 = arith.constant 0 : i32
    return %arg0, %arg1, %c0_i32 : i32, i32, i32
  }
}

</mosaic_0001>

<bundles_post_ra>
// kernel: tpu_custom_call.1
= control target key start
LH: loop header
LB: loop body
LE: loop exit
PB: predicated region body
PF: predicated region fallthrough
CT: control target
= control target key end

     0   :  { %s18783_s0 = inlined_call_operand.hbm [shape: f32[2,1,1024], index: 0, kind: input, shape index: {}]   ;;  %s18784_s1 = inlined_call_operand.hbm [shape: f32[256,1024], index: 1, kind: input, shape index: {}]   ;;  %s18785_s2 = inlined_call_operand.hbm [shape: bf16[1024,1024], index: 2, kind: input, shape index: {}]   ;;  %s18786_s3 = inlined_call_operand.hbm [shape: f32[1,1024], index: 3, kind: input, shape index: {}]   ;;  %s18787_s4 = inlined_call_operand.hbm [shape: bf16[1024,128], index: 4, kind: input, shape index: {}]   ;;  %s18788_s5 = inlined_call_operand.hbm [shape: f32[1,128], index: 5, kind: input, shape index: {}]   ;;  %s18789_s6 = inlined_call_operand.hbm [shape: f32[2,256,128], index: 6, kind: output, shape index: {}]  }
   0x1   :  { %19265 = sst [smem:[#allocation268_spill]] %s18784_s1 }
   0x2   :  { %11 = vsyncpa [#allocation3], 0 }
   0x3   :  { %13 = vsyncpa [#allocation3 + $0x1], 0 }
   0x4   :  { %14 = vsyncpa [#allocation6], 0 }
   0x5   :  { %15 = vsyncpa [#allocation9], 0 }
   0x6   :  { %16 = vsyncpa [#allocation12], 0 }
   0x7   :  { %17 = vsyncpa [#allocation4], 0 }
   0x8   :  { %19 = vsyncpa [#allocation4 + $0x1], 0  ;;  %s12835_s21 = smov 0   ;;  %s12837_s22 = smov 0  }
   0x9   :  { %s12839_s23 = smov 0   ;;  %s12841_s24 = smov 0  }
   0xa   :  { %s12843_s25 = smov 0   ;;  %s12845_s26 = smov 0  }
   0xb LB: > { %s18790_s27 = sadd.s32 4294967295, %s12784_s26   ;;  %p10258_p0 = scmp.ge.s32.totalorder %s12784_s26, 1  ;;  %s12784_s26 = sphi %s12845_s26, %s25_s26   ;;  %s12780_s25 = sphi %s12843_s25, %s20381_s25   ;;  %s12776_s24 = sphi %s12841_s24, %s20380_s24   ;;  %s12772_s23 = sphi %s12839_s23, %s20379_s23   ;;  %s12768_s22 = sphi %s12837_s22, %s20378_s22   ;;  %s12764_s21 = sphi %s12835_s21, %s20377_s21  }
   0xc   : > { %p12869_p1 = scmp.eq.s32.totalorder %s18790_s27, 0  ;;  %p206_p2 = scmp.lt.s32.totalorder %s12784_s26, 3 }
   0xd   : > { %s12786_s30 = smov [#allocation5]   ;;  %s12787_s9 = smov [#allocation8]  }
   0xe   : > { %s19266_s28 = scalar_select %p12869_p1, 1, 0 }
   0xf   : > { %p12874_p3 = pnand %p10258_p0, %p206_p2  ;;  %s222_s7 = sshll.u32 %s12786_s30, 4  ;;  %s12878_s7 = int_to_ptr.vmem [resolvable:$true] %s222_s7 }
  0x10   : > { %s249_s10 = sshll.u32 %s12787_s9, 4  ;;  %s12788_s11 = smov [#allocation7]   ;;  %s12889_s10 = int_to_ptr.vmem [resolvable:$true] %s249_s10 }
  0x11   : > { %s19267_s29 = scalar_select %p12874_p3, 1, 0 }
  0x12   : > { %p12356_p4 = pneg %p12874_p3  ;;  %s12891_s12 = sshll.u32 %s12788_s11, 4  ;;  %s236_s12 = int_to_ptr.vmem [resolvable:$true] %s12891_s12 }
  0x13   : > { %s19269_s1 = sld [smem:[#allocation268_spill]] }
  0x14   : > { %p12885_p6 = pnand %p12356_p4, %p12869_p1 }
  0x16   : > { %p12901_p8 = pneg %p12885_p6 }
  0x19   : > { %s12520_s15 = scalar_lea.hbm %s19269_s1, 32768 }
  0x1a   : > { %p12521_p7 = scmp.ne.s32.totalorder %s19269_s1, %s12520_s15  ;;  %p12527_p11 = scmp.lt.u32.totalorder %s12520_s15, %s19269_s1 }
  0x1c   : > { %p12523_p9 = pnand %p12901_p8, %p12521_p7 }
  0x1e   : > { %p12524_p10 = pneg %p12523_p9 }
  0x20   : > { %p12529_p12 = pnand %p12527_p11, %p12524_p10 }
  0x22   : > { %12532 = shalt.err (!%p12529_p12)
}
  0x23   : > { %s12533_s30 = scalar_lea.vmem %s12878_s7, 32768  ;;  %p12541_p4 = scmp.lt.s32.totalorder %s12878_s7, %s12878_s7 }
  0x24   : > { %p12534_p13 = scmp.ne.s32.totalorder %s12878_s7, %s12533_s30  ;;  %p12542_p5 = scmp.lt.s32.totalorder %s12533_s30, %s12533_s30 }
  0x26   : > { %p12536_p0 = pnand %p12534_p13, %p12901_p8  ;;  %p12543_p7 = por %p12542_p5, %p12541_p4 }
  0x28   : > { %p12537_p2 = pneg %p12536_p0 }
  0x2a   : > { %p12544_p9 = pnand %p12543_p7, %p12537_p2 }
  0x2c   : > { %12547 = shalt.err (!%p12544_p9)
}
  0x2d   : > { %s12789_s9 = smov 1024   ;;  %s18794_s11 = smov 64  }
  0x2e   : > { %12359 = dma.hbm_to_vmem [thread:$0]  (!%p12885_p6), %s19269_s1, 32768, %s12878_s7, [#allocation6], %s12789_s9, %s12789_s9, %s18794_s11  }
  0x2f   : > { %s12548_s17 = scalar_lea.hbm %s18786_s3, 128 }
  0x30   : > { %p12549_p5 = scmp.ne.s32.totalorder %s18786_s3, %s12548_s17  ;;  %p12555_p12 = scmp.lt.u32.totalorder %s12548_s17, %s18786_s3 }
  0x32   : > { %p12551_p10 = pnand %p12549_p5, %p12901_p8 }
  0x34   : > { %p12552_p11 = pneg %p12551_p10 }
  0x36   : > { %p12557_p13 = pnand %p12555_p12, %p12552_p11 }
  0x38   : > { %12560 = shalt.err (!%p12557_p13)
}
  0x39   : > { %s12561_s7 = scalar_lea.vmem %s12889_s10, 128  ;;  %p12569_p7 = scmp.lt.s32.totalorder %s12889_s10, %s12889_s10 }
  0x3a   : > { %p12562_p0 = scmp.ne.s32.totalorder %s12889_s10, %s12561_s7  ;;  %p12570_p9 = scmp.lt.s32.totalorder %s12561_s7, %s12561_s7 }
  0x3c   : > { %p12564_p2 = pnand %p12562_p0, %p12901_p8  ;;  %p12571_p5 = por %p12570_p9, %p12569_p7 }
  0x3e   : > { %p12565_p4 = pneg %p12564_p2 }
  0x40   : > { %p12572_p10 = pnand %p12571_p5, %p12565_p4 }
  0x42   : > { %12575 = shalt.err (!%p12572_p10)
}
  0x43   : > { %12365 = dma.hbm_to_vmem [thread:$0]  (!%p12885_p6), %s18786_s3, 128, %s12889_s10, [#allocation9]  }
  0x44   : > { %s12576_s15 = scalar_lea.hbm %s18785_s2, 65536 }
  0x45   : > { %p12577_p11 = scmp.ne.s32.totalorder %s18785_s2, %s12576_s15  ;;  %p12583_p0 = scmp.lt.u32.totalorder %s12576_s15, %s18785_s2 }
  0x47   : > { %p12579_p12 = pnand %p12577_p11, %p12901_p8 }
  0x49   : > { %p12580_p13 = pneg %p12579_p12 }
  0x4b   : > { %p12585_p2 = pnand %p12583_p0, %p12580_p13 }
  0x4d   : > { %12588 = shalt.err (!%p12585_p2)
}
  0x4e   : > { %s12589_s30 = scalar_lea.vmem %s236_s12, 65536  ;;  %p12597_p5 = scmp.lt.s32.totalorder %s236_s12, %s236_s12 }
  0x4f   : > { %p12590_p4 = scmp.ne.s32.totalorder %s236_s12, %s12589_s30  ;;  %p12598_p10 = scmp.lt.s32.totalorder %s12589_s30, %s12589_s30 }
  0x51   : > { %p12592_p7 = pnand %p12590_p4, %p12901_p8  ;;  %p12599_p3 = por %p12598_p10, %p12597_p5 }
  0x53   : > { %p12593_p9 = pneg %p12592_p7 }
  0x55   : > { %p12600_p1 = pnand %p12599_p3, %p12593_p9 }
  0x57   : > { %12603 = shalt.err (!%p12600_p1)
}
  0x58   : > { %s12791_s10 = smov 512   ;;  %s12792_s7 = smov 32  }
  0x59   : > { %12362 = dma.hbm_to_vmem [thread:$0]  (!%p12885_p6), %s18785_s2, 65536, %s236_s12, [#allocation6], %s12791_s10, %s12791_s10, %s12792_s7  }
  0x5a   : > { %s12793_s13 = smov [#allocation10]   ;;  %s12604_s17 = scalar_lea.hbm %s18787_s4, 8192 }
  0x5b   : > { %s259_s14 = sshll.u32 %s12793_s13, 4  ;;  %p12605_p1 = scmp.ne.s32.totalorder %s18787_s4, %s12604_s17  ;;  %s260_s14 = int_to_ptr.vmem [resolvable:$true] %s259_s14 }
  0x5c   : > { %p12611_p12 = scmp.lt.u32.totalorder %s12604_s17, %s18787_s4 }
  0x5d   : > { %p12607_p3 = pnand %p12605_p1, %p12901_p8 }
  0x5f   : > { %p12608_p11 = pneg %p12607_p3 }
  0x61   : > { %p12613_p13 = pnand %p12611_p12, %p12608_p11 }
  0x63   : > { %12616 = shalt.err (!%p12613_p13)
}
  0x64   : > { %s12617_s12 = scalar_lea.vmem %s260_s14, 8192  ;;  %p12625_p7 = scmp.lt.s32.totalorder %s260_s14, %s260_s14 }
  0x65   : > { %p12618_p0 = scmp.ne.s32.totalorder %s260_s14, %s12617_s12  ;;  %p12626_p9 = scmp.lt.s32.totalorder %s12617_s12, %s12617_s12 }
  0x67   : > { %p12620_p2 = pnand %p12618_p0, %p12901_p8  ;;  %p12627_p5 = por %p12626_p9, %p12625_p7 }
  0x69   : > { %p12621_p4 = pneg %p12620_p2 }
  0x6b   : > { %p12628_p10 = pnand %p12627_p5, %p12621_p4 }
  0x6d   : > { %12631 = shalt.err (!%p12628_p10)
}
  0x6e   : > { %s12794_s10 = smov 4   ;;  %s19271_s7 = smov 64  }
  0x6f   : > { %12368 = dma.hbm_to_vmem [thread:$0]  (!%p12885_p6), %s18787_s4, 8192, %s260_s14, [#allocation9], %s19271_s7, %s19271_s7, %s12794_s10  }
  0x70   : > { %s12795_s9 = smov [#allocation11]   ;;  %s12632_s17 = scalar_lea.hbm %s18788_s5, 16 }
  0x71   : > { %s273_s13 = sshll.u32 %s12795_s9, 4  ;;  %p12633_p1 = scmp.ne.s32.totalorder %s18788_s5, %s12632_s17  ;;  %s274_s13 = int_to_ptr.vmem [resolvable:$true] %s273_s13 }
  0x72   : > { %p12639_p12 = scmp.lt.u32.totalorder %s12632_s17, %s18788_s5 }
  0x73   : > { %p12635_p3 = pnand %p12633_p1, %p12901_p8 }
  0x75   : > { %p12636_p11 = pneg %p12635_p3 }
  0x77   : > { %p12641_p13 = pnand %p12639_p12, %p12636_p11 }
  0x79   : > { %12644 = shalt.err (!%p12641_p13)
}
  0x7a   : > { %s12645_s14 = scalar_lea.vmem %s274_s13, 16  ;;  %s12652_s10 = scalar_lea.vmem %s274_s13, 32 }
  0x7b   : > { %p12646_p0 = scmp.ne.s32.totalorder %s274_s13, %s12645_s14  ;;  %p12653_p7 = scmp.lt.s32.totalorder %s274_s13, %s274_s13 }
  0x7c   : > { %p12654_p9 = scmp.lt.s32.totalorder %s12652_s10, %s12645_s14 }
  0x7d   : > { %p12648_p2 = pnand %p12646_p0, %p12901_p8 }
  0x7e   : > { %p12655_p5 = por %p12654_p9, %p12653_p7 }
  0x7f   : > { %p12649_p4 = pneg %p12648_p2 }
  0x81   : > { %p12656_p10 = pnand %p12655_p5, %p12649_p4 }
  0x83   : > { %12659 = shalt.err (!%p12656_p10)
}
  0x84   : > { %12371 = dma.hbm_to_vmem [thread:$0]  (!%p12885_p6), %s18788_s5, 16, %s274_s13, [#allocation12]  }
  0x85   : > { %s10257_s18 = sadd.s32 4294967294, %s12784_s26   ;;  %s37_s27 = sadd.s32 1, %s12780_s25 }
  0x86   : > { %p39_p8 = scmp.ge.s32.totalorder %s37_s27, 2  ;;  %s44_s8 = sadd.s32 1, %s12772_s23 }
  0x87   : > { %p51_p1 = scmp.ne.s32.totalorder %s12772_s23, %s12768_s22  ;;  %p52_p3 = scmp.eq.s32.totalorder %s12784_s26, 0 }
  0x88   : > { %s20383_s27 = smov (%p39_p8, %s37_s27), 0  ;;  %p57_p12 = scmp.ne.s32.totalorder %s12768_s22, %s12764_s21 }
  0x89   : > { %p13011_p11 = por %p52_p3, %p51_p1  ;;  %s41_s13 = ssub.s32 %s12780_s25, %s20383_s27 }
  0x8a   : > { %s19273_s15 = sadd.s32 4294967295, %s12784_s26   ;;  %p42_p13 = scmp.eq.s32.totalorder %s41_s13, 0 }
  0x8b   : > { %p193_p6 = scmp.eq.s32.totalorder %s19273_s15, 1  ;;  %p19274_p0 = scmp.ne.s32.totalorder %s19266_s28, 0 }
  0x8c   : > { %p199_p7 = scmp.eq.s32.totalorder %s10257_s18, 1  ;;  %p12385_p5 = scmp.lt.s32.totalorder %s12784_s26, 2 }
  0x8d   : > { %p13023_p2 = por %p19274_p0, %p57_p12  ;;  %p13027_p4 = por %p193_p6, %p51_p1 }
  0x8e   : > { %s13032_s19 = scalar_select %p42_p13, %s12772_s23, %s44_s8  }
  0x8f   : > { %s19276_s17 = scalar_select %p13027_p4, 1, 0 }
  0x90   : > { %p13034_p9 = por %p199_p7, %p57_p12  ;;  %s284_s30 = sand.u32 1, %s12772_s23  }
  0x91   : > { %s10858_s12 = sshll.u32 %s12780_s25, 7  ;;  %s10265_s14 = sshll.u32 %s284_s30, 3 }
  0x92   : > { %s19277_s20 = scalar_select %p13034_p9, 1, 0 }
  0x93   : > { %s13044_s11 = scalar_lea.hbm %s18783_s0, %s10858_s12  ;;  %s288_s18 = scalar_lea.vmem [#allocation2], %s10265_s14 }
  0x94   : > { %s296_s8 = sshll.u32 %s288_s18, 4  ;;  %p13048_p10 = pnand %p12385_p5, %p13011_p11  ;;  %s13052_s8 = int_to_ptr.vmem [resolvable:$true] %s296_s8 }
  0x95   : > { %s285_s15 = scalar_lea.sflag [#allocation3], %s284_s30  ;;  %s12660_s1 = scalar_lea.hbm %s13044_s11, 128 }
  0x96   : > { %p12661_p8 = scmp.ne.s32.totalorder %s13044_s11, %s12660_s1  ;;  %p12662_p1 = pneg %p13048_p10 }
  0x97   : > { %s12665_s9 = scalar_lea.hbm %s18783_s0, 256  ;;  %p12666_p11 = scmp.lt.u32.totalorder %s13044_s11, %s18783_s0 }
  0x98   : > { %p12663_p3 = pnand %p12662_p1, %p12661_p8  ;;  %p12667_p6 = scmp.lt.u32.totalorder %s12665_s9, %s12660_s1 }
  0x99   : > { %p12669_p0 = scmp.lt.u32.totalorder %s12660_s1, %s13044_s11 }
  0x9a   : > { %p12664_p12 = pneg %p12663_p3  ;;  %p12668_p13 = por %p12667_p6, %p12666_p11 }
  0x9c   : > { %p12670_p7 = por %p12669_p0, %p12668_p13 }
  0x9e   : > { %p12671_p5 = pnand %p12670_p7, %p12664_p12 }
  0xa0   : > { %12674 = shalt.err (!%p12671_p5)
}
  0xa1   : > { %s12675_s30 = scalar_lea.vmem %s13052_s8, 128  ;;  %s12796_s18 = smov [#allocation2]  }
  0xa2   : > { %p12676_p8 = scmp.ne.s32.totalorder %s13052_s8, %s12675_s30  ;;  %s12680_s12 = sshll.u32 %s12796_s18, 4  ;;  %s12681_s12 = int_to_ptr.vmem [resolvable:$false] %s12680_s12 }
  0xa3   : > { %s12682_s14 = scalar_lea.vmem %s12681_s12, 256  ;;  %p12683_p4 = scmp.lt.s32.totalorder %s13052_s8, %s12681_s12 }
  0xa4   : > { %p12678_p3 = pnand %p12676_p8, %p12662_p1  ;;  %p12684_p11 = scmp.lt.s32.totalorder %s12682_s14, %s12675_s30 }
  0xa6   : > { %p12679_p9 = pneg %p12678_p3  ;;  %p12685_p6 = por %p12684_p11, %p12683_p4 }
  0xa8   : > { %p12686_p13 = pnand %p12685_p6, %p12679_p9 }
  0xaa   : > { %12689 = shalt.err (!%p12686_p13)
}
  0xab   : > { %12375 = dma.hbm_to_vmem [thread:$0]  (!%p13048_p10), %s13044_s11, 128, %s13052_s8, %s285_s15  }
  0xac   : > { %p19279_p12 = scmp.ne.s32.totalorder %s19267_s29, 0 }
  0xae   : > { %305 = sbr.rel (%p19279_p12) target bundleno = 1839 (0x72f), region = 44 }
  0xb5   : > { %s13082_s1 = sand.u32 1, %s12768_s22  }
  0xb6   : > { %s10269_s9 = sshll.u32 %s13082_s1, 3  ;;  %s308_s10 = scalar_lea.sflag [#allocation3], %s13082_s1 }
  0xb7   : > { %s13086_s7 = scalar_lea.vmem [#allocation2], %s10269_s9 }
  0xb8   : > { %12743 = dma.done.wait (%p13023_p2), %s308_s10, 128  }
  0xb9   : > { %12745 = vsyncadd (%p13023_p2), %s308_s10, 4294967168  ;;  %p19280_p4 = scmp.ne.s32.totalorder %s19266_s28, 0 }
  0xbb   : > { %12747 = dma.done.wait (%p19280_p4), [#allocation6], 98304  }
  0xbc   : > { %12749 = vsyncadd (%p19280_p4), [#allocation6], 4294868992 }
  0xbd   : > { %12751 = dma.done.wait (%p19280_p4), [#allocation9], 8320  }
  0xbe   : > { %12753 = vsyncadd (%p19280_p4), [#allocation9], 4294958976 }
  0xbf   : > { %12755 = dma.done.wait (%p19280_p4), [#allocation12], 16  }
  0xc0   : > { %12757 = vsyncadd (%p19280_p4), [#allocation12], 4294967280  ;;  %v1813_v0 = vld [vmem:[#allocation7] sm:$0xff]  ;;  %v1814_v2 = vld [vmem:[#allocation7 + $0x8] sm:$0xff]  ;;  %v621_v32 = vlaneseq  ;;  %s10275_s28 = sshll.u32 %s13082_s1, 8  ;;  %s10859_s16 = sshll.u32 %s12776_s24, 12 }
  0xc1   : > { %v1817_v1 = vld [vmem:[#allocation7 + $0x20] sm:$0xff]  ;;  %v1818_v4 = vld [vmem:[#allocation7 + $0x28] sm:$0xff]  ;;  %v13108_v58 = vld [vmem:[%s13086_s7] sm:$0xff]  ;;  %s18663_s29 = scalar_lea.vmem [#allocation13], %s10275_s28  ;;  %s18730_s15 = scalar_lea.hbm %s18789_s6, %s10859_s16 }
  0xc2   : > { %v10277_v3 = vcombine.high %v1813_v0, %v1817_v1  ;;  %v10276_v5 = vcombine.low %v1813_v0, %v1817_v1  ;;  %v1821_v6 = vld [vmem:[#allocation7 + $0x40] sm:$0xff]  ;;  %v10279_v8 = vcombine.high %v1814_v2, %v1818_v4  ;;  %v10278_v9 = vcombine.low %v1814_v2, %v1818_v4  ;;  %v1822_v11 = vld [vmem:[#allocation7 + $0x48] sm:$0xff]  ;;  %s10122_s11 = sshll.u32 %s18663_s29, 4  ;;  %s10107_s30 = scalar_lea.sflag [#allocation4], %s13082_s1  ;;  %s18732_s11 = int_to_ptr.vmem [resolvable:$true] %s10122_s11 }
  0xc3   : > { %v1825_v7 = vld [vmem:[#allocation7 + $0x60] sm:$0xff]  ;;  %v1826_v12 = vld [vmem:[#allocation7 + $0x68] sm:$0xff]  ;;  %v13104_v41 = vshrl.u32 %v621_v32, 7  ;;  %s12690_s24 = scalar_lea.vmem %s18732_s11, 4096  ;;  %p20374_p9 = scmp.ne.s32.totalorder %s19276_s17, 0 }
  0xc4   : > { %v10285_v10 = vcombine.high %v1821_v6, %v1825_v7  ;;  %v1829_v13 = vld [vmem:[#allocation7 + $0x80] sm:$0xff]  ;;  %4927 = vmatprep.subr.bf16.mxu0 %v10277_v3  ;;  %v10287_v14 = vcombine.high %v1822_v11, %v1826_v12  ;;  %v1830_v16 = vld [vmem:[#allocation7 + $0x88] sm:$0xff]  ;;  %5699 = vmatprep.subr.bf16.mxu1 %v10279_v8  ;;  %v10284_v18 = vcombine.low %v1821_v6, %v1825_v7  ;;  %p12691_p2 = scmp.ne.s32.totalorder %s18732_s11, %s12690_s24  ;;  %s12797_s18 = smov [#allocation13]  }
  0xc5   : > { %v1833_v15 = vld [vmem:[#allocation7 + $0xa0] sm:$0xff]  ;;  %v1834_v17 = vld [vmem:[#allocation7 + $0xa8] sm:$0xff]  ;;  %4928 = vmatpush1.bf16.msra.mxu0 %v10276_v5  ;;  %5700 = vmatpush1.bf16.msra.mxu1 %v10278_v9  ;;  %v10286_v19 = vcombine.low %v1822_v11, %v1826_v12  ;;  %19281 = vst [vmem:[#allocation19_spill] sm:$0xff] %v13104_v41  ;;  %v18797_v50 = vsub.s32 1, %v13104_v41  ;;  %s12694_s12 = sshll.u32 %s12797_s18, 4  ;;  %s12695_s12 = int_to_ptr.vmem [resolvable:$false] %s12694_s12 }
  0xc6   : > { %4929 = vmatprep.subr.bf16.mxu0 %v10285_v10  ;;  %v10293_v20 = vcombine.high %v1829_v13, %v1833_v15  ;;  %5701 = vmatprep.subr.bf16.mxu1 %v10287_v14  ;;  %v10295_v21 = vcombine.high %v1830_v16, %v1834_v17  ;;  %v1837_v22 = vld [vmem:[#allocation7 + $0xc0] sm:$0xff]  ;;  %v1838_v24 = vld [vmem:[#allocation7 + $0xc8] sm:$0xff]  ;;  %v10292_v26 = vcombine.low %v1829_v13, %v1833_v15  ;;  %p12692_p10 = pnand %p12691_p2, %p20374_p9  ;;  %s12696_s14 = scalar_lea.vmem %s12695_s12, 8192 }
  0xc7   : > { %v1841_v23 = vld [vmem:[#allocation7 + $0xe0] sm:$0xff]  ;;  %v1842_v25 = vld [vmem:[#allocation7 + $0xe8] sm:$0xff]  ;;  %v10294_v27 = vcombine.low %v1830_v16, %v1834_v17  ;;  %v13113_v0 = vrot.slane %v13108_v58, %v18797_v50  ;;  %v407_v50 = vld [vmem:[#allocation5 + $0x158] sm:$0xff]  ;;  %p12697_p0 = scmp.lt.s32.totalorder %s18732_s11, %s12695_s12  ;;  %p12698_p7 = scmp.lt.s32.totalorder %s12696_s14, %s12690_s24 }
  0xc8   : > { %v10301_v28 = vcombine.high %v1837_v22, %v1841_v23  ;;  %v10303_v29 = vcombine.high %v1838_v24, %v1842_v25  ;;  %v1845_v30 = vld [vmem:[#allocation7 + $0x100] sm:$0xff]  ;;  %v1846_v33 = vld [vmem:[#allocation7 + $0x108] sm:$0xff]  ;;  %v10300_v35 = vcombine.low %v1837_v22, %v1841_v23  ;;  %v10302_v36 = vcombine.low %v1838_v24, %v1842_v25  ;;  %p12693_p1 = pneg %p12692_p10 }
  0xc9   : > { %4930 = vmatpush1.bf16.msra.mxu0 %v10284_v18  ;;  %5702 = vmatpush1.bf16.msra.mxu1 %v10286_v19  ;;  %v1849_v31 = vld [vmem:[#allocation7 + $0x120] sm:$0xff]  ;;  %v1850_v34 = vld [vmem:[#allocation7 + $0x128] sm:$0xff]  ;;  %p12699_p5 = por %p12698_p7, %p12697_p0 }
  0xca   : > { %4931 = vmatprep.subr.bf16.mxu0 %v10293_v20  ;;  %5703 = vmatprep.subr.bf16.mxu1 %v10295_v21  ;;  %v10309_v37 = vcombine.high %v1845_v30, %v1849_v31  ;;  %v10311_v38 = vcombine.high %v1846_v33, %v1850_v34  ;;  %v1853_v39 = vld [vmem:[#allocation7 + $0x140] sm:$0xff]  ;;  %v1854_v42 = vld [vmem:[#allocation7 + $0x148] sm:$0xff]  ;;  %v10308_v44 = vcombine.low %v1845_v30, %v1849_v31 }
  0xcb   : > { %v1857_v40 = vld [vmem:[#allocation7 + $0x160] sm:$0xff]  ;;  %v1858_v43 = vld [vmem:[#allocation7 + $0x168] sm:$0xff]  ;;  %v10310_v45 = vcombine.low %v1846_v33, %v1850_v34  ;;  %p12700_p8 = pnand %p12699_p5, %p12693_p1 }
  0xcc   : > { %v10317_v46 = vcombine.high %v1853_v39, %v1857_v40  ;;  %v10319_v47 = vcombine.high %v1854_v42, %v1858_v43  ;;  %v1861_v48 = vld [vmem:[#allocation7 + $0x180] sm:$0xff]  ;;  %v1862_v51 = vld [vmem:[#allocation7 + $0x188] sm:$0xff]  ;;  %v10316_v53 = vcombine.low %v1853_v39, %v1857_v40  ;;  %v10318_v55 = vcombine.low %v1854_v42, %v1858_v43 }
  0xcd   : > { %4932 = vmatpush1.bf16.msra.mxu0 %v10292_v26  ;;  %5704 = vmatpush1.bf16.msra.mxu1 %v10294_v27  ;;  %v1865_v49 = vld [vmem:[#allocation7 + $0x1a0] sm:$0xff]  ;;  %v1866_v52 = vld [vmem:[#allocation7 + $0x1a8] sm:$0xff] }
  0xce   : > { %4933 = vmatprep.subr.bf16.mxu0 %v10301_v28  ;;  %5705 = vmatprep.subr.bf16.mxu1 %v10303_v29  ;;  %v1869_v54 = vld [vmem:[#allocation7 + $0x1c0] sm:$0xff]  ;;  %v10325_v56 = vcombine.high %v1861_v48, %v1865_v49  ;;  %v365_v59 = vld [vmem:[#allocation5 + $0x8] sm:$0xff]  ;;  %v10327_v60 = vcombine.high %v1862_v51, %v1866_v52  ;;  %v10324_v1 = vcombine.low %v1861_v48, %v1865_v49 }
  0xcf   : > { %v1873_v57 = vld [vmem:[#allocation7 + $0x1e0] sm:$0xff]  ;;  %v1870_v61 = vld [vmem:[#allocation7 + $0x1c8] sm:$0xff]  ;;  %v662_v2 = vadd.f32 %v13113_v0, %v365_v59  ;;  %v10326_v4 = vcombine.low %v1862_v51, %v1866_v52  ;;  %v18799_v51 = vsub.s32 0, %v13104_v41 }
  0xd0   : > { %v1874_v62 = vld [vmem:[#allocation7 + $0x1e8] sm:$0xff]  ;;  %v10333_v5 = vcombine.high %v1869_v54, %v1873_v57  ;;  %v1877_v7 = vld [vmem:[#allocation7 + $0x200] sm:$0xff]  ;;  %v10332_v13 = vcombine.low %v1869_v54, %v1873_v57 }
  0xd1   : > { %4934 = vmatpush1.bf16.msra.mxu0 %v10300_v35  ;;  %5706 = vmatpush1.bf16.msra.mxu1 %v10302_v36  ;;  %v373_v63 = vld [vmem:[#allocation5 + $0x48] sm:$0xff]  ;;  %v10335_v6 = vcombine.high %v1870_v61, %v1874_v62  ;;  %v1881_v8 = vld [vmem:[#allocation7 + $0x220] sm:$0xff]  ;;  %vm918_vm0 = vcmp.gt.f32.partialorder %v662_v2, 0.0  ;;  %v1174_v9 = vmul.f32 0.01, %v662_v2  ;;  %v10334_v16 = vcombine.low %v1870_v61, %v1874_v62 }
  0xd2   : > { %4935 = vmatprep.subr.bf16.mxu0 %v10309_v37  ;;  %5707 = vmatprep.subr.bf16.mxu1 %v10311_v38  ;;  %v670_v3 = vadd.f32 %v13113_v0, %v373_v63  ;;  %v1878_v11 = vld [vmem:[#allocation7 + $0x208] sm:$0xff]  ;;  %v10341_v17 = vcombine.high %v1877_v7, %v1881_v8  ;;  %v1885_v20 = vld [vmem:[#allocation7 + $0x240] sm:$0xff]  ;;  %v10340_v24 = vcombine.low %v1877_v7, %v1881_v8 }
  0xd3   : > { %v1882_v12 = vld [vmem:[#allocation7 + $0x228] sm:$0xff]  ;;  %v1430_v14 = vsel %vm918_vm0, %v662_v2, %v1174_v9  ;;  %v1889_v21 = vld [vmem:[#allocation7 + $0x260] sm:$0xff]  ;;  %v13125_v61 = vrot.slane %v13108_v58, %v18799_v51 }
  0xd4   : > { %vm926_vm1 = vcmp.gt.f32.partialorder %v670_v3, 0.0  ;;  %v1182_v10 = vmul.f32 0.01, %v670_v3  ;;  %v10343_v19 = vcombine.high %v1878_v11, %v1882_v12  ;;  %v1886_v22 = vld [vmem:[#allocation7 + $0x248] sm:$0xff]  ;;  %v10342_v25 = vcombine.low %v1878_v11, %v1882_v12  ;;  %v1893_v28 = vld [vmem:[#allocation7 + $0x280] sm:$0xff] }
  0xd5   : > { %4936 = vmatpush1.bf16.msra.mxu0 %v10308_v44  ;;  %5708 = vmatpush1.bf16.msra.mxu1 %v10310_v45  ;;  %v1890_v23 = vld [vmem:[#allocation7 + $0x268] sm:$0xff]  ;;  %v10349_v26 = vcombine.high %v1885_v20, %v1889_v21  ;;  %v1897_v29 = vld [vmem:[#allocation7 + $0x2a0] sm:$0xff]  ;;  %v10348_v32 = vcombine.low %v1885_v20, %v1889_v21 }
  0xd6   : > { %4937 = vmatprep.subr.bf16.mxu0 %v10317_v46  ;;  %5709 = vmatprep.subr.bf16.mxu1 %v10319_v47  ;;  %v1438_v15 = vsel %vm926_vm1, %v670_v3, %v1182_v10  ;;  %v10351_v27 = vcombine.high %v1886_v22, %v1890_v23  ;;  %v1894_v30 = vld [vmem:[#allocation7 + $0x288] sm:$0xff]  ;;  %v10350_v33 = vcombine.low %v1886_v22, %v1890_v23  ;;  %v1901_v36 = vld [vmem:[#allocation7 + $0x2c0] sm:$0xff] }
  0xd7   : > { %v13117_v18 = vpack.c.bf16 %v1438_v15, %v1430_v14  ;;  %v1898_v31 = vld [vmem:[#allocation7 + $0x2a8] sm:$0xff]  ;;  %v10357_v34 = vcombine.high %v1893_v28, %v1897_v29  ;;  %v1905_v37 = vld [vmem:[#allocation7 + $0x2e0] sm:$0xff]  ;;  %v10356_v40 = vcombine.low %v1893_v28, %v1897_v29 }
  0xd8   : > { %v10359_v35 = vcombine.high %v1894_v30, %v1898_v31  ;;  %v1902_v38 = vld [vmem:[#allocation7 + $0x2c8] sm:$0xff]  ;;  %v10358_v42 = vcombine.low %v1894_v30, %v1898_v31  ;;  %v10365_v43 = vcombine.high %v1901_v36, %v1905_v37  ;;  %v1909_v45 = vld [vmem:[#allocation7 + $0x300] sm:$0xff]  ;;  %v10364_v49 = vcombine.low %v1901_v36, %v1905_v37 }
  0xd9   : > { %4938 = vmatpush1.bf16.msra.mxu0 %v10316_v53  ;;  %5710 = vmatpush1.bf16.msra.mxu1 %v10318_v55  ;;  %v1906_v39 = vld [vmem:[#allocation7 + $0x2e8] sm:$0xff]  ;;  %v1913_v46 = vld [vmem:[#allocation7 + $0x320] sm:$0xff] }
  0xda   : > { %4939 = vmatprep.subr.bf16.mxu0 %v10325_v56  ;;  %5711 = vmatprep.subr.bf16.mxu1 %v10327_v60  ;;  %v10367_v44 = vcombine.high %v1902_v38, %v1906_v39  ;;  %v1910_v47 = vld [vmem:[#allocation7 + $0x308] sm:$0xff]  ;;  %v10366_v52 = vcombine.low %v1902_v38, %v1906_v39  ;;  %v10373_v53 = vcombine.high %v1909_v45, %v1913_v46  ;;  %v1917_v55 = vld [vmem:[#allocation7 + $0x340] sm:$0xff] }
  0xdb   : > { %4959 = vmatprep.mubr.bf16.mxu0 %v13117_v18  ;;  %5731 = vmatprep.mubr.bf16.mxu1 %v13117_v18  ;;  %v1914_v48 = vld [vmem:[#allocation7 + $0x328] sm:$0xff]  ;;  %v1921_v56 = vld [vmem:[#allocation7 + $0x360] sm:$0xff]  ;;  %v10372_v60 = vcombine.low %v1909_v45, %v1913_v46 }
  0xdc   : > { %v10375_v54 = vcombine.high %v1910_v47, %v1914_v48  ;;  %v1918_v57 = vld [vmem:[#allocation7 + $0x348] sm:$0xff]  ;;  %v10374_v62 = vcombine.low %v1910_v47, %v1914_v48  ;;  %v10381_v63 = vcombine.high %v1917_v55, %v1921_v56  ;;  %v372_v2 = vld [vmem:[#allocation5 + $0x40] sm:$0xff]  ;;  %v10380_v10 = vcombine.low %v1917_v55, %v1921_v56 }
  0xdd   : > { %4940 = vmatpush1.bf16.msra.mxu0 %v10324_v1  ;;  %5712 = vmatpush1.bf16.msra.mxu1 %v10326_v4  ;;  %v1922_v59 = vld [vmem:[#allocation7 + $0x368] sm:$0xff]  ;;  %v364_v1 = vld [vmem:[#allocation5] sm:$0xff]  ;;  %v669_v58 = vadd.f32 %v13125_v61, %v372_v2 }
  0xde   : > { %4941 = vmatprep.subr.bf16.mxu0 %v10333_v5  ;;  %5713 = vmatprep.subr.bf16.mxu1 %v10335_v6  ;;  %v10383_v3 = vcombine.high %v1918_v57, %v1922_v59  ;;  %v1925_v4 = vld [vmem:[#allocation7 + $0x380] sm:$0xff]  ;;  %v1926_v6 = vld [vmem:[#allocation7 + $0x388] sm:$0xff]  ;;  %v661_v11 = vadd.f32 %v13125_v61, %v364_v1  ;;  %v10382_v12 = vcombine.low %v1918_v57, %v1922_v59 }
  0xdf   : > { %v1929_v5 = vld [vmem:[#allocation7 + $0x3a0] sm:$0xff]  ;;  %v1930_v7 = vld [vmem:[#allocation7 + $0x3a8] sm:$0xff]  ;;  %vm925_vm3 = vcmp.gt.f32.partialorder %v669_v58, 0.0 }
  0xe0   : > { %v381_v8 = vld [vmem:[#allocation5 + $0x88] sm:$0xff]  ;;  %v10391_v14 = vcombine.high %v1926_v6, %v1930_v7  ;;  %v1933_v15 = vld [vmem:[#allocation7 + $0x3c0] sm:$0xff]  ;;  %v10388_v22 = vcombine.low %v1925_v4, %v1929_v5  ;;  %v1173_v23 = vmul.f32 0.01, %v661_v11  ;;  %vm917_vm2 = vcmp.gt.f32.partialorder %v661_v11, 0.0 }
  0xe1   : > { %4942 = vmatpush1.bf16.msra.mxu0 %v10332_v13  ;;  %5714 = vmatpush1.bf16.msra.mxu1 %v10334_v16  ;;  %v389_v9 = vld [vmem:[#allocation5 + $0xc8] sm:$0xff]  ;;  %v10389_v13 = vcombine.high %v1925_v4, %v1929_v5  ;;  %v1937_v16 = vld [vmem:[#allocation7 + $0x3e0] sm:$0xff] }
  0xe2   : > { %4943 = vmatprep.subr.bf16.mxu0 %v10341_v17  ;;  %5715 = vmatprep.subr.bf16.mxu1 %v10343_v19  ;;  %v678_v17 = vadd.f32 %v13113_v0, %v381_v8  ;;  %v686_v19 = vadd.f32 %v13113_v0, %v389_v9  ;;  %v1934_v20 = vld [vmem:[#allocation7 + $0x3c8] sm:$0xff]  ;;  %v13131_v28 = vld [vmem:[#allocation7 + $0x400] sm:$0xff]  ;;  %v10396_v36 = vcombine.low %v1933_v15, %v1937_v16 }
  0xe3   : > { %v1938_v21 = vld [vmem:[#allocation7 + $0x3e8] sm:$0xff]  ;;  %v388_v29 = vld [vmem:[#allocation5 + $0xc0] sm:$0xff] }
  0xe4   : > { %v397_v30 = vld [vmem:[#allocation5 + $0x108] sm:$0xff]  ;;  %v10399_v31 = vcombine.high %v1934_v20, %v1938_v21  ;;  %vm934_vm4 = vcmp.gt.f32.partialorder %v678_v17, 0.0  ;;  %vm942_vm5 = vcmp.gt.f32.partialorder %v686_v19, 0.0  ;;  %v10398_v45 = vcombine.low %v1934_v20, %v1938_v21 }
  0xe5   : > { %4944 = vmatpush1.bf16.msra.mxu0 %v10340_v24  ;;  %5716 = vmatpush1.bf16.msra.mxu1 %v10342_v25  ;;  %v1181_v24 = vmul.f32 0.01, %v669_v58  ;;  %v380_v25 = vld [vmem:[#allocation5 + $0x80] sm:$0xff]  ;;  %v1942_v37 = vld [vmem:[#allocation7 + $0x408] sm:$0xff] }
  0xe6   : > { %4945 = vmatprep.subr.bf16.mxu0 %v10349_v26  ;;  %5717 = vmatprep.subr.bf16.mxu1 %v10351_v27  ;;  %v10390_v26 = vcombine.low %v1926_v6, %v1930_v7  ;;  %v10397_v27 = vcombine.high %v1933_v15, %v1937_v16  ;;  %v1946_v38 = vld [vmem:[#allocation7 + $0x428] sm:$0xff]  ;;  %v677_v39 = vadd.f32 %v13125_v61, %v380_v25 }
  0xe7   : > { %v10407_v48 = vcombine.high %v1942_v37, %v1946_v38  ;;  %v1950_v59 = vld [vmem:[#allocation7 + $0x448] sm:$0xff] }
  0xe8   : > { %v1189_v57 = vmul.f32 0.01, %v677_v39  ;;  %vm933_vm6 = vcmp.gt.f32.partialorder %v677_v39, 0.0  ;;  %v413_v6 = vld [vmem:[#allocation5 + $0x188] sm:$0xff] }
  0xe9   : > { %4946 = vmatpush1.bf16.msra.mxu0 %v10348_v32  ;;  %5718 = vmatpush1.bf16.msra.mxu1 %v10350_v33  ;;  %v1945_v32 = vld [vmem:[#allocation7 + $0x420] sm:$0xff]  ;;  %v1190_v33 = vmul.f32 0.01, %v678_v17  ;;  %v13153_v16 = vld [vmem:[#allocation7 + $0x488] sm:$0xff]  ;;  %v710_v21 = vadd.f32 %v13113_v0, %v413_v6 }
  0xea   : > { %4947 = vmatprep.subr.bf16.mxu0 %v10357_v34  ;;  %5719 = vmatprep.subr.bf16.mxu1 %v10359_v35  ;;  %v1198_v34 = vmul.f32 0.01, %v686_v19  ;;  %v405_v35 = vld [vmem:[#allocation5 + $0x148] sm:$0xff]  ;;  %v10405_v46 = vcombine.high %v13131_v28, %v1945_v32  ;;  %v10404_v56 = vcombine.low %v13131_v28, %v1945_v32  ;;  %v1969_v32 = vld [vmem:[#allocation7 + $0x4e0] sm:$0xff] }
  0xeb   : > { %v702_v47 = vadd.f32 %v13113_v0, %v405_v35  ;;  %v1966_v35 = vld [vmem:[#allocation7 + $0x4c8] sm:$0xff]  ;;  %vm966_vm12 = vcmp.gt.f32.partialorder %v710_v21, 0.0 }
  0xec   : > { %v445_v6 = vld [vmem:[#allocation5 + $0x288] sm:$0xff] }
  0xed   : > { %4948 = vmatpush1.bf16.msra.mxu0 %v10356_v40  ;;  %5720 = vmatpush1.bf16.msra.mxu1 %v10358_v42  ;;  %v1429_v40 = vsel %vm917_vm2, %v661_v11, %v1173_v23  ;;  %v1437_v42 = vsel %vm925_vm3, %v669_v58, %v1181_v24  ;;  %v1214_v5 = vmul.f32 0.01, %v702_v47  ;;  %vm958_vm9 = vcmp.gt.f32.partialorder %v702_v47, 0.0  ;;  %v13147_v11 = vld [vmem:[#allocation7 + $0x4a0] sm:$0xff]  ;;  %v421_v58 = vld [vmem:[#allocation5 + $0x1c8] sm:$0xff] }
  0xee   : > { %4949 = vmatprep.subr.bf16.mxu0 %v10365_v43  ;;  %5721 = vmatprep.subr.bf16.mxu1 %v10367_v44  ;;  %v685_v43 = vadd.f32 %v13125_v61, %v388_v29  ;;  %v694_v44 = vadd.f32 %v13113_v0, %v397_v30  ;;  %v13140_v55 = vpack.c.bf16 %v1437_v42, %v1429_v40 }
  0xef   : > { %v718_v24 = vadd.f32 %v13113_v0, %v421_v58  ;;  %v1985_v58 = vld [vmem:[#allocation7 + $0x560] sm:$0xff] }
  0xf0   : > { %v1197_v1 = vmul.f32 0.01, %v685_v43  ;;  %v1206_v2 = vmul.f32 0.01, %v694_v44  ;;  %vm941_vm7 = vcmp.gt.f32.partialorder %v685_v43, 0.0  ;;  %vm950_vm8 = vcmp.gt.f32.partialorder %v694_v44, 0.0 }
  0xf1   : > { %4950 = vmatpush1.bf16.msra.mxu0 %v10364_v49  ;;  %5722 = vmatpush1.bf16.msra.mxu1 %v10366_v52  ;;  %v1446_v49 = vsel %vm934_vm4, %v678_v17, %v1190_v33  ;;  %v1454_v52 = vsel %vm942_vm5, %v686_v19, %v1198_v34  ;;  %v1962_v17 = vld [vmem:[#allocation7 + $0x4a8] sm:$0xff]  ;;  %v1222_v34 = vmul.f32 0.01, %v710_v21  ;;  %vm974_vm13 = vcmp.gt.f32.partialorder %v718_v24, 0.0 }
  0xf2   : > { %4951 = vmatprep.subr.bf16.mxu0 %v10373_v53  ;;  %5723 = vmatprep.subr.bf16.mxu1 %v10375_v54  ;;  %v1949_v53 = vld [vmem:[#allocation7 + $0x440] sm:$0xff]  ;;  %v13143_v4 = vpack.c.bf16 %v1454_v52, %v1446_v49  ;;  %v1453_v19 = vsel %vm941_vm7, %v685_v43, %v1197_v1  ;;  %v1462_v20 = vsel %vm950_vm8, %v694_v44, %v1206_v2  ;;  %v429_v43 = vld [vmem:[#allocation5 + $0x208] sm:$0xff] }
  0xf3   : > { %v1953_v54 = vld [vmem:[#allocation7 + $0x460] sm:$0xff]  ;;  %v10423_v25 = vcombine.high %v13153_v16, %v1962_v17  ;;  %v437_v44 = vld [vmem:[#allocation5 + $0x248] sm:$0xff] }
  0xf4   : > { %v10412_v7 = vcombine.low %v1949_v53, %v1953_v54  ;;  %v10413_v8 = vcombine.high %v1949_v53, %v1953_v54  ;;  %v13178_v49 = vld [vmem:[#allocation7 + $0x500] sm:$0xff]  ;;  %v1478_v53 = vsel %vm966_vm12, %v710_v21, %v1222_v34  ;;  %v13223_v34 = vld [vmem:[#allocation7 + $0x5a8] sm:$0xff] }
  0xf5   : > { %4952 = vmatpush1.bf16.msra.mxu0 %v10372_v60  ;;  %5724 = vmatpush1.bf16.msra.mxu1 %v10374_v62  ;;  %v1954_v60 = vld [vmem:[#allocation7 + $0x468] sm:$0xff]  ;;  %v396_v62 = vld [vmem:[#allocation5 + $0x100] sm:$0xff] }
  0xf6   : > { %4953 = vmatprep.subr.bf16.mxu0 %v10381_v63  ;;  %5725 = vmatprep.subr.bf16.mxu1 %v10383_v3  ;;  %v10406_v63 = vcombine.low %v1942_v37, %v1946_v38  ;;  %v404_v3 = vld [vmem:[#allocation5 + $0x140] sm:$0xff]  ;;  %v10414_v9 = vcombine.low %v1950_v59, %v1954_v60  ;;  %v1230_v38 = vmul.f32 0.01, %v718_v24 }
  0xf7   : > { %v701_v15 = vadd.f32 %v13125_v61, %v404_v3  ;;  %v13180_v52 = vld [vmem:[#allocation7 + $0x520] sm:$0xff] }
  0xf8   : > { %v436_v1 = vld [vmem:[#allocation5 + $0x240] sm:$0xff] }
  0xf9   : > { %4954 = vmatpush1.bf16.msra.mxu0 %v10380_v10  ;;  %5726 = vmatpush1.bf16.msra.mxu1 %v10382_v12  ;;  %v13145_v10 = vld [vmem:[#allocation7 + $0x480] sm:$0xff]  ;;  %v1445_v12 = vsel %vm933_vm6, %v677_v39, %v1189_v57  ;;  %v1213_v30 = vmul.f32 0.01, %v701_v15  ;;  %vm957_vm11 = vcmp.gt.f32.partialorder %v701_v15, 0.0  ;;  %v10422_v39 = vcombine.low %v13153_v16, %v1962_v17  ;;  %v13187_v57 = vld [vmem:[#allocation7 + $0x528] sm:$0xff] }
  0xfa   : > { %4955 = vmatprep.subr.bf16.mxu0 %v10389_v13  ;;  %5727 = vmatprep.subr.bf16.mxu1 %v10391_v14  ;;  %v10415_v13 = vcombine.high %v1950_v59, %v1954_v60  ;;  %v693_v14 = vadd.f32 %v13125_v61, %v396_v62  ;;  %v10421_v23 = vcombine.high %v13145_v10, %v13147_v11  ;;  %v1982_v16 = vld [vmem:[#allocation7 + $0x548] sm:$0xff] }
  0xfb   : > { %v13166_v28 = vpack.c.bf16 %v1453_v19, %v1445_v12  ;;  %v10420_v37 = vcombine.low %v13145_v10, %v13147_v11  ;;  %v1486_v59 = vsel %vm974_vm13, %v718_v24, %v1230_v38  ;;  %v726_v60 = vadd.f32 %v13113_v0, %v429_v43  ;;  %v1986_v17 = vld [vmem:[#allocation7 + $0x568] sm:$0xff]  ;;  %v13235_v43 = vld [vmem:[#allocation7 + $0x5e0] sm:$0xff] }
  0xfc   : > { %v1205_v29 = vmul.f32 0.01, %v693_v14  ;;  %vm949_vm10 = vcmp.gt.f32.partialorder %v693_v14, 0.0  ;;  %v734_v62 = vadd.f32 %v13113_v0, %v437_v44  ;;  %v13201_v12 = vpack.c.bf16 %v1486_v59, %v1478_v53  ;;  %v461_v59 = vld [vmem:[#allocation5 + $0x308] sm:$0xff] }
  0xfd   : > { %4956 = vmatpush1.bf16.msra.mxu0 %v10388_v22  ;;  %5728 = vmatpush1.bf16.msra.mxu1 %v10390_v26  ;;  %v1470_v22 = vsel %vm958_vm9, %v702_v47, %v1214_v5  ;;  %v412_v26 = vld [vmem:[#allocation5 + $0x180] sm:$0xff]  ;;  %v10437_v5 = vcombine.high %v13178_v49, %v13180_v52  ;;  %v1238_v19 = vmul.f32 0.01, %v726_v60  ;;  %vm982_vm0 = vcmp.gt.f32.partialorder %v726_v60, 0.0 }
  0xfe   : > { %4957 = vmatprep.subr.bf16.mxu0 %v10397_v27  ;;  %5729 = vmatprep.subr.bf16.mxu1 %v10399_v31  ;;  %v420_v27 = vld [vmem:[#allocation5 + $0x1c0] sm:$0xff]  ;;  %v13168_v33 = vpack.c.bf16 %v1470_v22, %v1462_v20  ;;  %v709_v40 = vadd.f32 %v13125_v61, %v412_v26  ;;  %v1246_v20 = vmul.f32 0.01, %v734_v62  ;;  %v742_v22 = vadd.f32 %v13113_v0, %v445_v6 }
  0xff   : > { %v1965_v31 = vld [vmem:[#allocation7 + $0x4c0] sm:$0xff]  ;;  %v717_v47 = vadd.f32 %v13125_v61, %v420_v27  ;;  %vm990_vm1 = vcmp.gt.f32.partialorder %v734_v62, 0.0 }
 0x100   : > { %v10429_v42 = vcombine.high %v1965_v31, %v1969_v32  ;;  %v10428_v54 = vcombine.low %v1965_v31, %v1969_v32  ;;  %vm965_vm14 = vcmp.gt.f32.partialorder %v709_v40, 0.0  ;;  %v13219_v31 = vld [vmem:[#allocation7 + $0x5a0] sm:$0xff]  ;;  %v13221_v32 = vld [vmem:[#allocation7 + $0x588] sm:$0xff]  ;;  %v1502_v38 = vsel %vm990_vm1, %v734_v62, %v1246_v20 }
 0x101   : > { %4958 = vmatpush1.bf16.msra.mxu0 %v10396_v36  ;;  %5730 = vmatpush1.bf16.msra.mxu1 %v10398_v45  ;;  %v1970_v36 = vld [vmem:[#allocation7 + $0x4e8] sm:$0xff]  ;;  %v1461_v45 = vsel %vm949_vm10, %v693_v14, %v1205_v29  ;;  %vm973_vm15 = vcmp.gt.f32.partialorder %v717_v47, 0.0  ;;  %v1229_v10 = vmul.f32 0.01, %v717_v47  ;;  %v13205_v14 = vadd.f32 %v13125_v61, %v436_v1  ;;  %v444_v29 = vld [vmem:[#allocation5 + $0x280] sm:$0xff] }
 0x102   : > { %5120 = vmatprep.subr.bf16.mxu0 %v10405_v46  ;;  %5892 = vmatprep.subr.bf16.mxu1 %v10407_v48  ;;  %v1469_v46 = vsel %vm957_vm11, %v701_v15, %v1213_v30  ;;  %v10431_v48 = vcombine.high %v1966_v35, %v1970_v36  ;;  %v10430_v3 = vcombine.low %v1966_v35, %v1970_v36  ;;  %vm998_vm4 = vcmp.gt.f32.partialorder %v742_v22, 0.0  ;;  %v477_v20 = vld [vmem:[#allocation5 + $0x388] sm:$0xff] }
 0x103   : > { %v13193_v2 = vpack.c.bf16 %v1469_v46, %v1461_v45  ;;  %v10436_v15 = vcombine.low %v13178_v49, %v13180_v52  ;;  %v1485_v27 = vsel %vm973_vm15, %v717_v47, %v1229_v10  ;;  %v10447_v30 = vcombine.high %v1982_v16, %v1986_v17  ;;  %v13241_v49 = vld [vmem:[#allocation7 + $0x5e8] sm:$0xff]  ;;  %v13271_v10 = vld [vmem:[#allocation7 + $0x620] sm:$0xff] }
 0x104   : > { %4960 = vmatmul.mubr.bf16.vlgmr.msra.gmra.mrb[0].mxu0 %v13140_v55  ;;  %5732 = vmatmul.mubr.bf16.vlgmr.msra.gmra.mrb[0].mxu1 %v13140_v55  ;;  %vm989_vm3 = vcmp.gt.f32.partialorder %v13205_v14, 0.0  ;;  %v1245_v36 = vmul.f32 0.01, %v13205_v14  ;;  %v1254_v44 = vmul.f32 0.01, %v742_v22  ;;  %v10446_v46 = vcombine.low %v1982_v16, %v1986_v17  ;;  %v2006_v16 = vld [vmem:[#allocation7 + $0x608] sm:$0xff] }
 0x105   : > { %5121 = vmatpush1.bf16.msra.mxu0 %v10404_v56  ;;  %5893 = vmatpush1.bf16.msra.mxu1 %v10406_v63  ;;  %v13185_v56 = vld [vmem:[#allocation7 + $0x508] sm:$0xff]  ;;  %v428_v63 = vld [vmem:[#allocation5 + $0x200] sm:$0xff]  ;;  %v10455_v53 = vcombine.high %v13221_v32, %v13223_v34  ;;  %v10454_v1 = vcombine.low %v13221_v32, %v13223_v34 }
 0x106   : > { %4969 = vmatprep.mubr.bf16.mxu0 %v13143_v4  ;;  %5741 = vmatprep.mubr.bf16.mxu1 %v13143_v4  ;;  %v10439_v11 = vcombine.high %v13185_v56, %v13187_v57  ;;  %v10438_v21 = vcombine.low %v13185_v56, %v13187_v57  ;;  %v13250_v56 = vadd.f32 %v13125_v61, %v444_v29  ;;  %v2010_v17 = vld [vmem:[#allocation7 + $0x628] sm:$0xff]  ;;  %v2017_v32 = vld [vmem:[#allocation7 + $0x660] sm:$0xff] }
 0x107   : > { %5122 = vmatprep.subr.bf16.mxu0 %v10413_v8  ;;  %5894 = vmatprep.subr.bf16.mxu1 %v10415_v13  ;;  %v13197_v8 = vld [vmem:[#allocation7 + $0x540] sm:$0xff]  ;;  %v725_v13 = vadd.f32 %v13125_v61, %v428_v63  ;;  %v1510_v6 = vsel %vm998_vm4, %v742_v22, %v1254_v44  ;;  %v2014_v34 = vld [vmem:[#allocation7 + $0x648] sm:$0xff] }
 0x108   : > { %v10445_v24 = vcombine.high %v13197_v8, %v1985_v58  ;;  %vm997_vm6 = vcmp.gt.f32.partialorder %v13250_v56, 0.0  ;;  %v13285_v22 = vld [vmem:[#allocation7 + $0x640] sm:$0xff] }
 0x109   : > { %5123 = vmatpush1.bf16.msra.mxu0 %v10412_v7  ;;  %5895 = vmatpush1.bf16.msra.mxu1 %v10414_v9  ;;  %v453_v7 = vld [vmem:[#allocation5 + $0x2c8] sm:$0xff]  ;;  %v1221_v9 = vmul.f32 0.01, %v709_v40  ;;  %vm981_vm2 = vcmp.gt.f32.partialorder %v725_v13, 0.0  ;;  %v1237_v35 = vmul.f32 0.01, %v725_v13 }
 0x10a   : > { %5124 = vmatprep.subr.bf16.mxu0 %v10421_v23  ;;  %5896 = vmatprep.subr.bf16.mxu1 %v10423_v25  ;;  %v750_v23 = vadd.f32 %v13113_v0, %v453_v7  ;;  %v13214_v25 = vld [vmem:[#allocation7 + $0x580] sm:$0xff] }
 0x10b   : > { %v1477_v26 = vsel %vm965_vm14, %v709_v40, %v1221_v9  ;;  %v10444_v40 = vcombine.low %v13197_v8, %v1985_v58  ;;  %v10453_v47 = vcombine.high %v13214_v25, %v13219_v31  ;;  %v10452_v62 = vcombine.low %v13214_v25, %v13219_v31  ;;  %v460_v7 = vld [vmem:[#allocation5 + $0x300] sm:$0xff] }
 0x10c   : > { %4970 = vmatmul.mubr.bf16.gmra.mrb[4].mxu0 %v13166_v28  ;;  %5742 = vmatmul.mubr.bf16.gmra.mrb[4].mxu1 %v13166_v28  ;;  %v1262_v45 = vmul.f32 0.01, %v750_v23  ;;  %v13243_v52 = vpack.c.bf16 %v1485_v27, %v1477_v26  ;;  %vm1006_vm5 = vcmp.gt.f32.partialorder %v750_v23, 0.0  ;;  %v1493_v63 = vsel %vm981_vm2, %v725_v13, %v1237_v35  ;;  %v13269_v9 = vld [vmem:[#allocation7 + $0x600] sm:$0xff]  ;;  %v2018_v35 = vld [vmem:[#allocation7 + $0x668] sm:$0xff] }
 0x10d   : > { %4979 = vmatprep.mubr.bf16.mxu0 %v13168_v33  ;;  %5751 = vmatprep.mubr.bf16.mxu1 %v13168_v33  ;;  %v1253_v58 = vmul.f32 0.01, %v13250_v56  ;;  %v758_v13 = vadd.f32 %v13113_v0, %v461_v59  ;;  %v10469_v26 = vcombine.high %v13269_v9, %v13271_v10  ;;  %v13296_v29 = vadd.f32 %v13125_v61, %v460_v7  ;;  %v13327_v59 = vld [vmem:[#allocation7 + $0x6a8] sm:$0xff] }
 0x10e   : > { %5125 = vmatpush1.bf16.msra.mxu0 %v10420_v37  ;;  %5897 = vmatpush1.bf16.msra.mxu1 %v10422_v39  ;;  %v1494_v37 = vsel %vm982_vm0, %v726_v60, %v1238_v19  ;;  %v452_v39 = vld [vmem:[#allocation5 + $0x2c0] sm:$0xff]  ;;  %v469_v60 = vld [vmem:[#allocation5 + $0x348] sm:$0xff]  ;;  %v10471_v31 = vcombine.high %v2006_v16, %v2010_v17  ;;  %v10479_v44 = vcombine.high %v2014_v34, %v2018_v35 }
 0x10f   : > { %5126 = vmatprep.subr.bf16.mxu0 %v10429_v42  ;;  %5898 = vmatprep.subr.bf16.mxu1 %v10431_v48  ;;  %v13233_v42 = vld [vmem:[#allocation7 + $0x5c0] sm:$0xff]  ;;  %v13239_v48 = vld [vmem:[#allocation7 + $0x5c8] sm:$0xff]  ;;  %v13253_v57 = vadd.f32 %v13125_v61, %v452_v39  ;;  %vm1014_vm8 = vcmp.gt.f32.partialorder %v758_v13, 0.0  ;;  %v13304_v39 = vadd.f32 %v13113_v0, %v477_v20  ;;  %vm1013_vm10 = vcmp.gt.f32.partialorder %v13296_v29, 0.0 }
 0x110   : > { %v10463_v8 = vcombine.high %v13239_v48, %v13241_v49  ;;  %v10462_v25 = vcombine.low %v13239_v48, %v13241_v49  ;;  %v476_v49 = vld [vmem:[#allocation5 + $0x380] sm:$0xff]  ;;  %v501_v20 = vld [vmem:[#allocation5 + $0x448] sm:$0xff] }
 0x111   : > { %vm1005_vm7 = vcmp.gt.f32.partialorder %v13253_v57, 0.0  ;;  %v1261_v19 = vmul.f32 0.01, %v13253_v57  ;;  %vm1030_vm12 = vcmp.gt.f32.partialorder %v13304_v39, 0.0 }
 0x112   : > { %5127 = vmatpush1.bf16.msra.mxu0 %v10428_v54  ;;  %5899 = vmatpush1.bf16.msra.mxu1 %v10430_v3  ;;  %v13247_v54 = vpack.c.bf16 %v1502_v38, %v1494_v37  ;;  %v10461_v3 = vcombine.high %v13233_v42, %v13235_v43  ;;  %v10468_v38 = vcombine.low %v13269_v9, %v13271_v10  ;;  %v13342_v9 = vld [vmem:[#allocation7 + $0x6c8] sm:$0xff] }
 0x113   : > { %5128 = vmatprep.subr.bf16.mxu0 %v10437_v5  ;;  %5900 = vmatprep.subr.bf16.mxu1 %v10439_v11  ;;  %v1501_v5 = vsel %vm989_vm3, %v13205_v14, %v1245_v36  ;;  %v1518_v11 = vsel %vm1006_vm5, %v750_v23, %v1262_v45  ;;  %v766_v14 = vadd.f32 %v13113_v0, %v469_v60  ;;  %v1270_v36 = vmul.f32 0.01, %v758_v13  ;;  %v13311_v45 = vld [vmem:[#allocation7 + $0x680] sm:$0xff]  ;;  %v13344_v10 = vld [vmem:[#allocation7 + $0x6e8] sm:$0xff] }
 0x114   : > { %4980 = vmatmul.mubr.bf16.gmra.mrb[8].mxu0 %v13193_v2  ;;  %5752 = vmatmul.mubr.bf16.gmra.mrb[8].mxu1 %v13193_v2  ;;  %v13287_v23 = vpack.c.bf16 %v1501_v5, %v1493_v63  ;;  %v13293_v27 = vpack.c.bf16 %v1518_v11, %v1510_v6  ;;  %v1517_v48 = vsel %vm1005_vm7, %v13253_v57, %v1261_v19  ;;  %v484_v63 = vld [vmem:[#allocation5 + $0x3c0] sm:$0xff] }
 0x115   : > { %4989 = vmatprep.mubr.bf16.mxu0 %v13201_v12  ;;  %5761 = vmatprep.mubr.bf16.mxu1 %v13201_v12  ;;  %vm1022_vm9 = vcmp.gt.f32.partialorder %v766_v14, 0.0  ;;  %v1278_v37 = vmul.f32 0.01, %v766_v14  ;;  %v1526_v60 = vsel %vm1014_vm8, %v758_v13, %v1270_v36  ;;  %v10476_v57 = vcombine.low %v13285_v22, %v2017_v32  ;;  %v13381_v36 = vld [vmem:[#allocation7 + $0x720] sm:$0xff] }
 0x116   : > { %5129 = vmatpush1.bf16.msra.mxu0 %v10436_v15  ;;  %5901 = vmatpush1.bf16.msra.mxu1 %v10438_v21  ;;  %v468_v15 = vld [vmem:[#allocation5 + $0x340] sm:$0xff]  ;;  %v10460_v21 = vcombine.low %v13233_v42, %v13235_v43  ;;  %v10477_v42 = vcombine.high %v13285_v22, %v2017_v32  ;;  %v10478_v6 = vcombine.low %v2014_v34, %v2018_v35 }
 0x117   : > { %5130 = vmatprep.subr.bf16.mxu0 %v10445_v24  ;;  %5902 = vmatprep.subr.bf16.mxu1 %v10447_v30  ;;  %v485_v24 = vld [vmem:[#allocation5 + $0x3c8] sm:$0xff]  ;;  %v13299_v30 = vadd.f32 %v13125_v61, %v468_v15  ;;  %v492_v22 = vld [vmem:[#allocation5 + $0x400] sm:$0xff]  ;;  %v10495_v34 = vcombine.high %v13342_v9, %v13344_v10 }
 0x118   : > { %v13309_v43 = vadd.f32 %v13113_v0, %v485_v24  ;;  %v500_v32 = vld [vmem:[#allocation5 + $0x440] sm:$0xff] }
 0x119   : > { %vm1021_vm11 = vcmp.gt.f32.partialorder %v13299_v30, 0.0  ;;  %v1277_v5 = vmul.f32 0.01, %v13299_v30  ;;  %v13379_v35 = vld [vmem:[#allocation7 + $0x700] sm:$0xff] }
 0x11a   : > { %5131 = vmatpush1.bf16.msra.mxu0 %v10444_v40  ;;  %5903 = vmatpush1.bf16.msra.mxu1 %v10446_v46  ;;  %v10470_v40 = vcombine.low %v2006_v16, %v2010_v17  ;;  %v13313_v46 = vld [vmem:[#allocation7 + $0x6a0] sm:$0xff]  ;;  %v1294_v13 = vmul.f32 0.01, %v13309_v43  ;;  %v13355_v16 = vadd.f32 %v13125_v61, %v476_v49  ;;  %v13358_v17 = vadd.f32 %v13125_v61, %v484_v63 }
 0x11b   : > { %5132 = vmatprep.subr.bf16.mxu0 %v10453_v47  ;;  %5904 = vmatprep.subr.bf16.mxu1 %v10455_v53  ;;  %v1509_v47 = vsel %vm997_vm6, %v13250_v56, %v1253_v58  ;;  %v13325_v53 = vld [vmem:[#allocation7 + $0x688] sm:$0xff]  ;;  %v1269_v56 = vmul.f32 0.01, %v13296_v29  ;;  %v10485_v7 = vcombine.high %v13311_v45, %v13313_v46  ;;  %v1286_v58 = vmul.f32 0.01, %v13304_v39 }
 0x11c   : > { %4990 = vmatmul.mubr.bf16.gmra.mrb[12].mxu0 %v13243_v52  ;;  %5762 = vmatmul.mubr.bf16.gmra.mrb[12].mxu1 %v13243_v52  ;;  %v13346_v11 = vpack.c.bf16 %v1517_v48, %v1509_v47  ;;  %v10484_v19 = vcombine.low %v13311_v45, %v13313_v46  ;;  %vm1038_vm13 = vcmp.gt.f32.partialorder %v13309_v43, 0.0  ;;  %v10486_v24 = vcombine.low %v13325_v53, %v13327_v59  ;;  %v13403_v46 = vld [vmem:[#allocation7 + $0x740] sm:$0xff] }
 0x11d   : > { %4999 = vmatprep.mubr.bf16.mxu0 %v13247_v54  ;;  %5771 = vmatprep.mubr.bf16.mxu1 %v13247_v54  ;;  %vm1029_vm14 = vcmp.gt.f32.partialorder %v13355_v16, 0.0  ;;  %vm1037_vm15 = vcmp.gt.f32.partialorder %v13358_v17, 0.0  ;;  %v13405_v47 = vld [vmem:[#allocation7 + $0x760] sm:$0xff]  ;;  %v10501_v49 = vcombine.high %v13379_v35, %v13381_v36 }
 0x11e   : > { %5133 = vmatpush1.bf16.msra.mxu0 %v10452_v62  ;;  %5905 = vmatpush1.bf16.msra.mxu1 %v10454_v1  ;;  %v1534_v62 = vsel %vm1022_vm9, %v766_v14, %v1278_v37  ;;  %v493_v1 = vld [vmem:[#allocation5 + $0x408] sm:$0xff]  ;;  %v10487_v14 = vcombine.high %v13325_v53, %v13327_v59 }
 0x11f   : > { %5134 = vmatprep.subr.bf16.mxu0 %v10461_v3  ;;  %5906 = vmatprep.subr.bf16.mxu1 %v10463_v8  ;;  %v13334_v3 = vld [vmem:[#allocation7 + $0x6c0] sm:$0xff]  ;;  %v13352_v15 = vpack.c.bf16 %v1534_v62, %v1526_v60  ;;  %v13391_v37 = vld [vmem:[#allocation7 + $0x708] sm:$0xff]  ;;  %v789_v62 = vadd.f32 %v13125_v61, %v492_v22 }
 0x120   : > { %v13340_v8 = vld [vmem:[#allocation7 + $0x6e0] sm:$0xff]  ;;  %v13412_v53 = vld [vmem:[#allocation7 + $0x748] sm:$0xff] }
 0x121   : > { %v10492_v45 = vcombine.low %v13334_v3, %v13340_v8  ;;  %v13414_v59 = vld [vmem:[#allocation7 + $0x768] sm:$0xff]  ;;  %vm1045_vm2 = vcmp.gt.f32.partialorder %v789_v62, 0.0  ;;  %v13451_v22 = vld [vmem:[#allocation7 + $0x800] sm:$0xff] }
 0x122   : > { %5135 = vmatpush1.bf16.msra.mxu0 %v10460_v21  ;;  %5907 = vmatpush1.bf16.msra.mxu1 %v10462_v25  ;;  %v13364_v21 = vadd.f32 %v13113_v0, %v493_v1  ;;  %v10493_v25 = vcombine.high %v13334_v3, %v13340_v8  ;;  %v517_v3 = vld [vmem:[#allocation5 + $0x4c8] sm:$0xff]  ;;  %v10509_v8 = vcombine.high %v13403_v46, %v13405_v47 }
 0x123   : > { %5136 = vmatprep.subr.bf16.mxu0 %v10469_v26  ;;  %5908 = vmatprep.subr.bf16.mxu1 %v10471_v31  ;;  %v1525_v26 = vsel %vm1013_vm10, %v13296_v29, %v1269_v56  ;;  %v1533_v31 = vsel %vm1021_vm11, %v13299_v30, %v1277_v5  ;;  %v1542_v29 = vsel %vm1030_vm12, %v13304_v39, %v1286_v58  ;;  %v1285_v30 = vmul.f32 0.01, %v13355_v16  ;;  %v13440_v58 = vld [vmem:[#allocation7 + $0x788] sm:$0xff] }
 0x124   : > { %5000 = vmatmul.mubr.bf16.gmra.mrb[16].mxu0 %v13287_v23  ;;  %5772 = vmatmul.mubr.bf16.gmra.mrb[16].mxu1 %v13287_v23  ;;  %v798_v39 = vadd.f32 %v13113_v0, %v501_v20  ;;  %v1302_v48 = vmul.f32 0.01, %v13364_v21  ;;  %v13416_v60 = vpack.c.bf16 %v1533_v31, %v1525_v26  ;;  %v13420_v56 = vadd.f32 %v13125_v61, %v500_v32  ;;  %v13449_v20 = vld [vmem:[#allocation7 + $0x7a8] sm:$0xff]  ;;  %v516_v32 = vld [vmem:[#allocation5 + $0x4c0] sm:$0xff] }
 0x125   : > { %5009 = vmatprep.mubr.bf16.mxu0 %v13293_v27  ;;  %5781 = vmatprep.mubr.bf16.mxu1 %v13293_v27  ;;  %vm1046_vm0 = vcmp.gt.f32.partialorder %v13364_v21, 0.0  ;;  %v1301_v26 = vmul.f32 0.01, %v789_v62 }
 0x126   : > { %5137 = vmatpush1.bf16.msra.mxu0 %v10468_v38  ;;  %5909 = vmatpush1.bf16.msra.mxu1 %v10470_v40  ;;  %v13393_v38 = vld [vmem:[#allocation7 + $0x728] sm:$0xff]  ;;  %v1550_v40 = vsel %vm1038_vm13, %v13309_v43, %v1294_v13  ;;  %v10494_v43 = vcombine.low %v13342_v9, %v13344_v10  ;;  %vm1054_vm1 = vcmp.gt.f32.partialorder %v798_v39, 0.0  ;;  %v13436_v9 = vld [vmem:[#allocation7 + $0x780] sm:$0xff]  ;;  %v1541_v13 = vsel %vm1029_vm14, %v13355_v16, %v1285_v30 }
 0x127   : > { %5138 = vmatprep.subr.bf16.mxu0 %v10477_v42  ;;  %5910 = vmatprep.subr.bf16.mxu1 %v10479_v44  ;;  %v1293_v42 = vmul.f32 0.01, %v13358_v17  ;;  %v509_v44 = vld [vmem:[#allocation5 + $0x488] sm:$0xff]  ;;  %v10503_v63 = vcombine.high %v13391_v37, %v13393_v38  ;;  %v13424_v1 = vpack.c.bf16 %v1550_v40, %v1542_v29  ;;  %v13438_v10 = vld [vmem:[#allocation7 + $0x7a0] sm:$0xff]  ;;  %vm1053_vm3 = vcmp.gt.f32.partialorder %v13420_v56, 0.0 }
 0x128   : > { %v13428_v5 = vadd.f32 %v13113_v0, %v509_v44  ;;  %v1309_v31 = vmul.f32 0.01, %v13420_v56  ;;  %v814_v29 = vadd.f32 %v13113_v0, %v517_v3  ;;  %v2061_v30 = vld [vmem:[#allocation7 + $0x7c0] sm:$0xff]  ;;  %v533_v40 = vld [vmem:[#allocation5 + $0x548] sm:$0xff]  ;;  %v10516_v3 = vcombine.low %v13436_v9, %v13438_v10 }
 0x129   : > { %v1549_v16 = vsel %vm1037_vm15, %v13358_v17, %v1293_v42  ;;  %v10510_v42 = vcombine.low %v13412_v53, %v13414_v59  ;;  %v2062_v44 = vld [vmem:[#allocation7 + $0x7c8] sm:$0xff] }
 0x12a   : > { %5139 = vmatpush1.bf16.msra.mxu0 %v10476_v57  ;;  %5911 = vmatpush1.bf16.msra.mxu1 %v10478_v6  ;;  %v1310_v57 = vmul.f32 0.01, %v798_v39  ;;  %v10500_v6 = vcombine.low %v13379_v35, %v13381_v36  ;;  %v13466_v35 = vld [vmem:[#allocation7 + $0x828] sm:$0xff]  ;;  %v1318_v17 = vmul.f32 0.01, %v13428_v5  ;;  %vm1062_vm4 = vcmp.gt.f32.partialorder %v13428_v5, 0.0 }
 0x12b   : > { %5140 = vmatprep.subr.bf16.mxu0 %v10485_v7  ;;  %5912 = vmatprep.subr.bf16.mxu1 %v10487_v14  ;;  %v10502_v7 = vcombine.low %v13391_v37, %v13393_v38  ;;  %v508_v14 = vld [vmem:[#allocation5 + $0x480] sm:$0xff]  ;;  %v525_v38 = vld [vmem:[#allocation5 + $0x508] sm:$0xff]  ;;  %vm1070_vm5 = vcmp.gt.f32.partialorder %v814_v29, 0.0 }
 0x12c   : > { %5010 = vmatmul.mubr.bf16.gmra.mrb[20].mxu0 %v13346_v11  ;;  %5782 = vmatmul.mubr.bf16.gmra.mrb[20].mxu1 %v13346_v11  ;;  %v1566_v36 = vsel %vm1054_vm1, %v798_v39, %v1310_v57  ;;  %v2065_v37 = vld [vmem:[#allocation7 + $0x7e0] sm:$0xff]  ;;  %v10517_v39 = vcombine.high %v13436_v9, %v13438_v10  ;;  %v813_v57 = vadd.f32 %v13125_v61, %v516_v32 }
 0x12d   : > { %5019 = vmatprep.mubr.bf16.mxu0 %v13352_v15  ;;  %5791 = vmatprep.mubr.bf16.mxu1 %v13352_v15  ;;  %v524_v10 = vld [vmem:[#allocation5 + $0x500] sm:$0xff] }
 0x12e   : > { %5141 = vmatpush1.bf16.msra.mxu0 %v10484_v19  ;;  %5913 = vmatpush1.bf16.msra.mxu1 %v10486_v24  ;;  %v10511_v19 = vcombine.high %v13412_v53, %v13414_v59  ;;  %v13453_v24 = vld [vmem:[#allocation7 + $0x820] sm:$0xff]  ;;  %v1557_v53 = vsel %vm1045_vm2, %v789_v62, %v1301_v26  ;;  %v805_v59 = vadd.f32 %v13125_v61, %v508_v14  ;;  %vm1069_vm7 = vcmp.gt.f32.partialorder %v813_v57, 0.0 }
 0x12f   : > { %5142 = vmatprep.subr.bf16.mxu0 %v10493_v25  ;;  %5914 = vmatprep.subr.bf16.mxu1 %v10495_v34  ;;  %v1558_v25 = vsel %vm1046_vm0, %v13364_v21, %v1302_v48  ;;  %v13464_v34 = vld [vmem:[#allocation7 + $0x808] sm:$0xff]  ;;  %v10508_v21 = vcombine.low %v13403_v46, %v13405_v47  ;;  %v10519_v46 = vcombine.high %v13440_v58, %v13449_v20 }
 0x130   : > { %v10518_v62 = vcombine.low %v13440_v58, %v13449_v20  ;;  %vm1061_vm6 = vcmp.gt.f32.partialorder %v805_v59, 0.0  ;;  %v1317_v9 = vmul.f32 0.01, %v805_v59  ;;  %v532_v20 = vld [vmem:[#allocation5 + $0x540] sm:$0xff]  ;;  %v2078_v47 = vld [vmem:[#allocation7 + $0x848] sm:$0xff] }
 0x131   : > { %v2082_v48 = vld [vmem:[#allocation7 + $0x868] sm:$0xff] }
 0x132   : > { %5143 = vmatpush1.bf16.msra.mxu0 %v10492_v45  ;;  %5915 = vmatpush1.bf16.msra.mxu1 %v10494_v43  ;;  %v2066_v45 = vld [vmem:[#allocation7 + $0x7e8] sm:$0xff]  ;;  %v13480_v43 = vpack.c.bf16 %v1549_v16, %v1541_v13  ;;  %v830_v13 = vadd.f32 %v13113_v0, %v533_v40  ;;  %v1573_v40 = vsel %vm1061_vm6, %v805_v59, %v1317_v9 }
 0x133   : > { %5144 = vmatprep.subr.bf16.mxu0 %v10501_v49  ;;  %5916 = vmatprep.subr.bf16.mxu1 %v10503_v63  ;;  %v13486_v49 = vpack.c.bf16 %v1566_v36, %v1558_v25  ;;  %v1326_v63 = vmul.f32 0.01, %v814_v29  ;;  %v10527_v14 = vcombine.high %v2062_v44, %v2066_v45  ;;  %v541_v16 = vld [vmem:[#allocation5 + $0x588] sm:$0xff]  ;;  %v10524_v25 = vcombine.low %v2061_v30, %v2065_v37 }
 0x134   : > { %5020 = vmatmul.mubr.bf16.gmra.mrb[24].mxu0 %v13416_v60  ;;  %5792 = vmatmul.mubr.bf16.gmra.mrb[24].mxu1 %v13416_v60  ;;  %vm1086_vm9 = vcmp.gt.f32.partialorder %v830_v13, 0.0  ;;  %v549_v36 = vld [vmem:[#allocation5 + $0x5c8] sm:$0xff] }
 0x135   : > { %5029 = vmatprep.mubr.bf16.mxu0 %v13424_v1  ;;  %5801 = vmatprep.mubr.bf16.mxu1 %v13424_v1  ;;  %v1582_v58 = vsel %vm1070_vm5, %v814_v29, %v1326_v63  ;;  %v10535_v29 = vcombine.high %v13464_v34, %v13466_v35 }
 0x136   : > { %5145 = vmatpush1.bf16.msra.mxu0 %v10500_v6  ;;  %5917 = vmatpush1.bf16.msra.mxu1 %v10502_v7  ;;  %v1565_v6 = vsel %vm1053_vm3, %v13420_v56, %v1309_v31  ;;  %v10525_v7 = vcombine.high %v2061_v30, %v2065_v37  ;;  %v1574_v56 = vsel %vm1062_vm4, %v13428_v5, %v1318_v17 }
 0x137   : > { %5146 = vmatprep.subr.bf16.mxu0 %v10509_v8  ;;  %5918 = vmatprep.subr.bf16.mxu1 %v10511_v19  ;;  %v822_v8 = vadd.f32 %v13113_v0, %v525_v38  ;;  %v1325_v19 = vmul.f32 0.01, %v813_v57  ;;  %v13509_v26 = vpack.c.bf16 %v1565_v6, %v1557_v53  ;;  %v10526_v31 = vcombine.low %v2062_v44, %v2066_v45  ;;  %v548_v53 = vld [vmem:[#allocation5 + $0x5c0] sm:$0xff] }
 0x138   : > { %v10533_v5 = vcombine.high %v13451_v22, %v13453_v24  ;;  %v13515_v17 = vpack.c.bf16 %v1582_v58, %v1574_v56  ;;  %v821_v30 = vadd.f32 %v13125_v61, %v524_v10  ;;  %v829_v37 = vadd.f32 %v13125_v61, %v532_v20 }
 0x139   : > { %vm1078_vm8 = vcmp.gt.f32.partialorder %v822_v8, 0.0  ;;  %v1334_v32 = vmul.f32 0.01, %v822_v8  ;;  %v838_v38 = vadd.f32 %v13113_v0, %v541_v16  ;;  %v556_v16 = vld [vmem:[#allocation5 + $0x600] sm:$0xff] }
 0x13a   : > { %5147 = vmatpush1.bf16.msra.mxu0 %v10508_v21  ;;  %5919 = vmatpush1.bf16.msra.mxu1 %v10510_v42  ;;  %v1342_v21 = vmul.f32 0.01, %v830_v13  ;;  %v1581_v42 = vsel %vm1069_vm7, %v813_v57, %v1325_v19  ;;  %vm1077_vm10 = vcmp.gt.f32.partialorder %v821_v30, 0.0  ;;  %v1333_v63 = vmul.f32 0.01, %v821_v30 }
 0x13b   : > { %5148 = vmatprep.subr.bf16.mxu0 %v10517_v39  ;;  %5920 = vmatprep.subr.bf16.mxu1 %v10519_v46  ;;  %v846_v39 = vadd.f32 %v13113_v0, %v549_v36  ;;  %v1590_v44 = vsel %vm1078_vm8, %v822_v8, %v1334_v32  ;;  %v540_v46 = vld [vmem:[#allocation5 + $0x580] sm:$0xff]  ;;  %v1350_v6 = vmul.f32 0.01, %v838_v38  ;;  %vm1085_vm11 = vcmp.gt.f32.partialorder %v829_v37, 0.0 }
 0x13c   : > { %5030 = vmatmul.mubr.bf16.gmra.mrb[28].mxu0 %v13480_v43  ;;  %5802 = vmatmul.mubr.bf16.gmra.mrb[28].mxu1 %v13480_v43  ;;  %v1598_v45 = vsel %vm1086_vm9, %v830_v13, %v1342_v21  ;;  %vm1094_vm12 = vcmp.gt.f32.partialorder %v838_v38, 0.0  ;;  %v837_v57 = vadd.f32 %v13125_v61, %v540_v46  ;;  %v845_v8 = vadd.f32 %v13125_v61, %v548_v53  ;;  %v565_v13 = vld [vmem:[#allocation5 + $0x648] sm:$0xff] }
 0x13d   : > { %5039 = vmatprep.mubr.bf16.mxu0 %v13486_v49  ;;  %5811 = vmatprep.mubr.bf16.mxu1 %v13486_v49  ;;  %v1358_v59 = vmul.f32 0.01, %v846_v39  ;;  %vm1102_vm13 = vcmp.gt.f32.partialorder %v846_v39, 0.0  ;;  %v1589_v56 = vsel %vm1077_vm10, %v821_v30, %v1333_v63  ;;  %v1606_v10 = vsel %vm1094_vm12, %v838_v38, %v1350_v6  ;;  %v573_v38 = vld [vmem:[#allocation5 + $0x688] sm:$0xff]  ;;  %v572_v6 = vld [vmem:[#allocation5 + $0x680] sm:$0xff] }
 0x13e   : > { %5149 = vmatpush1.bf16.msra.mxu0 %v10516_v3  ;;  %5921 = vmatpush1.bf16.msra.mxu1 %v10518_v62  ;;  %v1341_v3 = vmul.f32 0.01, %v829_v37  ;;  %v13529_v62 = vpack.c.bf16 %v1581_v42, %v1573_v40  ;;  %v862_v20 = vadd.f32 %v13113_v0, %v565_v13  ;;  %vm1093_vm14 = vcmp.gt.f32.partialorder %v837_v57, 0.0  ;;  %v581_v40 = vld [vmem:[#allocation5 + $0x6c8] sm:$0xff] }
 0x13f   : > { %5150 = vmatprep.subr.bf16.mxu0 %v10525_v7  ;;  %5922 = vmatprep.subr.bf16.mxu1 %v10527_v14  ;;  %v13531_v7 = vpack.c.bf16 %v1598_v45, %v1590_v44  ;;  %v557_v14 = vld [vmem:[#allocation5 + $0x608] sm:$0xff]  ;;  %v1614_v58 = vsel %vm1102_vm13, %v846_v39, %v1358_v59  ;;  %vm1101_vm15 = vcmp.gt.f32.partialorder %v845_v8, 0.0  ;;  %v1357_v36 = vmul.f32 0.01, %v845_v8  ;;  %v580_v59 = vld [vmem:[#allocation5 + $0x6c0] sm:$0xff] }
 0x140   : > { %v1597_v9 = vsel %vm1085_vm11, %v829_v37, %v1341_v3  ;;  %v854_v19 = vadd.f32 %v13113_v0, %v557_v14  ;;  %v13544_v32 = vpack.c.bf16 %v1614_v58, %v1606_v10  ;;  %vm1118_vm1 = vcmp.gt.f32.partialorder %v862_v20, 0.0  ;;  %v589_v13 = vld [vmem:[#allocation5 + $0x708] sm:$0xff] }
 0x141   : > { %v1374_v37 = vmul.f32 0.01, %v862_v20  ;;  %v1613_v39 = vsel %vm1101_vm15, %v845_v8, %v1357_v36  ;;  %v870_v46 = vadd.f32 %v13113_v0, %v573_v38  ;;  %v878_v53 = vadd.f32 %v13113_v0, %v581_v40 }
 0x142   : > { %5151 = vmatpush1.bf16.msra.mxu0 %v10524_v25  ;;  %5923 = vmatpush1.bf16.msra.mxu1 %v10526_v31  ;;  %v564_v25 = vld [vmem:[#allocation5 + $0x640] sm:$0xff]  ;;  %v1349_v31 = vmul.f32 0.01, %v837_v57  ;;  %19282 = vst [vmem:[#allocation20_spill] sm:$0xff] %v13544_v32  ;;  %vm1110_vm0 = vcmp.gt.f32.partialorder %v854_v19, 0.0  ;;  %v869_v58 = vadd.f32 %v13125_v61, %v572_v6 }
 0x143   : > { %5313 = vmatprep.subr.bf16.mxu0 %v10533_v5  ;;  %6085 = vmatprep.subr.bf16.mxu1 %v10535_v29  ;;  %v13542_v5 = vpack.c.bf16 %v1597_v9, %v1589_v56  ;;  %v853_v29 = vadd.f32 %v13125_v61, %v556_v16  ;;  %v861_v21 = vadd.f32 %v13125_v61, %v564_v25  ;;  %v1366_v30 = vmul.f32 0.01, %v854_v19 }
 0x144   : > { %5040 = vmatmul.mubr.bf16.gmra.mrb[32].mxu0 %v13509_v26  ;;  %5812 = vmatmul.mubr.bf16.gmra.mrb[32].mxu1 %v13509_v26  ;;  %v1605_v42 = vsel %vm1093_vm14, %v837_v57, %v1349_v31  ;;  %v1630_v45 = vsel %vm1118_vm1, %v862_v20, %v1374_v37  ;;  %v597_v57 = vld [vmem:[#allocation5 + $0x748] sm:$0xff]  ;;  %v1382_v8 = vmul.f32 0.01, %v870_v46  ;;  %v1390_v9 = vmul.f32 0.01, %v878_v53 }
 0x145   : > { %5049 = vmatprep.mubr.bf16.mxu0 %v13515_v17  ;;  %5821 = vmatprep.mubr.bf16.mxu1 %v13515_v17  ;;  %vm1109_vm2 = vcmp.gt.f32.partialorder %v853_v29, 0.0  ;;  %vm1117_vm3 = vcmp.gt.f32.partialorder %v861_v21, 0.0  ;;  %v1622_v44 = vsel %vm1110_vm0, %v854_v19, %v1366_v30  ;;  %v1365_v63 = vmul.f32 0.01, %v853_v29  ;;  %v588_v30 = vld [vmem:[#allocation5 + $0x700] sm:$0xff] }
 0x146   : > { %v1373_v3 = vmul.f32 0.01, %v861_v21  ;;  %v13556_v14 = vpack.c.bf16 %v1613_v39, %v1605_v42  ;;  %v13558_v56 = vpack.c.bf16 %v1630_v45, %v1622_v44  ;;  %vm1126_vm4 = vcmp.gt.f32.partialorder %v870_v46, 0.0  ;;  %v613_v39 = vld [vmem:[#allocation5 + $0x7c8] sm:$0xff] }
 0x147   : > { %vm1134_vm5 = vcmp.gt.f32.partialorder %v878_v53, 0.0  ;;  %v1621_v10 = vsel %vm1109_vm2, %v853_v29, %v1365_v63  ;;  %v877_v19 = vadd.f32 %v13125_v61, %v580_v59  ;;  %v886_v16 = vadd.f32 %v13113_v0, %v589_v13  ;;  %v596_v29 = vld [vmem:[#allocation5 + $0x740] sm:$0xff] }
 0x148   : > { %19283 = vst [vmem:[#allocation21_spill] sm:$0xff] %v13556_v14  ;;  %19284 = vst [vmem:[#allocation22_spill] sm:$0xff] %v13558_v56  ;;  %v1629_v20 = vsel %vm1117_vm3, %v861_v21, %v1373_v3  ;;  %v894_v25 = vadd.f32 %v13113_v0, %v597_v57  ;;  %v1638_v31 = vsel %vm1126_vm4, %v870_v46, %v1382_v8  ;;  %vm1125_vm6 = vcmp.gt.f32.partialorder %v869_v58, 0.0  ;;  %v605_v21 = vld [vmem:[#allocation5 + $0x788] sm:$0xff] }
 0x149   : > { %v1646_v36 = vsel %vm1134_vm5, %v878_v53, %v1390_v9  ;;  %v13570_v37 = vpack.c.bf16 %v1629_v20, %v1621_v10  ;;  %vm1133_vm7 = vcmp.gt.f32.partialorder %v877_v19, 0.0  ;;  %v1381_v38 = vmul.f32 0.01, %v869_v58  ;;  %v604_v20 = vld [vmem:[#allocation5 + $0x780] sm:$0xff] }
 0x14a   : > { %v13572_v40 = vpack.c.bf16 %v1646_v36, %v1638_v31  ;;  %v1389_v42 = vmul.f32 0.01, %v877_v19  ;;  %vm1142_vm8 = vcmp.gt.f32.partialorder %v886_v16, 0.0  ;;  %vm1150_vm9 = vcmp.gt.f32.partialorder %v894_v25, 0.0  ;;  %v612_v31 = vld [vmem:[#allocation5 + $0x7c0] sm:$0xff] }
 0x14b   : > { %19285 = vst [vmem:[#allocation23_spill] sm:$0xff] %v13570_v37  ;;  %v1398_v44 = vmul.f32 0.01, %v886_v16  ;;  %v1406_v45 = vmul.f32 0.01, %v894_v25  ;;  %v885_v63 = vadd.f32 %v13125_v61, %v588_v30  ;;  %v893_v46 = vadd.f32 %v13125_v61, %v596_v29  ;;  %v367_v30 = vld [vmem:[#allocation5 + $0x18] sm:$0xff] }
 0x14c   : > { %5050 = vmatmul.mubr.bf16.gmra.mrb[36].mxu0 %v13529_v62  ;;  %5822 = vmatmul.mubr.bf16.gmra.mrb[36].mxu1 %v13529_v62  ;;  %19286 = vst [vmem:[#allocation24_spill] sm:$0xff] %v13572_v40  ;;  %v902_v53 = vadd.f32 %v13113_v0, %v605_v21  ;;  %v910_v3 = vadd.f32 %v13113_v0, %v613_v39  ;;  %v18796_v13 = vsub.s32 3, %v13104_v41  ;;  %v18798_v0 = vsub.s32 2, %v13104_v41  ;;  %v375_v29 = vld [vmem:[#allocation5 + $0x58] sm:$0xff] }
 0x14d   : > { %5059 = vmatprep.mubr.bf16.mxu0 %v13531_v7  ;;  %5831 = vmatprep.mubr.bf16.mxu1 %v13531_v7  ;;  %v1637_v6 = vsel %vm1125_vm6, %v869_v58, %v1381_v38  ;;  %v1645_v59 = vsel %vm1133_vm7, %v877_v19, %v1389_v42  ;;  %v1654_v57 = vsel %vm1142_vm8, %v886_v16, %v1398_v44  ;;  %v1397_v9 = vmul.f32 0.01, %v885_v63  ;;  %v12516_v42 = vld [vmem:[%s13086_s7] sm:$0xff] }
 0x14e   : > { %v1662_v8 = vsel %vm1150_vm9, %v894_v25, %v1406_v45  ;;  %vm1141_vm10 = vcmp.gt.f32.partialorder %v885_v63, 0.0  ;;  %vm1149_vm11 = vcmp.gt.f32.partialorder %v893_v46, 0.0  ;;  %v1405_v10 = vmul.f32 0.01, %v893_v46 }
 0x14f   : > { %v13588_v58 = vpack.c.bf16 %v1645_v59, %v1637_v6  ;;  %v1414_v19 = vmul.f32 0.01, %v902_v53  ;;  %v1422_v36 = vmul.f32 0.01, %v910_v3  ;;  %v13590_v38 = vpack.c.bf16 %v1662_v8, %v1654_v57  ;;  %v366_v8 = vld [vmem:[#allocation5 + $0x10] sm:$0xff] }
 0x150   : > { %v13595_v16 = vrot.slane %v12516_v42, %v18796_v13  ;;  %vm1158_vm12 = vcmp.gt.f32.partialorder %v902_v53, 0.0  ;;  %vm1166_vm13 = vcmp.gt.f32.partialorder %v910_v3, 0.0  ;;  %v1653_v25 = vsel %vm1141_vm10, %v885_v63, %v1397_v9  ;;  %v374_v63 = vld [vmem:[#allocation5 + $0x50] sm:$0xff] }
 0x151   : > { %19287 = vst [vmem:[#allocation25_spill] sm:$0xff] %v13588_v58  ;;  %19288 = vst [vmem:[#allocation26_spill] sm:$0xff] %v13590_v38  ;;  %v901_v21 = vadd.f32 %v13125_v61, %v604_v20  ;;  %v909_v39 = vadd.f32 %v13125_v61, %v612_v31  ;;  %v1661_v44 = vsel %vm1149_vm11, %v893_v46, %v1405_v10  ;;  %v383_v61 = vld [vmem:[#allocation5 + $0x98] sm:$0xff] }
 0x152   : > { %v664_v45 = vadd.f32 %v13595_v16, %v367_v30  ;;  %v672_v6 = vadd.f32 %v13595_v16, %v375_v29  ;;  %v1670_v59 = vsel %vm1158_vm12, %v902_v53, %v1414_v19  ;;  %v1678_v57 = vsel %vm1166_vm13, %v910_v3, %v1422_v36  ;;  %v391_v20 = vld [vmem:[#allocation5 + $0xd8] sm:$0xff] }
 0x153   : > { %v13609_v9 = vrot.slane %v12516_v42, %v18798_v0  ;;  %v13611_v31 = vpack.c.bf16 %v1661_v44, %v1653_v25  ;;  %vm1157_vm14 = vcmp.gt.f32.partialorder %v901_v21, 0.0  ;;  %vm1165_vm15 = vcmp.gt.f32.partialorder %v909_v39, 0.0 }
 0x154   : > { %5060 = vmatmul.mubr.bf16.gmra.mrb[40].mxu0 %v13542_v5  ;;  %5832 = vmatmul.mubr.bf16.gmra.mrb[40].mxu1 %v13542_v5  ;;  %v1413_v46 = vmul.f32 0.01, %v901_v21  ;;  %v13613_v10 = vpack.c.bf16 %v1678_v57, %v1670_v59  ;;  %v1421_v30 = vmul.f32 0.01, %v909_v39  ;;  %vm920_vm0 = vcmp.gt.f32.partialorder %v664_v45, 0.0 }
 0x155   : > { %5069 = vmatprep.mubr.bf16.mxu0 %v13544_v32  ;;  %5841 = vmatprep.mubr.bf16.mxu1 %v13544_v32  ;;  %19289 = vst [vmem:[#allocation27_spill] sm:$0xff] %v13611_v31  ;;  %vm928_vm1 = vcmp.gt.f32.partialorder %v672_v6, 0.0  ;;  %v1176_v53 = vmul.f32 0.01, %v664_v45  ;;  %v1184_v3 = vmul.f32 0.01, %v672_v6  ;;  %v663_v19 = vadd.f32 %v13609_v9, %v366_v8 }
 0x156   : > { %19290 = vst [vmem:[#allocation28_spill] sm:$0xff] %v13613_v10  ;;  %v671_v36 = vadd.f32 %v13609_v9, %v374_v63  ;;  %v680_v29 = vadd.f32 %v13595_v16, %v383_v61  ;;  %v688_v42 = vadd.f32 %v13595_v16, %v391_v20  ;;  %v1669_v25 = vsel %vm1157_vm14, %v901_v21, %v1413_v46  ;;  %v382_v8 = vld [vmem:[#allocation5 + $0x90] sm:$0xff]  ;;  %v399_v61 = vld [vmem:[#allocation5 + $0x118] sm:$0xff]  ;;  %v2281_v32 = vld [vmem:[#allocation7 + $0xea0] sm:$0xff] }
 0x157   : > { %v1677_v44 = vsel %vm1165_vm15, %v909_v39, %v1421_v30  ;;  %v1432_v59 = vsel %vm920_vm0, %v664_v45, %v1176_v53  ;;  %v1440_v57 = vsel %vm928_vm1, %v672_v6, %v1184_v3  ;;  %vm919_vm2 = vcmp.gt.f32.partialorder %v663_v19, 0.0  ;;  %v390_v63 = vld [vmem:[#allocation5 + $0xd0] sm:$0xff] }
 0x158   : > { %vm927_vm3 = vcmp.gt.f32.partialorder %v671_v36, 0.0  ;;  %v1175_v20 = vmul.f32 0.01, %v663_v19  ;;  %v1183_v13 = vmul.f32 0.01, %v671_v36  ;;  %vm936_vm4 = vcmp.gt.f32.partialorder %v680_v29, 0.0 }
 0x159   : > { %vm944_vm5 = vcmp.gt.f32.partialorder %v688_v42, 0.0  ;;  %v13625_v0 = vpack.c.bf16 %v1677_v44, %v1669_v25  ;;  %v1192_v51 = vmul.f32 0.01, %v680_v29  ;;  %v1200_v21 = vmul.f32 0.01, %v688_v42 }
 0x15a   : > { %v13627_v46 = vpack.c.bf16 %v1440_v57, %v1432_v59  ;;  %v679_v39 = vadd.f32 %v13609_v9, %v382_v8  ;;  %v687_v45 = vadd.f32 %v13609_v9, %v390_v63  ;;  %v696_v6 = vadd.f32 %v13595_v16, %v399_v61  ;;  %v2077_v59 = vld [vmem:[#allocation7 + $0x840] sm:$0xff]  ;;  %v398_v8 = vld [vmem:[#allocation5 + $0x110] sm:$0xff] }
 0x15b   : > { %19291 = vst [vmem:[#allocation29_spill] sm:$0xff] %v13625_v0  ;;  %v704_v30 = vadd.f32 %v13595_v16, %v407_v50  ;;  %v1431_v53 = vsel %vm919_vm2, %v663_v19, %v1175_v20  ;;  %v1439_v3 = vsel %vm927_vm3, %v671_v36, %v1183_v13  ;;  %v1448_v25 = vsel %vm936_vm4, %v680_v29, %v1192_v51  ;;  %v2081_v57 = vld [vmem:[#allocation7 + $0x860] sm:$0xff]  ;;  %v406_v63 = vld [vmem:[#allocation5 + $0x150] sm:$0xff]  ;;  %v415_v51 = vld [vmem:[#allocation5 + $0x198] sm:$0xff] }
 0x15c   : > { %5070 = vmatmul.mubr.bf16.gmra.mrb[44].mxu0 %v13556_v14  ;;  %5842 = vmatmul.mubr.bf16.gmra.mrb[44].mxu1 %v13556_v14  ;;  %19292 = vst [vmem:[#allocation30_spill] sm:$0xff] %v13627_v46  ;;  %v1456_v44 = vsel %vm944_vm5, %v688_v42, %v1200_v21  ;;  %vm935_vm6 = vcmp.gt.f32.partialorder %v679_v39, 0.0  ;;  %vm943_vm7 = vcmp.gt.f32.partialorder %v687_v45, 0.0  ;;  %v1191_v50 = vmul.f32 0.01, %v679_v39  ;;  %v423_v29 = vld [vmem:[#allocation5 + $0x1d8] sm:$0xff] }
 0x15d   : > { %5079 = vmatprep.mubr.bf16.mxu0 %v13558_v56  ;;  %5851 = vmatprep.mubr.bf16.mxu1 %v13558_v56  ;;  %v1199_v61 = vmul.f32 0.01, %v687_v45  ;;  %vm952_vm8 = vcmp.gt.f32.partialorder %v696_v6, 0.0  ;;  %v13641_v19 = vpack.c.bf16 %v1439_v3, %v1431_v53  ;;  %v1208_v13 = vmul.f32 0.01, %v696_v6  ;;  %v2125_v56 = vld [vmem:[#allocation7 + $0x9c0] sm:$0xff] }
 0x15e   : > { %v1216_v36 = vmul.f32 0.01, %v704_v30  ;;  %v13643_v20 = vpack.c.bf16 %v1456_v44, %v1448_v25  ;;  %vm960_vm9 = vcmp.gt.f32.partialorder %v704_v30, 0.0  ;;  %v10540_v42 = vcombine.low %v2077_v59, %v2081_v57  ;;  %v2086_v44 = vld [vmem:[#allocation7 + $0x888] sm:$0xff]  ;;  %v13764_v14 = vld [vmem:[#allocation7 + $0xa00] sm:$0xff] }
 0x15f   : > { %19293 = vst [vmem:[#allocation31_spill] sm:$0xff] %v13641_v19  ;;  %v10541_v21 = vcombine.high %v2077_v59, %v2081_v57  ;;  %v1447_v53 = vsel %vm935_vm6, %v679_v39, %v1191_v50  ;;  %v1455_v3 = vsel %vm943_vm7, %v687_v45, %v1199_v61  ;;  %v1464_v25 = vsel %vm952_vm8, %v696_v6, %v1208_v13  ;;  %v414_v50 = vld [vmem:[#allocation5 + $0x190] sm:$0xff]  ;;  %v13662_v61 = vld [vmem:[#allocation7 + $0x8c0] sm:$0xff] }
 0x160   : > { %19294 = vst [vmem:[#allocation32_spill] sm:$0xff] %v13643_v20  ;;  %v19295_v59 = vcombine.low %v13451_v22, %v13453_v24  ;;  %v1472_v57 = vsel %vm960_vm9, %v704_v30, %v1216_v36  ;;  %v19296_v39 = vcombine.low %v13464_v34, %v13466_v35  ;;  %v10542_v45 = vcombine.low %v2078_v47, %v2082_v48  ;;  %v13664_v13 = vld [vmem:[#allocation7 + $0x8e0] sm:$0xff]  ;;  %v422_v24 = vld [vmem:[#allocation5 + $0x1d0] sm:$0xff]  ;;  %v13667_v30 = vld [vmem:[#allocation7 + $0x8c8] sm:$0xff] }
 0x161   : > { %v13669_v34 = vld [vmem:[#allocation7 + $0x8e8] sm:$0xff]  ;;  %v13671_v35 = vpack.c.bf16 %v1455_v3, %v1447_v53  ;;  %v711_v53 = vadd.f32 %v13609_v9, %v414_v50  ;;  %v13681_v3 = vadd.f32 %v13609_v9, %v422_v24  ;;  %v430_v24 = vld [vmem:[#allocation5 + $0x210] sm:$0xff] }
 0x163   : > { %19297 = vst [vmem:[#allocation33_spill] sm:$0xff] %v13671_v35  ;;  %vm967_vm14 = vcmp.gt.f32.partialorder %v711_v53, 0.0  ;;  %vm975_vm15 = vcmp.gt.f32.partialorder %v13681_v3, 0.0 }
 0x164   : > { %5080 = vmatmul.mubr.bf16.gmra.mrb[48].mxu0 %v13570_v37  ;;  %5852 = vmatmul.mubr.bf16.gmra.mrb[48].mxu1 %v13570_v37  ;;  %v446_v37 = vld [vmem:[#allocation5 + $0x290] sm:$0xff] }
 0x165   : > { %5089 = vmatprep.mubr.bf16.mxu0 %v13572_v40  ;;  %5861 = vmatprep.mubr.bf16.mxu1 %v13572_v40  ;;  %v2118_v40 = vld [vmem:[#allocation7 + $0x988] sm:$0xff] }
 0x16c   : > { %5090 = vmatmul.mubr.bf16.gmra.mrb[52].mxu0 %v13588_v58  ;;  %5862 = vmatmul.mubr.bf16.gmra.mrb[52].mxu1 %v13588_v58  ;;  %v2090_v58 = vld [vmem:[#allocation7 + $0x8a8] sm:$0xff] }
 0x16d   : > { %5099 = vmatprep.mubr.bf16.mxu0 %v13590_v38  ;;  %5871 = vmatprep.mubr.bf16.mxu1 %v13590_v38  ;;  %v10543_v38 = vcombine.high %v2078_v47, %v2082_v48  ;;  %v10551_v22 = vcombine.high %v2086_v44, %v2090_v58  ;;  %v13673_v48 = vpack.c.bf16 %v1472_v57, %v1464_v25  ;;  %v13685_v57 = vld [vmem:[#allocation7 + $0x900] sm:$0xff] }
 0x16e   : > { %v10559_v25 = vcombine.high %v13667_v30, %v13669_v34 }
 0x16f   : > { %19298 = vst [vmem:[#allocation34_spill] sm:$0xff] %v13673_v48 }
 0x174   : > { %5100 = vmatmul.mubr.bf16.gmra.mrb[56].mxu0 %v13611_v31  ;;  %5872 = vmatmul.mubr.bf16.gmra.mrb[56].mxu1 %v13611_v31  ;;  %v2089_v31 = vld [vmem:[#allocation7 + $0x8a0] sm:$0xff] }
 0x175   : > { %5109 = vmatprep.mubr.bf16.mxu0 %v13613_v10  ;;  %5881 = vmatprep.mubr.bf16.mxu1 %v13613_v10  ;;  %v2085_v10 = vld [vmem:[#allocation7 + $0x880] sm:$0xff] }
 0x176   : > { %v10549_v6 = vcombine.high %v2085_v10, %v2089_v31 }
 0x17c   : > { %5110 = vmatmul.mubr.bf16.gmra.mrb[60].mxu0 %v13625_v0  ;;  %5882 = vmatmul.mubr.bf16.gmra.mrb[60].mxu1 %v13625_v0  ;;  %v703_v0 = vadd.f32 %v13609_v9, %v406_v63  ;;  %v720_v63 = vadd.f32 %v13595_v16, %v423_v29 }
 0x17d   : > { %5152 = vmatprep.mubr.bf16.mxu0 %v13627_v46  ;;  %5924 = vmatprep.mubr.bf16.mxu1 %v13627_v46  ;;  %v695_v46 = vadd.f32 %v13609_v9, %v398_v8  ;;  %v712_v8 = vadd.f32 %v13595_v16, %v415_v51 }
 0x17e   : > { %vm959_vm11 = vcmp.gt.f32.partialorder %v703_v0, 0.0  ;;  %v1215_v36 = vmul.f32 0.01, %v703_v0  ;;  %vm976_vm13 = vcmp.gt.f32.partialorder %v720_v63, 0.0  ;;  %v1232_v29 = vmul.f32 0.01, %v720_v63 }
 0x17f   : > { %vm951_vm10 = vcmp.gt.f32.partialorder %v695_v46, 0.0  ;;  %v1207_v47 = vmul.f32 0.01, %v695_v46  ;;  %vm968_vm12 = vcmp.gt.f32.partialorder %v712_v8, 0.0  ;;  %v1224_v51 = vmul.f32 0.01, %v712_v8 }
 0x184   : > { %5153 = vmatmul.mubr.bf16.vlgmr.msra.gmra.mrb[0].mxu0 %v13641_v19  ;;  %5925 = vmatmul.mubr.bf16.vlgmr.msra.gmra.mrb[0].mxu1 %v13641_v19  ;;  %v455_v19 = vld [vmem:[#allocation5 + $0x2d8] sm:$0xff] }
 0x185   : > { %5314 = vmatpush1.bf16.msra.mxu0 %v19295_v59  ;;  %6086 = vmatpush1.bf16.msra.mxu1 %v19296_v39  ;;  %v439_v59 = vld [vmem:[#allocation5 + $0x258] sm:$0xff]  ;;  %v10548_v39 = vcombine.low %v2085_v10, %v2089_v31  ;;  %v13687_v31 = vld [vmem:[#allocation7 + $0x920] sm:$0xff]  ;;  %v1480_v10 = vsel %vm968_vm12, %v712_v8, %v1224_v51  ;;  %v13715_v51 = vld [vmem:[#allocation7 + $0xc08] sm:$0xff] }
 0x186   : > { %5162 = vmatprep.mubr.bf16.mxu0 %v13643_v20  ;;  %5934 = vmatprep.mubr.bf16.mxu1 %v13643_v20  ;;  %v10550_v20 = vcombine.low %v2086_v44, %v2090_v58  ;;  %v1471_v58 = vsel %vm959_vm11, %v703_v0, %v1215_v36  ;;  %v13695_v44 = vld [vmem:[#allocation7 + $0x908] sm:$0xff]  ;;  %v13703_v0 = vld [vmem:[#allocation7 + $0xc00] sm:$0xff] }
 0x187   : > { %5315 = vmatprep.subr.bf16.mxu0 %v10541_v21  ;;  %6087 = vmatprep.subr.bf16.mxu1 %v10543_v38  ;;  %v431_v21 = vld [vmem:[#allocation5 + $0x218] sm:$0xff]  ;;  %v10557_v38 = vcombine.high %v13662_v61, %v13664_v13  ;;  %v13705_v8 = vld [vmem:[#allocation7 + $0xc20] sm:$0xff] }
 0x188   : > { %v728_v50 = vadd.f32 %v13595_v16, %v431_v21  ;;  %v13713_v36 = vld [vmem:[#allocation7 + $0x960] sm:$0xff]  ;;  %v13722_v21 = vld [vmem:[#allocation7 + $0xc28] sm:$0xff] }
 0x189   : > { %5316 = vmatpush1.bf16.msra.mxu0 %v10540_v42  ;;  %6088 = vmatpush1.bf16.msra.mxu1 %v10542_v45  ;;  %v1463_v42 = vsel %vm951_vm10, %v695_v46, %v1207_v47  ;;  %v10556_v46 = vcombine.low %v13662_v61, %v13664_v13  ;;  %v13697_v45 = vld [vmem:[#allocation7 + $0x928] sm:$0xff]  ;;  %v1223_v61 = vmul.f32 0.01, %v711_v53  ;;  %v10558_v13 = vcombine.low %v13667_v30, %v13669_v34 }
 0x18a   : > { %5317 = vmatprep.subr.bf16.mxu0 %v10549_v6  ;;  %6089 = vmatprep.subr.bf16.mxu1 %v10551_v22  ;;  %v1488_v6 = vsel %vm976_vm13, %v720_v63, %v1232_v29  ;;  %v736_v22 = vadd.f32 %v13595_v16, %v439_v59  ;;  %v10565_v47 = vcombine.high %v13685_v57, %v13687_v31  ;;  %v13711_v63 = vld [vmem:[#allocation7 + $0x940] sm:$0xff]  ;;  %v1231_v34 = vmul.f32 0.01, %v13681_v3  ;;  %v438_v59 = vld [vmem:[#allocation5 + $0x250] sm:$0xff] }
 0x18b   : > { %v13717_v29 = vpack.c.bf16 %v1471_v58, %v1463_v42  ;;  %v13724_v30 = vpack.c.bf16 %v1488_v6, %v1480_v10  ;;  %v1240_v58 = vmul.f32 0.01, %v728_v50  ;;  %v10566_v10 = vcombine.low %v13695_v44, %v13697_v45  ;;  %v447_v6 = vld [vmem:[#allocation5 + $0x298] sm:$0xff] }
 0x18c   : > { %5163 = vmatmul.mubr.bf16.gmra.mrb[4].mxu0 %v13671_v35  ;;  %5935 = vmatmul.mubr.bf16.gmra.mrb[4].mxu1 %v13671_v35  ;;  %v10564_v35 = vcombine.low %v13685_v57, %v13687_v31  ;;  %vm984_vm0 = vcmp.gt.f32.partialorder %v728_v50, 0.0  ;;  %vm992_vm1 = vcmp.gt.f32.partialorder %v736_v22, 0.0  ;;  %v1479_v42 = vsel %vm967_vm14, %v711_v53, %v1223_v61  ;;  %v2122_v53 = vld [vmem:[#allocation7 + $0x9a8] sm:$0xff] }
 0x18d   : > { %5172 = vmatprep.mubr.bf16.mxu0 %v13673_v48  ;;  %5944 = vmatprep.mubr.bf16.mxu1 %v13673_v48  ;;  %19299 = vst [vmem:[#allocation35_spill] sm:$0xff] %v13717_v29  ;;  %19300 = vst [vmem:[#allocation36_spill] sm:$0xff] %v13724_v30  ;;  %v2114_v48 = vld [vmem:[#allocation7 + $0x968] sm:$0xff]  ;;  %v735_v57 = vadd.f32 %v13609_v9, %v438_v59  ;;  %v1496_v61 = vsel %vm984_vm0, %v728_v50, %v1240_v58  ;;  %v2129_v50 = vld [vmem:[#allocation7 + $0x9e0] sm:$0xff] }
 0x18e   : > { %5318 = vmatpush1.bf16.msra.mxu0 %v10548_v39  ;;  %6090 = vmatpush1.bf16.msra.mxu1 %v10550_v20  ;;  %v10567_v20 = vcombine.high %v13695_v44, %v13697_v45  ;;  %v727_v39 = vadd.f32 %v13609_v9, %v430_v24  ;;  %v10573_v24 = vcombine.high %v13711_v63, %v13713_v36  ;;  %v2117_v44 = vld [vmem:[#allocation7 + $0x980] sm:$0xff]  ;;  %v13755_v58 = vld [vmem:[#allocation7 + $0x9c8] sm:$0xff] }
 0x18f   : > { %5319 = vmatprep.subr.bf16.mxu0 %v10557_v38  ;;  %6091 = vmatprep.subr.bf16.mxu1 %v10559_v25  ;;  %v2110_v38 = vld [vmem:[#allocation7 + $0x948] sm:$0xff]  ;;  %v1248_v25 = vmul.f32 0.01, %v736_v22  ;;  %v2121_v45 = vld [vmem:[#allocation7 + $0x9a0] sm:$0xff]  ;;  %v10572_v59 = vcombine.low %v13711_v63, %v13713_v36  ;;  %vm991_vm3 = vcmp.gt.f32.partialorder %v735_v57, 0.0 }
 0x190   : > { %v10575_v31 = vcombine.high %v2110_v38, %v2114_v48  ;;  %vm983_vm2 = vcmp.gt.f32.partialorder %v727_v39, 0.0  ;;  %v2130_v36 = vld [vmem:[#allocation7 + $0x9e8] sm:$0xff] }
 0x192   : > { %5320 = vmatpush1.bf16.msra.mxu0 %v10556_v46  ;;  %6092 = vmatpush1.bf16.msra.mxu1 %v10558_v13  ;;  %v1487_v13 = vsel %vm975_vm15, %v13681_v3, %v1231_v34  ;;  %v752_v46 = vadd.f32 %v13595_v16, %v455_v19  ;;  %v10574_v3 = vcombine.low %v2110_v38, %v2114_v48  ;;  %v1247_v19 = vmul.f32 0.01, %v735_v57  ;;  %v454_v48 = vld [vmem:[#allocation5 + $0x2d0] sm:$0xff] }
 0x193   : > { %5321 = vmatprep.subr.bf16.mxu0 %v10565_v47  ;;  %6093 = vmatprep.subr.bf16.mxu1 %v10567_v20  ;;  %v744_v47 = vadd.f32 %v13595_v16, %v447_v6  ;;  %v1504_v20 = vsel %vm992_vm1, %v736_v22, %v1248_v25  ;;  %v10581_v34 = vcombine.high %v2117_v44, %v2121_v45  ;;  %v463_v25 = vld [vmem:[#allocation5 + $0x318] sm:$0xff] }
 0x194   : > { %5173 = vmatmul.mubr.bf16.gmra.mrb[8].mxu0 %v13717_v29  ;;  %5945 = vmatmul.mubr.bf16.gmra.mrb[8].mxu1 %v13717_v29  ;;  %v1239_v29 = vmul.f32 0.01, %v727_v39  ;;  %v13753_v6 = vpack.c.bf16 %v1487_v13, %v1479_v42  ;;  %v1264_v63 = vmul.f32 0.01, %v752_v46  ;;  %vm1008_vm5 = vcmp.gt.f32.partialorder %v752_v46, 0.0 }
 0x195   : > { %5182 = vmatprep.mubr.bf16.mxu0 %v13724_v30  ;;  %5954 = vmatprep.mubr.bf16.mxu1 %v13724_v30  ;;  %v10583_v30 = vcombine.high %v2118_v40, %v2122_v53  ;;  %v1256_v22 = vmul.f32 0.01, %v744_v47  ;;  %vm1000_vm4 = vcmp.gt.f32.partialorder %v744_v47, 0.0  ;;  %v10580_v38 = vcombine.low %v2117_v44, %v2121_v45  ;;  %v2137_v44 = vld [vmem:[#allocation7 + $0xa20] sm:$0xff]  ;;  %v2134_v45 = vld [vmem:[#allocation7 + $0xa08] sm:$0xff] }
 0x196   : > { %5322 = vmatpush1.bf16.msra.mxu0 %v10564_v35  ;;  %6094 = vmatpush1.bf16.msra.mxu1 %v10566_v10  ;;  %19301 = vst [vmem:[#allocation37_spill] sm:$0xff] %v13753_v6  ;;  %v13757_v35 = vpack.c.bf16 %v1504_v20, %v1496_v61  ;;  %v1495_v42 = vsel %vm983_vm2, %v727_v39, %v1239_v29  ;;  %v471_v10 = vld [vmem:[#allocation5 + $0x358] sm:$0xff] }
 0x197   : > { %5323 = vmatprep.subr.bf16.mxu0 %v10573_v24  ;;  %6095 = vmatprep.subr.bf16.mxu1 %v10575_v31  ;;  %v10582_v24 = vcombine.low %v2118_v40, %v2122_v53  ;;  %v10589_v31 = vcombine.high %v2125_v56, %v2129_v50  ;;  %v1503_v13 = vsel %vm991_vm3, %v735_v57, %v1247_v19  ;;  %v2138_v57 = vld [vmem:[#allocation7 + $0xa28] sm:$0xff]  ;;  %v470_v19 = vld [vmem:[#allocation5 + $0x350] sm:$0xff] }
 0x198   : > { %19302 = vst [vmem:[#allocation38_spill] sm:$0xff] %v13757_v35  ;;  %v743_v61 = vadd.f32 %v13609_v9, %v446_v37  ;;  %v10591_v20 = vcombine.high %v13755_v58, %v2130_v36  ;;  %v1512_v29 = vsel %vm1000_vm4, %v744_v47, %v1256_v22  ;;  %v1520_v40 = vsel %vm1008_vm5, %v752_v46, %v1264_v63  ;;  %v13778_v63 = vld [vmem:[#allocation7 + $0xa40] sm:$0xff] }
 0x199   : > { %v751_v39 = vadd.f32 %v13609_v9, %v454_v48  ;;  %v760_v37 = vadd.f32 %v13595_v16, %v463_v25  ;;  %v10588_v53 = vcombine.low %v2125_v56, %v2129_v50  ;;  %v10597_v47 = vcombine.high %v13764_v14, %v2137_v44  ;;  %v2145_v48 = vld [vmem:[#allocation7 + $0xa60] sm:$0xff]  ;;  %v2142_v50 = vld [vmem:[#allocation7 + $0xa48] sm:$0xff] }
 0x19a   : > { %5324 = vmatpush1.bf16.msra.mxu0 %v10572_v59  ;;  %6096 = vmatpush1.bf16.msra.mxu1 %v10574_v3  ;;  %v462_v59 = vld [vmem:[#allocation5 + $0x310] sm:$0xff]  ;;  %v10590_v3 = vcombine.low %v13755_v58, %v2130_v36  ;;  %v13776_v46 = vpack.c.bf16 %v1503_v13, %v1495_v42  ;;  %v10599_v22 = vcombine.high %v2134_v45, %v2138_v57  ;;  %vm999_vm6 = vcmp.gt.f32.partialorder %v743_v61, 0.0  ;;  %v479_v42 = vld [vmem:[#allocation5 + $0x398] sm:$0xff] }
 0x19b   : > { %5325 = vmatprep.subr.bf16.mxu0 %v10581_v34  ;;  %6097 = vmatprep.subr.bf16.mxu1 %v10583_v30  ;;  %v768_v30 = vadd.f32 %v13595_v16, %v471_v10  ;;  %v1255_v34 = vmul.f32 0.01, %v743_v61  ;;  %v13780_v25 = vpack.c.bf16 %v1520_v40, %v1512_v29  ;;  %vm1007_vm7 = vcmp.gt.f32.partialorder %v751_v39, 0.0 }
 0x19c   : > { %5183 = vmatmul.mubr.bf16.gmra.mrb[12].mxu0 %v13753_v6  ;;  %5955 = vmatmul.mubr.bf16.gmra.mrb[12].mxu1 %v13753_v6  ;;  %19303 = vst [vmem:[#allocation39_spill] sm:$0xff] %v13776_v46  ;;  %v1263_v56 = vmul.f32 0.01, %v751_v39  ;;  %v1272_v10 = vmul.f32 0.01, %v760_v37  ;;  %v13783_v36 = vadd.f32 %v13609_v9, %v462_v59  ;;  %vm1016_vm8 = vcmp.gt.f32.partialorder %v760_v37, 0.0 }
 0x19d   : > { %5192 = vmatprep.mubr.bf16.mxu0 %v13757_v35  ;;  %5964 = vmatprep.mubr.bf16.mxu1 %v13757_v35  ;;  %19304 = vst [vmem:[#allocation40_spill] sm:$0xff] %v13780_v25  ;;  %v1280_v58 = vmul.f32 0.01, %v768_v30  ;;  %vm1024_vm9 = vcmp.gt.f32.partialorder %v768_v30, 0.0  ;;  %v10598_v13 = vcombine.low %v2134_v45, %v2138_v57  ;;  %v1511_v29 = vsel %vm999_vm6, %v743_v61, %v1255_v34  ;;  %v13790_v35 = vld [vmem:[#allocation7 + $0xa80] sm:$0xff]  ;;  %v2150_v57 = vld [vmem:[#allocation7 + $0xa88] sm:$0xff] }
 0x19e   : > { %5326 = vmatpush1.bf16.msra.mxu0 %v10580_v38  ;;  %6098 = vmatpush1.bf16.msra.mxu1 %v10582_v24  ;;  %v2146_v38 = vld [vmem:[#allocation7 + $0xa68] sm:$0xff]  ;;  %v487_v24 = vld [vmem:[#allocation5 + $0x3d8] sm:$0xff]  ;;  %v767_v40 = vadd.f32 %v13609_v9, %v470_v19  ;;  %v478_v34 = vld [vmem:[#allocation5 + $0x390] sm:$0xff]  ;;  %v10604_v19 = vcombine.low %v13778_v63, %v2145_v48  ;;  %vm1015_vm10 = vcmp.gt.f32.partialorder %v13783_v36, 0.0 }
 0x19f   : > { %5327 = vmatprep.subr.bf16.mxu0 %v10589_v31  ;;  %6099 = vmatprep.subr.bf16.mxu1 %v10591_v20  ;;  %v10596_v31 = vcombine.low %v13764_v14, %v2137_v44  ;;  %v10605_v20 = vcombine.high %v13778_v63, %v2145_v48  ;;  %v10607_v59 = vcombine.high %v2142_v50, %v2146_v38  ;;  %v2154_v61 = vld [vmem:[#allocation7 + $0xaa8] sm:$0xff]  ;;  %v2193_v6 = vld [vmem:[#allocation7 + $0xbe0] sm:$0xff] }
 0x1a0   : > { %v1519_v14 = vsel %vm1007_vm7, %v751_v39, %v1263_v56  ;;  %v776_v44 = vadd.f32 %v13595_v16, %v479_v42  ;;  %v784_v45 = vadd.f32 %v13595_v16, %v487_v24  ;;  %v10606_v39 = vcombine.low %v2142_v50, %v2146_v38  ;;  %v2162_v50 = vld [vmem:[#allocation7 + $0xae8] sm:$0xff] }
 0x1a1   : > { %v13806_v42 = vpack.c.bf16 %v1519_v14, %v1511_v29  ;;  %v1271_v24 = vmul.f32 0.01, %v13783_v36  ;;  %vm1023_vm11 = vcmp.gt.f32.partialorder %v767_v40, 0.0  ;;  %v495_v29 = vld [vmem:[#allocation5 + $0x418] sm:$0xff]  ;;  %v10614_v14 = vcombine.low %v2150_v57, %v2154_v61 }
 0x1a2   : > { %5328 = vmatpush1.bf16.msra.mxu0 %v10588_v53  ;;  %6100 = vmatpush1.bf16.msra.mxu1 %v10590_v3  ;;  %v13792_v53 = vld [vmem:[#allocation7 + $0xaa0] sm:$0xff]  ;;  %v1528_v3 = vsel %vm1016_vm8, %v760_v37, %v1272_v10  ;;  %v1279_v37 = vmul.f32 0.01, %v767_v40  ;;  %v1288_v63 = vmul.f32 0.01, %v776_v44  ;;  %vm1032_vm12 = vcmp.gt.f32.partialorder %v776_v44, 0.0 }
 0x1a3   : > { %5329 = vmatprep.subr.bf16.mxu0 %v10597_v47  ;;  %6101 = vmatprep.subr.bf16.mxu1 %v10599_v22  ;;  %v1536_v47 = vsel %vm1024_vm9, %v768_v30, %v1280_v58  ;;  %v486_v22 = vld [vmem:[#allocation5 + $0x3d0] sm:$0xff]  ;;  %v10613_v56 = vcombine.high %v13790_v35, %v13792_v53  ;;  %19305 = vst [vmem:[#allocation41_spill] sm:$0xff] %v13806_v42  ;;  %v2157_v10 = vld [vmem:[#allocation7 + $0xac0] sm:$0xff]  ;;  %v1296_v48 = vmul.f32 0.01, %v784_v45  ;;  %vm1040_vm13 = vcmp.gt.f32.partialorder %v784_v45, 0.0 }
 0x1a4   : > { %5193 = vmatmul.mubr.bf16.gmra.mrb[16].mxu0 %v13776_v46  ;;  %5965 = vmatmul.mubr.bf16.gmra.mrb[16].mxu1 %v13776_v46  ;;  %v10615_v30 = vcombine.high %v2150_v57, %v2154_v61  ;;  %v2161_v58 = vld [vmem:[#allocation7 + $0xae0] sm:$0xff]  ;;  %v10612_v38 = vcombine.low %v13790_v35, %v13792_v53  ;;  %v1535_v35 = vsel %vm1023_vm11, %v767_v40, %v1279_v37 }
 0x1a5   : > { %5202 = vmatprep.mubr.bf16.mxu0 %v13780_v25  ;;  %5974 = vmatprep.mubr.bf16.mxu1 %v13780_v25  ;;  %v2169_v46 = vld [vmem:[#allocation7 + $0xb20] sm:$0xff]  ;;  %v1544_v53 = vsel %vm1032_vm12, %v776_v44, %v1288_v63  ;;  %v1552_v57 = vsel %vm1040_vm13, %v784_v45, %v1296_v48 }
 0x1a6   : > { %5330 = vmatpush1.bf16.msra.mxu0 %v10596_v31  ;;  %6102 = vmatpush1.bf16.msra.mxu1 %v10598_v13  ;;  %v13809_v31 = vpack.c.bf16 %v1536_v47, %v1528_v3  ;;  %v775_v13 = vadd.f32 %v13609_v9, %v478_v34  ;;  %v10621_v3 = vcombine.high %v2157_v10, %v2161_v58  ;;  %v2173_v48 = vld [vmem:[#allocation7 + $0xb40] sm:$0xff] }
 0x1a7   : > { %5331 = vmatprep.subr.bf16.mxu0 %v10605_v20  ;;  %6103 = vmatprep.subr.bf16.mxu1 %v10607_v59  ;;  %v2158_v20 = vld [vmem:[#allocation7 + $0xac8] sm:$0xff]  ;;  %v503_v59 = vld [vmem:[#allocation5 + $0x458] sm:$0xff]  ;;  %v1527_v47 = vsel %vm1015_vm10, %v13783_v36, %v1271_v24  ;;  %v783_v34 = vadd.f32 %v13609_v9, %v486_v22  ;;  %v792_v22 = vadd.f32 %v13595_v16, %v495_v29 }
 0x1a8   : > { %19306 = vst [vmem:[#allocation42_spill] sm:$0xff] %v13809_v31  ;;  %v10623_v25 = vcombine.high %v2158_v20, %v2162_v50  ;;  %v1287_v61 = vmul.f32 0.01, %v775_v13  ;;  %v2170_v36 = vld [vmem:[#allocation7 + $0xb28] sm:$0xff]  ;;  %vm1031_vm14 = vcmp.gt.f32.partialorder %v775_v13, 0.0  ;;  %v10620_v24 = vcombine.low %v2157_v10, %v2161_v58 }
 0x1a9   : > { %v10622_v40 = vcombine.low %v2158_v20, %v2162_v50  ;;  %v13830_v37 = vpack.c.bf16 %v1535_v35, %v1527_v47  ;;  %v1295_v45 = vmul.f32 0.01, %v783_v34  ;;  %vm1039_vm15 = vcmp.gt.f32.partialorder %v783_v34, 0.0  ;;  %v2174_v10 = vld [vmem:[#allocation7 + $0xb48] sm:$0xff]  ;;  %v511_v50 = vld [vmem:[#allocation5 + $0x498] sm:$0xff] }
 0x1aa   : > { %5332 = vmatpush1.bf16.msra.mxu0 %v10604_v19  ;;  %6104 = vmatpush1.bf16.msra.mxu1 %v10606_v39  ;;  %v13819_v19 = vld [vmem:[#allocation7 + $0xb00] sm:$0xff]  ;;  %v2166_v39 = vld [vmem:[#allocation7 + $0xb08] sm:$0xff]  ;;  %v1543_v29 = vsel %vm1031_vm14, %v775_v13, %v1287_v61  ;;  %vm1048_vm0 = vcmp.gt.f32.partialorder %v792_v22, 0.0 }
 0x1ab   : > { %5333 = vmatprep.subr.bf16.mxu0 %v10613_v56  ;;  %6105 = vmatprep.subr.bf16.mxu1 %v10615_v30  ;;  %v800_v56 = vadd.f32 %v13595_v16, %v503_v59  ;;  %v494_v30 = vld [vmem:[#allocation5 + $0x410] sm:$0xff]  ;;  %v10629_v44 = vcombine.high %v13819_v19, %v2169_v46  ;;  %19307 = vst [vmem:[#allocation43_spill] sm:$0xff] %v13830_v37  ;;  %v2178_v58 = vld [vmem:[#allocation7 + $0xb68] sm:$0xff]  ;;  %v1304_v59 = vmul.f32 0.01, %v792_v22  ;;  %v2181_v61 = vld [vmem:[#allocation7 + $0xb80] sm:$0xff] }
 0x1ac   : > { %5203 = vmatmul.mubr.bf16.gmra.mrb[20].mxu0 %v13806_v42  ;;  %5975 = vmatmul.mubr.bf16.gmra.mrb[20].mxu1 %v13806_v42  ;;  %v10631_v63 = vcombine.high %v2166_v39, %v2170_v36  ;;  %v13832_v42 = vpack.c.bf16 %v1552_v57, %v1544_v53  ;;  %v791_v20 = vadd.f32 %v13609_v9, %v494_v30  ;;  %v2185_v30 = vld [vmem:[#allocation7 + $0xba0] sm:$0xff] }
 0x1ad   : > { %5212 = vmatprep.mubr.bf16.mxu0 %v13809_v31  ;;  %5984 = vmatprep.mubr.bf16.mxu1 %v13809_v31  ;;  %v2177_v31 = vld [vmem:[#allocation7 + $0xb60] sm:$0xff]  ;;  %vm1056_vm1 = vcmp.gt.f32.partialorder %v800_v56, 0.0  ;;  %v10630_v47 = vcombine.low %v2166_v39, %v2170_v36  ;;  %v1551_v13 = vsel %vm1039_vm15, %v783_v34, %v1295_v45  ;;  %v10639_v57 = vcombine.high %v2174_v10, %v2178_v58  ;;  %v2182_v39 = vld [vmem:[#allocation7 + $0xb88] sm:$0xff] }
 0x1ae   : > { %5334 = vmatpush1.bf16.msra.mxu0 %v10612_v38  ;;  %6106 = vmatpush1.bf16.msra.mxu1 %v10614_v14  ;;  %19308 = vst [vmem:[#allocation44_spill] sm:$0xff] %v13832_v42  ;;  %v502_v38 = vld [vmem:[#allocation5 + $0x450] sm:$0xff]  ;;  %v1312_v14 = vmul.f32 0.01, %v800_v56  ;;  %v10637_v35 = vcombine.high %v2173_v48, %v2177_v31  ;;  %v2186_v36 = vld [vmem:[#allocation7 + $0xba8] sm:$0xff]  ;;  %v1560_v34 = vsel %vm1048_vm0, %v792_v22, %v1304_v59  ;;  %vm1047_vm2 = vcmp.gt.f32.partialorder %v791_v20, 0.0 }
 0x1af   : > { %5335 = vmatprep.subr.bf16.mxu0 %v10621_v3  ;;  %6107 = vmatprep.subr.bf16.mxu1 %v10623_v25  ;;  %v519_v3 = vld [vmem:[#allocation5 + $0x4d8] sm:$0xff]  ;;  %v10628_v25 = vcombine.low %v13819_v19, %v2169_v46  ;;  %v799_v53 = vadd.f32 %v13609_v9, %v502_v38  ;;  %v808_v46 = vadd.f32 %v13595_v16, %v511_v50  ;;  %v1303_v45 = vmul.f32 0.01, %v791_v20 }
 0x1b0   : > { %v816_v19 = vadd.f32 %v13595_v16, %v519_v3  ;;  %v10638_v38 = vcombine.low %v2174_v10, %v2178_v58  ;;  %v10645_v50 = vcombine.high %v2181_v61, %v2185_v30  ;;  %v527_v58 = vld [vmem:[#allocation5 + $0x518] sm:$0xff] }
 0x1b1   : > { %vm1055_vm3 = vcmp.gt.f32.partialorder %v799_v53, 0.0  ;;  %v1311_v3 = vmul.f32 0.01, %v799_v53  ;;  %vm1064_vm4 = vcmp.gt.f32.partialorder %v808_v46, 0.0  ;;  %v1559_v10 = vsel %vm1047_vm2, %v791_v20, %v1303_v45 }
 0x1b2   : > { %5336 = vmatpush1.bf16.msra.mxu0 %v10620_v24  ;;  %6108 = vmatpush1.bf16.msra.mxu1 %v10622_v40  ;;  %v1568_v24 = vsel %vm1056_vm1, %v800_v56, %v1312_v14  ;;  %v10636_v40 = vcombine.low %v2173_v48, %v2177_v31  ;;  %v1320_v56 = vmul.f32 0.01, %v808_v46  ;;  %v1328_v59 = vmul.f32 0.01, %v816_v19  ;;  %v2190_v31 = vld [vmem:[#allocation7 + $0xbc8] sm:$0xff] }
 0x1b3   : > { %5337 = vmatprep.subr.bf16.mxu0 %v10629_v44  ;;  %6109 = vmatprep.subr.bf16.mxu1 %v10631_v63  ;;  %v13847_v44 = vpack.c.bf16 %v1551_v13, %v1543_v29  ;;  %v510_v63 = vld [vmem:[#allocation5 + $0x490] sm:$0xff]  ;;  %v13849_v22 = vpack.c.bf16 %v1568_v24, %v1560_v34  ;;  %v2194_v48 = vld [vmem:[#allocation7 + $0xbe8] sm:$0xff]  ;;  %vm1072_vm5 = vcmp.gt.f32.partialorder %v816_v19, 0.0  ;;  %v10644_v14 = vcombine.low %v2181_v61, %v2185_v30 }
 0x1b4   : > { %5213 = vmatmul.mubr.bf16.gmra.mrb[24].mxu0 %v13830_v37  ;;  %5985 = vmatmul.mubr.bf16.gmra.mrb[24].mxu1 %v13830_v37  ;;  %v10647_v37 = vcombine.high %v2182_v39, %v2186_v36  ;;  %v518_v29 = vld [vmem:[#allocation5 + $0x4d0] sm:$0xff]  ;;  %v1567_v13 = vsel %vm1055_vm3, %v799_v53, %v1311_v3  ;;  %v10655_v34 = vcombine.high %v2190_v31, %v2194_v48  ;;  %v543_v3 = vld [vmem:[#allocation5 + $0x598] sm:$0xff] }
 0x1b5   : > { %5222 = vmatprep.mubr.bf16.mxu0 %v13832_v42  ;;  %5994 = vmatprep.mubr.bf16.mxu1 %v13832_v42  ;;  %19309 = vst [vmem:[#allocation45_spill] sm:$0xff] %v13847_v44  ;;  %v2189_v42 = vld [vmem:[#allocation7 + $0xbc0] sm:$0xff]  ;;  %19310 = vst [vmem:[#allocation46_spill] sm:$0xff] %v13849_v22  ;;  %v1576_v20 = vsel %vm1064_vm4, %v808_v46, %v1320_v56  ;;  %v1584_v61 = vsel %vm1072_vm5, %v816_v19, %v1328_v59  ;;  %v551_v56 = vld [vmem:[#allocation5 + $0x5d8] sm:$0xff] }
 0x1b6   : > { %5338 = vmatpush1.bf16.msra.mxu0 %v10628_v25  ;;  %6110 = vmatpush1.bf16.msra.mxu1 %v10630_v47  ;;  %v535_v25 = vld [vmem:[#allocation5 + $0x558] sm:$0xff]  ;;  %v10646_v47 = vcombine.low %v2182_v39, %v2186_v36  ;;  %v815_v30 = vadd.f32 %v13609_v9, %v518_v29  ;;  %v824_v39 = vadd.f32 %v13595_v16, %v527_v58 }
 0x1b7   : > { %5339 = vmatprep.subr.bf16.mxu0 %v10637_v35  ;;  %6111 = vmatprep.subr.bf16.mxu1 %v10639_v57  ;;  %v10653_v35 = vcombine.high %v2189_v42, %v2193_v6  ;;  %v807_v57 = vadd.f32 %v13609_v9, %v510_v63  ;;  %v832_v53 = vadd.f32 %v13595_v16, %v535_v25 }
 0x1b8   : > { %v10652_v36 = vcombine.low %v2189_v42, %v2193_v6  ;;  %v10661_v24 = vcombine.high %v13703_v0, %v13705_v8  ;;  %v10663_v46 = vcombine.high %v13715_v51, %v13722_v21  ;;  %v13869_v19 = vpack.c.bf16 %v1584_v61, %v1576_v20 }
 0x1b9   : > { %v1319_v45 = vmul.f32 0.01, %v807_v57  ;;  %v1327_v63 = vmul.f32 0.01, %v815_v30  ;;  %vm1063_vm6 = vcmp.gt.f32.partialorder %v807_v57, 0.0  ;;  %vm1071_vm7 = vcmp.gt.f32.partialorder %v815_v30, 0.0 }
 0x1ba   : > { %5340 = vmatpush1.bf16.msra.mxu0 %v10636_v40  ;;  %6112 = vmatpush1.bf16.msra.mxu1 %v10638_v38  ;;  %v13865_v40 = vpack.c.bf16 %v1567_v13, %v1559_v10  ;;  %19312 = vst [vmem:[#allocation48_spill] sm:$0xff] %v13869_v19  ;;  %v526_v38 = vld [vmem:[#allocation5 + $0x510] sm:$0xff]  ;;  %v1336_v6 = vmul.f32 0.01, %v824_v39  ;;  %v1344_v42 = vmul.f32 0.01, %v832_v53  ;;  %v840_v58 = vadd.f32 %v13595_v16, %v543_v3 }
 0x1bb   : > { %5341 = vmatprep.subr.bf16.mxu0 %v10645_v50  ;;  %6113 = vmatprep.subr.bf16.mxu1 %v10647_v37  ;;  %v10654_v37 = vcombine.low %v2190_v31, %v2194_v48  ;;  %v534_v50 = vld [vmem:[#allocation5 + $0x550] sm:$0xff]  ;;  %vm1080_vm8 = vcmp.gt.f32.partialorder %v824_v39, 0.0  ;;  %vm1088_vm9 = vcmp.gt.f32.partialorder %v832_v53, 0.0  ;;  %v823_v59 = vadd.f32 %v13609_v9, %v526_v38 }
 0x1bc   : > { %5223 = vmatmul.mubr.bf16.gmra.mrb[28].mxu0 %v13847_v44  ;;  %5995 = vmatmul.mubr.bf16.gmra.mrb[28].mxu1 %v13847_v44  ;;  %19311 = vst [vmem:[#allocation47_spill] sm:$0xff] %v13865_v40  ;;  %v1575_v31 = vsel %vm1063_vm6, %v807_v57, %v1319_v45  ;;  %v1583_v48 = vsel %vm1071_vm7, %v815_v30, %v1327_v63  ;;  %v542_v57 = vld [vmem:[#allocation5 + $0x590] sm:$0xff]  ;;  %v1352_v20 = vmul.f32 0.01, %v840_v58  ;;  %vm1096_vm12 = vcmp.gt.f32.partialorder %v840_v58, 0.0  ;;  %v2249_v44 = vld [vmem:[#allocation7 + $0xda0] sm:$0xff] }
 0x1bd   : > { %5232 = vmatprep.mubr.bf16.mxu0 %v13849_v22  ;;  %6004 = vmatprep.mubr.bf16.mxu1 %v13849_v22  ;;  %v831_v29 = vadd.f32 %v13609_v9, %v534_v50  ;;  %v1600_v10 = vsel %vm1088_vm9, %v832_v53, %v1344_v42  ;;  %v848_v25 = vadd.f32 %v13595_v16, %v551_v56  ;;  %vm1079_vm10 = vcmp.gt.f32.partialorder %v823_v59, 0.0  ;;  %v550_v30 = vld [vmem:[#allocation5 + $0x5d0] sm:$0xff]  ;;  %v567_v53 = vld [vmem:[#allocation5 + $0x658] sm:$0xff] }
 0x1be   : > { %5342 = vmatpush1.bf16.msra.mxu0 %v10644_v14  ;;  %6114 = vmatpush1.bf16.msra.mxu1 %v10646_v47  ;;  %v1592_v14 = vsel %vm1080_vm8, %v824_v39, %v1336_v6  ;;  %v13881_v47 = vpack.c.bf16 %v1583_v48, %v1575_v31  ;;  %v559_v39 = vld [vmem:[#allocation5 + $0x618] sm:$0xff]  ;;  %v1608_v45 = vsel %vm1096_vm12, %v840_v58, %v1352_v20  ;;  %v566_v31 = vld [vmem:[#allocation5 + $0x650] sm:$0xff] }
 0x1bf   : > { %5343 = vmatprep.subr.bf16.mxu0 %v10653_v35  ;;  %6115 = vmatprep.subr.bf16.mxu1 %v10655_v34  ;;  %v1335_v35 = vmul.f32 0.01, %v823_v59  ;;  %v13883_v13 = vpack.c.bf16 %v1600_v10, %v1592_v14  ;;  %v1343_v34 = vmul.f32 0.01, %v831_v29  ;;  %vm1087_vm11 = vcmp.gt.f32.partialorder %v831_v29, 0.0  ;;  %v575_v14 = vld [vmem:[#allocation5 + $0x698] sm:$0xff] }
 0x1c0   : > { %19313 = vst [vmem:[#allocation49_spill] sm:$0xff] %v13881_v47  ;;  %v1360_v61 = vmul.f32 0.01, %v848_v25  ;;  %vm1104_vm13 = vcmp.gt.f32.partialorder %v848_v25, 0.0  ;;  %v856_v38 = vadd.f32 %v13595_v16, %v559_v39  ;;  %v864_v50 = vadd.f32 %v13595_v16, %v567_v53  ;;  %v583_v10 = vld [vmem:[#allocation5 + $0x6d8] sm:$0xff] }
 0x1c1   : > { %19314 = vst [vmem:[#allocation50_spill] sm:$0xff] %v13883_v13 }
 0x1c2   : > { %5344 = vmatpush1.bf16.msra.mxu0 %v10652_v36  ;;  %6116 = vmatpush1.bf16.msra.mxu1 %v10654_v37  ;;  %v1591_v36 = vsel %vm1079_vm10, %v823_v59, %v1335_v35  ;;  %v1599_v37 = vsel %vm1087_vm11, %v831_v29, %v1343_v34  ;;  %v1616_v63 = vsel %vm1104_vm13, %v848_v25, %v1360_v61  ;;  %v558_v59 = vld [vmem:[#allocation5 + $0x610] sm:$0xff]  ;;  %v1368_v48 = vmul.f32 0.01, %v856_v38 }
 0x1c3   : > { %5506 = vmatprep.subr.bf16.mxu0 %v10661_v24  ;;  %6278 = vmatprep.subr.bf16.mxu1 %v10663_v46  ;;  %v839_v24 = vadd.f32 %v13609_v9, %v542_v57  ;;  %v847_v46 = vadd.f32 %v13609_v9, %v550_v30  ;;  %v13893_v6 = vpack.c.bf16 %v1599_v37, %v1591_v36  ;;  %v1376_v29 = vmul.f32 0.01, %v864_v50 }
 0x1c4   : > { %5233 = vmatmul.mubr.bf16.gmra.mrb[32].mxu0 %v13865_v40  ;;  %6005 = vmatmul.mubr.bf16.gmra.mrb[32].mxu1 %v13865_v40  ;;  %v13895_v42 = vpack.c.bf16 %v1616_v63, %v1608_v45  ;;  %vm1112_vm0 = vcmp.gt.f32.partialorder %v856_v38, 0.0  ;;  %vm1120_vm1 = vcmp.gt.f32.partialorder %v864_v50, 0.0  ;;  %v855_v58 = vadd.f32 %v13609_v9, %v558_v59  ;;  %v574_v45 = vld [vmem:[#allocation5 + $0x690] sm:$0xff]  ;;  %v2234_v40 = vld [vmem:[#allocation7 + $0xd28] sm:$0xff] }
 0x1c5   : > { %5242 = vmatprep.mubr.bf16.mxu0 %v13869_v19  ;;  %6014 = vmatprep.mubr.bf16.mxu1 %v13869_v19  ;;  %19315 = vst [vmem:[#allocation51_spill] sm:$0xff] %v13893_v6  ;;  %v1351_v3 = vmul.f32 0.01, %v839_v24  ;;  %v1359_v56 = vmul.f32 0.01, %v847_v46  ;;  %vm1095_vm14 = vcmp.gt.f32.partialorder %v839_v24, 0.0  ;;  %v863_v34 = vadd.f32 %v13609_v9, %v566_v31 }
 0x1c6   : > { %19316 = vst [vmem:[#allocation52_spill] sm:$0xff] %v13895_v42  ;;  %vm1103_vm15 = vcmp.gt.f32.partialorder %v847_v46, 0.0  ;;  %v1624_v57 = vsel %vm1112_vm0, %v856_v38, %v1368_v48  ;;  %v1632_v20 = vsel %vm1120_vm1, %v864_v50, %v1376_v29  ;;  %v872_v61 = vadd.f32 %v13595_v16, %v575_v14  ;;  %v582_v63 = vld [vmem:[#allocation5 + $0x6d0] sm:$0xff]  ;;  %v591_v38 = vld [vmem:[#allocation5 + $0x718] sm:$0xff]  ;;  %v2230_v19 = vld [vmem:[#allocation7 + $0xd08] sm:$0xff] }
 0x1c7   : > { %v1607_v25 = vsel %vm1095_vm14, %v839_v24, %v1351_v3  ;;  %v1615_v35 = vsel %vm1103_vm15, %v847_v46, %v1359_v56  ;;  %v880_v30 = vadd.f32 %v13595_v16, %v583_v10  ;;  %v1367_v53 = vmul.f32 0.01, %v855_v58  ;;  %v599_v50 = vld [vmem:[#allocation5 + $0x758] sm:$0xff] }
 0x1c8   : > { %v13905_v39 = vpack.c.bf16 %v1615_v35, %v1607_v25  ;;  %v13907_v36 = vpack.c.bf16 %v1632_v20, %v1624_v57  ;;  %vm1111_vm2 = vcmp.gt.f32.partialorder %v855_v58, 0.0  ;;  %v1375_v37 = vmul.f32 0.01, %v863_v34  ;;  %v590_v20 = vld [vmem:[#allocation5 + $0x710] sm:$0xff] }
 0x1c9   : > { %vm1119_vm3 = vcmp.gt.f32.partialorder %v863_v34, 0.0  ;;  %v1384_v24 = vmul.f32 0.01, %v872_v61  ;;  %v1392_v46 = vmul.f32 0.01, %v880_v30  ;;  %vm1128_vm4 = vcmp.gt.f32.partialorder %v872_v61, 0.0 }
 0x1ca   : > { %19317 = vst [vmem:[#allocation53_spill] sm:$0xff] %v13905_v39  ;;  %19318 = vst [vmem:[#allocation54_spill] sm:$0xff] %v13907_v36  ;;  %vm1136_vm5 = vcmp.gt.f32.partialorder %v880_v30, 0.0  ;;  %v1623_v3 = vsel %vm1111_vm2, %v855_v58, %v1367_v53  ;;  %v1631_v56 = vsel %vm1119_vm3, %v863_v34, %v1375_v37  ;;  %v871_v59 = vadd.f32 %v13609_v9, %v574_v45  ;;  %v598_v34 = vld [vmem:[#allocation5 + $0x750] sm:$0xff] }
 0x1cb   : > { %v879_v31 = vadd.f32 %v13609_v9, %v582_v63  ;;  %v1640_v48 = vsel %vm1128_vm4, %v872_v61, %v1384_v24  ;;  %v1648_v29 = vsel %vm1136_vm5, %v880_v30, %v1392_v46  ;;  %v888_v14 = vadd.f32 %v13595_v16, %v591_v38  ;;  %v607_v61 = vld [vmem:[#allocation5 + $0x798] sm:$0xff] }
 0x1cc   : > { %5243 = vmatmul.mubr.bf16.gmra.mrb[36].mxu0 %v13881_v47  ;;  %6015 = vmatmul.mubr.bf16.gmra.mrb[36].mxu1 %v13881_v47  ;;  %v896_v10 = vadd.f32 %v13595_v16, %v599_v50  ;;  %v13917_v25 = vpack.c.bf16 %v1631_v56, %v1623_v3  ;;  %v13919_v58 = vpack.c.bf16 %v1648_v29, %v1640_v48  ;;  %v1383_v35 = vmul.f32 0.01, %v871_v59  ;;  %v615_v30 = vld [vmem:[#allocation5 + $0x7d8] sm:$0xff]  ;;  %v13991_v47 = vld [vmem:[#allocation7 + $0xca8] sm:$0xff] }
 0x1cd   : > { %5252 = vmatprep.mubr.bf16.mxu0 %v13883_v13  ;;  %6024 = vmatprep.mubr.bf16.mxu1 %v13883_v13  ;;  %v1391_v57 = vmul.f32 0.01, %v879_v31  ;;  %vm1127_vm6 = vcmp.gt.f32.partialorder %v871_v59, 0.0  ;;  %vm1135_vm7 = vcmp.gt.f32.partialorder %v879_v31, 0.0  ;;  %v1400_v53 = vmul.f32 0.01, %v888_v14 }
 0x1ce   : > { %19319 = vst [vmem:[#allocation55_spill] sm:$0xff] %v13917_v25  ;;  %19320 = vst [vmem:[#allocation56_spill] sm:$0xff] %v13919_v58  ;;  %v1408_v37 = vmul.f32 0.01, %v896_v10  ;;  %vm1144_vm8 = vcmp.gt.f32.partialorder %v888_v14, 0.0  ;;  %vm1152_vm9 = vcmp.gt.f32.partialorder %v896_v10, 0.0  ;;  %v887_v45 = vadd.f32 %v13609_v9, %v590_v20 }
 0x1cf   : > { %v1639_v24 = vsel %vm1127_vm6, %v871_v59, %v1383_v35  ;;  %v1647_v46 = vsel %vm1135_vm7, %v879_v31, %v1391_v57  ;;  %v895_v63 = vadd.f32 %v13609_v9, %v598_v34  ;;  %v1656_v50 = vsel %vm1144_vm8, %v888_v14, %v1400_v53  ;;  %v606_v31 = vld [vmem:[#allocation5 + $0x790] sm:$0xff]  ;;  %v377_v53 = vld [vmem:[#allocation5 + $0x68] sm:$0xff] }
 0x1d0   : > { %v1664_v3 = vsel %vm1152_vm9, %v896_v10, %v1408_v37  ;;  %v904_v56 = vadd.f32 %v13595_v16, %v607_v61  ;;  %v912_v48 = vadd.f32 %v13595_v16, %v615_v30  ;;  %v13930_v29 = vpack.c.bf16 %v1647_v46, %v1639_v24  ;;  %v614_v34 = vld [vmem:[#allocation5 + $0x7d0] sm:$0xff]  ;;  %v369_v16 = vld [vmem:[#allocation5 + $0x28] sm:$0xff] }
 0x1d1   : > { %v1399_v20 = vmul.f32 0.01, %v887_v45  ;;  %vm1143_vm10 = vcmp.gt.f32.partialorder %v887_v45, 0.0  ;;  %v1407_v59 = vmul.f32 0.01, %v895_v63  ;;  %vm1151_vm11 = vcmp.gt.f32.partialorder %v895_v63, 0.0 }
 0x1d2   : > { %19321 = vst [vmem:[#allocation57_spill] sm:$0xff] %v13930_v29  ;;  %v1416_v35 = vmul.f32 0.01, %v904_v56  ;;  %v1424_v57 = vmul.f32 0.01, %v912_v48  ;;  %v12517_v38 = vld [vmem:[%s13086_s7] sm:$0xff]  ;;  %v903_v24 = vadd.f32 %v13609_v9, %v606_v31  ;;  %v911_v46 = vadd.f32 %v13609_v9, %v614_v34 }
 0x1d3   : > { %v19323_v14 = vsub.s32 5, %v13104_v41  ;;  %vm1160_vm12 = vcmp.gt.f32.partialorder %v904_v56, 0.0  ;;  %vm1168_vm13 = vcmp.gt.f32.partialorder %v912_v48, 0.0  ;;  %v1655_v61 = vsel %vm1143_vm10, %v887_v45, %v1399_v20  ;;  %v376_v9 = vld [vmem:[#allocation5 + $0x60] sm:$0xff]  ;;  %v13989_v13 = vld [vmem:[#allocation7 + $0xc88] sm:$0xff] }
 0x1d4   : > { %5253 = vmatmul.mubr.bf16.gmra.mrb[40].mxu0 %v13893_v6  ;;  %6025 = vmatmul.mubr.bf16.gmra.mrb[40].mxu1 %v13893_v6  ;;  %v1663_v30 = vsel %vm1151_vm11, %v895_v63, %v1407_v59  ;;  %v1415_v59 = vmul.f32 0.01, %v903_v24  ;;  %v1423_v31 = vmul.f32 0.01, %v911_v46  ;;  %vm1159_vm14 = vcmp.gt.f32.partialorder %v903_v24, 0.0 }
 0x1d5   : > { %5262 = vmatprep.mubr.bf16.mxu0 %v13895_v42  ;;  %6034 = vmatprep.mubr.bf16.mxu1 %v13895_v42  ;;  %v13937_v10 = vrot.slane %v12517_v38, %v19323_v14  ;;  %v13952_v20 = vpack.c.bf16 %v1663_v30, %v1655_v61  ;;  %vm1167_vm15 = vcmp.gt.f32.partialorder %v911_v46, 0.0 }
 0x1d6   : > { %v1679_v34 = vsel %vm1167_vm15, %v911_v46, %v1423_v31  ;;  %v401_v46 = vld [vmem:[#allocation5 + $0x128] sm:$0xff] }
 0x1d7   : > { %v666_v14 = vadd.f32 %v13937_v10, %v369_v16  ;;  %v674_v37 = vadd.f32 %v13937_v10, %v377_v53  ;;  %19325 = vst [vmem:[#allocation59_spill] sm:$0xff] %v13952_v20 }
 0x1d9   : > { %vm922_vm0 = vcmp.gt.f32.partialorder %v666_v14, 0.0  ;;  %vm930_vm1 = vcmp.gt.f32.partialorder %v674_v37, 0.0 }
 0x1dc   : > { %5263 = vmatmul.mubr.bf16.gmra.mrb[44].mxu0 %v13905_v39  ;;  %6035 = vmatmul.mubr.bf16.gmra.mrb[44].mxu1 %v13905_v39  ;;  %v408_v39 = vld [vmem:[#allocation5 + $0x160] sm:$0xff] }
 0x1dd   : > { %5272 = vmatprep.mubr.bf16.mxu0 %v13907_v36  ;;  %6044 = vmatprep.mubr.bf16.mxu1 %v13907_v36  ;;  %v384_v36 = vld [vmem:[#allocation5 + $0xa0] sm:$0xff] }
 0x1e4   : > { %5273 = vmatmul.mubr.bf16.gmra.mrb[48].mxu0 %v13917_v25  ;;  %6045 = vmatmul.mubr.bf16.gmra.mrb[48].mxu1 %v13917_v25  ;;  %v13932_v25 = vpack.c.bf16 %v1664_v3, %v1656_v50  ;;  %v1672_v50 = vsel %vm1160_vm12, %v904_v56, %v1416_v35  ;;  %v1680_v3 = vsel %vm1168_vm13, %v912_v48, %v1424_v57  ;;  %v1178_v56 = vmul.f32 0.01, %v666_v14 }
 0x1e5   : > { %5282 = vmatprep.mubr.bf16.mxu0 %v13919_v58  ;;  %6054 = vmatprep.mubr.bf16.mxu1 %v13919_v58  ;;  %v19324_v58 = vsub.s32 4, %v13104_v41  ;;  %v13954_v63 = vpack.c.bf16 %v1680_v3, %v1672_v50  ;;  %v1186_v48 = vmul.f32 0.01, %v674_v37  ;;  %v1671_v57 = vsel %vm1159_vm14, %v903_v24, %v1415_v59  ;;  %v392_v24 = vld [vmem:[#allocation5 + $0xe0] sm:$0xff]  ;;  %v409_v59 = vld [vmem:[#allocation5 + $0x168] sm:$0xff] }
 0x1e6   : > { %19322 = vst [vmem:[#allocation58_spill] sm:$0xff] %v13932_v25  ;;  %v1434_v53 = vsel %vm922_vm0, %v666_v14, %v1178_v56  ;;  %v13964_v3 = vpack.c.bf16 %v1679_v34, %v1671_v57 }
 0x1e7   : > { %v13950_v45 = vrot.slane %v12517_v38, %v19324_v58  ;;  %19326 = vst [vmem:[#allocation60_spill] sm:$0xff] %v13954_v63  ;;  %v385_v58 = vld [vmem:[#allocation5 + $0xa8] sm:$0xff]  ;;  %v1442_v61 = vsel %vm930_vm1, %v674_v37, %v1186_v48 }
 0x1e8   : > { %v393_v38 = vld [vmem:[#allocation5 + $0xe8] sm:$0xff]  ;;  %v682_v50 = vadd.f32 %v13937_v10, %v385_v58  ;;  %19327 = vst [vmem:[#allocation61_spill] sm:$0xff] %v13964_v3  ;;  %v698_v58 = vadd.f32 %v13937_v10, %v401_v46 }
 0x1e9   : > { %v673_v16 = vadd.f32 %v13950_v45, %v376_v9  ;;  %v681_v37 = vadd.f32 %v13950_v45, %v384_v36  ;;  %v689_v56 = vadd.f32 %v13950_v45, %v392_v24 }
 0x1ea   : > { %v1194_v9 = vmul.f32 0.01, %v682_v50  ;;  %vm938_vm4 = vcmp.gt.f32.partialorder %v682_v50, 0.0  ;;  %vm954_vm8 = vcmp.gt.f32.partialorder %v698_v58, 0.0 }
 0x1eb   : > { %vm929_vm3 = vcmp.gt.f32.partialorder %v673_v16, 0.0  ;;  %v1193_v24 = vmul.f32 0.01, %v681_v37  ;;  %vm937_vm6 = vcmp.gt.f32.partialorder %v681_v37, 0.0  ;;  %vm945_vm7 = vcmp.gt.f32.partialorder %v689_v56, 0.0 }
 0x1ec   : > { %5283 = vmatmul.mubr.bf16.gmra.mrb[52].mxu0 %v13930_v29  ;;  %6055 = vmatmul.mubr.bf16.gmra.mrb[52].mxu1 %v13930_v29  ;;  %v368_v29 = vld [vmem:[#allocation5 + $0x20] sm:$0xff]  ;;  %v1450_v57 = vsel %vm938_vm4, %v682_v50, %v1194_v9 }
 0x1ed   : > { %5292 = vmatprep.mubr.bf16.mxu0 %v13932_v25  ;;  %6064 = vmatprep.mubr.bf16.mxu1 %v13932_v25  ;;  %v665_v35 = vadd.f32 %v13950_v45, %v368_v29  ;;  %v690_v29 = vadd.f32 %v13937_v10, %v393_v38  ;;  %v13966_v25 = vpack.c.bf16 %v1442_v61, %v1434_v53  ;;  %v2209_v53 = vld [vmem:[#allocation7 + $0xc60] sm:$0xff]  ;;  %v2206_v61 = vld [vmem:[#allocation7 + $0xc48] sm:$0xff] }
 0x1ee   : > { %v706_v38 = vadd.f32 %v13937_v10, %v409_v59  ;;  %v13980_v59 = vld [vmem:[#allocation7 + $0xc80] sm:$0xff]  ;;  %v1449_v42 = vsel %vm937_vm6, %v681_v37, %v1193_v24 }
 0x1ef   : > { %v1177_v30 = vmul.f32 0.01, %v665_v35  ;;  %vm921_vm2 = vcmp.gt.f32.partialorder %v665_v35, 0.0  ;;  %19328 = vst [vmem:[#allocation62_spill] sm:$0xff] %v13966_v25  ;;  %v1202_v14 = vmul.f32 0.01, %v690_v29 }
 0x1f0   : > { %vm946_vm5 = vcmp.gt.f32.partialorder %v690_v29, 0.0  ;;  %vm962_vm9 = vcmp.gt.f32.partialorder %v706_v38, 0.0  ;;  %v13982_v50 = vld [vmem:[#allocation7 + $0xca0] sm:$0xff] }
 0x1f1   : > { %v1433_v31 = vsel %vm921_vm2, %v665_v35, %v1177_v30  ;;  %v2205_v35 = vld [vmem:[#allocation7 + $0xc40] sm:$0xff]  ;;  %v1458_v34 = vsel %vm946_vm5, %v690_v29, %v1202_v14  ;;  %v2210_v30 = vld [vmem:[#allocation7 + $0xc68] sm:$0xff] }
 0x1f2   : > { %v13978_v46 = vpack.c.bf16 %v1458_v34, %v1450_v57  ;;  %v10668_v29 = vcombine.low %v2205_v35, %v2209_v53  ;;  %v10669_v9 = vcombine.high %v2205_v35, %v2209_v53  ;;  %v10671_v14 = vcombine.high %v2206_v61, %v2210_v30 }
 0x1f3   : > { %v705_v34 = vadd.f32 %v13950_v45, %v408_v39  ;;  %v19331_v35 = vcombine.low %v13703_v0, %v13705_v8  ;;  %v14003_v39 = vld [vmem:[#allocation7 + $0x30] sm:$0xff] }
 0x1f4   : > { %5293 = vmatmul.mubr.bf16.gmra.mrb[56].mxu0 %v13952_v20  ;;  %6065 = vmatmul.mubr.bf16.gmra.mrb[56].mxu1 %v13952_v20  ;;  %v1185_v20 = vmul.f32 0.01, %v673_v16  ;;  %19330 = vst [vmem:[#allocation64_spill] sm:$0xff] %v13978_v46 }
 0x1f5   : > { %5302 = vmatprep.mubr.bf16.mxu0 %v13954_v63  ;;  %6074 = vmatprep.mubr.bf16.mxu1 %v13954_v63  ;;  %v1201_v63 = vmul.f32 0.01, %v689_v56  ;;  %vm961_vm11 = vcmp.gt.f32.partialorder %v705_v34, 0.0 }
 0x1f6   : > { %v1441_v48 = vsel %vm929_vm3, %v673_v16, %v1185_v20  ;;  %v1210_v20 = vmul.f32 0.01, %v698_v58  ;;  %v1218_v16 = vmul.f32 0.01, %v706_v38 }
 0x1f7   : > { %v13976_v36 = vpack.c.bf16 %v1441_v48, %v1433_v31  ;;  %v10670_v31 = vcombine.low %v2206_v61, %v2210_v30  ;;  %v417_v48 = vld [vmem:[#allocation5 + $0x1a8] sm:$0xff]  ;;  %v1457_v6 = vsel %vm945_vm7, %v689_v56, %v1201_v63  ;;  %v10677_v63 = vcombine.high %v13980_v59, %v13982_v50  ;;  %v14005_v56 = vld [vmem:[#allocation7 + $0x18] sm:$0xff] }
 0x1f8   : > { %v1466_v53 = vsel %vm954_vm8, %v698_v58, %v1210_v20  ;;  %v1474_v37 = vsel %vm962_vm9, %v706_v38, %v1218_v16  ;;  %v19332_v61 = vcombine.low %v13715_v51, %v13722_v21  ;;  %v714_v0 = vadd.f32 %v13937_v10, %v417_v48  ;;  %v14015_v38 = vld [vmem:[#allocation7 + $0x38] sm:$0xff]  ;;  %v2225_v16 = vld [vmem:[#allocation7 + $0xce0] sm:$0xff]  ;;  %v433_v51 = vld [vmem:[#allocation5 + $0x228] sm:$0xff] }
 0x1f9   : > { %19329 = vst [vmem:[#allocation63_spill] sm:$0xff] %v13976_v36  ;;  %v10679_v30 = vcombine.high %v13989_v13, %v13991_v47  ;;  %v14022_v21 = vpack.c.bf16 %v1457_v6, %v1449_v42  ;;  %v1217_v20 = vmul.f32 0.01, %v705_v34  ;;  %v14024_v48 = vpack.c.bf16 %v1474_v37, %v1466_v53  ;;  %v441_v53 = vld [vmem:[#allocation5 + $0x268] sm:$0xff] }
 0x1fa   : > { %v10676_v58 = vcombine.low %v13980_v59, %v13982_v50  ;;  %v1226_v6 = vmul.f32 0.01, %v714_v0  ;;  %vm970_vm12 = vcmp.gt.f32.partialorder %v714_v0, 0.0 }
 0x1fb   : > { %19333 = vst [vmem:[#allocation65_spill] sm:$0xff] %v14022_v21  ;;  %19334 = vst [vmem:[#allocation66_spill] sm:$0xff] %v14024_v48  ;;  %v1473_v37 = vsel %vm961_vm11, %v705_v34, %v1217_v20 }
 0x1fc   : > { %5303 = vmatmul.mubr.bf16.gmra.mrb[60].mxu0 %v13964_v3  ;;  %6075 = vmatmul.mubr.bf16.gmra.mrb[60].mxu1 %v13964_v3  ;;  %v400_v3 = vld [vmem:[#allocation5 + $0x120] sm:$0xff] }
 0x1fd   : > { %5345 = vmatprep.mubr.bf16.mxu0 %v13966_v25  ;;  %6117 = vmatprep.mubr.bf16.mxu1 %v13966_v25  ;;  %v425_v25 = vld [vmem:[#allocation5 + $0x1e8] sm:$0xff]  ;;  %v697_v57 = vadd.f32 %v13950_v45, %v400_v3  ;;  %v14001_v3 = vld [vmem:[#allocation7 + $0x10] sm:$0xff] }
 0x1fe   : > { %v722_v8 = vadd.f32 %v13937_v10, %v425_v25  ;;  %v2221_v25 = vld [vmem:[#allocation7 + $0xcc0] sm:$0xff] }
 0x1ff   : > { %v1209_v24 = vmul.f32 0.01, %v697_v57  ;;  %vm953_vm10 = vcmp.gt.f32.partialorder %v697_v57, 0.0 }
 0x200   : > { %v1234_v42 = vmul.f32 0.01, %v722_v8  ;;  %vm978_vm13 = vcmp.gt.f32.partialorder %v722_v8, 0.0 }
 0x202   : > { %v1490_v34 = vsel %vm978_vm13, %v722_v8, %v1234_v42  ;;  %v2242_v42 = vld [vmem:[#allocation7 + $0xd68] sm:$0xff] }
 0x204   : > { %5346 = vmatmul.mubr.bf16.vlgmr.msra.gmra.mrb[0].mxu0 %v13976_v36  ;;  %6118 = vmatmul.mubr.bf16.vlgmr.msra.gmra.mrb[0].mxu1 %v13976_v36  ;;  %v2233_v36 = vld [vmem:[#allocation7 + $0xd20] sm:$0xff] }
 0x205   : > { %5507 = vmatpush1.bf16.msra.mxu0 %v19331_v35  ;;  %6279 = vmatpush1.bf16.msra.mxu1 %v19332_v61  ;;  %v416_v35 = vld [vmem:[#allocation5 + $0x1a0] sm:$0xff]  ;;  %v2226_v61 = vld [vmem:[#allocation7 + $0xce8] sm:$0xff] }
 0x206   : > { %5355 = vmatprep.mubr.bf16.mxu0 %v13978_v46  ;;  %6127 = vmatprep.mubr.bf16.mxu1 %v13978_v46  ;;  %v10678_v46 = vcombine.low %v13989_v13, %v13991_v47  ;;  %v713_v59 = vadd.f32 %v13950_v45, %v416_v35  ;;  %v10684_v13 = vcombine.low %v2221_v25, %v2225_v16  ;;  %v432_v35 = vld [vmem:[#allocation5 + $0x220] sm:$0xff] }
 0x207   : > { %5508 = vmatprep.subr.bf16.mxu0 %v10669_v9  ;;  %6280 = vmatprep.subr.bf16.mxu1 %v10671_v14  ;;  %v2222_v9 = vld [vmem:[#allocation7 + $0xcc8] sm:$0xff]  ;;  %v424_v14 = vld [vmem:[#allocation5 + $0x1e0] sm:$0xff] }
 0x208   : > { %v10687_v50 = vcombine.high %v2222_v9, %v2226_v61  ;;  %v721_v47 = vadd.f32 %v13950_v45, %v424_v14  ;;  %v10686_v20 = vcombine.low %v2222_v9, %v2226_v61  ;;  %vm969_vm14 = vcmp.gt.f32.partialorder %v713_v59, 0.0  ;;  %v449_v61 = vld [vmem:[#allocation5 + $0x2a8] sm:$0xff] }
 0x209   : > { %5509 = vmatpush1.bf16.msra.mxu0 %v10668_v29  ;;  %6281 = vmatpush1.bf16.msra.mxu1 %v10670_v31  ;;  %v10685_v29 = vcombine.high %v2221_v25, %v2225_v16  ;;  %v1465_v31 = vsel %vm953_vm10, %v697_v57, %v1209_v24  ;;  %v1482_v57 = vsel %vm970_vm12, %v714_v0, %v1226_v6  ;;  %v440_v25 = vld [vmem:[#allocation5 + $0x260] sm:$0xff]  ;;  %v2238_v6 = vld [vmem:[#allocation7 + $0xd48] sm:$0xff] }
 0x20a   : > { %5510 = vmatprep.subr.bf16.mxu0 %v10677_v63  ;;  %6282 = vmatprep.subr.bf16.mxu1 %v10679_v30  ;;  %v2229_v63 = vld [vmem:[#allocation7 + $0xd00] sm:$0xff]  ;;  %v730_v30 = vadd.f32 %v13937_v10, %v433_v51  ;;  %v738_v24 = vadd.f32 %v13937_v10, %v441_v53  ;;  %v14042_v14 = vpack.c.bf16 %v1473_v37, %v1465_v31  ;;  %v1225_v51 = vmul.f32 0.01, %v713_v59  ;;  %v457_v31 = vld [vmem:[#allocation5 + $0x2e8] sm:$0xff] }
 0x20b   : > { %v10695_v16 = vcombine.high %v2230_v19, %v2234_v40  ;;  %v14044_v22 = vpack.c.bf16 %v1490_v34, %v1482_v57  ;;  %v1233_v0 = vmul.f32 0.01, %v721_v47  ;;  %vm977_vm15 = vcmp.gt.f32.partialorder %v721_v47, 0.0  ;;  %v2245_v34 = vld [vmem:[#allocation7 + $0xd80] sm:$0xff] }
 0x20c   : > { %5356 = vmatmul.mubr.bf16.gmra.mrb[4].mxu0 %v14022_v21  ;;  %6128 = vmatmul.mubr.bf16.gmra.mrb[4].mxu1 %v14022_v21  ;;  %v10693_v21 = vcombine.high %v2229_v63, %v2233_v36  ;;  %19335 = vst [vmem:[#allocation67_spill] sm:$0xff] %v14042_v14  ;;  %v1242_v8 = vmul.f32 0.01, %v730_v30  ;;  %vm986_vm0 = vcmp.gt.f32.partialorder %v730_v30, 0.0  ;;  %v10692_v9 = vcombine.low %v2229_v63, %v2233_v36  ;;  %v2250_v63 = vld [vmem:[#allocation7 + $0xda8] sm:$0xff] }
 0x20d   : > { %5365 = vmatprep.mubr.bf16.mxu0 %v14024_v48  ;;  %6137 = vmatprep.mubr.bf16.mxu1 %v14024_v48  ;;  %v2237_v48 = vld [vmem:[#allocation7 + $0xd40] sm:$0xff]  ;;  %19336 = vst [vmem:[#allocation68_spill] sm:$0xff] %v14044_v22  ;;  %vm994_vm1 = vcmp.gt.f32.partialorder %v738_v24, 0.0  ;;  %v10694_v53 = vcombine.low %v2230_v19, %v2234_v40  ;;  %v737_v57 = vadd.f32 %v13950_v45, %v440_v25 }
 0x20e   : > { %5511 = vmatpush1.bf16.msra.mxu0 %v10676_v58  ;;  %6283 = vmatpush1.bf16.msra.mxu1 %v10678_v46  ;;  %v2241_v58 = vld [vmem:[#allocation7 + $0xd60] sm:$0xff]  ;;  %v1250_v46 = vmul.f32 0.01, %v738_v24  ;;  %v1489_v36 = vsel %vm977_vm15, %v721_v47, %v1233_v0  ;;  %v1498_v40 = vsel %vm986_vm0, %v730_v30, %v1242_v8  ;;  %v746_v19 = vadd.f32 %v13937_v10, %v449_v61 }
 0x20f   : > { %5512 = vmatprep.subr.bf16.mxu0 %v10685_v29  ;;  %6284 = vmatprep.subr.bf16.mxu1 %v10687_v50  ;;  %v729_v29 = vadd.f32 %v13950_v45, %v432_v35  ;;  %v10701_v37 = vcombine.high %v2237_v48, %v2241_v58  ;;  %v1481_v50 = vsel %vm969_vm14, %v713_v59, %v1225_v51  ;;  %v1249_v30 = vmul.f32 0.01, %v737_v57  ;;  %v2253_v8 = vld [vmem:[#allocation7 + $0xdc0] sm:$0xff] }
 0x210   : > { %v1506_v59 = vsel %vm994_vm1, %v738_v24, %v1250_v46  ;;  %v10700_v35 = vcombine.low %v2237_v48, %v2241_v58  ;;  %v10702_v25 = vcombine.low %v2238_v6, %v2242_v42  ;;  %v14058_v47 = vpack.c.bf16 %v1489_v36, %v1481_v50  ;;  %v2257_v61 = vld [vmem:[#allocation7 + $0xde0] sm:$0xff]  ;;  %v2258_v48 = vld [vmem:[#allocation7 + $0xde8] sm:$0xff] }
 0x211   : > { %v1241_v51 = vmul.f32 0.01, %v729_v29  ;;  %vm985_vm2 = vcmp.gt.f32.partialorder %v729_v29, 0.0  ;;  %vm993_vm3 = vcmp.gt.f32.partialorder %v737_v57, 0.0  ;;  %v1258_v24 = vmul.f32 0.01, %v746_v19 }
 0x212   : > { %5513 = vmatpush1.bf16.msra.mxu0 %v10684_v13  ;;  %6285 = vmatpush1.bf16.msra.mxu1 %v10686_v20  ;;  %v10703_v13 = vcombine.high %v2238_v6, %v2242_v42  ;;  %v754_v20 = vadd.f32 %v13937_v10, %v457_v31  ;;  %19337 = vst [vmem:[#allocation69_spill] sm:$0xff] %v14058_v47  ;;  %v448_v46 = vld [vmem:[#allocation5 + $0x2a0] sm:$0xff]  ;;  %vm1002_vm4 = vcmp.gt.f32.partialorder %v746_v19, 0.0  ;;  %v465_v6 = vld [vmem:[#allocation5 + $0x328] sm:$0xff] }
 0x213   : > { %5514 = vmatprep.subr.bf16.mxu0 %v10693_v21  ;;  %6286 = vmatprep.subr.bf16.mxu1 %v10695_v16  ;;  %v2246_v21 = vld [vmem:[#allocation7 + $0xd88] sm:$0xff]  ;;  %v10709_v16 = vcombine.high %v2245_v34, %v2249_v44  ;;  %v10708_v42 = vcombine.low %v2245_v34, %v2249_v44  ;;  %v1497_v31 = vsel %vm985_vm2, %v729_v29, %v1241_v51 }
 0x214   : > { %5366 = vmatmul.mubr.bf16.gmra.mrb[8].mxu0 %v14042_v14  ;;  %6138 = vmatmul.mubr.bf16.gmra.mrb[8].mxu1 %v14042_v14  ;;  %v10711_v0 = vcombine.high %v2246_v21, %v2250_v63  ;;  %v1266_v58 = vmul.f32 0.01, %v754_v20  ;;  %vm1010_vm5 = vcmp.gt.f32.partialorder %v754_v20, 0.0  ;;  %v10710_v50 = vcombine.low %v2246_v21, %v2250_v63  ;;  %v2261_v14 = vld [vmem:[#allocation7 + $0xe00] sm:$0xff]  ;;  %v2262_v21 = vld [vmem:[#allocation7 + $0xe08] sm:$0xff] }
 0x215   : > { %5375 = vmatprep.mubr.bf16.mxu0 %v14044_v22  ;;  %6147 = vmatprep.mubr.bf16.mxu1 %v14044_v22  ;;  %v14060_v22 = vpack.c.bf16 %v1506_v59, %v1498_v40  ;;  %v1505_v36 = vsel %vm993_vm3, %v737_v57, %v1249_v30  ;;  %v745_v40 = vadd.f32 %v13950_v45, %v448_v46  ;;  %v2266_v63 = vld [vmem:[#allocation7 + $0xe28] sm:$0xff]  ;;  %v472_v46 = vld [vmem:[#allocation5 + $0x360] sm:$0xff] }
 0x216   : > { %5515 = vmatpush1.bf16.msra.mxu0 %v10692_v9  ;;  %6287 = vmatpush1.bf16.msra.mxu1 %v10694_v53  ;;  %v2254_v9 = vld [vmem:[#allocation7 + $0xdc8] sm:$0xff]  ;;  %v456_v53 = vld [vmem:[#allocation5 + $0x2e0] sm:$0xff]  ;;  %v1514_v44 = vsel %vm1002_vm4, %v746_v19, %v1258_v24  ;;  %v762_v34 = vadd.f32 %v13937_v10, %v465_v6  ;;  %v1522_v57 = vsel %vm1010_vm5, %v754_v20, %v1266_v58 }
 0x217   : > { %5516 = vmatprep.subr.bf16.mxu0 %v10701_v37  ;;  %6288 = vmatprep.subr.bf16.mxu1 %v10703_v13  ;;  %19338 = vst [vmem:[#allocation70_spill] sm:$0xff] %v14060_v22  ;;  %v473_v37 = vld [vmem:[#allocation5 + $0x368] sm:$0xff]  ;;  %v10717_v13 = vcombine.high %v2253_v8, %v2257_v61  ;;  %v10719_v59 = vcombine.high %v2254_v9, %v2258_v48  ;;  %vm1001_vm6 = vcmp.gt.f32.partialorder %v745_v40, 0.0  ;;  %v1257_v24 = vmul.f32 0.01, %v745_v40  ;;  %v2269_v6 = vld [vmem:[#allocation7 + $0xe40] sm:$0xff] }
 0x218   : > { %v753_v29 = vadd.f32 %v13950_v45, %v456_v53  ;;  %v770_v51 = vadd.f32 %v13937_v10, %v473_v37  ;;  %v10718_v30 = vcombine.low %v2254_v9, %v2258_v48  ;;  %v14074_v19 = vpack.c.bf16 %v1505_v36, %v1497_v31  ;;  %v481_v9 = vld [vmem:[#allocation5 + $0x3a8] sm:$0xff] }
 0x219   : > { %v10727_v53 = vcombine.high %v2262_v21, %v2266_v63  ;;  %v1274_v58 = vmul.f32 0.01, %v762_v34  ;;  %vm1018_vm8 = vcmp.gt.f32.partialorder %v762_v34, 0.0  ;;  %v489_v37 = vld [vmem:[#allocation5 + $0x3e8] sm:$0xff]  ;;  %v1513_v36 = vsel %vm1001_vm6, %v745_v40, %v1257_v24 }
 0x21a   : > { %5517 = vmatpush1.bf16.msra.mxu0 %v10700_v35  ;;  %6289 = vmatpush1.bf16.msra.mxu1 %v10702_v25  ;;  %v2265_v35 = vld [vmem:[#allocation7 + $0xe20] sm:$0xff]  ;;  %v10716_v25 = vcombine.low %v2253_v8, %v2257_v61  ;;  %19339 = vst [vmem:[#allocation71_spill] sm:$0xff] %v14074_v19  ;;  %v1265_v20 = vmul.f32 0.01, %v753_v29  ;;  %v2274_v8 = vld [vmem:[#allocation7 + $0xe68] sm:$0xff]  ;;  %vm1009_vm7 = vcmp.gt.f32.partialorder %v753_v29, 0.0 }
 0x21b   : > { %5518 = vmatprep.subr.bf16.mxu0 %v10709_v16  ;;  %6290 = vmatprep.subr.bf16.mxu1 %v10711_v0  ;;  %v464_v16 = vld [vmem:[#allocation5 + $0x320] sm:$0xff]  ;;  %v10725_v0 = vcombine.high %v2261_v14, %v2265_v35  ;;  %v1282_v61 = vmul.f32 0.01, %v770_v51  ;;  %v10724_v48 = vcombine.low %v2261_v14, %v2265_v35  ;;  %vm1026_vm9 = vcmp.gt.f32.partialorder %v770_v51, 0.0 }
 0x21c   : > { %5376 = vmatmul.mubr.bf16.gmra.mrb[12].mxu0 %v14058_v47  ;;  %6148 = vmatmul.mubr.bf16.gmra.mrb[12].mxu1 %v14058_v47  ;;  %v14076_v47 = vpack.c.bf16 %v1522_v57, %v1514_v44  ;;  %v761_v31 = vadd.f32 %v13950_v45, %v464_v16  ;;  %v2277_v57 = vld [vmem:[#allocation7 + $0xe80] sm:$0xff]  ;;  %v1521_v14 = vsel %vm1009_vm7, %v753_v29, %v1265_v20 }
 0x21d   : > { %5385 = vmatprep.mubr.bf16.mxu0 %v14060_v22  ;;  %6157 = vmatprep.mubr.bf16.mxu1 %v14060_v22  ;;  %v2273_v22 = vld [vmem:[#allocation7 + $0xe60] sm:$0xff]  ;;  %v1530_v35 = vsel %vm1018_vm8, %v762_v34, %v1274_v58  ;;  %v1538_v40 = vsel %vm1026_vm9, %v770_v51, %v1282_v61  ;;  %v786_v16 = vadd.f32 %v13937_v10, %v489_v37 }
 0x21e   : > { %5519 = vmatpush1.bf16.msra.mxu0 %v10708_v42  ;;  %6291 = vmatpush1.bf16.msra.mxu1 %v10710_v50  ;;  %19340 = vst [vmem:[#allocation72_spill] sm:$0xff] %v14076_v47  ;;  %v2270_v42 = vld [vmem:[#allocation7 + $0xe48] sm:$0xff]  ;;  %v10726_v50 = vcombine.low %v2262_v21, %v2266_v63  ;;  %v778_v21 = vadd.f32 %v13937_v10, %v481_v9  ;;  %vm1017_vm10 = vcmp.gt.f32.partialorder %v761_v31, 0.0  ;;  %v14092_v20 = vld [vmem:[#allocation7 + $0xec0] sm:$0xff] }
 0x21f   : > { %5520 = vmatprep.subr.bf16.mxu0 %v10717_v13  ;;  %6292 = vmatprep.subr.bf16.mxu1 %v10719_v59  ;;  %v10733_v13 = vcombine.high %v2269_v6, %v2273_v22  ;;  %v769_v59 = vadd.f32 %v13950_v45, %v472_v46  ;;  %v10735_v44 = vcombine.high %v2270_v42, %v2274_v8  ;;  %v2278_v63 = vld [vmem:[#allocation7 + $0xe88] sm:$0xff]  ;;  %v2289_v58 = vld [vmem:[#allocation7 + $0xee0] sm:$0xff]  ;;  %vm1042_vm13 = vcmp.gt.f32.partialorder %v786_v16, 0.0 }
 0x220   : > { %v10734_v24 = vcombine.low %v2270_v42, %v2274_v8  ;;  %v10741_v46 = vcombine.high %v2277_v57, %v2281_v32  ;;  %v14090_v29 = vpack.c.bf16 %v1521_v14, %v1513_v36  ;;  %v14094_v9 = vpack.c.bf16 %v1538_v40, %v1530_v35  ;;  %v480_v61 = vld [vmem:[#allocation5 + $0x3a0] sm:$0xff]  ;;  %v497_v8 = vld [vmem:[#allocation5 + $0x428] sm:$0xff] }
 0x221   : > { %v1281_v34 = vmul.f32 0.01, %v769_v59  ;;  %vm1025_vm11 = vcmp.gt.f32.partialorder %v769_v59, 0.0  ;;  %v1290_v51 = vmul.f32 0.01, %v778_v21  ;;  %vm1034_vm12 = vcmp.gt.f32.partialorder %v778_v21, 0.0 }
 0x222   : > { %5521 = vmatpush1.bf16.msra.mxu0 %v10716_v25  ;;  %6293 = vmatpush1.bf16.msra.mxu1 %v10718_v30  ;;  %v2282_v25 = vld [vmem:[#allocation7 + $0xea8] sm:$0xff]  ;;  %v10732_v30 = vcombine.low %v2269_v6, %v2273_v22  ;;  %19341 = vst [vmem:[#allocation73_spill] sm:$0xff] %v14090_v29  ;;  %19342 = vst [vmem:[#allocation74_spill] sm:$0xff] %v14094_v9  ;;  %v488_v42 = vld [vmem:[#allocation5 + $0x3e0] sm:$0xff]  ;;  %v10740_v37 = vcombine.low %v2277_v57, %v2281_v32 }
 0x223   : > { %5522 = vmatprep.subr.bf16.mxu0 %v10725_v0  ;;  %6294 = vmatprep.subr.bf16.mxu1 %v10727_v53  ;;  %v1273_v0 = vmul.f32 0.01, %v761_v31  ;;  %v10743_v53 = vcombine.high %v2278_v63, %v2282_v25  ;;  %v2286_v22 = vld [vmem:[#allocation7 + $0xec8] sm:$0xff]  ;;  %v10742_v36 = vcombine.low %v2278_v63, %v2282_v25  ;;  %v1537_v14 = vsel %vm1025_vm11, %v769_v59, %v1281_v34  ;;  %v2297_v32 = vld [vmem:[#allocation7 + $0xf20] sm:$0xff] }
 0x224   : > { %5386 = vmatmul.mubr.bf16.gmra.mrb[16].mxu0 %v14074_v19  ;;  %6158 = vmatmul.mubr.bf16.gmra.mrb[16].mxu1 %v14074_v19  ;;  %v2290_v6 = vld [vmem:[#allocation7 + $0xee8] sm:$0xff]  ;;  %v777_v35 = vadd.f32 %v13950_v45, %v480_v61  ;;  %v785_v57 = vadd.f32 %v13950_v45, %v488_v42  ;;  %v794_v63 = vadd.f32 %v13937_v10, %v497_v8  ;;  %v504_v61 = vld [vmem:[#allocation5 + $0x460] sm:$0xff] }
 0x225   : > { %5395 = vmatprep.mubr.bf16.mxu0 %v14076_v47  ;;  %6167 = vmatprep.mubr.bf16.mxu1 %v14076_v47  ;;  %v10751_v40 = vcombine.high %v2286_v22, %v2290_v6  ;;  %v14101_v47 = vld [vmem:[#allocation7 + $0xf00] sm:$0xff]  ;;  %v2294_v25 = vld [vmem:[#allocation7 + $0xf08] sm:$0xff]  ;;  %v10750_v34 = vcombine.low %v2286_v22, %v2290_v6 }
 0x226   : > { %5523 = vmatpush1.bf16.msra.mxu0 %v10724_v48  ;;  %6295 = vmatpush1.bf16.msra.mxu1 %v10726_v50  ;;  %v1298_v48 = vmul.f32 0.01, %v786_v16  ;;  %v1529_v50 = vsel %vm1017_vm10, %v761_v31, %v1273_v0  ;;  %v1546_v31 = vsel %vm1034_vm12, %v778_v21, %v1290_v51  ;;  %v10757_v21 = vcombine.high %v14101_v47, %v2297_v32  ;;  %v2301_v8 = vld [vmem:[#allocation7 + $0xf40] sm:$0xff]  ;;  %v513_v6 = vld [vmem:[#allocation5 + $0x4a8] sm:$0xff] }
 0x227   : > { %5524 = vmatprep.subr.bf16.mxu0 %v10733_v13  ;;  %6296 = vmatprep.subr.bf16.mxu1 %v10735_v44  ;;  %v505_v13 = vld [vmem:[#allocation5 + $0x468] sm:$0xff]  ;;  %v10749_v44 = vcombine.high %v14092_v20, %v2289_v58  ;;  %vm1033_vm14 = vcmp.gt.f32.partialorder %v777_v35, 0.0  ;;  %v1289_v51 = vmul.f32 0.01, %v777_v35  ;;  %vm1041_vm15 = vcmp.gt.f32.partialorder %v785_v57, 0.0  ;;  %v2313_v19 = vld [vmem:[#allocation7 + $0xfa0] sm:$0xff] }
 0x228   : > { %v1554_v59 = vsel %vm1042_vm13, %v786_v16, %v1298_v48  ;;  %v802_v0 = vadd.f32 %v13937_v10, %v505_v13  ;;  %v2305_v16 = vld [vmem:[#allocation7 + $0xf60] sm:$0xff]  ;;  %vm1050_vm0 = vcmp.gt.f32.partialorder %v794_v63, 0.0  ;;  %v1306_v13 = vmul.f32 0.01, %v794_v63 }
 0x229   : > { %v14115_v48 = vpack.c.bf16 %v1554_v59, %v1546_v31  ;;  %v1545_v31 = vsel %vm1033_vm14, %v777_v35, %v1289_v51  ;;  %v801_v59 = vadd.f32 %v13950_v45, %v504_v61 }
 0x22a   : > { %5525 = vmatpush1.bf16.msra.mxu0 %v10732_v30  ;;  %6297 = vmatpush1.bf16.msra.mxu1 %v10734_v24  ;;  %v2298_v30 = vld [vmem:[#allocation7 + $0xf28] sm:$0xff]  ;;  %v10748_v24 = vcombine.low %v14092_v20, %v2289_v58  ;;  %v1314_v22 = vmul.f32 0.01, %v802_v0  ;;  %vm1058_vm1 = vcmp.gt.f32.partialorder %v802_v0, 0.0  ;;  %v1562_v35 = vsel %vm1050_vm0, %v794_v63, %v1306_v13 }
 0x22b   : > { %5526 = vmatprep.subr.bf16.mxu0 %v10741_v46  ;;  %6298 = vmatprep.subr.bf16.mxu1 %v10743_v53  ;;  %v496_v46 = vld [vmem:[#allocation5 + $0x420] sm:$0xff]  ;;  %v14113_v53 = vpack.c.bf16 %v1537_v14, %v1529_v50  ;;  %v10759_v42 = vcombine.high %v2294_v25, %v2298_v30  ;;  %19344 = vst [vmem:[#allocation76_spill] sm:$0xff] %v14115_v48  ;;  %v2302_v20 = vld [vmem:[#allocation7 + $0xf48] sm:$0xff]  ;;  %vm1057_vm3 = vcmp.gt.f32.partialorder %v801_v59, 0.0 }
 0x22c   : > { %5396 = vmatmul.mubr.bf16.gmra.mrb[20].mxu0 %v14090_v29  ;;  %6168 = vmatmul.mubr.bf16.gmra.mrb[20].mxu1 %v14090_v29  ;;  %v2306_v58 = vld [vmem:[#allocation7 + $0xf68] sm:$0xff]  ;;  %v10756_v50 = vcombine.low %v14101_v47, %v2297_v32  ;;  %v10758_v14 = vcombine.low %v2294_v25, %v2298_v30  ;;  %v2309_v29 = vld [vmem:[#allocation7 + $0xf80] sm:$0xff]  ;;  %v810_v32 = vadd.f32 %v13937_v10, %v513_v6 }
 0x22d   : > { %5405 = vmatprep.mubr.bf16.mxu0 %v14094_v9  ;;  %6177 = vmatprep.mubr.bf16.mxu1 %v14094_v9  ;;  %19343 = vst [vmem:[#allocation75_spill] sm:$0xff] %v14113_v53  ;;  %v10767_v9 = vcombine.high %v2302_v20, %v2306_v58  ;;  %v2310_v30 = vld [vmem:[#allocation7 + $0xf88] sm:$0xff]  ;;  %v10766_v51 = vcombine.low %v2302_v20, %v2306_v58 }
 0x22e   : > { %5527 = vmatpush1.bf16.msra.mxu0 %v10740_v37  ;;  %6299 = vmatpush1.bf16.msra.mxu1 %v10742_v36  ;;  %v1297_v37 = vmul.f32 0.01, %v785_v57  ;;  %v521_v36 = vld [vmem:[#allocation5 + $0x4e8] sm:$0xff]  ;;  %vm1066_vm4 = vcmp.gt.f32.partialorder %v810_v32, 0.0  ;;  %v10772_v20 = vcombine.low %v2309_v29, %v2313_v19 }
 0x22f   : > { %5528 = vmatprep.subr.bf16.mxu0 %v10749_v44  ;;  %6300 = vmatprep.subr.bf16.mxu1 %v10751_v40  ;;  %v793_v44 = vadd.f32 %v13950_v45, %v496_v46  ;;  %v10765_v40 = vcombine.high %v2301_v8, %v2305_v16  ;;  %v818_v25 = vadd.f32 %v13937_v10, %v521_v36  ;;  %v2317_v36 = vld [vmem:[#allocation7 + $0xfc0] sm:$0xff] }
 0x230   : > { %v1553_v47 = vsel %vm1041_vm15, %v785_v57, %v1297_v37  ;;  %v1570_v46 = vsel %vm1058_vm1, %v802_v0, %v1314_v22  ;;  %v10773_v57 = vcombine.high %v2309_v29, %v2313_v19  ;;  %v512_v37 = vld [vmem:[#allocation5 + $0x4a0] sm:$0xff]  ;;  %v1322_v0 = vmul.f32 0.01, %v810_v32 }
 0x231   : > { %vm1049_vm2 = vcmp.gt.f32.partialorder %v793_v44, 0.0  ;;  %v14130_v61 = vpack.c.bf16 %v1553_v47, %v1545_v31  ;;  %v14132_v63 = vpack.c.bf16 %v1570_v46, %v1562_v35  ;;  %v1330_v13 = vmul.f32 0.01, %v818_v25  ;;  %v520_v22 = vld [vmem:[#allocation5 + $0x4e0] sm:$0xff] }
 0x232   : > { %5529 = vmatpush1.bf16.msra.mxu0 %v10748_v24  ;;  %6301 = vmatpush1.bf16.msra.mxu1 %v10750_v34  ;;  %v2314_v24 = vld [vmem:[#allocation7 + $0xfa8] sm:$0xff]  ;;  %v10764_v34 = vcombine.low %v2301_v8, %v2305_v16  ;;  %vm1074_vm5 = vcmp.gt.f32.partialorder %v818_v25, 0.0  ;;  %v809_v47 = vadd.f32 %v13950_v45, %v512_v37  ;;  %v1578_v19 = vsel %vm1066_vm4, %v810_v32, %v1322_v0 }
 0x233   : > { %5530 = vmatprep.subr.bf16.mxu0 %v10757_v21  ;;  %6302 = vmatprep.subr.bf16.mxu1 %v10759_v42  ;;  %v1305_v21 = vmul.f32 0.01, %v793_v44  ;;  %19345 = vst [vmem:[#allocation77_spill] sm:$0xff] %v14130_v61  ;;  %v1313_v42 = vmul.f32 0.01, %v801_v59  ;;  %v10775_v6 = vcombine.high %v2310_v30, %v2314_v24  ;;  %19346 = vst [vmem:[#allocation78_spill] sm:$0xff] %v14132_v63 }
 0x234   : > { %5406 = vmatmul.mubr.bf16.gmra.mrb[24].mxu0 %v14113_v53  ;;  %6178 = vmatmul.mubr.bf16.gmra.mrb[24].mxu1 %v14113_v53  ;;  %v2318_v8 = vld [vmem:[#allocation7 + $0xfc8] sm:$0xff]  ;;  %v1586_v29 = vsel %vm1074_vm5, %v818_v25, %v1330_v13  ;;  %v10283_v32 = vcombine.high %v14005_v56, %v14015_v38  ;;  %vm1065_vm6 = vcmp.gt.f32.partialorder %v809_v47, 0.0  ;;  %v1899_v53 = vld [vmem:[#allocation7 + $0x2b0] sm:$0xff] }
 0x235   : > { %5415 = vmatprep.mubr.bf16.mxu0 %v14115_v48  ;;  %6187 = vmatprep.mubr.bf16.mxu1 %v14115_v48  ;;  %v2321_v48 = vld [vmem:[#allocation7 + $0xfe0] sm:$0xff]  ;;  %v2322_v16 = vld [vmem:[#allocation7 + $0xfe8] sm:$0xff]  ;;  %v1561_v58 = vsel %vm1049_vm2, %v793_v44, %v1305_v21  ;;  %v1569_v31 = vsel %vm1057_vm3, %v801_v59, %v1313_v42  ;;  %v817_v44 = vadd.f32 %v13950_v45, %v520_v22 }
 0x236   : > { %5531 = vmatpush1.bf16.msra.mxu0 %v10756_v50  ;;  %6303 = vmatpush1.bf16.msra.mxu1 %v10758_v14  ;;  %v529_v50 = vld [vmem:[#allocation5 + $0x528] sm:$0xff]  ;;  %v10783_v35 = vcombine.high %v2318_v8, %v2322_v16  ;;  %v10782_v46 = vcombine.low %v2318_v8, %v2322_v16  ;;  %v14148_v21 = vpack.c.bf16 %v1569_v31, %v1561_v58  ;;  %v528_v42 = vld [vmem:[#allocation5 + $0x520] sm:$0xff] }
 0x237   : > { %5532 = vmatprep.subr.bf16.mxu0 %v10765_v40  ;;  %6304 = vmatprep.subr.bf16.mxu1 %v10767_v9  ;;  %v537_v14 = vld [vmem:[#allocation5 + $0x568] sm:$0xff]  ;;  %v10774_v9 = vcombine.low %v2310_v30, %v2314_v24  ;;  %v10781_v40 = vcombine.high %v2317_v36, %v2321_v48  ;;  %v826_v30 = vadd.f32 %v13937_v10, %v529_v50  ;;  %vm1073_vm7 = vcmp.gt.f32.partialorder %v817_v44, 0.0 }
 0x238   : > { %v834_v59 = vadd.f32 %v13937_v10, %v537_v14  ;;  %v10780_v24 = vcombine.low %v2317_v36, %v2321_v48  ;;  %19347 = vst [vmem:[#allocation79_spill] sm:$0xff] %v14148_v21  ;;  %v14152_v25 = vpack.c.bf16 %v1586_v29, %v1578_v19  ;;  %v545_v36 = vld [vmem:[#allocation5 + $0x5a8] sm:$0xff]  ;;  %v825_v13 = vadd.f32 %v13950_v45, %v528_v42  ;;  %v544_v29 = vld [vmem:[#allocation5 + $0x5a0] sm:$0xff] }
 0x239   : > { %v1338_v48 = vmul.f32 0.01, %v826_v30  ;;  %vm1082_vm8 = vcmp.gt.f32.partialorder %v826_v30, 0.0  ;;  %v553_v0 = vld [vmem:[#allocation5 + $0x5e8] sm:$0xff]  ;;  %v842_v50 = vadd.f32 %v13937_v10, %v545_v36 }
 0x23a   : > { %5533 = vmatpush1.bf16.msra.mxu0 %v10764_v34  ;;  %6305 = vmatpush1.bf16.msra.mxu1 %v10766_v51  ;;  %v10281_v34 = vcombine.high %v14001_v3, %v14003_v39  ;;  %19348 = vst [vmem:[#allocation80_spill] sm:$0xff] %v14152_v25  ;;  %v1321_v51 = vmul.f32 0.01, %v809_v47  ;;  %v1346_v37 = vmul.f32 0.01, %v834_v59  ;;  %vm1090_vm9 = vcmp.gt.f32.partialorder %v834_v59, 0.0 }
 0x23b   : > { %5534 = vmatprep.subr.bf16.mxu0 %v10773_v57  ;;  %6306 = vmatprep.subr.bf16.mxu1 %v10775_v6  ;;  %v1329_v57 = vmul.f32 0.01, %v817_v44  ;;  %v536_v6 = vld [vmem:[#allocation5 + $0x560] sm:$0xff]  ;;  %v850_v14 = vadd.f32 %v13937_v10, %v553_v0  ;;  %vm1081_vm10 = vcmp.gt.f32.partialorder %v825_v13, 0.0  ;;  %vm1098_vm12 = vcmp.gt.f32.partialorder %v842_v50, 0.0 }
 0x23c   : > { %5416 = vmatmul.mubr.bf16.gmra.mrb[28].mxu0 %v14130_v61  ;;  %6188 = vmatmul.mubr.bf16.gmra.mrb[28].mxu1 %v14130_v61  ;;  %v1577_v8 = vsel %vm1065_vm6, %v809_v47, %v1321_v51  ;;  %v833_v22 = vadd.f32 %v13950_v45, %v536_v6  ;;  %v1602_v58 = vsel %vm1090_vm9, %v834_v59, %v1346_v37  ;;  %v569_v59 = vld [vmem:[#allocation5 + $0x668] sm:$0xff]  ;;  %v1859_v61 = vld [vmem:[#allocation7 + $0x170] sm:$0xff] }
 0x23d   : > { %5425 = vmatprep.mubr.bf16.mxu0 %v14132_v63  ;;  %6197 = vmatprep.mubr.bf16.mxu1 %v14132_v63  ;;  %v1585_v16 = vsel %vm1073_vm7, %v817_v44, %v1329_v57  ;;  %v1362_v19 = vmul.f32 0.01, %v850_v14  ;;  %v552_v44 = vld [vmem:[#allocation5 + $0x5e0] sm:$0xff]  ;;  %vm1106_vm13 = vcmp.gt.f32.partialorder %v850_v14, 0.0 }
 0x23e   : > { %5535 = vmatpush1.bf16.msra.mxu0 %v10772_v20  ;;  %6307 = vmatpush1.bf16.msra.mxu1 %v10774_v9  ;;  %v1594_v20 = vsel %vm1082_vm8, %v826_v30, %v1338_v48  ;;  %v14164_v9 = vpack.c.bf16 %v1585_v16, %v1577_v8  ;;  %vm1089_vm11 = vcmp.gt.f32.partialorder %v833_v22, 0.0  ;;  %v1345_v47 = vmul.f32 0.01, %v833_v22  ;;  %v561_v30 = vld [vmem:[#allocation5 + $0x628] sm:$0xff] }
 0x23f   : > { %5536 = vmatprep.subr.bf16.mxu0 %v10781_v40  ;;  %6308 = vmatprep.subr.bf16.mxu1 %v10783_v35  ;;  %v1337_v40 = vmul.f32 0.01, %v825_v13  ;;  %v14166_v31 = vpack.c.bf16 %v1602_v58, %v1594_v20  ;;  %v1354_v35 = vmul.f32 0.01, %v842_v50  ;;  %v1618_v57 = vsel %vm1106_vm13, %v850_v14, %v1362_v19  ;;  %v577_v20 = vld [vmem:[#allocation5 + $0x6a8] sm:$0xff] }
 0x240   : > { %19349 = vst [vmem:[#allocation81_spill] sm:$0xff] %v14164_v9  ;;  %v858_v42 = vadd.f32 %v13937_v10, %v561_v30  ;;  %v866_v48 = vadd.f32 %v13937_v10, %v569_v59  ;;  %v585_v58 = vld [vmem:[#allocation5 + $0x6e8] sm:$0xff] }
 0x241   : > { %19350 = vst [vmem:[#allocation82_spill] sm:$0xff] %v14166_v31  ;;  %v1610_v51 = vsel %vm1098_vm12, %v842_v50, %v1354_v35 }
 0x242   : > { %5537 = vmatpush1.bf16.msra.mxu0 %v10780_v24  ;;  %6309 = vmatpush1.bf16.msra.mxu1 %v10782_v46  ;;  %v1593_v24 = vsel %vm1081_vm10, %v825_v13, %v1337_v40  ;;  %v1601_v46 = vsel %vm1089_vm11, %v833_v22, %v1345_v47  ;;  %v14178_v6 = vpack.c.bf16 %v1618_v57, %v1610_v51  ;;  %v560_v13 = vld [vmem:[#allocation5 + $0x620] sm:$0xff]  ;;  %v1370_v8 = vmul.f32 0.01, %v858_v42 }
 0x243   : > { %6471 = vmatprep.subr.bf16.mxu0 %v10281_v34  ;;  %7243 = vmatprep.subr.bf16.mxu1 %v10283_v32  ;;  %v841_v34 = vadd.f32 %v13950_v45, %v544_v29  ;;  %v849_v32 = vadd.f32 %v13950_v45, %v552_v44  ;;  %v14176_v37 = vpack.c.bf16 %v1601_v46, %v1593_v24  ;;  %v1378_v16 = vmul.f32 0.01, %v866_v48  ;;  %v568_v22 = vld [vmem:[#allocation5 + $0x660] sm:$0xff] }
 0x244   : > { %5426 = vmatmul.mubr.bf16.gmra.mrb[32].mxu0 %v14148_v21  ;;  %6198 = vmatmul.mubr.bf16.gmra.mrb[32].mxu1 %v14148_v21  ;;  %19352 = vst [vmem:[#allocation84_spill] sm:$0xff] %v14178_v6  ;;  %vm1114_vm0 = vcmp.gt.f32.partialorder %v858_v42, 0.0  ;;  %vm1122_vm1 = vcmp.gt.f32.partialorder %v866_v48, 0.0  ;;  %v857_v50 = vadd.f32 %v13950_v45, %v560_v13  ;;  %v865_v47 = vadd.f32 %v13950_v45, %v568_v22  ;;  %v576_v51 = vld [vmem:[#allocation5 + $0x6a0] sm:$0xff] }
 0x245   : > { %5435 = vmatprep.mubr.bf16.mxu0 %v14152_v25  ;;  %6207 = vmatprep.mubr.bf16.mxu1 %v14152_v25  ;;  %19351 = vst [vmem:[#allocation83_spill] sm:$0xff] %v14176_v37  ;;  %vm1097_vm14 = vcmp.gt.f32.partialorder %v841_v34, 0.0  ;;  %v1353_v36 = vmul.f32 0.01, %v841_v34  ;;  %v1361_v0 = vmul.f32 0.01, %v849_v32  ;;  %v1626_v35 = vsel %vm1114_vm0, %v858_v42, %v1370_v8 }
 0x246   : > { %vm1105_vm15 = vcmp.gt.f32.partialorder %v849_v32, 0.0  ;;  %v1634_v19 = vsel %vm1122_vm1, %v866_v48, %v1378_v16  ;;  %v874_v29 = vadd.f32 %v13937_v10, %v577_v20  ;;  %v882_v44 = vadd.f32 %v13937_v10, %v585_v58  ;;  %v601_v42 = vld [vmem:[#allocation5 + $0x768] sm:$0xff]  ;;  %v1852_v25 = vld [vmem:[#allocation7 + $0x138] sm:$0xff] }
 0x247   : > { %v1609_v14 = vsel %vm1097_vm14, %v841_v34, %v1353_v36  ;;  %v1617_v40 = vsel %vm1105_vm15, %v849_v32, %v1361_v0  ;;  %vm1113_vm2 = vcmp.gt.f32.partialorder %v857_v50, 0.0  ;;  %v14191_v59 = vpack.c.bf16 %v1634_v19, %v1626_v35  ;;  %v584_v34 = vld [vmem:[#allocation5 + $0x6e0] sm:$0xff]  ;;  %v593_v36 = vld [vmem:[#allocation5 + $0x728] sm:$0xff] }
 0x248   : > { %v14189_v30 = vpack.c.bf16 %v1617_v40, %v1609_v14  ;;  %v1369_v24 = vmul.f32 0.01, %v857_v50  ;;  %v1377_v46 = vmul.f32 0.01, %v865_v47  ;;  %vm1121_vm3 = vcmp.gt.f32.partialorder %v865_v47, 0.0 }
 0x249   : > { %19354 = vst [vmem:[#allocation86_spill] sm:$0xff] %v14191_v59  ;;  %v1386_v32 = vmul.f32 0.01, %v874_v29  ;;  %v1394_v57 = vmul.f32 0.01, %v882_v44  ;;  %vm1130_vm4 = vcmp.gt.f32.partialorder %v874_v29, 0.0  ;;  %v873_v48 = vadd.f32 %v13950_v45, %v576_v51 }
 0x24a   : > { %19353 = vst [vmem:[#allocation85_spill] sm:$0xff] %v14189_v30  ;;  %vm1138_vm5 = vcmp.gt.f32.partialorder %v882_v44, 0.0  ;;  %v881_v0 = vadd.f32 %v13950_v45, %v584_v34  ;;  %v1625_v13 = vsel %vm1113_vm2, %v857_v50, %v1369_v24  ;;  %v1633_v8 = vsel %vm1121_vm3, %v865_v47, %v1377_v46  ;;  %v592_v47 = vld [vmem:[#allocation5 + $0x720] sm:$0xff]  ;;  %v609_v46 = vld [vmem:[#allocation5 + $0x7a8] sm:$0xff] }
 0x24b   : > { %v890_v16 = vadd.f32 %v13937_v10, %v593_v36  ;;  %v1642_v22 = vsel %vm1130_vm4, %v874_v29, %v1386_v32  ;;  %v1650_v20 = vsel %vm1138_vm5, %v882_v44, %v1394_v57  ;;  %v898_v58 = vadd.f32 %v13937_v10, %v601_v42  ;;  %v600_v24 = vld [vmem:[#allocation5 + $0x760] sm:$0xff]  ;;  %v617_v34 = vld [vmem:[#allocation5 + $0x7e8] sm:$0xff] }
 0x24c   : > { %5436 = vmatmul.mubr.bf16.gmra.mrb[36].mxu0 %v14164_v9  ;;  %6208 = vmatmul.mubr.bf16.gmra.mrb[36].mxu1 %v14164_v9  ;;  %v14202_v14 = vpack.c.bf16 %v1633_v8, %v1625_v13  ;;  %v1385_v40 = vmul.f32 0.01, %v873_v48  ;;  %v1393_v35 = vmul.f32 0.01, %v881_v0  ;;  %v14204_v19 = vpack.c.bf16 %v1650_v20, %v1642_v22 }
 0x24d   : > { %5445 = vmatprep.mubr.bf16.mxu0 %v14166_v31  ;;  %6217 = vmatprep.mubr.bf16.mxu1 %v14166_v31  ;;  %vm1129_vm6 = vcmp.gt.f32.partialorder %v873_v48, 0.0  ;;  %vm1137_vm7 = vcmp.gt.f32.partialorder %v881_v0, 0.0  ;;  %v1402_v51 = vmul.f32 0.01, %v890_v16  ;;  %vm1146_vm8 = vcmp.gt.f32.partialorder %v890_v16, 0.0 }
 0x24e   : > { %19355 = vst [vmem:[#allocation87_spill] sm:$0xff] %v14202_v14  ;;  %19356 = vst [vmem:[#allocation88_spill] sm:$0xff] %v14204_v19  ;;  %v1410_v50 = vmul.f32 0.01, %v898_v58  ;;  %vm1154_vm9 = vcmp.gt.f32.partialorder %v898_v58, 0.0  ;;  %v1641_v29 = vsel %vm1129_vm6, %v873_v48, %v1385_v40  ;;  %v1649_v44 = vsel %vm1137_vm7, %v881_v0, %v1393_v35  ;;  %v608_v40 = vld [vmem:[#allocation5 + $0x7a0] sm:$0xff] }
 0x24f   : > { %v1658_v32 = vsel %vm1146_vm8, %v890_v16, %v1402_v51  ;;  %v889_v57 = vadd.f32 %v13950_v45, %v592_v47  ;;  %v897_v36 = vadd.f32 %v13950_v45, %v600_v24  ;;  %v906_v13 = vadd.f32 %v13937_v10, %v609_v46  ;;  %v616_v47 = vld [vmem:[#allocation5 + $0x7e0] sm:$0xff]  ;;  %v12518_v24 = vld [vmem:[%s13086_s7] sm:$0xff] }
 0x250   : > { %v1666_v42 = vsel %vm1154_vm9, %v898_v58, %v1410_v50  ;;  %v914_v8 = vadd.f32 %v13937_v10, %v617_v34  ;;  %v18912_v48 = vsub.s32 7, %v13104_v41  ;;  %v14215_v0 = vpack.c.bf16 %v1649_v44, %v1641_v29  ;;  %v371_v10 = vld [vmem:[#allocation5 + $0x38] sm:$0xff] }
 0x251   : > { %v14217_v22 = vpack.c.bf16 %v1666_v42, %v1658_v32  ;;  %vm1145_vm10 = vcmp.gt.f32.partialorder %v889_v57, 0.0  ;;  %v1401_v16 = vmul.f32 0.01, %v889_v57  ;;  %v1409_v20 = vmul.f32 0.01, %v897_v36  ;;  %v379_v50 = vld [vmem:[#allocation5 + $0x78] sm:$0xff] }
 0x252   : > { %19357 = vst [vmem:[#allocation89_spill] sm:$0xff] %v14215_v0  ;;  %vm1153_vm11 = vcmp.gt.f32.partialorder %v897_v36, 0.0  ;;  %v1418_v35 = vmul.f32 0.01, %v906_v13  ;;  %v1426_v51 = vmul.f32 0.01, %v914_v8  ;;  %v14222_v58 = vrot.slane %v12518_v24, %v18912_v48 }
 0x253   : > { %19358 = vst [vmem:[#allocation90_spill] sm:$0xff] %v14217_v22  ;;  %vm1162_vm12 = vcmp.gt.f32.partialorder %v906_v13, 0.0  ;;  %vm1170_vm13 = vcmp.gt.f32.partialorder %v914_v8, 0.0  ;;  %v905_v46 = vadd.f32 %v13950_v45, %v608_v40  ;;  %v1657_v34 = vsel %vm1145_vm10, %v889_v57, %v1401_v16 }
 0x254   : > { %5446 = vmatmul.mubr.bf16.gmra.mrb[40].mxu0 %v14176_v37  ;;  %6218 = vmatmul.mubr.bf16.gmra.mrb[40].mxu1 %v14176_v37  ;;  %v1665_v29 = vsel %vm1153_vm11, %v897_v36, %v1409_v20  ;;  %v913_v44 = vadd.f32 %v13950_v45, %v616_v47  ;;  %v18921_v32 = vsub.s32 6, %v13104_v41  ;;  %v1674_v42 = vsel %vm1162_vm12, %v906_v13, %v1418_v35  ;;  %v370_v13 = vld [vmem:[#allocation5 + $0x30] sm:$0xff]  ;;  %v387_v35 = vld [vmem:[#allocation5 + $0xb8] sm:$0xff] }
 0x255   : > { %5455 = vmatprep.mubr.bf16.mxu0 %v14178_v6  ;;  %6227 = vmatprep.mubr.bf16.mxu1 %v14178_v6  ;;  %v1682_v48 = vsel %vm1170_vm13, %v914_v8, %v1426_v51  ;;  %v14234_v40 = vpack.c.bf16 %v1665_v29, %v1657_v34  ;;  %vm1161_vm14 = vcmp.gt.f32.partialorder %v905_v46, 0.0  ;;  %v378_v8 = vld [vmem:[#allocation5 + $0x70] sm:$0xff]  ;;  %v395_v51 = vld [vmem:[#allocation5 + $0xf8] sm:$0xff]  ;;  %v684_v34 = vadd.f32 %v14222_v58, %v387_v35 }
 0x256   : > { %vm1169_vm15 = vcmp.gt.f32.partialorder %v913_v44, 0.0  ;;  %v1425_v57 = vmul.f32 0.01, %v913_v44  ;;  %v14240_v45 = vrot.slane %v12518_v24, %v18921_v32  ;;  %v692_v29 = vadd.f32 %v14222_v58, %v395_v51  ;;  %v1828_v6 = vld [vmem:[#allocation7 + $0x78] sm:$0xff] }
 0x257   : > { %19359 = vst [vmem:[#allocation91_spill] sm:$0xff] %v14234_v40  ;;  %vm940_vm4 = vcmp.gt.f32.partialorder %v684_v34, 0.0  ;;  %v14271_v37 = vld [vmem:[#allocation7 + $0x98] sm:$0xff] }
 0x258   : > { %v667_v47 = vadd.f32 %v14240_v45, %v370_v13  ;;  %v675_v24 = vadd.f32 %v14240_v45, %v378_v8  ;;  %v411_v8 = vld [vmem:[#allocation5 + $0x178] sm:$0xff]  ;;  %vm948_vm5 = vcmp.gt.f32.partialorder %v692_v29, 0.0 }
 0x259   : > { %v708_v51 = vadd.f32 %v14222_v58, %v411_v8 }
 0x25a   : > { %vm923_vm2 = vcmp.gt.f32.partialorder %v667_v47, 0.0  ;;  %vm931_vm3 = vcmp.gt.f32.partialorder %v675_v24, 0.0 }
 0x25b   : > { %vm964_vm9 = vcmp.gt.f32.partialorder %v708_v51, 0.0 }
 0x25c   : > { %5456 = vmatmul.mubr.bf16.gmra.mrb[44].mxu0 %v14189_v30  ;;  %6228 = vmatmul.mubr.bf16.gmra.mrb[44].mxu1 %v14189_v30  ;;  %v1824_v30 = vld [vmem:[#allocation7 + $0x58] sm:$0xff] }
 0x25d   : > { %5465 = vmatprep.mubr.bf16.mxu0 %v14191_v59  ;;  %6237 = vmatprep.mubr.bf16.mxu1 %v14191_v59  ;;  %v14236_v59 = vpack.c.bf16 %v1682_v48, %v1674_v42  ;;  %v1681_v48 = vsel %vm1169_vm15, %v913_v44, %v1425_v57  ;;  %v394_v42 = vld [vmem:[#allocation5 + $0xf0] sm:$0xff]  ;;  %v1187_v44 = vmul.f32 0.01, %v675_v24  ;;  %v403_v57 = vld [vmem:[#allocation5 + $0x138] sm:$0xff]  ;;  %v10290_v31 = vcombine.low %v1824_v30, %v1828_v6 }
 0x25f   : > { %19360 = vst [vmem:[#allocation92_spill] sm:$0xff] %v14236_v59  ;;  %v1443_v35 = vsel %vm931_vm3, %v675_v24, %v1187_v44 }
 0x264   : > { %5466 = vmatmul.mubr.bf16.gmra.mrb[48].mxu0 %v14202_v14  ;;  %6238 = vmatmul.mubr.bf16.gmra.mrb[48].mxu1 %v14202_v14  ;;  %v676_v14 = vadd.f32 %v14222_v58, %v379_v50 }
 0x265   : > { %5475 = vmatprep.mubr.bf16.mxu0 %v14204_v19  ;;  %6247 = vmatprep.mubr.bf16.mxu1 %v14204_v19  ;;  %v668_v19 = vadd.f32 %v14222_v58, %v371_v10 }
 0x266   : > { %v1188_v16 = vmul.f32 0.01, %v676_v14  ;;  %vm932_vm1 = vcmp.gt.f32.partialorder %v676_v14, 0.0 }
 0x267   : > { %v1180_v36 = vmul.f32 0.01, %v668_v19  ;;  %vm924_vm0 = vcmp.gt.f32.partialorder %v668_v19, 0.0 }
 0x268   : > { %v1444_v50 = vsel %vm932_vm1, %v676_v14, %v1188_v16  ;;  %v1204_v14 = vmul.f32 0.01, %v692_v29  ;;  %v700_v16 = vadd.f32 %v14222_v58, %v403_v57  ;;  %v1827_v57 = vld [vmem:[#allocation7 + $0x70] sm:$0xff] }
 0x269   : > { %v1436_v10 = vsel %vm924_vm0, %v668_v19, %v1180_v36  ;;  %v1196_v19 = vmul.f32 0.01, %v684_v34  ;;  %v691_v36 = vadd.f32 %v14240_v45, %v394_v42 }
 0x26a   : > { %v14252_v32 = vpack.c.bf16 %v1444_v50, %v1436_v10  ;;  %v1460_v50 = vsel %vm948_vm5, %v692_v29, %v1204_v14  ;;  %vm956_vm8 = vcmp.gt.f32.partialorder %v700_v16, 0.0  ;;  %v427_v29 = vld [vmem:[#allocation5 + $0x1f8] sm:$0xff] }
 0x26b   : > { %v1452_v10 = vsel %vm940_vm4, %v684_v34, %v1196_v19  ;;  %vm947_vm7 = vcmp.gt.f32.partialorder %v691_v36, 0.0  ;;  %v419_v34 = vld [vmem:[#allocation5 + $0x1b8] sm:$0xff] }
 0x26c   : > { %5476 = vmatmul.mubr.bf16.gmra.mrb[52].mxu0 %v14215_v0  ;;  %6248 = vmatmul.mubr.bf16.gmra.mrb[52].mxu1 %v14215_v0  ;;  %v1417_v0 = vmul.f32 0.01, %v905_v46  ;;  %19362 = vst [vmem:[#allocation94_spill] sm:$0xff] %v14252_v32  ;;  %v14264_v24 = vpack.c.bf16 %v1460_v50, %v1452_v10  ;;  %v10291_v10 = vcombine.high %v1824_v30, %v1828_v6  ;;  %v14276_v50 = vld [vmem:[#allocation7 + $0xb8] sm:$0xff] }
 0x26d   : > { %5485 = vmatprep.mubr.bf16.mxu0 %v14217_v22  ;;  %6257 = vmatprep.mubr.bf16.mxu1 %v14217_v22  ;;  %v1212_v22 = vmul.f32 0.01, %v700_v16  ;;  %v716_v6 = vadd.f32 %v14222_v58, %v419_v34 }
 0x26e   : > { %v1673_v20 = vsel %vm1161_vm14, %v905_v46, %v1417_v0  ;;  %v386_v0 = vld [vmem:[#allocation5 + $0xb0] sm:$0xff]  ;;  %19364 = vst [vmem:[#allocation96_spill] sm:$0xff] %v14264_v24 }
 0x26f   : > { %v14250_v46 = vpack.c.bf16 %v1681_v48, %v1673_v20  ;;  %v683_v13 = vadd.f32 %v14240_v45, %v386_v0  ;;  %v1203_v0 = vmul.f32 0.01, %v691_v36  ;;  %vm972_vm12 = vcmp.gt.f32.partialorder %v716_v6, 0.0 }
 0x271   : > { %19361 = vst [vmem:[#allocation93_spill] sm:$0xff] %v14250_v46  ;;  %v1195_v48 = vmul.f32 0.01, %v683_v13  ;;  %vm939_vm6 = vcmp.gt.f32.partialorder %v683_v13, 0.0  ;;  %v1459_v8 = vsel %vm947_vm7, %v691_v36, %v1203_v0  ;;  %v14278_v36 = vld [vmem:[#allocation7 + $0x410] sm:$0xff] }
 0x273   : > { %v1451_v44 = vsel %vm939_vm6, %v683_v13, %v1195_v48  ;;  %v1468_v13 = vsel %vm956_vm8, %v700_v16, %v1212_v22  ;;  %v14290_v22 = vld [vmem:[#allocation7 + $0x418] sm:$0xff] }
 0x274   : > { %5486 = vmatmul.mubr.bf16.gmra.mrb[56].mxu0 %v14234_v40  ;;  %6258 = vmatmul.mubr.bf16.gmra.mrb[56].mxu1 %v14234_v40  ;;  %v1179_v40 = vmul.f32 0.01, %v667_v47  ;;  %v14292_v16 = vld [vmem:[#allocation7 + $0x438] sm:$0xff]  ;;  %v14306_v34 = vpack.c.bf16 %v1459_v8, %v1451_v44 }
 0x275   : > { %5495 = vmatprep.mubr.bf16.mxu0 %v14236_v59  ;;  %6267 = vmatprep.mubr.bf16.mxu1 %v14236_v59  ;;  %v1823_v59 = vld [vmem:[#allocation7 + $0x50] sm:$0xff]  ;;  %v435_v8 = vld [vmem:[#allocation5 + $0x238] sm:$0xff] }
 0x276   : > { %v1435_v20 = vsel %vm923_vm2, %v667_v47, %v1179_v40  ;;  %v1220_v40 = vmul.f32 0.01, %v708_v51  ;;  %v410_v47 = vld [vmem:[#allocation5 + $0x170] sm:$0xff]  ;;  %v10288_v19 = vcombine.low %v1823_v59, %v1827_v57  ;;  %v10289_v14 = vcombine.high %v1823_v59, %v1827_v57  ;;  %19367 = vst [vmem:[#allocation97_spill] sm:$0xff] %v14306_v34 }
 0x277   : > { %v14262_v42 = vpack.c.bf16 %v1443_v35, %v1435_v20  ;;  %v14267_v35 = vld [vmem:[#allocation7 + $0x90] sm:$0xff]  ;;  %v707_v48 = vadd.f32 %v14240_v45, %v410_v47  ;;  %v19366_v57 = vcombine.low %v14005_v56, %v14015_v38  ;;  %v10299_v47 = vcombine.high %v14271_v37, %v14276_v50 }
 0x278   : > { %v14280_v59 = vld [vmem:[#allocation7 + $0x430] sm:$0xff]  ;;  %v1476_v0 = vsel %vm964_vm9, %v708_v51, %v1220_v40 }
 0x279   : > { %19363 = vst [vmem:[#allocation95_spill] sm:$0xff] %v14262_v42  ;;  %v1219_v56 = vmul.f32 0.01, %v707_v48  ;;  %v418_v38 = vld [vmem:[#allocation5 + $0x1b0] sm:$0xff]  ;;  %v14308_v30 = vpack.c.bf16 %v1476_v0, %v1468_v13  ;;  %vm963_vm11 = vcmp.gt.f32.partialorder %v707_v48, 0.0  ;;  %v443_v0 = vld [vmem:[#allocation5 + $0x278] sm:$0xff] }
 0x27a   : > { %v426_v51 = vld [vmem:[#allocation5 + $0x1f0] sm:$0xff] }
 0x27b   : > { %19368 = vst [vmem:[#allocation98_spill] sm:$0xff] %v14308_v30  ;;  %v723_v9 = vadd.f32 %v14240_v45, %v426_v51 }
 0x27c   : > { %5496 = vmatmul.mubr.bf16.gmra.mrb[60].mxu0 %v14250_v46  ;;  %6268 = vmatmul.mubr.bf16.gmra.mrb[60].mxu1 %v14250_v46  ;;  %v402_v46 = vld [vmem:[#allocation5 + $0x130] sm:$0xff] }
 0x27d   : > { %5538 = vmatprep.mubr.bf16.mxu0 %v14252_v32  ;;  %6310 = vmatprep.mubr.bf16.mxu1 %v14252_v32  ;;  %v699_v20 = vadd.f32 %v14240_v45, %v402_v46  ;;  %v14269_v32 = vld [vmem:[#allocation7 + $0xb0] sm:$0xff]  ;;  %v19365_v46 = vcombine.low %v14001_v3, %v14003_v39  ;;  %v724_v39 = vadd.f32 %v14222_v58, %v427_v29  ;;  %v1228_v29 = vmul.f32 0.01, %v716_v6 }
 0x27e   : > { %v10297_v3 = vcombine.high %v14267_v35, %v14269_v32  ;;  %vm979_vm15 = vcmp.gt.f32.partialorder %v723_v9, 0.0 }
 0x27f   : > { %v1211_v40 = vmul.f32 0.01, %v699_v20  ;;  %vm955_vm10 = vcmp.gt.f32.partialorder %v699_v20, 0.0  ;;  %v1236_v44 = vmul.f32 0.01, %v724_v39  ;;  %vm980_vm13 = vcmp.gt.f32.partialorder %v724_v39, 0.0 }
 0x284   : > { %5539 = vmatmul.mubr.bf16.vlgmr.msra.gmra.mrb[0].mxu0 %v14262_v42  ;;  %6311 = vmatmul.mubr.bf16.vlgmr.msra.gmra.mrb[0].mxu1 %v14262_v42  ;;  %v1840_v42 = vld [vmem:[#allocation7 + $0xd8] sm:$0xff] }
 0x285   : > { %6472 = vmatpush1.bf16.msra.mxu0 %v19365_v46  ;;  %7244 = vmatpush1.bf16.msra.mxu1 %v19366_v57  ;;  %v1839_v46 = vld [vmem:[#allocation7 + $0xd0] sm:$0xff] }
 0x286   : > { %5548 = vmatprep.mubr.bf16.mxu0 %v14264_v24  ;;  %6320 = vmatprep.mubr.bf16.mxu1 %v14264_v24  ;;  %v1843_v57 = vld [vmem:[#allocation7 + $0xf0] sm:$0xff]  ;;  %v1844_v24 = vld [vmem:[#allocation7 + $0xf8] sm:$0xff] }
 0x287   : > { %6473 = vmatprep.subr.bf16.mxu0 %v10289_v14  ;;  %7245 = vmatprep.subr.bf16.mxu1 %v10291_v10  ;;  %v10296_v14 = vcombine.low %v14267_v35, %v14269_v32  ;;  %v10298_v10 = vcombine.low %v14271_v37, %v14276_v50  ;;  %v10305_v13 = vcombine.high %v1839_v46, %v1843_v57  ;;  %v1847_v35 = vld [vmem:[#allocation7 + $0x110] sm:$0xff] }
 0x288   : > { %v10307_v32 = vcombine.high %v1840_v42, %v1844_v24  ;;  %v1475_v37 = vsel %vm963_vm11, %v707_v48, %v1219_v56  ;;  %v1484_v50 = vsel %vm972_vm12, %v716_v6, %v1228_v29  ;;  %v10304_v51 = vcombine.low %v1839_v46, %v1843_v57  ;;  %v434_v56 = vld [vmem:[#allocation5 + $0x230] sm:$0xff]  ;;  %v1856_v57 = vld [vmem:[#allocation7 + $0x158] sm:$0xff] }
 0x289   : > { %6474 = vmatpush1.bf16.msra.mxu0 %v10288_v19  ;;  %7246 = vmatpush1.bf16.msra.mxu1 %v10290_v31  ;;  %v715_v19 = vadd.f32 %v14240_v45, %v418_v38  ;;  %v1467_v31 = vsel %vm955_vm10, %v699_v20, %v1211_v40  ;;  %v1848_v38 = vld [vmem:[#allocation7 + $0x118] sm:$0xff]  ;;  %v1492_v20 = vsel %vm980_vm13, %v724_v39, %v1236_v44  ;;  %v1235_v6 = vmul.f32 0.01, %v723_v9  ;;  %v442_v46 = vld [vmem:[#allocation5 + $0x270] sm:$0xff] }
 0x28a   : > { %6475 = vmatprep.subr.bf16.mxu0 %v10297_v3  ;;  %7247 = vmatprep.subr.bf16.mxu1 %v10299_v47  ;;  %v1851_v3 = vld [vmem:[#allocation7 + $0x130] sm:$0xff]  ;;  %v732_v47 = vadd.f32 %v14222_v58, %v435_v8  ;;  %v740_v40 = vadd.f32 %v14222_v58, %v443_v0  ;;  %v10306_v21 = vcombine.low %v1840_v42, %v1844_v24  ;;  %v451_v44 = vld [vmem:[#allocation5 + $0x2b8] sm:$0xff] }
 0x28b   : > { %v10313_v63 = vcombine.high %v1847_v35, %v1851_v3  ;;  %v14326_v48 = vpack.c.bf16 %v1475_v37, %v1467_v31  ;;  %v10315_v29 = vcombine.high %v1848_v38, %v1852_v25  ;;  %v1855_v8 = vld [vmem:[#allocation7 + $0x150] sm:$0xff]  ;;  %vm971_vm14 = vcmp.gt.f32.partialorder %v715_v19, 0.0  ;;  %v459_v0 = vld [vmem:[#allocation5 + $0x2f8] sm:$0xff] }
 0x28c   : > { %5549 = vmatmul.mubr.bf16.gmra.mrb[4].mxu0 %v14306_v34  ;;  %6321 = vmatmul.mubr.bf16.gmra.mrb[4].mxu1 %v14306_v34  ;;  %v1227_v34 = vmul.f32 0.01, %v715_v19  ;;  %v1244_v39 = vmul.f32 0.01, %v732_v47  ;;  %vm988_vm0 = vcmp.gt.f32.partialorder %v732_v47, 0.0  ;;  %v10312_v24 = vcombine.low %v1847_v35, %v1851_v3  ;;  %v1864_v35 = vld [vmem:[#allocation7 + $0x198] sm:$0xff] }
 0x28d   : > { %5558 = vmatprep.mubr.bf16.mxu0 %v14308_v30  ;;  %6330 = vmatprep.mubr.bf16.mxu1 %v14308_v30  ;;  %19369 = vst [vmem:[#allocation99_spill] sm:$0xff] %v14326_v48  ;;  %v14328_v30 = vpack.c.bf16 %v1492_v20, %v1484_v50  ;;  %v1252_v42 = vmul.f32 0.01, %v740_v40  ;;  %vm996_vm1 = vcmp.gt.f32.partialorder %v740_v40, 0.0  ;;  %v10321_v31 = vcombine.high %v1855_v8, %v1859_v61  ;;  %v1863_v20 = vld [vmem:[#allocation7 + $0x190] sm:$0xff]  ;;  %v1868_v3 = vld [vmem:[#allocation7 + $0x1b8] sm:$0xff] }
 0x28e   : > { %6476 = vmatpush1.bf16.msra.mxu0 %v10296_v14  ;;  %7248 = vmatpush1.bf16.msra.mxu1 %v10298_v10  ;;  %v1860_v14 = vld [vmem:[#allocation7 + $0x178] sm:$0xff]  ;;  %v731_v10 = vadd.f32 %v14240_v45, %v434_v56  ;;  %v739_v37 = vadd.f32 %v14240_v45, %v442_v46 }
 0x28f   : > { %6477 = vmatprep.subr.bf16.mxu0 %v10305_v13  ;;  %7249 = vmatprep.subr.bf16.mxu1 %v10307_v32  ;;  %19370 = vst [vmem:[#allocation100_spill] sm:$0xff] %v14328_v30  ;;  %v10314_v13 = vcombine.low %v1848_v38, %v1852_v25  ;;  %v1483_v32 = vsel %vm971_vm14, %v715_v19, %v1227_v34 }
 0x290   : > { %v10323_v50 = vcombine.high %v1856_v57, %v1860_v14  ;;  %v748_v25 = vadd.f32 %v14222_v58, %v451_v44  ;;  %v1508_v34 = vsel %vm996_vm1, %v740_v40, %v1252_v42  ;;  %v756_v19 = vadd.f32 %v14222_v58, %v459_v0  ;;  %v1871_v44 = vld [vmem:[#allocation7 + $0x1d0] sm:$0xff]  ;;  %v475_v0 = vld [vmem:[#allocation5 + $0x378] sm:$0xff] }
 0x291   : > { %v10320_v38 = vcombine.low %v1855_v8, %v1859_v61  ;;  %v1243_v56 = vmul.f32 0.01, %v731_v10  ;;  %vm987_vm2 = vcmp.gt.f32.partialorder %v731_v10, 0.0  ;;  %v458_v42 = vld [vmem:[#allocation5 + $0x2f0] sm:$0xff]  ;;  %v1876_v61 = vld [vmem:[#allocation7 + $0x1f8] sm:$0xff]  ;;  %vm995_vm3 = vcmp.gt.f32.partialorder %v739_v37, 0.0 }
 0x292   : > { %6478 = vmatpush1.bf16.msra.mxu0 %v10304_v51  ;;  %7250 = vmatpush1.bf16.msra.mxu1 %v10306_v21  ;;  %v1867_v51 = vld [vmem:[#allocation7 + $0x1b0] sm:$0xff]  ;;  %v1491_v21 = vsel %vm979_vm15, %v723_v9, %v1235_v6  ;;  %v1260_v40 = vmul.f32 0.01, %v748_v25  ;;  %vm1004_vm4 = vcmp.gt.f32.partialorder %v748_v25, 0.0  ;;  %v1268_v8 = vmul.f32 0.01, %v756_v19 }
 0x293   : > { %6479 = vmatprep.subr.bf16.mxu0 %v10313_v63  ;;  %7251 = vmatprep.subr.bf16.mxu1 %v10315_v29  ;;  %v1500_v63 = vsel %vm988_vm0, %v732_v47, %v1244_v39  ;;  %v10322_v29 = vcombine.low %v1856_v57, %v1860_v14  ;;  %v10329_v46 = vcombine.high %v1863_v20, %v1867_v51  ;;  %v1251_v47 = vmul.f32 0.01, %v739_v37  ;;  %v450_v6 = vld [vmem:[#allocation5 + $0x2b0] sm:$0xff]  ;;  %v467_v57 = vld [vmem:[#allocation5 + $0x338] sm:$0xff] }
 0x294   : > { %5559 = vmatmul.mubr.bf16.gmra.mrb[8].mxu0 %v14326_v48  ;;  %6331 = vmatmul.mubr.bf16.gmra.mrb[8].mxu1 %v14326_v48  ;;  %v14342_v9 = vpack.c.bf16 %v1491_v21, %v1483_v32  ;;  %v10331_v39 = vcombine.high %v1864_v35, %v1868_v3  ;;  %v1875_v48 = vld [vmem:[#allocation7 + $0x1f0] sm:$0xff]  ;;  %v10328_v14 = vcombine.low %v1863_v20, %v1867_v51  ;;  %vm1012_vm5 = vcmp.gt.f32.partialorder %v756_v19, 0.0 }
 0x295   : > { %5568 = vmatprep.mubr.bf16.mxu0 %v14328_v30  ;;  %6340 = vmatprep.mubr.bf16.mxu1 %v14328_v30  ;;  %v14344_v30 = vpack.c.bf16 %v1508_v34, %v1500_v63  ;;  %v10337_v32 = vcombine.high %v1871_v44, %v1875_v48  ;;  %v755_v21 = vadd.f32 %v14240_v45, %v458_v42  ;;  %v1879_v34 = vld [vmem:[#allocation7 + $0x210] sm:$0xff] }
 0x296   : > { %6480 = vmatpush1.bf16.msra.mxu0 %v10312_v24  ;;  %7252 = vmatpush1.bf16.msra.mxu1 %v10314_v13  ;;  %19371 = vst [vmem:[#allocation101_spill] sm:$0xff] %v14342_v9  ;;  %v1872_v24 = vld [vmem:[#allocation7 + $0x1d8] sm:$0xff]  ;;  %v747_v13 = vadd.f32 %v14240_v45, %v450_v6  ;;  %v1507_v20 = vsel %vm995_vm3, %v739_v37, %v1251_v47  ;;  %v466_v47 = vld [vmem:[#allocation5 + $0x330] sm:$0xff] }
 0x297   : > { %6481 = vmatprep.subr.bf16.mxu0 %v10321_v31  ;;  %7253 = vmatprep.subr.bf16.mxu1 %v10323_v50  ;;  %19372 = vst [vmem:[#allocation102_spill] sm:$0xff] %v14344_v30  ;;  %v10330_v31 = vcombine.low %v1864_v35, %v1868_v3  ;;  %v1499_v50 = vsel %vm987_vm2, %v731_v10, %v1243_v56  ;;  %v1880_v3 = vld [vmem:[#allocation7 + $0x218] sm:$0xff]  ;;  %vm1011_vm7 = vcmp.gt.f32.partialorder %v755_v21, 0.0 }
 0x298   : > { %v10339_v63 = vcombine.high %v1872_v24, %v1876_v61  ;;  %v1516_v51 = vsel %vm1004_vm4, %v748_v25, %v1260_v40  ;;  %v764_v35 = vadd.f32 %v14222_v58, %v467_v57  ;;  %v1524_v10 = vsel %vm1012_vm5, %v756_v19, %v1268_v8  ;;  %v1887_v57 = vld [vmem:[#allocation7 + $0x250] sm:$0xff] }
 0x299   : > { %v772_v56 = vadd.f32 %v14222_v58, %v475_v0  ;;  %v1259_v6 = vmul.f32 0.01, %v747_v13  ;;  %v14358_v37 = vpack.c.bf16 %v1507_v20, %v1499_v50  ;;  %v1267_v25 = vmul.f32 0.01, %v755_v21  ;;  %v474_v8 = vld [vmem:[#allocation5 + $0x370] sm:$0xff] }
 0x29a   : > { %6482 = vmatpush1.bf16.msra.mxu0 %v10320_v38  ;;  %7254 = vmatpush1.bf16.msra.mxu1 %v10322_v29  ;;  %v1883_v38 = vld [vmem:[#allocation7 + $0x230] sm:$0xff]  ;;  %v1884_v29 = vld [vmem:[#allocation7 + $0x238] sm:$0xff]  ;;  %vm1003_vm6 = vcmp.gt.f32.partialorder %v747_v13, 0.0  ;;  %v1276_v19 = vmul.f32 0.01, %v764_v35  ;;  %vm1020_vm8 = vcmp.gt.f32.partialorder %v764_v35, 0.0  ;;  %v763_v0 = vadd.f32 %v14240_v45, %v466_v47 }
 0x29b   : > { %6483 = vmatprep.subr.bf16.mxu0 %v10329_v46  ;;  %7255 = vmatprep.subr.bf16.mxu1 %v10331_v39  ;;  %v10336_v46 = vcombine.low %v1871_v44, %v1875_v48  ;;  %v10338_v39 = vcombine.low %v1872_v24, %v1876_v61  ;;  %v10345_v42 = vcombine.high %v1879_v34, %v1883_v38  ;;  %v1892_v48 = vld [vmem:[#allocation7 + $0x278] sm:$0xff]  ;;  %v1284_v44 = vmul.f32 0.01, %v772_v56 }
 0x29c   : > { %5569 = vmatmul.mubr.bf16.gmra.mrb[12].mxu0 %v14342_v9  ;;  %6341 = vmatmul.mubr.bf16.gmra.mrb[12].mxu1 %v14342_v9  ;;  %19373 = vst [vmem:[#allocation103_spill] sm:$0xff] %v14358_v37  ;;  %v10347_v40 = vcombine.high %v1880_v3, %v1884_v29  ;;  %v1891_v9 = vld [vmem:[#allocation7 + $0x270] sm:$0xff]  ;;  %v483_v24 = vld [vmem:[#allocation5 + $0x3b8] sm:$0xff]  ;;  %v10344_v61 = vcombine.low %v1879_v34, %v1883_v38  ;;  %vm1028_vm9 = vcmp.gt.f32.partialorder %v772_v56, 0.0  ;;  %vm1019_vm10 = vcmp.gt.f32.partialorder %v763_v0, 0.0 }
 0x29d   : > { %5578 = vmatprep.mubr.bf16.mxu0 %v14344_v30  ;;  %6350 = vmatprep.mubr.bf16.mxu1 %v14344_v30  ;;  %v14360_v30 = vpack.c.bf16 %v1524_v10, %v1516_v51  ;;  %v10353_v50 = vcombine.high %v1887_v57, %v1891_v9  ;;  %v771_v20 = vadd.f32 %v14240_v45, %v474_v8  ;;  %v1895_v10 = vld [vmem:[#allocation7 + $0x290] sm:$0xff] }
 0x29e   : > { %6484 = vmatpush1.bf16.msra.mxu0 %v10328_v14  ;;  %7256 = vmatpush1.bf16.msra.mxu1 %v10330_v31  ;;  %v1888_v14 = vld [vmem:[#allocation7 + $0x258] sm:$0xff]  ;;  %v1523_v34 = vsel %vm1011_vm7, %v755_v21, %v1267_v25  ;;  %v1532_v38 = vsel %vm1020_vm8, %v764_v35, %v1276_v19  ;;  %v482_v25 = vld [vmem:[#allocation5 + $0x3b0] sm:$0xff] }
 0x29f   : > { %6485 = vmatprep.subr.bf16.mxu0 %v10337_v32  ;;  %7257 = vmatprep.subr.bf16.mxu1 %v10339_v63  ;;  %19374 = vst [vmem:[#allocation104_spill] sm:$0xff] %v14360_v30  ;;  %v491_v31 = vld [vmem:[#allocation5 + $0x3f8] sm:$0xff]  ;;  %v10346_v32 = vcombine.low %v1880_v3, %v1884_v29  ;;  %v1515_v63 = vsel %vm1003_vm6, %v747_v13, %v1259_v6  ;;  %v1283_v35 = vmul.f32 0.01, %v771_v20  ;;  %v14376_v8 = vld [vmem:[#allocation7 + $0x2d0] sm:$0xff]  ;;  %vm1027_vm11 = vcmp.gt.f32.partialorder %v771_v20, 0.0 }
 0x2a0   : > { %v10355_v51 = vcombine.high %v1888_v14, %v1892_v48  ;;  %v780_v3 = vadd.f32 %v14222_v58, %v483_v24  ;;  %v1896_v29 = vld [vmem:[#allocation7 + $0x298] sm:$0xff]  ;;  %v1540_v13 = vsel %vm1028_vm9, %v772_v56, %v1284_v44  ;;  %v788_v6 = vadd.f32 %v14222_v58, %v491_v31  ;;  %v1907_v24 = vld [vmem:[#allocation7 + $0x2f0] sm:$0xff] }
 0x2a1   : > { %v10354_v47 = vcombine.low %v1888_v14, %v1892_v48  ;;  %v14374_v21 = vpack.c.bf16 %v1523_v34, %v1515_v63  ;;  %v490_v44 = vld [vmem:[#allocation5 + $0x3f0] sm:$0xff]  ;;  %v499_v48 = vld [vmem:[#allocation5 + $0x438] sm:$0xff]  ;;  %v779_v31 = vadd.f32 %v14240_v45, %v482_v25  ;;  %v10369_v63 = vcombine.high %v14376_v8, %v1907_v24 }
 0x2a2   : > { %6486 = vmatpush1.bf16.msra.mxu0 %v10336_v46  ;;  %7258 = vmatpush1.bf16.msra.mxu1 %v10338_v39  ;;  %v1900_v46 = vld [vmem:[#allocation7 + $0x2b8] sm:$0xff]  ;;  %v10352_v39 = vcombine.low %v1887_v57, %v1891_v9  ;;  %v1292_v56 = vmul.f32 0.01, %v780_v3  ;;  %vm1036_vm12 = vcmp.gt.f32.partialorder %v780_v3, 0.0  ;;  %v1300_v14 = vmul.f32 0.01, %v788_v6 }
 0x2a3   : > { %6487 = vmatprep.subr.bf16.mxu0 %v10345_v42  ;;  %7259 = vmatprep.subr.bf16.mxu1 %v10347_v40  ;;  %v1275_v42 = vmul.f32 0.01, %v763_v0  ;;  %v10361_v40 = vcombine.high %v1895_v10, %v1899_v53  ;;  %19375 = vst [vmem:[#allocation105_spill] sm:$0xff] %v14374_v21  ;;  %v10363_v19 = vcombine.high %v1896_v29, %v1900_v46  ;;  %v1904_v9 = vld [vmem:[#allocation7 + $0x2d8] sm:$0xff]  ;;  %vm1044_vm13 = vcmp.gt.f32.partialorder %v788_v6, 0.0 }
 0x2a4   : > { %5579 = vmatmul.mubr.bf16.gmra.mrb[16].mxu0 %v14358_v37  ;;  %6351 = vmatmul.mubr.bf16.gmra.mrb[16].mxu1 %v14358_v37  ;;  %v1908_v57 = vld [vmem:[#allocation7 + $0x2f8] sm:$0xff]  ;;  %v787_v34 = vadd.f32 %v14240_v45, %v490_v44  ;;  %vm1035_vm14 = vcmp.gt.f32.partialorder %v779_v31, 0.0  ;;  %v1919_v44 = vld [vmem:[#allocation7 + $0x350] sm:$0xff] }
 0x2a5   : > { %5588 = vmatprep.mubr.bf16.mxu0 %v14360_v30  ;;  %6360 = vmatprep.mubr.bf16.mxu1 %v14360_v30  ;;  %v14378_v30 = vpack.c.bf16 %v1540_v13, %v1532_v38  ;;  %v10371_v38 = vcombine.high %v1904_v9, %v1908_v57  ;;  %v14385_v13 = vld [vmem:[#allocation7 + $0x310] sm:$0xff]  ;;  %v10370_v25 = vcombine.low %v1904_v9, %v1908_v57  ;;  %v515_v57 = vld [vmem:[#allocation5 + $0x4b8] sm:$0xff] }
 0x2a6   : > { %6488 = vmatpush1.bf16.msra.mxu0 %v10344_v61  ;;  %7260 = vmatpush1.bf16.msra.mxu1 %v10346_v32  ;;  %v10360_v61 = vcombine.low %v1895_v10, %v1899_v53  ;;  %v507_v32 = vld [vmem:[#allocation5 + $0x478] sm:$0xff]  ;;  %v1915_v53 = vld [vmem:[#allocation7 + $0x330] sm:$0xff]  ;;  %v1539_v10 = vsel %vm1027_vm11, %v771_v20, %v1283_v35  ;;  %vm1043_vm15 = vcmp.gt.f32.partialorder %v787_v34, 0.0  ;;  %v1291_v35 = vmul.f32 0.01, %v779_v31 }
 0x2a7   : > { %6489 = vmatprep.subr.bf16.mxu0 %v10353_v50  ;;  %7261 = vmatprep.subr.bf16.mxu1 %v10355_v51  ;;  %19376 = vst [vmem:[#allocation106_spill] sm:$0xff] %v14378_v30  ;;  %v10362_v50 = vcombine.low %v1896_v29, %v1900_v46  ;;  %v1531_v51 = vsel %vm1019_vm10, %v763_v0, %v1275_v42  ;;  %v1931_v37 = vld [vmem:[#allocation7 + $0x3b0] sm:$0xff] }
 0x2a8   : > { %v1548_v29 = vsel %vm1036_vm12, %v780_v3, %v1292_v56  ;;  %v796_v46 = vadd.f32 %v14222_v58, %v499_v48  ;;  %v1556_v0 = vsel %vm1044_vm13, %v788_v6, %v1300_v14  ;;  %v804_v42 = vadd.f32 %v14222_v58, %v507_v32  ;;  %v1923_v6 = vld [vmem:[#allocation7 + $0x370] sm:$0xff] }
 0x2a9   : > { %v10377_v20 = vcombine.high %v14385_v13, %v1915_v53  ;;  %v14397_v3 = vpack.c.bf16 %v1539_v10, %v1531_v51  ;;  %v14399_v14 = vpack.c.bf16 %v1556_v0, %v1548_v29  ;;  %v1299_v48 = vmul.f32 0.01, %v787_v34 }
 0x2aa   : > { %6490 = vmatpush1.bf16.msra.mxu0 %v10352_v39  ;;  %7262 = vmatpush1.bf16.msra.mxu1 %v10354_v47  ;;  %v1912_v39 = vld [vmem:[#allocation7 + $0x318] sm:$0xff]  ;;  %vm1052_vm0 = vcmp.gt.f32.partialorder %v796_v46, 0.0  ;;  %v1308_v32 = vmul.f32 0.01, %v796_v46  ;;  %v1316_v9 = vmul.f32 0.01, %v804_v42  ;;  %v10385_v10 = vcombine.high %v1919_v44, %v1923_v6 }
 0x2ab   : > { %6491 = vmatprep.subr.bf16.mxu0 %v10361_v40  ;;  %7263 = vmatprep.subr.bf16.mxu1 %v10363_v19  ;;  %v1916_v47 = vld [vmem:[#allocation7 + $0x338] sm:$0xff]  ;;  %v10368_v40 = vcombine.low %v14376_v8, %v1907_v24  ;;  %19377 = vst [vmem:[#allocation107_spill] sm:$0xff] %v14397_v3  ;;  %v498_v19 = vld [vmem:[#allocation5 + $0x430] sm:$0xff]  ;;  %19378 = vst [vmem:[#allocation108_spill] sm:$0xff] %v14399_v14  ;;  %vm1060_vm1 = vcmp.gt.f32.partialorder %v804_v42, 0.0  ;;  %v1547_v29 = vsel %vm1035_vm14, %v779_v31, %v1291_v35 }
 0x2ac   : > { %5589 = vmatmul.mubr.bf16.gmra.mrb[20].mxu0 %v14374_v21  ;;  %6361 = vmatmul.mubr.bf16.gmra.mrb[20].mxu1 %v14374_v21  ;;  %v10379_v56 = vcombine.high %v1912_v39, %v1916_v47  ;;  %v506_v8 = vld [vmem:[#allocation5 + $0x470] sm:$0xff]  ;;  %v1920_v24 = vld [vmem:[#allocation7 + $0x358] sm:$0xff]  ;;  %v795_v51 = vadd.f32 %v14240_v45, %v498_v19  ;;  %v1564_v31 = vsel %vm1052_vm0, %v796_v46, %v1308_v32 }
 0x2ad   : > { %5598 = vmatprep.mubr.bf16.mxu0 %v14378_v30  ;;  %6370 = vmatprep.mubr.bf16.mxu1 %v14378_v30  ;;  %v803_v0 = vadd.f32 %v14240_v45, %v506_v8  ;;  %v1927_v21 = vld [vmem:[#allocation7 + $0x390] sm:$0xff] }
 0x2ae   : > { %6492 = vmatpush1.bf16.msra.mxu0 %v10360_v61  ;;  %7264 = vmatpush1.bf16.msra.mxu1 %v10362_v50  ;;  %v1924_v61 = vld [vmem:[#allocation7 + $0x378] sm:$0xff]  ;;  %vm1051_vm2 = vcmp.gt.f32.partialorder %v795_v51, 0.0  ;;  %v1307_v35 = vmul.f32 0.01, %v795_v51  ;;  %v514_v8 = vld [vmem:[#allocation5 + $0x4b0] sm:$0xff] }
 0x2af   : > { %6493 = vmatprep.subr.bf16.mxu0 %v10369_v63  ;;  %7265 = vmatprep.subr.bf16.mxu1 %v10371_v38  ;;  %v523_v50 = vld [vmem:[#allocation5 + $0x4f8] sm:$0xff]  ;;  %v10376_v63 = vcombine.low %v14385_v13, %v1915_v53  ;;  %v10378_v38 = vcombine.low %v1912_v39, %v1916_v47  ;;  %v10387_v30 = vcombine.high %v1920_v24, %v1924_v61  ;;  %vm1059_vm3 = vcmp.gt.f32.partialorder %v803_v0, 0.0 }
 0x2b0   : > { %v1555_v13 = vsel %vm1043_vm15, %v787_v34, %v1299_v48  ;;  %v812_v53 = vadd.f32 %v14222_v58, %v515_v57  ;;  %v820_v39 = vadd.f32 %v14222_v58, %v523_v50  ;;  %v1928_v47 = vld [vmem:[#allocation7 + $0x398] sm:$0xff]  ;;  %v10386_v19 = vcombine.low %v1920_v24, %v1924_v61  ;;  %v1935_v50 = vld [vmem:[#allocation7 + $0x3d0] sm:$0xff] }
 0x2b1   : > { %v10393_v34 = vcombine.high %v1927_v21, %v1931_v37  ;;  %v1315_v48 = vmul.f32 0.01, %v803_v0  ;;  %v10392_v24 = vcombine.low %v1927_v21, %v1931_v37  ;;  %v1563_v61 = vsel %vm1051_vm2, %v795_v51, %v1307_v35 }
 0x2b2   : > { %6494 = vmatpush1.bf16.msra.mxu0 %v10368_v40  ;;  %7266 = vmatpush1.bf16.msra.mxu1 %v10370_v25  ;;  %v1932_v40 = vld [vmem:[#allocation7 + $0x3b8] sm:$0xff]  ;;  %v1572_v25 = vsel %vm1060_vm1, %v804_v42, %v1316_v9  ;;  %v1324_v42 = vmul.f32 0.01, %v812_v53  ;;  %v1332_v32 = vmul.f32 0.01, %v820_v39  ;;  %vm1068_vm4 = vcmp.gt.f32.partialorder %v812_v53, 0.0 }
 0x2b3   : > { %6495 = vmatprep.subr.bf16.mxu0 %v10377_v20  ;;  %7267 = vmatprep.subr.bf16.mxu1 %v10379_v56  ;;  %v10384_v20 = vcombine.low %v1919_v44, %v1923_v6  ;;  %v14414_v56 = vpack.c.bf16 %v1555_v13, %v1547_v29  ;;  %v10395_v57 = vcombine.high %v1928_v47, %v1932_v40  ;;  %v1936_v44 = vld [vmem:[#allocation7 + $0x3d8] sm:$0xff]  ;;  %vm1076_vm5 = vcmp.gt.f32.partialorder %v820_v39, 0.0  ;;  %v522_v9 = vld [vmem:[#allocation5 + $0x4f0] sm:$0xff] }
 0x2b4   : > { %5599 = vmatmul.mubr.bf16.gmra.mrb[24].mxu0 %v14397_v3  ;;  %6371 = vmatmul.mubr.bf16.gmra.mrb[24].mxu1 %v14397_v3  ;;  %v14416_v46 = vpack.c.bf16 %v1572_v25, %v1564_v31  ;;  %v1940_v6 = vld [vmem:[#allocation7 + $0x3f8] sm:$0xff]  ;;  %v1571_v29 = vsel %vm1059_vm3, %v803_v0, %v1315_v48  ;;  %v811_v13 = vadd.f32 %v14240_v45, %v514_v8  ;;  %v530_v48 = vld [vmem:[#allocation5 + $0x530] sm:$0xff] }
 0x2b5   : > { %5608 = vmatprep.mubr.bf16.mxu0 %v14399_v14  ;;  %6380 = vmatprep.mubr.bf16.mxu1 %v14399_v14  ;;  %19379 = vst [vmem:[#allocation109_spill] sm:$0xff] %v14414_v56  ;;  %v1939_v14 = vld [vmem:[#allocation7 + $0x3f0] sm:$0xff]  ;;  %v10403_v31 = vcombine.high %v1936_v44, %v1940_v6  ;;  %v1580_v37 = vsel %vm1068_vm4, %v812_v53, %v1324_v42  ;;  %v555_v42 = vld [vmem:[#allocation5 + $0x5f8] sm:$0xff] }
 0x2b6   : > { %6496 = vmatpush1.bf16.msra.mxu0 %v10376_v63  ;;  %7268 = vmatpush1.bf16.msra.mxu1 %v10378_v38  ;;  %19380 = vst [vmem:[#allocation110_spill] sm:$0xff] %v14416_v46  ;;  %v531_v63 = vld [vmem:[#allocation5 + $0x538] sm:$0xff]  ;;  %v1588_v21 = vsel %vm1076_vm5, %v820_v39, %v1332_v32  ;;  %v819_v51 = vadd.f32 %v14240_v45, %v522_v9  ;;  %vm1067_vm6 = vcmp.gt.f32.partialorder %v811_v13, 0.0 }
 0x2b7   : > { %6497 = vmatprep.subr.bf16.mxu0 %v10385_v10  ;;  %7269 = vmatprep.subr.bf16.mxu1 %v10387_v30  ;;  %v539_v38 = vld [vmem:[#allocation5 + $0x578] sm:$0xff]  ;;  %v10394_v30 = vcombine.low %v1928_v47, %v1932_v40  ;;  %v10401_v10 = vcombine.high %v1935_v50, %v1939_v14  ;;  %v828_v47 = vadd.f32 %v14222_v58, %v531_v63 }
 0x2b8   : > { %v836_v0 = vadd.f32 %v14222_v58, %v539_v38  ;;  %v10400_v40 = vcombine.low %v1935_v50, %v1939_v14  ;;  %v10402_v25 = vcombine.low %v1936_v44, %v1940_v6  ;;  %v14432_v35 = vpack.c.bf16 %v1571_v29, %v1563_v61  ;;  %v547_v50 = vld [vmem:[#allocation5 + $0x5b8] sm:$0xff] }
 0x2b9   : > { %v10411_v53 = vcombine.high %v14290_v22, %v14292_v16  ;;  %v14436_v39 = vpack.c.bf16 %v1588_v21, %v1580_v37  ;;  %vm1075_vm7 = vcmp.gt.f32.partialorder %v819_v51, 0.0  ;;  %v1340_v14 = vmul.f32 0.01, %v828_v47  ;;  %v546_v21 = vld [vmem:[#allocation5 + $0x5b0] sm:$0xff] }
 0x2ba   : > { %6498 = vmatpush1.bf16.msra.mxu0 %v10384_v20  ;;  %7270 = vmatpush1.bf16.msra.mxu1 %v10386_v19  ;;  %v10409_v20 = vcombine.high %v14278_v36, %v14280_v59  ;;  %19381 = vst [vmem:[#allocation111_spill] sm:$0xff] %v14432_v35  ;;  %v1323_v19 = vmul.f32 0.01, %v811_v13  ;;  %v1348_v8 = vmul.f32 0.01, %v836_v0  ;;  %vm1084_vm8 = vcmp.gt.f32.partialorder %v828_v47, 0.0 }
 0x2bb   : > { %6499 = vmatprep.subr.bf16.mxu0 %v10393_v34  ;;  %7271 = vmatprep.subr.bf16.mxu1 %v10395_v57  ;;  %19382 = vst [vmem:[#allocation112_spill] sm:$0xff] %v14436_v39  ;;  %v1331_v34 = vmul.f32 0.01, %v819_v51  ;;  %v538_v57 = vld [vmem:[#allocation5 + $0x570] sm:$0xff]  ;;  %vm1092_vm9 = vcmp.gt.f32.partialorder %v836_v0, 0.0  ;;  %v827_v32 = vadd.f32 %v14240_v45, %v530_v48  ;;  %v844_v63 = vadd.f32 %v14222_v58, %v547_v50 }
 0x2bc   : > { %5609 = vmatmul.mubr.bf16.gmra.mrb[28].mxu0 %v14414_v56  ;;  %6381 = vmatmul.mubr.bf16.gmra.mrb[28].mxu1 %v14414_v56  ;;  %v1579_v44 = vsel %vm1067_vm6, %v811_v13, %v1323_v19  ;;  %v835_v9 = vadd.f32 %v14240_v45, %v538_v57  ;;  %v1604_v61 = vsel %vm1092_vm9, %v836_v0, %v1348_v8  ;;  %v571_v0 = vld [vmem:[#allocation5 + $0x678] sm:$0xff] }
 0x2bd   : > { %5618 = vmatprep.mubr.bf16.mxu0 %v14416_v46  ;;  %6390 = vmatprep.mubr.bf16.mxu1 %v14416_v46  ;;  %v1587_v6 = vsel %vm1075_vm7, %v819_v51, %v1331_v34  ;;  %v852_v38 = vadd.f32 %v14222_v58, %v555_v42  ;;  %vm1083_vm10 = vcmp.gt.f32.partialorder %v827_v32, 0.0  ;;  %v554_v51 = vld [vmem:[#allocation5 + $0x5f0] sm:$0xff]  ;;  %vm1100_vm12 = vcmp.gt.f32.partialorder %v844_v63, 0.0 }
 0x2be   : > { %6500 = vmatpush1.bf16.msra.mxu0 %v10392_v24  ;;  %7272 = vmatpush1.bf16.msra.mxu1 %v10394_v30  ;;  %v1596_v24 = vsel %vm1084_vm8, %v828_v47, %v1340_v14  ;;  %v14448_v30 = vpack.c.bf16 %v1587_v6, %v1579_v44  ;;  %vm1091_vm11 = vcmp.gt.f32.partialorder %v835_v9, 0.0  ;;  %v1347_v13 = vmul.f32 0.01, %v835_v9  ;;  %v563_v47 = vld [vmem:[#allocation5 + $0x638] sm:$0xff] }
 0x2bf   : > { %6501 = vmatprep.subr.bf16.mxu0 %v10401_v10  ;;  %7273 = vmatprep.subr.bf16.mxu1 %v10403_v31  ;;  %v1339_v10 = vmul.f32 0.01, %v827_v32  ;;  %v14450_v29 = vpack.c.bf16 %v1604_v61, %v1596_v24  ;;  %v1356_v31 = vmul.f32 0.01, %v844_v63  ;;  %v1364_v37 = vmul.f32 0.01, %v852_v38 }
 0x2c0   : > { %19383 = vst [vmem:[#allocation113_spill] sm:$0xff] %v14448_v30  ;;  %vm1108_vm13 = vcmp.gt.f32.partialorder %v852_v38, 0.0  ;;  %v860_v48 = vadd.f32 %v14222_v58, %v563_v47  ;;  %v868_v14 = vadd.f32 %v14222_v58, %v571_v0  ;;  %v579_v24 = vld [vmem:[#allocation5 + $0x6b8] sm:$0xff] }
 0x2c1   : > { %19384 = vst [vmem:[#allocation114_spill] sm:$0xff] %v14450_v29  ;;  %v1612_v19 = vsel %vm1100_vm12, %v844_v63, %v1356_v31  ;;  %v1620_v34 = vsel %vm1108_vm13, %v852_v38, %v1364_v37  ;;  %v587_v61 = vld [vmem:[#allocation5 + $0x6f8] sm:$0xff] }
 0x2c2   : > { %6502 = vmatpush1.bf16.msra.mxu0 %v10400_v40  ;;  %7274 = vmatpush1.bf16.msra.mxu1 %v10402_v25  ;;  %v1595_v40 = vsel %vm1083_vm10, %v827_v32, %v1339_v10  ;;  %v1603_v25 = vsel %vm1091_vm11, %v835_v9, %v1347_v13  ;;  %v14462_v57 = vpack.c.bf16 %v1620_v34, %v1612_v19  ;;  %v562_v32 = vld [vmem:[#allocation5 + $0x630] sm:$0xff]  ;;  %v1372_v44 = vmul.f32 0.01, %v860_v48 }
 0x2c3   : > { %6664 = vmatprep.subr.bf16.mxu0 %v10409_v20  ;;  %7436 = vmatprep.subr.bf16.mxu1 %v10411_v53  ;;  %v843_v20 = vadd.f32 %v14240_v45, %v546_v21  ;;  %v851_v53 = vadd.f32 %v14240_v45, %v554_v51  ;;  %v14460_v8 = vpack.c.bf16 %v1603_v25, %v1595_v40  ;;  %v1380_v6 = vmul.f32 0.01, %v868_v14  ;;  %v570_v9 = vld [vmem:[#allocation5 + $0x670] sm:$0xff] }
 0x2c4   : > { %5619 = vmatmul.mubr.bf16.gmra.mrb[32].mxu0 %v14432_v35  ;;  %6391 = vmatmul.mubr.bf16.gmra.mrb[32].mxu1 %v14432_v35  ;;  %19386 = vst [vmem:[#allocation116_spill] sm:$0xff] %v14462_v57  ;;  %vm1116_vm0 = vcmp.gt.f32.partialorder %v860_v48, 0.0  ;;  %vm1124_vm1 = vcmp.gt.f32.partialorder %v868_v14, 0.0  ;;  %v859_v63 = vadd.f32 %v14240_v45, %v562_v32  ;;  %v867_v13 = vadd.f32 %v14240_v45, %v570_v9  ;;  %v578_v19 = vld [vmem:[#allocation5 + $0x6b0] sm:$0xff] }
 0x2c5   : > { %5628 = vmatprep.mubr.bf16.mxu0 %v14436_v39  ;;  %6400 = vmatprep.mubr.bf16.mxu1 %v14436_v39  ;;  %19385 = vst [vmem:[#allocation115_spill] sm:$0xff] %v14460_v8  ;;  %vm1099_vm14 = vcmp.gt.f32.partialorder %v843_v20, 0.0  ;;  %v1355_v50 = vmul.f32 0.01, %v843_v20  ;;  %v1363_v42 = vmul.f32 0.01, %v851_v53  ;;  %v1628_v31 = vsel %vm1116_vm0, %v860_v48, %v1372_v44 }
 0x2c6   : > { %vm1107_vm15 = vcmp.gt.f32.partialorder %v851_v53, 0.0  ;;  %v1636_v37 = vsel %vm1124_vm1, %v868_v14, %v1380_v6  ;;  %v876_v21 = vadd.f32 %v14222_v58, %v579_v24  ;;  %v884_v51 = vadd.f32 %v14222_v58, %v587_v61  ;;  %v586_v34 = vld [vmem:[#allocation5 + $0x6f0] sm:$0xff]  ;;  %v595_v48 = vld [vmem:[#allocation5 + $0x738] sm:$0xff] }
 0x2c7   : > { %v1611_v38 = vsel %vm1099_vm14, %v843_v20, %v1355_v50  ;;  %v1619_v10 = vsel %vm1107_vm15, %v851_v53, %v1363_v42  ;;  %v1371_v0 = vmul.f32 0.01, %v859_v63  ;;  %v14475_v40 = vpack.c.bf16 %v1636_v37, %v1628_v31  ;;  %v603_v14 = vld [vmem:[#allocation5 + $0x778] sm:$0xff]  ;;  %v14765_v39 = vld [vmem:[#allocation7 + $0xc10] sm:$0xff] }
 0x2c8   : > { %v14473_v47 = vpack.c.bf16 %v1619_v10, %v1611_v38  ;;  %vm1115_vm2 = vcmp.gt.f32.partialorder %v859_v63, 0.0  ;;  %vm1123_vm3 = vcmp.gt.f32.partialorder %v867_v13, 0.0  ;;  %v1379_v25 = vmul.f32 0.01, %v867_v13  ;;  %v14767_v35 = vld [vmem:[#allocation7 + $0xc30] sm:$0xff] }
 0x2c9   : > { %19388 = vst [vmem:[#allocation118_spill] sm:$0xff] %v14475_v40  ;;  %v1388_v20 = vmul.f32 0.01, %v876_v21  ;;  %v1396_v53 = vmul.f32 0.01, %v884_v51  ;;  %vm1132_vm4 = vcmp.gt.f32.partialorder %v876_v21, 0.0  ;;  %v1627_v50 = vsel %vm1115_vm2, %v859_v63, %v1371_v0 }
 0x2ca   : > { %19387 = vst [vmem:[#allocation117_spill] sm:$0xff] %v14473_v47  ;;  %vm1140_vm5 = vcmp.gt.f32.partialorder %v884_v51, 0.0  ;;  %v1635_v42 = vsel %vm1123_vm3, %v867_v13, %v1379_v25  ;;  %v875_v32 = vadd.f32 %v14240_v45, %v578_v19  ;;  %v883_v44 = vadd.f32 %v14240_v45, %v586_v34  ;;  %v594_v13 = vld [vmem:[#allocation5 + $0x730] sm:$0xff]  ;;  %19433 = vst [vmem:[#allocation133_spill] sm:$0xff] %v14767_v35 }
 0x2cb   : > { %v1644_v6 = vsel %vm1132_vm4, %v876_v21, %v1388_v20  ;;  %v1652_v9 = vsel %vm1140_vm5, %v884_v51, %v1396_v53  ;;  %v892_v24 = vadd.f32 %v14222_v58, %v595_v48  ;;  %v900_v61 = vadd.f32 %v14222_v58, %v603_v14  ;;  %v602_v25 = vld [vmem:[#allocation5 + $0x770] sm:$0xff]  ;;  %v611_v21 = vld [vmem:[#allocation5 + $0x7b8] sm:$0xff] }
 0x2cc   : > { %5629 = vmatmul.mubr.bf16.gmra.mrb[36].mxu0 %v14448_v30  ;;  %6401 = vmatmul.mubr.bf16.gmra.mrb[36].mxu1 %v14448_v30  ;;  %v14485_v38 = vpack.c.bf16 %v1635_v42, %v1627_v50  ;;  %v14487_v63 = vpack.c.bf16 %v1652_v9, %v1644_v6  ;;  %vm1131_vm6 = vcmp.gt.f32.partialorder %v875_v32, 0.0  ;;  %v1387_v10 = vmul.f32 0.01, %v875_v32  ;;  %v619_v51 = vld [vmem:[#allocation5 + $0x7f8] sm:$0xff] }
 0x2cd   : > { %5638 = vmatprep.mubr.bf16.mxu0 %v14450_v29  ;;  %6410 = vmatprep.mubr.bf16.mxu1 %v14450_v29  ;;  %v1395_v31 = vmul.f32 0.01, %v883_v44  ;;  %vm1139_vm7 = vcmp.gt.f32.partialorder %v883_v44, 0.0  ;;  %v1404_v37 = vmul.f32 0.01, %v892_v24  ;;  %vm1148_vm8 = vcmp.gt.f32.partialorder %v892_v24, 0.0 }
 0x2ce   : > { %19389 = vst [vmem:[#allocation119_spill] sm:$0xff] %v14485_v38  ;;  %19390 = vst [vmem:[#allocation120_spill] sm:$0xff] %v14487_v63  ;;  %v1412_v0 = vmul.f32 0.01, %v900_v61  ;;  %vm1156_vm9 = vcmp.gt.f32.partialorder %v900_v61, 0.0  ;;  %v891_v20 = vadd.f32 %v14240_v45, %v594_v13  ;;  %v1643_v53 = vsel %vm1131_vm6, %v875_v32, %v1387_v10  ;;  %v610_v10 = vld [vmem:[#allocation5 + $0x7b0] sm:$0xff] }
 0x2cf   : > { %v1651_v19 = vsel %vm1139_vm7, %v883_v44, %v1395_v31  ;;  %v899_v34 = vadd.f32 %v14240_v45, %v602_v25  ;;  %v1660_v48 = vsel %vm1148_vm8, %v892_v24, %v1404_v37  ;;  %v908_v50 = vadd.f32 %v14222_v58, %v611_v21  ;;  %v618_v31 = vld [vmem:[#allocation5 + $0x7f0] sm:$0xff] }
 0x2d0   : > { %v1668_v14 = vsel %vm1156_vm9, %v900_v61, %v1412_v0  ;;  %v916_v42 = vadd.f32 %v14222_v58, %v619_v51  ;;  %v14498_v6 = vpack.c.bf16 %v1651_v19, %v1643_v53  ;;  %v1403_v9 = vmul.f32 0.01, %v891_v20  ;;  %v19431_v29 = vld [vmem:[#allocation31_spill] sm:$0xff]  ;;  %v19436_v56 = vld [vmem:[#allocation32_spill] sm:$0xff] }
 0x2d1   : > { %v14500_v13 = vpack.c.bf16 %v1668_v14, %v1660_v48  ;;  %vm1147_vm10 = vcmp.gt.f32.partialorder %v891_v20, 0.0  ;;  %vm1155_vm11 = vcmp.gt.f32.partialorder %v899_v34, 0.0  ;;  %v1420_v32 = vmul.f32 0.01, %v908_v50  ;;  %v1955_v48 = vld [vmem:[#allocation7 + $0x470] sm:$0xff]  ;;  %v1952_v14 = vld [vmem:[#allocation7 + $0x458] sm:$0xff] }
 0x2d2   : > { %19391 = vst [vmem:[#allocation121_spill] sm:$0xff] %v14498_v6  ;;  %v1428_v44 = vmul.f32 0.01, %v916_v42  ;;  %vm1164_vm12 = vcmp.gt.f32.partialorder %v908_v50, 0.0  ;;  %vm1172_vm13 = vcmp.gt.f32.partialorder %v916_v42, 0.0  ;;  %v1659_v24 = vsel %vm1147_vm10, %v891_v20, %v1403_v9  ;;  %v1959_v9 = vld [vmem:[#allocation7 + $0x490] sm:$0xff] }
 0x2d3   : > { %19392 = vst [vmem:[#allocation122_spill] sm:$0xff] %v14500_v13  ;;  %v907_v61 = vadd.f32 %v14240_v45, %v610_v10  ;;  %v915_v37 = vadd.f32 %v14240_v45, %v618_v31  ;;  %v1676_v0 = vsel %vm1164_vm12, %v908_v50, %v1420_v32  ;;  %v1956_v50 = vld [vmem:[#allocation7 + $0x478] sm:$0xff]  ;;  %v1963_v32 = vld [vmem:[#allocation7 + $0x4b0] sm:$0xff]  ;;  %19432 = vst [vmem:[#allocation31_spill] sm:$0xff] %v14765_v39 }
 0x2d4   : > { %5639 = vmatmul.mubr.bf16.gmra.mrb[40].mxu0 %v14460_v8  ;;  %6411 = vmatmul.mubr.bf16.gmra.mrb[40].mxu1 %v14460_v8  ;;  %v1684_v25 = vsel %vm1172_vm13, %v916_v42, %v1428_v44  ;;  %v10419_v44 = vcombine.high %v1952_v14, %v1956_v50  ;;  %v1960_v10 = vld [vmem:[#allocation7 + $0x498] sm:$0xff] }
 0x2d5   : > { %5648 = vmatprep.mubr.bf16.mxu0 %v14462_v57  ;;  %6420 = vmatprep.mubr.bf16.mxu1 %v14462_v57  ;;  %v14510_v51 = vpack.c.bf16 %v1684_v25, %v1676_v0  ;;  %v1419_v53 = vmul.f32 0.01, %v907_v61  ;;  %v1427_v19 = vmul.f32 0.01, %v915_v37  ;;  %vm1163_vm14 = vcmp.gt.f32.partialorder %v907_v61, 0.0  ;;  %v1964_v31 = vld [vmem:[#allocation7 + $0x4b8] sm:$0xff] }
 0x2d6   : > { %vm1171_vm15 = vcmp.gt.f32.partialorder %v915_v37, 0.0  ;;  %v10427_v0 = vcombine.high %v1960_v10, %v1964_v31  ;;  %v1967_v25 = vld [vmem:[#allocation7 + $0x4d0] sm:$0xff] }
 0x2d7   : > { %19394 = vst [vmem:[#allocation124_spill] sm:$0xff] %v14510_v51  ;;  %v1683_v45 = vsel %vm1171_vm15, %v915_v37, %v1427_v19  ;;  %v10425_v37 = vcombine.high %v1959_v9, %v1963_v32  ;;  %v14532_v19 = vld [vmem:[#allocation7 + $0x810] sm:$0xff] }
 0x2dc   : > { %5649 = vmatmul.mubr.bf16.gmra.mrb[44].mxu0 %v14473_v47  ;;  %6421 = vmatmul.mubr.bf16.gmra.mrb[44].mxu1 %v14473_v47 }
 0x2dd   : > { %5658 = vmatprep.mubr.bf16.mxu0 %v14475_v40  ;;  %6430 = vmatprep.mubr.bf16.mxu1 %v14475_v40 }
 0x2e4   : > { %5659 = vmatmul.mubr.bf16.gmra.mrb[48].mxu0 %v14485_v38  ;;  %6431 = vmatmul.mubr.bf16.gmra.mrb[48].mxu1 %v14485_v38  ;;  %v1411_v38 = vmul.f32 0.01, %v899_v34 }
 0x2e5   : > { %5668 = vmatprep.mubr.bf16.mxu0 %v14487_v63  ;;  %6440 = vmatprep.mubr.bf16.mxu1 %v14487_v63  ;;  %v14752_v63 = vld [vmem:[#allocation7 + $0x8b8] sm:$0xff] }
 0x2e6   : > { %v1667_v58 = vsel %vm1155_vm11, %v899_v34, %v1411_v38  ;;  %v1675_v38 = vsel %vm1163_vm14, %v907_v61, %v1419_v53  ;;  %v1951_v34 = vld [vmem:[#allocation7 + $0x450] sm:$0xff]  ;;  %v10418_v61 = vcombine.low %v1952_v14, %v1956_v50  ;;  %v1968_v53 = vld [vmem:[#allocation7 + $0x4d8] sm:$0xff] }
 0x2e7   : > { %v14508_v21 = vpack.c.bf16 %v1667_v58, %v1659_v24  ;;  %v14516_v20 = vpack.c.bf16 %v1683_v45, %v1675_v38  ;;  %v10417_v42 = vcombine.high %v1951_v34, %v1955_v48  ;;  %v19396_v24 = vcombine.low %v14278_v36, %v14280_v59  ;;  %v1972_v36 = vld [vmem:[#allocation7 + $0x4f8] sm:$0xff]  ;;  %v1975_v14 = vld [vmem:[#allocation7 + $0x510] sm:$0xff] }
 0x2e8   : > { %v10416_v58 = vcombine.low %v1951_v34, %v1955_v48  ;;  %v10424_v59 = vcombine.low %v1959_v9, %v1963_v32  ;;  %v10426_v38 = vcombine.low %v1960_v10, %v1964_v31  ;;  %v14540_v34 = vld [vmem:[#allocation7 + $0x838] sm:$0xff]  ;;  %v10435_v48 = vcombine.high %v1968_v53, %v1972_v36  ;;  %v1979_v50 = vld [vmem:[#allocation7 + $0x530] sm:$0xff] }
 0x2e9   : > { %19393 = vst [vmem:[#allocation123_spill] sm:$0xff] %v14508_v21  ;;  %19395 = vst [vmem:[#allocation125_spill] sm:$0xff] %v14516_v20  ;;  %v1976_v9 = vld [vmem:[#allocation7 + $0x518] sm:$0xff]  ;;  %v10434_v10 = vcombine.low %v1968_v53, %v1972_v36  ;;  %v10441_v31 = vcombine.high %v1975_v14, %v1979_v50 }
 0x2ea   : > { %v1980_v32 = vld [vmem:[#allocation7 + $0x538] sm:$0xff] }
 0x2eb   : > { %v1992_v53 = vld [vmem:[#allocation7 + $0x598] sm:$0xff] }
 0x2ec   : > { %5669 = vmatmul.mubr.bf16.gmra.mrb[52].mxu0 %v14498_v6  ;;  %6441 = vmatmul.mubr.bf16.gmra.mrb[52].mxu1 %v14498_v6  ;;  %v1996_v36 = vld [vmem:[#allocation7 + $0x5b8] sm:$0xff]  ;;  %v14748_v6 = vld [vmem:[#allocation7 + $0x8b0] sm:$0xff] }
 0x2ed   : > { %5678 = vmatprep.mubr.bf16.mxu0 %v14500_v13  ;;  %6450 = vmatprep.mubr.bf16.mxu1 %v14500_v13 }
 0x2f4   : > { %5679 = vmatmul.mubr.bf16.gmra.mrb[56].mxu0 %v14508_v21  ;;  %6451 = vmatmul.mubr.bf16.gmra.mrb[56].mxu1 %v14508_v21 }
 0x2f5   : > { %5688 = vmatprep.mubr.bf16.mxu0 %v14510_v51  ;;  %6460 = vmatprep.mubr.bf16.mxu1 %v14510_v51 }
 0x2fc   : > { %5689 = vmatmul.mubr.bf16.gmra.mrb[60].mxu0 %v14516_v20  ;;  %6461 = vmatmul.mubr.bf16.gmra.mrb[60].mxu1 %v14516_v20  ;;  %v14742_v20 = vld [vmem:[#allocation7 + $0x890] sm:$0xff] }
 0x2fd   : > { %6503 = vmatprep.mubr.bf16.mxu0 %v13117_v18  ;;  %7275 = vmatprep.mubr.bf16.mxu1 %v13117_v18  ;;  %v19397_v18 = vcombine.low %v14290_v22, %v14292_v16  ;;  %v14534_v22 = vld [vmem:[#allocation7 + $0x830] sm:$0xff]  ;;  %v14536_v16 = vld [vmem:[#allocation7 + $0x818] sm:$0xff] }
 0x304   : > { %6504 = vmatmul.mubr.bf16.vlgmr.msra.gmra.mrb[64].mxu0 %v13140_v55  ;;  %7276 = vmatmul.mubr.bf16.vlgmr.msra.gmra.mrb[64].mxu1 %v13140_v55  ;;  %v1971_v55 = vld [vmem:[#allocation7 + $0x4f0] sm:$0xff] }
 0x305   : > { %6665 = vmatpush1.bf16.msra.mxu0 %v19396_v24  ;;  %7437 = vmatpush1.bf16.msra.mxu1 %v19397_v18  ;;  %v10443_v24 = vcombine.high %v1976_v9, %v1980_v32  ;;  %v1987_v18 = vld [vmem:[#allocation7 + $0x570] sm:$0xff] }
 0x306   : > { %6513 = vmatprep.mubr.bf16.mxu0 %v13143_v4  ;;  %7285 = vmatprep.mubr.bf16.mxu1 %v13143_v4  ;;  %v10433_v4 = vcombine.high %v1967_v25, %v1971_v55 }
 0x307   : > { %6666 = vmatprep.subr.bf16.mxu0 %v10417_v42  ;;  %7438 = vmatprep.subr.bf16.mxu1 %v10419_v44  ;;  %v10432_v44 = vcombine.low %v1967_v25, %v1971_v55  ;;  %v1991_v25 = vld [vmem:[#allocation7 + $0x590] sm:$0xff] }
 0x308   : > { %v1995_v55 = vld [vmem:[#allocation7 + $0x5b0] sm:$0xff] }
 0x309   : > { %6667 = vmatpush1.bf16.msra.mxu0 %v10416_v58  ;;  %7439 = vmatpush1.bf16.msra.mxu1 %v10418_v61  ;;  %v1983_v58 = vld [vmem:[#allocation7 + $0x550] sm:$0xff]  ;;  %v1984_v61 = vld [vmem:[#allocation7 + $0x558] sm:$0xff] }
 0x30a   : > { %6668 = vmatprep.subr.bf16.mxu0 %v10425_v37  ;;  %7440 = vmatprep.subr.bf16.mxu1 %v10427_v0  ;;  %v1988_v37 = vld [vmem:[#allocation7 + $0x578] sm:$0xff]  ;;  %v10442_v0 = vcombine.low %v1976_v9, %v1980_v32  ;;  %v10449_v42 = vcombine.high %v1983_v58, %v1987_v18 }
 0x30b   : > { %v2000_v9 = vld [vmem:[#allocation7 + $0x5d8] sm:$0xff] }
 0x30c   : > { %6514 = vmatmul.mubr.bf16.gmra.mrb[68].mxu0 %v13166_v28  ;;  %7286 = vmatmul.mubr.bf16.gmra.mrb[68].mxu1 %v13166_v28  ;;  %v10440_v28 = vcombine.low %v1975_v14, %v1979_v50  ;;  %v1999_v14 = vld [vmem:[#allocation7 + $0x5d0] sm:$0xff]  ;;  %v2004_v32 = vld [vmem:[#allocation7 + $0x5f8] sm:$0xff] }
 0x30d   : > { %6523 = vmatprep.mubr.bf16.mxu0 %v13168_v33  ;;  %7295 = vmatprep.mubr.bf16.mxu1 %v13168_v33  ;;  %v10451_v33 = vcombine.high %v1984_v61, %v1988_v37  ;;  %v2003_v50 = vld [vmem:[#allocation7 + $0x5f0] sm:$0xff] }
 0x30e   : > { %6669 = vmatpush1.bf16.msra.mxu0 %v10424_v59  ;;  %7441 = vmatpush1.bf16.msra.mxu1 %v10426_v38  ;;  %v10448_v59 = vcombine.low %v1983_v58, %v1987_v18  ;;  %v10450_v38 = vcombine.low %v1984_v61, %v1988_v37  ;;  %v2012_v58 = vld [vmem:[#allocation7 + $0x638] sm:$0xff]  ;;  %v10464_v18 = vcombine.low %v1999_v14, %v2003_v50 }
 0x30f   : > { %6670 = vmatprep.subr.bf16.mxu0 %v10433_v4  ;;  %7442 = vmatprep.subr.bf16.mxu1 %v10435_v48  ;;  %v10457_v4 = vcombine.high %v1991_v25, %v1995_v55  ;;  %v10459_v48 = vcombine.high %v1992_v53, %v1996_v36  ;;  %v10466_v61 = vcombine.low %v2000_v9, %v2004_v32 }
 0x312   : > { %6671 = vmatpush1.bf16.msra.mxu0 %v10432_v44  ;;  %7443 = vmatpush1.bf16.msra.mxu1 %v10434_v10  ;;  %v10458_v44 = vcombine.low %v1992_v53, %v1996_v36  ;;  %v10465_v10 = vcombine.high %v1999_v14, %v2003_v50 }
 0x313   : > { %6672 = vmatprep.subr.bf16.mxu0 %v10441_v31  ;;  %7444 = vmatprep.subr.bf16.mxu1 %v10443_v24  ;;  %v2007_v31 = vld [vmem:[#allocation7 + $0x610] sm:$0xff]  ;;  %v2008_v24 = vld [vmem:[#allocation7 + $0x618] sm:$0xff] }
 0x314   : > { %6524 = vmatmul.mubr.bf16.gmra.mrb[72].mxu0 %v13193_v2  ;;  %7296 = vmatmul.mubr.bf16.gmra.mrb[72].mxu1 %v13193_v2  ;;  %v10456_v2 = vcombine.low %v1991_v25, %v1995_v55  ;;  %v2016_v25 = vld [vmem:[#allocation7 + $0x658] sm:$0xff]  ;;  %v10474_v53 = vcombine.low %v2008_v24, %v2012_v58 }
 0x315   : > { %6533 = vmatprep.mubr.bf16.mxu0 %v13201_v12  ;;  %7305 = vmatprep.mubr.bf16.mxu1 %v13201_v12  ;;  %v10467_v12 = vcombine.high %v2000_v9, %v2004_v32  ;;  %v2020_v55 = vld [vmem:[#allocation7 + $0x678] sm:$0xff] }
 0x316   : > { %6673 = vmatpush1.bf16.msra.mxu0 %v10440_v28  ;;  %7445 = vmatpush1.bf16.msra.mxu1 %v10442_v0  ;;  %v10475_v28 = vcombine.high %v2008_v24, %v2012_v58  ;;  %v2015_v0 = vld [vmem:[#allocation7 + $0x650] sm:$0xff]  ;;  %v10482_v50 = vcombine.low %v2016_v25, %v2020_v55 }
 0x317   : > { %6674 = vmatprep.subr.bf16.mxu0 %v10449_v42  ;;  %7446 = vmatprep.subr.bf16.mxu1 %v10451_v33  ;;  %v2011_v42 = vld [vmem:[#allocation7 + $0x630] sm:$0xff] }
 0x318   : > { %v10473_v37 = vcombine.high %v2007_v31, %v2011_v42  ;;  %v2019_v33 = vld [vmem:[#allocation7 + $0x670] sm:$0xff] }
 0x319   : > { %v10481_v36 = vcombine.high %v2015_v0, %v2019_v33  ;;  %v10480_v14 = vcombine.low %v2015_v0, %v2019_v33  ;;  %v2039_v24 = vld [vmem:[#allocation7 + $0x710] sm:$0xff] }
 0x31a   : > { %6675 = vmatpush1.bf16.msra.mxu0 %v10448_v59  ;;  %7447 = vmatpush1.bf16.msra.mxu1 %v10450_v38  ;;  %v2023_v59 = vld [vmem:[#allocation7 + $0x690] sm:$0xff] }
 0x31b   : > { %6676 = vmatprep.subr.bf16.mxu0 %v10457_v4  ;;  %7448 = vmatprep.subr.bf16.mxu1 %v10459_v48  ;;  %v2027_v38 = vld [vmem:[#allocation7 + $0x6b0] sm:$0xff]  ;;  %v2024_v4 = vld [vmem:[#allocation7 + $0x698] sm:$0xff] }
 0x31c   : > { %6534 = vmatmul.mubr.bf16.gmra.mrb[76].mxu0 %v13243_v52  ;;  %7306 = vmatmul.mubr.bf16.gmra.mrb[76].mxu1 %v13243_v52  ;;  %v10472_v52 = vcombine.low %v2007_v31, %v2011_v42  ;;  %v2028_v48 = vld [vmem:[#allocation7 + $0x6b8] sm:$0xff]  ;;  %v10489_v9 = vcombine.high %v2023_v59, %v2027_v38  ;;  %v2043_v58 = vld [vmem:[#allocation7 + $0x730] sm:$0xff] }
 0x31d   : > { %6543 = vmatprep.mubr.bf16.mxu0 %v13247_v54  ;;  %7315 = vmatprep.mubr.bf16.mxu1 %v13247_v54  ;;  %v10483_v54 = vcombine.high %v2016_v25, %v2020_v55  ;;  %v10491_v32 = vcombine.high %v2024_v4, %v2028_v48  ;;  %v10490_v31 = vcombine.low %v2024_v4, %v2028_v48  ;;  %v2047_v25 = vld [vmem:[#allocation7 + $0x750] sm:$0xff]  ;;  %v2056_v4 = vld [vmem:[#allocation7 + $0x798] sm:$0xff] }
 0x31e   : > { %6677 = vmatpush1.bf16.msra.mxu0 %v10456_v2  ;;  %7449 = vmatpush1.bf16.msra.mxu1 %v10458_v44  ;;  %v2031_v2 = vld [vmem:[#allocation7 + $0x6d0] sm:$0xff]  ;;  %v10505_v0 = vcombine.high %v2039_v24, %v2043_v58  ;;  %v2060_v48 = vld [vmem:[#allocation7 + $0x7b8] sm:$0xff] }
 0x31f   : > { %6678 = vmatprep.subr.bf16.mxu0 %v10465_v10  ;;  %7450 = vmatprep.subr.bf16.mxu1 %v10467_v12  ;;  %v2035_v44 = vld [vmem:[#allocation7 + $0x6f0] sm:$0xff]  ;;  %v2032_v10 = vld [vmem:[#allocation7 + $0x6d8] sm:$0xff] }
 0x320   : > { %v2036_v12 = vld [vmem:[#allocation7 + $0x6f8] sm:$0xff]  ;;  %v10497_v42 = vcombine.high %v2031_v2, %v2035_v44  ;;  %v2051_v55 = vld [vmem:[#allocation7 + $0x770] sm:$0xff] }
 0x322   : > { %6679 = vmatpush1.bf16.msra.mxu0 %v10464_v18  ;;  %7451 = vmatpush1.bf16.msra.mxu1 %v10466_v61  ;;  %v2040_v18 = vld [vmem:[#allocation7 + $0x718] sm:$0xff] }
 0x323   : > { %6680 = vmatprep.subr.bf16.mxu0 %v10473_v37  ;;  %7452 = vmatprep.subr.bf16.mxu1 %v10475_v28  ;;  %v2044_v61 = vld [vmem:[#allocation7 + $0x738] sm:$0xff]  ;;  %v10496_v37 = vcombine.low %v2031_v2, %v2035_v44  ;;  %v10498_v28 = vcombine.low %v2032_v10, %v2036_v12  ;;  %v2063_v2 = vld [vmem:[#allocation7 + $0x7d0] sm:$0xff] }
 0x324   : > { %6544 = vmatmul.mubr.bf16.gmra.mrb[80].mxu0 %v13287_v23  ;;  %7316 = vmatmul.mubr.bf16.gmra.mrb[80].mxu1 %v13287_v23  ;;  %v10488_v23 = vcombine.low %v2023_v59, %v2027_v38  ;;  %v10507_v33 = vcombine.high %v2040_v18, %v2044_v61  ;;  %v2055_v59 = vld [vmem:[#allocation7 + $0x790] sm:$0xff] }
 0x325   : > { %6553 = vmatprep.mubr.bf16.mxu0 %v13293_v27  ;;  %7325 = vmatprep.mubr.bf16.mxu1 %v13293_v27  ;;  %v10499_v27 = vcombine.high %v2032_v10, %v2036_v12  ;;  %v2059_v38 = vld [vmem:[#allocation7 + $0x7b0] sm:$0xff]  ;;  %v2064_v10 = vld [vmem:[#allocation7 + $0x7d8] sm:$0xff] }
 0x326   : > { %6681 = vmatpush1.bf16.msra.mxu0 %v10472_v52  ;;  %7453 = vmatpush1.bf16.msra.mxu1 %v10474_v53  ;;  %v2048_v52 = vld [vmem:[#allocation7 + $0x758] sm:$0xff]  ;;  %v2067_v44 = vld [vmem:[#allocation7 + $0x7f0] sm:$0xff] }
 0x327   : > { %6682 = vmatprep.subr.bf16.mxu0 %v10481_v36  ;;  %7454 = vmatprep.subr.bf16.mxu1 %v10483_v54  ;;  %v2052_v53 = vld [vmem:[#allocation7 + $0x778] sm:$0xff]  ;;  %v10506_v36 = vcombine.low %v2040_v18, %v2044_v61  ;;  %v10513_v54 = vcombine.high %v2047_v25, %v2051_v55 }
 0x328   : > { %v2068_v12 = vld [vmem:[#allocation7 + $0x7f8] sm:$0xff] }
 0x329   : > { %v19400_v61 = vld [vmem:[#allocation20_spill] sm:$0xff] }
 0x32a   : > { %6683 = vmatpush1.bf16.msra.mxu0 %v10480_v14  ;;  %7455 = vmatpush1.bf16.msra.mxu1 %v10482_v50  ;;  %v10512_v14 = vcombine.low %v2047_v25, %v2051_v55  ;;  %v10514_v50 = vcombine.low %v2048_v52, %v2052_v53 }
 0x32b   : > { %6684 = vmatprep.subr.bf16.mxu0 %v10489_v9  ;;  %7456 = vmatprep.subr.bf16.mxu1 %v10491_v32  ;;  %v10521_v9 = vcombine.high %v2055_v59, %v2059_v38  ;;  %v10523_v32 = vcombine.high %v2056_v4, %v2060_v48 }
 0x32c   : > { %6554 = vmatmul.mubr.bf16.gmra.mrb[84].mxu0 %v13346_v11  ;;  %7326 = vmatmul.mubr.bf16.gmra.mrb[84].mxu1 %v13346_v11  ;;  %v10504_v11 = vcombine.low %v2039_v24, %v2043_v58  ;;  %v10537_v24 = vcombine.high %v14532_v19, %v14534_v22  ;;  %v10539_v58 = vcombine.high %v14536_v16, %v14540_v34 }
 0x32d   : > { %6563 = vmatprep.mubr.bf16.mxu0 %v13352_v15  ;;  %7335 = vmatprep.mubr.bf16.mxu1 %v13352_v15  ;;  %v10515_v15 = vcombine.high %v2048_v52, %v2052_v53 }
 0x32e   : > { %6685 = vmatpush1.bf16.msra.mxu0 %v10488_v23  ;;  %7457 = vmatpush1.bf16.msra.mxu1 %v10490_v31  ;;  %v10522_v23 = vcombine.low %v2056_v4, %v2060_v48  ;;  %v10529_v31 = vcombine.high %v2063_v2, %v2067_v44  ;;  %v19403_v4 = vsub.s32 1, %v13104_v41 }
 0x32f   : > { %6686 = vmatprep.subr.bf16.mxu0 %v10497_v42  ;;  %7458 = vmatprep.subr.bf16.mxu1 %v10499_v27  ;;  %v10528_v42 = vcombine.low %v2063_v2, %v2067_v44  ;;  %v10530_v27 = vcombine.low %v2064_v10, %v2068_v12 }
 0x332   : > { %6687 = vmatpush1.bf16.msra.mxu0 %v10496_v37  ;;  %7459 = vmatpush1.bf16.msra.mxu1 %v10498_v28 }
 0x333   : > { %6688 = vmatprep.subr.bf16.mxu0 %v10505_v0  ;;  %7460 = vmatprep.subr.bf16.mxu1 %v10507_v33 }
 0x334   : > { %6564 = vmatmul.mubr.bf16.gmra.mrb[88].mxu0 %v13416_v60  ;;  %7336 = vmatmul.mubr.bf16.gmra.mrb[88].mxu1 %v13416_v60  ;;  %v10520_v60 = vcombine.low %v2055_v59, %v2059_v38  ;;  %v19402_v38 = vld [vmem:[#allocation22_spill] sm:$0xff] }
 0x335   : > { %6573 = vmatprep.mubr.bf16.mxu0 %v13424_v1  ;;  %7345 = vmatprep.mubr.bf16.mxu1 %v13424_v1  ;;  %v10531_v1 = vcombine.high %v2064_v10, %v2068_v12 }
 0x336   : > { %6689 = vmatpush1.bf16.msra.mxu0 %v10504_v11  ;;  %7461 = vmatpush1.bf16.msra.mxu1 %v10506_v36  ;;  %v19401_v36 = vld [vmem:[#allocation21_spill] sm:$0xff] }
 0x337   : > { %6690 = vmatprep.subr.bf16.mxu0 %v10513_v54  ;;  %7462 = vmatprep.subr.bf16.mxu1 %v10515_v15 }
 0x33a   : > { %6691 = vmatpush1.bf16.msra.mxu0 %v10512_v14  ;;  %7463 = vmatpush1.bf16.msra.mxu1 %v10514_v50 }
 0x33b   : > { %6692 = vmatprep.subr.bf16.mxu0 %v10521_v9  ;;  %7464 = vmatprep.subr.bf16.mxu1 %v10523_v32 }
 0x33c   : > { %6574 = vmatmul.mubr.bf16.gmra.mrb[92].mxu0 %v13480_v43  ;;  %7346 = vmatmul.mubr.bf16.gmra.mrb[92].mxu1 %v13480_v43  ;;  %v2325_v43 = vld [vmem:[#allocation8] sm:$0xff] }
 0x33d   : > { %6583 = vmatprep.mubr.bf16.mxu0 %v13486_v49  ;;  %7355 = vmatprep.mubr.bf16.mxu1 %v13486_v49  ;;  %v19398_v49 = vsub.s32 0, %v13104_v41  ;;  %v14605_v48 = vrot.slane %v2325_v43, %v19403_v4 }
 0x33e   : > { %6693 = vmatpush1.bf16.msra.mxu0 %v10520_v60  ;;  %7465 = vmatpush1.bf16.msra.mxu1 %v10522_v23 }
 0x33f   : > { %6694 = vmatprep.subr.bf16.mxu0 %v10529_v31  ;;  %7466 = vmatprep.subr.bf16.mxu1 %v10531_v1  ;;  %v14587_v18 = vrot.slane %v2325_v43, %v19398_v49  ;;  %v19409_v49 = vsub.s32 3, %v13104_v41 }
 0x342   : > { %6695 = vmatpush1.bf16.msra.mxu0 %v10528_v42  ;;  %7467 = vmatpush1.bf16.msra.mxu1 %v10530_v27 }
 0x343   : > { %6857 = vmatprep.subr.bf16.mxu0 %v10537_v24  ;;  %7629 = vmatprep.subr.bf16.mxu1 %v10539_v58  ;;  %v19408_v58 = vld [vmem:[#allocation23_spill] sm:$0xff] }
 0x344   : > { %6584 = vmatmul.mubr.bf16.gmra.mrb[96].mxu0 %v13509_v26  ;;  %7356 = vmatmul.mubr.bf16.gmra.mrb[96].mxu1 %v13509_v26  ;;  %v19399_v26 = vsub.s32 2, %v13104_v41  ;;  %v19419_v41 = vld [vmem:[#allocation28_spill] sm:$0xff] }
 0x345   : > { %6593 = vmatprep.mubr.bf16.mxu0 %v13515_v17  ;;  %7365 = vmatprep.mubr.bf16.mxu1 %v13515_v17 }
 0x346   : > { %v14592_v17 = vrot.slane %v2325_v43, %v19399_v26  ;;  %v14633_v26 = vrot.slane %v2325_v43, %v19409_v49 }
 0x34c   : > { %6594 = vmatmul.mubr.bf16.gmra.mrb[100].mxu0 %v13529_v62  ;;  %7366 = vmatmul.mubr.bf16.gmra.mrb[100].mxu1 %v13529_v62 }
 0x34d   : > { %6603 = vmatprep.mubr.bf16.mxu0 %v13531_v7  ;;  %7375 = vmatprep.mubr.bf16.mxu1 %v13531_v7 }
 0x354   : > { %6604 = vmatmul.mubr.bf16.gmra.mrb[104].mxu0 %v13542_v5  ;;  %7376 = vmatmul.mubr.bf16.gmra.mrb[104].mxu1 %v13542_v5 }
 0x355   : > { %6613 = vmatprep.mubr.bf16.mxu0 %v19400_v61  ;;  %7385 = vmatprep.mubr.bf16.mxu1 %v19400_v61 }
 0x357   : > { %v5540_v62 = vpop.f32.mrb[0].mxu0  ;;  %v6312_v37 = vpop.f32.mrb[0].mxu1 }
 0x358   : > { %v11308_v7 = vadd.f32 %v5540_v62, %v14587_v18  ;;  %v5542_v28 = vpop.f32.mrb[1].mxu0  ;;  %v11372_v0 = vadd.f32 %v6312_v37, %v14592_v17  ;;  %v6314_v33 = vpop.f32.mrb[1].mxu1 }
 0x359   : > { %v5544_v25 = vpop.f32.mrb[2].mxu0  ;;  %v6316_v5 = vpop.f32.mrb[2].mxu1  ;;  %v11309_v31 = vadd.f32 %v5542_v28, %v14605_v48 }
 0x35a   : > { %v11310_v55 = vadd.f32 %v5544_v25, %v14587_v18  ;;  %v5546_v52 = vpop.f32.mrb[3].mxu0  ;;  %v8271_v53 = vmul.f32 0.01, %v11308_v7  ;;  %vm8015_vm0 = vcmp.gt.f32.partialorder %v11308_v7, 0.0  ;;  %v6318_v11 = vpop.f32.mrb[3].mxu1  ;;  %v11374_v59 = vadd.f32 %v6316_v5, %v14592_v17 }
 0x35b   : > { %v8273_v54 = vmul.f32 0.01, %v11372_v0  ;;  %vm8017_vm2 = vcmp.gt.f32.partialorder %v11372_v0, 0.0  ;;  %v11311_v42 = vadd.f32 %v5546_v52, %v14605_v48  ;;  %v8272_v37 = vmul.f32 0.01, %v11309_v31 }
 0x35c   : > { %vm8023_vm1 = vcmp.gt.f32.partialorder %v11310_v55, 0.0  ;;  %6614 = vmatmul.mubr.bf16.gmra.mrb[108].mxu0 %v19401_v36  ;;  %v8279_v15 = vmul.f32 0.01, %v11310_v55  ;;  %7386 = vmatmul.mubr.bf16.gmra.mrb[108].mxu1 %v19401_v36  ;;  %v14608_v14 = vsel %vm8015_vm0, %v11308_v7, %v8271_v53  ;;  %vm8025_vm3 = vcmp.gt.f32.partialorder %v11374_v59, 0.0  ;;  %v19410_v7 = vld [vmem:[#allocation24_spill] sm:$0xff] }
 0x35d   : > { %6623 = vmatprep.mubr.bf16.mxu0 %v19402_v38  ;;  %7395 = vmatprep.mubr.bf16.mxu1 %v19402_v38  ;;  %19404 = vst [vmem:[#allocation20_spill] sm:$0xff] %v14608_v14  ;;  %v8281_v9 = vmul.f32 0.01, %v11374_v59  ;;  %v14618_v10 = vsel %vm8017_vm2, %v11372_v0, %v8273_v54  ;;  %v8280_v28 = vmul.f32 0.01, %v11311_v42  ;;  %vm8016_vm4 = vcmp.gt.f32.partialorder %v11309_v31, 0.0 }
 0x35e   : > { %v14610_v50 = vsel %vm8023_vm1, %v11310_v55, %v8279_v15  ;;  %19406 = vst [vmem:[#allocation22_spill] sm:$0xff] %v14618_v10  ;;  %vm8024_vm5 = vcmp.gt.f32.partialorder %v11311_v42, 0.0  ;;  %v11375_v0 = vadd.f32 %v6318_v11, %v14633_v26  ;;  %v11373_v25 = vadd.f32 %v6314_v33, %v14633_v26  ;;  %v19413_v38 = vld [vmem:[#allocation25_spill] sm:$0xff] }
 0x35f   : > { %19405 = vst [vmem:[#allocation21_spill] sm:$0xff] %v14610_v50  ;;  %v14612_v32 = vpop.f32.mrb[4].mxu0  ;;  %v14616_v44 = vpop.f32.mrb[4].mxu1  ;;  %v14620_v12 = vsel %vm8025_vm3, %v11374_v59, %v8281_v9  ;;  %v14648_v53 = vsel %vm8016_vm4, %v11309_v31, %v8272_v37  ;;  %v14650_v36 = vsel %vm8024_vm5, %v11311_v42, %v8280_v28  ;;  %v19414_v9 = vld [vmem:[#allocation26_spill] sm:$0xff] }
 0x360   : > { %19407 = vst [vmem:[#allocation126_spill] sm:$0xff] %v14620_v12  ;;  %v5552_v60 = vpop.f32.mrb[5].mxu0  ;;  %v6324_v23 = vpop.f32.mrb[5].mxu1  ;;  %19411 = vst [vmem:[#allocation23_spill] sm:$0xff] %v14648_v53  ;;  %v8282_v54 = vmul.f32 0.01, %v11375_v0 }
 0x361   : > { %v14626_v27 = vpop.f32.mrb[6].mxu0  ;;  %v14628_v24 = vpop.f32.mrb[6].mxu1  ;;  %19412 = vst [vmem:[#allocation24_spill] sm:$0xff] %v14650_v36  ;;  %vm8026_vm6 = vcmp.gt.f32.partialorder %v11375_v0, 0.0  ;;  %v8274_v4 = vmul.f32 0.01, %v11373_v25  ;;  %v11313_v31 = vadd.f32 %v5552_v60, %v14605_v48 }
 0x362   : > { %v5556_v61 = vpop.f32.mrb[7].mxu0  ;;  %v6328_v62 = vpop.f32.mrb[7].mxu1  ;;  %vm8018_vm7 = vcmp.gt.f32.partialorder %v11373_v25, 0.0  ;;  %v2084_v36 = vld [vmem:[#allocation7 + $0x878] sm:$0xff] }
 0x363   : > { %v11315_v11 = vadd.f32 %v5556_v61, %v14605_v48  ;;  %v11379_v37 = vadd.f32 %v6328_v62, %v14633_v26  ;;  %v14673_v28 = vsel %vm8018_vm7, %v11373_v25, %v8274_v4  ;;  %vm8032_vm9 = vcmp.gt.f32.partialorder %v11313_v31, 0.0  ;;  %v19417_v25 = vld [vmem:[#allocation27_spill] sm:$0xff] }
 0x364   : > { %6624 = vmatmul.mubr.bf16.gmra.mrb[112].mxu0 %v19408_v58  ;;  %7396 = vmatmul.mubr.bf16.gmra.mrb[112].mxu1 %v19408_v58  ;;  %19416 = vst [vmem:[#allocation26_spill] sm:$0xff] %v14673_v28 }
 0x365   : > { %6633 = vmatprep.mubr.bf16.mxu0 %v19410_v7  ;;  %7405 = vmatprep.mubr.bf16.mxu1 %v19410_v7  ;;  %v14670_v7 = vsel %vm8026_vm6, %v11375_v0, %v8282_v54  ;;  %v8296_v61 = vmul.f32 0.01, %v11315_v11  ;;  %vm8040_vm8 = vcmp.gt.f32.partialorder %v11315_v11, 0.0  ;;  %v8298_v45 = vmul.f32 0.01, %v11379_v37 }
 0x366   : > { %19415 = vst [vmem:[#allocation25_spill] sm:$0xff] %v14670_v7  ;;  %vm8042_vm10 = vcmp.gt.f32.partialorder %v11379_v37, 0.0 }
 0x367   : > { %v14640_v55 = vpop.f32.mrb[8].mxu0  ;;  %v14642_v43 = vpop.f32.mrb[8].mxu1  ;;  %v14691_v4 = vsel %vm8040_vm8, %v11315_v11, %v8296_v61 }
 0x368   : > { %v14644_v5 = vpop.f32.mrb[9].mxu0  ;;  %v14646_v52 = vpop.f32.mrb[9].mxu1  ;;  %19418 = vst [vmem:[#allocation27_spill] sm:$0xff] %v14691_v4  ;;  %v19423_v4 = vld [vmem:[#allocation29_spill] sm:$0xff] }
 0x369   : > { %v14652_v15 = vpop.f32.mrb[10].mxu0  ;;  %v14654_v59 = vpop.f32.mrb[10].mxu1 }
 0x36a   : > { %v14663_v42 = vpop.f32.mrb[11].mxu0  ;;  %v14665_v58 = vpop.f32.mrb[11].mxu1 }
 0x36c   : > { %6634 = vmatmul.mubr.bf16.gmra.mrb[116].mxu0 %v19413_v38  ;;  %7406 = vmatmul.mubr.bf16.gmra.mrb[116].mxu1 %v19413_v38  ;;  %v8288_v38 = vmul.f32 0.01, %v11313_v31 }
 0x36d   : > { %6643 = vmatprep.mubr.bf16.mxu0 %v19414_v9  ;;  %7415 = vmatprep.mubr.bf16.mxu1 %v19414_v9  ;;  %v11377_v9 = vadd.f32 %v6324_v23, %v14633_v26 }
 0x36e   : > { %v14696_v23 = vsel %vm8032_vm9, %v11313_v31, %v8288_v38  ;;  %v11314_v31 = vadd.f32 %v14626_v27, %v14587_v18 }
 0x36f   : > { %v14668_v49 = vpop.f32.mrb[12].mxu0  ;;  %v14675_v1 = vpop.f32.mrb[12].mxu1  ;;  %19420 = vst [vmem:[#allocation28_spill] sm:$0xff] %v14696_v23  ;;  %v8290_v2 = vmul.f32 0.01, %v11377_v9  ;;  %vm8034_vm11 = vcmp.gt.f32.partialorder %v11377_v9, 0.0 }
 0x370   : > { %v14677_v60 = vpop.f32.mrb[13].mxu0  ;;  %v14682_v33 = vpop.f32.mrb[13].mxu1  ;;  %vm8039_vm13 = vcmp.gt.f32.partialorder %v11314_v31, 0.0 }
 0x371   : > { %v14684_v0 = vpop.f32.mrb[14].mxu0  ;;  %v14686_v54 = vpop.f32.mrb[14].mxu1  ;;  %v14718_v28 = vsel %vm8034_vm11, %v11377_v9, %v8290_v2  ;;  %v11378_v9 = vadd.f32 %v14628_v24, %v14592_v17  ;;  %v14750_v24 = vld [vmem:[#allocation7 + $0x898] sm:$0xff] }
 0x372   : > { %v14688_v62 = vpop.f32.mrb[15].mxu0  ;;  %v14698_v10 = vpop.f32.mrb[15].mxu1  ;;  %19422 = vst [vmem:[#allocation128_spill] sm:$0xff] %v14718_v28  ;;  %v2083_v28 = vld [vmem:[#allocation7 + $0x870] sm:$0xff] }
 0x373   : > { %vm8041_vm14 = vcmp.gt.f32.partialorder %v11378_v9, 0.0 }
 0x374   : > { %6644 = vmatmul.mubr.bf16.gmra.mrb[120].mxu0 %v19417_v25  ;;  %7416 = vmatmul.mubr.bf16.gmra.mrb[120].mxu1 %v19417_v25  ;;  %v14708_v25 = vsel %vm8042_vm10, %v11379_v37, %v8298_v45  ;;  %v8295_v37 = vmul.f32 0.01, %v11314_v31 }
 0x375   : > { %6653 = vmatprep.mubr.bf16.mxu0 %v19419_v41  ;;  %7425 = vmatprep.mubr.bf16.mxu1 %v19419_v41  ;;  %19421 = vst [vmem:[#allocation127_spill] sm:$0xff] %v14708_v25  ;;  %v11312_v41 = vadd.f32 %v14612_v32, %v14587_v18  ;;  %v19424_v32 = vld [vmem:[#allocation30_spill] sm:$0xff]  ;;  %v2080_v25 = vld [vmem:[#allocation7 + $0x858] sm:$0xff] }
 0x376   : > { %v14758_v47 = vsel %vm8039_vm13, %v11314_v31, %v8295_v37  ;;  %v10547_v30 = vcombine.high %v2080_v25, %v2084_v36  ;;  %v19435_v37 = vcombine.low %v14536_v16, %v14540_v34  ;;  %v10546_v3 = vcombine.low %v2080_v25, %v2084_v36  ;;  %v14790_v16 = vld [vmem:[#allocation7 + $0xc18] sm:$0xff]  ;;  %v2095_v25 = vld [vmem:[#allocation7 + $0x8d0] sm:$0xff] }
 0x377   : > { %v14700_v12 = vpop.f32.mrb[16].mxu0  ;;  %v14704_v11 = vpop.f32.mrb[16].mxu1  ;;  %v8287_v27 = vmul.f32 0.01, %v11312_v41  ;;  %vm8031_vm12 = vcmp.gt.f32.partialorder %v11312_v41, 0.0  ;;  %19428 = vst [vmem:[#allocation130_spill] sm:$0xff] %v14758_v47 }
 0x378   : > { %v14706_v61 = vpop.f32.mrb[17].mxu0  ;;  %v14714_v38 = vpop.f32.mrb[17].mxu1  ;;  %19439 = vst [vmem:[#allocation135_spill] sm:$0xff] %v14790_v16  ;;  %v14792_v34 = vld [vmem:[#allocation7 + $0xc38] sm:$0xff]  ;;  %v19450_v16 = vld [vmem:[#allocation34_spill] sm:$0xff] }
 0x379   : > { %v14716_v50 = vpop.f32.mrb[18].mxu0  ;;  %v14720_v14 = vpop.f32.mrb[18].mxu1  ;;  %v14755_v40 = vsel %vm8031_vm12, %v11312_v41, %v8287_v27  ;;  %v19434_v41 = vcombine.low %v14532_v19, %v14534_v22  ;;  %v10555_v19 = vcombine.high %v14750_v24, %v14752_v63  ;;  %19440 = vst [vmem:[#allocation136_spill] sm:$0xff] %v14792_v34  ;;  %v2100_v22 = vld [vmem:[#allocation7 + $0x8f8] sm:$0xff] }
 0x37a   : > { %v14722_v23 = vpop.f32.mrb[19].mxu0  ;;  %v14730_v7 = vpop.f32.mrb[19].mxu1  ;;  %19427 = vst [vmem:[#allocation129_spill] sm:$0xff] %v14755_v40  ;;  %v10552_v40 = vcombine.low %v14742_v20, %v14748_v6 }
 0x37c   : > { %6654 = vmatmul.mubr.bf16.gmra.mrb[124].mxu0 %v19423_v4  ;;  %7426 = vmatmul.mubr.bf16.gmra.mrb[124].mxu1 %v19423_v4  ;;  %v2079_v4 = vld [vmem:[#allocation7 + $0x850] sm:$0xff] }
 0x37d   : > { %6696 = vmatprep.mubr.bf16.mxu0 %v19424_v32  ;;  %7468 = vmatprep.mubr.bf16.mxu1 %v19424_v32  ;;  %v11376_v32 = vadd.f32 %v14616_v44, %v14592_v17  ;;  %v10545_v13 = vcombine.high %v2079_v4, %v2083_v28  ;;  %v8297_v44 = vmul.f32 0.01, %v11378_v9  ;;  %v10544_v31 = vcombine.low %v2079_v4, %v2083_v28  ;;  %v2099_v4 = vld [vmem:[#allocation7 + $0x8f0] sm:$0xff] }
 0x37f   : > { %v14732_v2 = vpop.f32.mrb[20].mxu0  ;;  %v14736_v53 = vpop.f32.mrb[20].mxu1  ;;  %v8289_v27 = vmul.f32 0.01, %v11376_v32  ;;  %vm8033_vm15 = vcmp.gt.f32.partialorder %v11376_v32, 0.0 }
 0x380   : > { %v14738_v45 = vpop.f32.mrb[21].mxu0  ;;  %v14744_v51 = vpop.f32.mrb[21].mxu1 }
 0x381   : > { %19425 = vst [vmem:[#allocation29_spill] sm:$0xff] %v14744_v51  ;;  %v14746_v21 = vpop.f32.mrb[22].mxu0  ;;  %v14760_v57 = vpop.f32.mrb[22].mxu1 }
 0x382   : > { %19426 = vst [vmem:[#allocation30_spill] sm:$0xff] %v14746_v21  ;;  %19429 = vst [vmem:[#allocation131_spill] sm:$0xff] %v14760_v57  ;;  %v14762_v8 = vpop.f32.mrb[23].mxu0  ;;  %v14781_v46 = vpop.f32.mrb[23].mxu1  ;;  %v14983_v57 = vld [vmem:[#allocation7 + $0xb30] sm:$0xff]  ;;  %v15010_v21 = vadd.f32 %v14652_v15, %v14587_v18  ;;  %v15027_v15 = vadd.f32 %v14665_v58, %v14633_v26  ;;  %v15043_v58 = vadd.f32 %v14668_v49, %v14587_v18 }
 0x383   : > { %19430 = vst [vmem:[#allocation132_spill] sm:$0xff] %v14762_v8  ;;  %v10553_v8 = vcombine.high %v14742_v20, %v14748_v6  ;;  %19437 = vst [vmem:[#allocation32_spill] sm:$0xff] %v14781_v46  ;;  %v19449_v20 = vld [vmem:[#allocation33_spill] sm:$0xff]  ;;  %v15066_v49 = vadd.f32 %v14684_v0, %v14587_v18 }
 0x384   : > { %6697 = vmatmul.mubr.bf16.vlgmr.msra.gmra.mrb[64].mxu0 %v19431_v29  ;;  %7469 = vmatmul.mubr.bf16.vlgmr.msra.gmra.mrb[64].mxu1 %v19431_v29  ;;  %19479 = vst [vmem:[#allocation163_spill] sm:$0xff] %v15043_v58  ;;  %vm8058_vm3 = vcmp.gt.f32.partialorder %v15027_v15, 0.0  ;;  %vm8055_vm4 = vcmp.gt.f32.partialorder %v15010_v21, 0.0 }
 0x385   : > { %6858 = vmatpush1.bf16.msra.mxu0 %v19434_v41  ;;  %7630 = vmatpush1.bf16.msra.mxu1 %v19435_v37  ;;  %v11319_v41 = vadd.f32 %v14663_v42, %v14605_v48  ;;  %v2096_v37 = vld [vmem:[#allocation7 + $0x8d8] sm:$0xff]  ;;  %v10554_v42 = vcombine.low %v14750_v24, %v14752_v63  ;;  %19481 = vst [vmem:[#allocation165_spill] sm:$0xff] %v15066_v49 }
 0x386   : > { %6706 = vmatprep.mubr.bf16.mxu0 %v19436_v56  ;;  %7478 = vmatprep.mubr.bf16.mxu1 %v19436_v56  ;;  %v11317_v56 = vadd.f32 %v14644_v5, %v14605_v48  ;;  %v2103_v5 = vld [vmem:[#allocation7 + $0x910] sm:$0xff]  ;;  %v2104_v63 = vld [vmem:[#allocation7 + $0x918] sm:$0xff]  ;;  %v10562_v34 = vcombine.low %v2096_v37, %v2100_v22 }
 0x387   : > { %v14783_v29 = vpop.f32.mrb[24].mxu0  ;;  %6859 = vmatprep.subr.bf16.mxu0 %v10545_v13  ;;  %v14794_v36 = vpop.f32.mrb[24].mxu1  ;;  %7631 = vmatprep.subr.bf16.mxu1 %v10547_v30  ;;  %v14801_v13 = vsel %vm8041_vm14, %v11378_v9, %v8297_v44  ;;  %v14808_v30 = vsel %vm8033_vm15, %v11376_v32, %v8289_v27  ;;  %v10561_v44 = vcombine.high %v2095_v25, %v2099_v4  ;;  %v8312_v27 = vmul.f32 0.01, %v11319_v41  ;;  %v2108_v24 = vld [vmem:[#allocation7 + $0x938] sm:$0xff] }
 0x388   : > { %19438 = vst [vmem:[#allocation134_spill] sm:$0xff] %v14783_v29  ;;  %19441 = vst [vmem:[#allocation137_spill] sm:$0xff] %v14794_v36  ;;  %v14796_v28 = vpop.f32.mrb[25].mxu0  ;;  %v14812_v47 = vpop.f32.mrb[25].mxu1  ;;  %v10563_v32 = vcombine.high %v2096_v37, %v2100_v22  ;;  %vm8056_vm0 = vcmp.gt.f32.partialorder %v11319_v41, 0.0  ;;  %vm8048_vm1 = vcmp.gt.f32.partialorder %v11317_v56, 0.0 }
 0x389   : > { %19442 = vst [vmem:[#allocation138_spill] sm:$0xff] %v14796_v28  ;;  %19443 = vst [vmem:[#allocation139_spill] sm:$0xff] %v14801_v13  ;;  %6860 = vmatpush1.bf16.msra.mxu0 %v10544_v31  ;;  %7632 = vmatpush1.bf16.msra.mxu1 %v10546_v3  ;;  %v14814_v9 = vpop.f32.mrb[26].mxu0  ;;  %v14820_v6 = vpop.f32.mrb[26].mxu1  ;;  %v2107_v31 = vld [vmem:[#allocation7 + $0x930] sm:$0xff]  ;;  %v15014_v28 = vadd.f32 %v14654_v59, %v14592_v17 }
 0x38a   : > { %6861 = vmatprep.subr.bf16.mxu0 %v10553_v8  ;;  %19444 = vst [vmem:[#allocation140_spill] sm:$0xff] %v14808_v30  ;;  %19445 = vst [vmem:[#allocation141_spill] sm:$0xff] %v14812_v47  ;;  %7633 = vmatprep.subr.bf16.mxu1 %v10555_v19  ;;  %v14822_v8 = vpop.f32.mrb[27].mxu0  ;;  %v10560_v19 = vcombine.low %v2095_v25, %v2099_v4  ;;  %v8304_v3 = vmul.f32 0.01, %v11317_v56  ;;  %v14828_v30 = vpop.f32.mrb[27].mxu1  ;;  %v10569_v39 = vcombine.high %v2103_v5, %v2107_v31 }
 0x38b   : > { %19446 = vst [vmem:[#allocation142_spill] sm:$0xff] %v14814_v9  ;;  %19447 = vst [vmem:[#allocation143_spill] sm:$0xff] %v14820_v6  ;;  %v14836_v6 = vld [vmem:[#allocation7 + $0x950] sm:$0xff]  ;;  %v14842_v25 = vld [vmem:[#allocation7 + $0x978] sm:$0xff]  ;;  %v14845_v4 = vsel %vm8056_vm0, %v11319_v41, %v8312_v27  ;;  %v10568_v22 = vcombine.low %v2103_v5, %v2107_v31 }
 0x38c   : > { %19448 = vst [vmem:[#allocation144_spill] sm:$0xff] %v14822_v8  ;;  %6707 = vmatmul.mubr.bf16.gmra.mrb[68].mxu0 %v19449_v20  ;;  %7479 = vmatmul.mubr.bf16.gmra.mrb[68].mxu1 %v19449_v20  ;;  %19451 = vst [vmem:[#allocation33_spill] sm:$0xff] %v14828_v30  ;;  %v10571_v8 = vcombine.high %v2104_v63, %v2108_v24  ;;  %v14847_v37 = vld [vmem:[#allocation7 + $0x990] sm:$0xff]  ;;  %v14859_v41 = vld [vmem:[#allocation7 + $0x9b8] sm:$0xff]  ;;  %v14862_v5 = vsel %vm8048_vm1, %v11317_v56, %v8304_v3 }
 0x38d   : > { %6716 = vmatprep.mubr.bf16.mxu0 %v19450_v16  ;;  %7488 = vmatprep.mubr.bf16.mxu1 %v19450_v16  ;;  %v14840_v16 = vld [vmem:[#allocation7 + $0x958] sm:$0xff]  ;;  %19455 = vst [vmem:[#allocation147_spill] sm:$0xff] %v14845_v4  ;;  %19458 = vst [vmem:[#allocation150_spill] sm:$0xff] %v14862_v5  ;;  %v14896_v5 = vld [vmem:[#allocation7 + $0xa50] sm:$0xff] }
 0x38e   : > { %6862 = vmatpush1.bf16.msra.mxu0 %v10552_v40  ;;  %7634 = vmatpush1.bf16.msra.mxu1 %v10554_v42  ;;  %v14838_v40 = vld [vmem:[#allocation7 + $0x970] sm:$0xff]  ;;  %v14892_v56 = vld [vmem:[#allocation7 + $0xa18] sm:$0xff] }
 0x38f   : > { %v14830_v13 = vpop.f32.mrb[28].mxu0  ;;  %6863 = vmatprep.subr.bf16.mxu0 %v10561_v44  ;;  %v14832_v20 = vpop.f32.mrb[28].mxu1  ;;  %7635 = vmatprep.subr.bf16.mxu1 %v10563_v32  ;;  %v10570_v32 = vcombine.low %v2104_v63, %v2108_v24  ;;  %v14873_v63 = vld [vmem:[#allocation7 + $0x9f0] sm:$0xff]  ;;  %v14875_v24 = vld [vmem:[#allocation7 + $0x9d8] sm:$0xff] }
 0x390   : > { %19452 = vst [vmem:[#allocation34_spill] sm:$0xff] %v14830_v13  ;;  %19453 = vst [vmem:[#allocation145_spill] sm:$0xff] %v14832_v20  ;;  %v14834_v35 = vpop.f32.mrb[29].mxu0  ;;  %v14849_v42 = vpop.f32.mrb[29].mxu1  ;;  %v14855_v20 = vld [vmem:[#allocation7 + $0x9b0] sm:$0xff]  ;;  %v14857_v13 = vld [vmem:[#allocation7 + $0x998] sm:$0xff] }
 0x391   : > { %19454 = vst [vmem:[#allocation146_spill] sm:$0xff] %v14834_v35  ;;  %19456 = vst [vmem:[#allocation148_spill] sm:$0xff] %v14849_v42  ;;  %v14851_v44 = vpop.f32.mrb[30].mxu0  ;;  %v10577_v35 = vcombine.high %v14836_v6, %v14838_v40  ;;  %v14864_v31 = vpop.f32.mrb[30].mxu1  ;;  %v19462_v3 = vld [vmem:[#allocation36_spill] sm:$0xff]  ;;  %v10578_v42 = vcombine.low %v14840_v16, %v14842_v25 }
 0x392   : > { %6864 = vmatpush1.bf16.msra.mxu0 %v10560_v19  ;;  %19457 = vst [vmem:[#allocation149_spill] sm:$0xff] %v14851_v44  ;;  %7636 = vmatpush1.bf16.msra.mxu1 %v10562_v34  ;;  %19459 = vst [vmem:[#allocation151_spill] sm:$0xff] %v14864_v31  ;;  %v14866_v27 = vpop.f32.mrb[31].mxu0  ;;  %v19461_v19 = vld [vmem:[#allocation35_spill] sm:$0xff]  ;;  %v10576_v44 = vcombine.low %v14836_v6, %v14838_v40  ;;  %v14898_v4 = vpop.f32.mrb[31].mxu1  ;;  %v10585_v6 = vcombine.high %v14847_v37, %v14855_v20 }
 0x393   : > { %6865 = vmatprep.subr.bf16.mxu0 %v10569_v39  ;;  %19460 = vst [vmem:[#allocation152_spill] sm:$0xff] %v14866_v27  ;;  %7637 = vmatprep.subr.bf16.mxu1 %v10571_v8  ;;  %v10579_v39 = vcombine.high %v14840_v16, %v14842_v25  ;;  %v14871_v34 = vld [vmem:[#allocation7 + $0x9d0] sm:$0xff]  ;;  %v14881_v27 = vld [vmem:[#allocation7 + $0x9f8] sm:$0xff]  ;;  %19463 = vst [vmem:[#allocation35_spill] sm:$0xff] %v14898_v4  ;;  %v10586_v40 = vcombine.low %v14857_v13, %v14859_v41 }
 0x394   : > { %6717 = vmatmul.mubr.bf16.gmra.mrb[72].mxu0 %v19461_v19  ;;  %7489 = vmatmul.mubr.bf16.gmra.mrb[72].mxu1 %v19461_v19  ;;  %v14883_v31 = vld [vmem:[#allocation7 + $0xa10] sm:$0xff]  ;;  %v14894_v19 = vld [vmem:[#allocation7 + $0xa38] sm:$0xff] }
 0x395   : > { %6726 = vmatprep.mubr.bf16.mxu0 %v19462_v3  ;;  %v14885_v8 = vld [vmem:[#allocation7 + $0xa30] sm:$0xff]  ;;  %7498 = vmatprep.mubr.bf16.mxu1 %v19462_v3  ;;  %v14910_v25 = vld [vmem:[#allocation7 + $0xa58] sm:$0xff] }
 0x396   : > { %6866 = vmatpush1.bf16.msra.mxu0 %v10568_v22  ;;  %7638 = vmatpush1.bf16.msra.mxu1 %v10570_v32  ;;  %v10584_v22 = vcombine.low %v14847_v37, %v14855_v20  ;;  %v14908_v16 = vld [vmem:[#allocation7 + $0xa70] sm:$0xff]  ;;  %v14912_v3 = vld [vmem:[#allocation7 + $0xa78] sm:$0xff]  ;;  %v10593_v37 = vcombine.high %v14871_v34, %v14873_v63 }
 0x397   : > { %v14900_v30 = vpop.f32.mrb[32].mxu0  ;;  %6867 = vmatprep.subr.bf16.mxu0 %v10577_v35  ;;  %v14914_v4 = vpop.f32.mrb[32].mxu1  ;;  %7639 = vmatprep.subr.bf16.mxu1 %v10579_v39  ;;  %v10587_v35 = vcombine.high %v14857_v13, %v14859_v41  ;;  %v14926_v9 = vld [vmem:[#allocation7 + $0xa90] sm:$0xff]  ;;  %v14938_v20 = vld [vmem:[#allocation7 + $0xa98] sm:$0xff] }
 0x398   : > { %19464 = vst [vmem:[#allocation36_spill] sm:$0xff] %v14900_v30  ;;  %19465 = vst [vmem:[#allocation153_spill] sm:$0xff] %v14914_v4  ;;  %v14916_v30 = vpop.f32.mrb[33].mxu0  ;;  %v14928_v47 = vld [vmem:[#allocation7 + $0xab0] sm:$0xff]  ;;  %v14940_v4 = vld [vmem:[#allocation7 + $0xab8] sm:$0xff]  ;;  %v14954_v29 = vpop.f32.mrb[33].mxu1 }
 0x399   : > { %19466 = vst [vmem:[#allocation154_spill] sm:$0xff] %v14916_v30  ;;  %v10595_v30 = vcombine.high %v14875_v24, %v14881_v27  ;;  %v14950_v36 = vld [vmem:[#allocation7 + $0xad0] sm:$0xff]  ;;  %19467 = vst [vmem:[#allocation155_spill] sm:$0xff] %v14954_v29  ;;  %v14956_v46 = vpop.f32.mrb[34].mxu0  ;;  %v14964_v13 = vld [vmem:[#allocation7 + $0xad8] sm:$0xff]  ;;  %v14970_v29 = vadd.f32 %v14640_v55, %v14587_v18  ;;  %v14987_v55 = vadd.f32 %v14642_v43, %v14592_v17 }
 0x39a   : > { %6868 = vmatpush1.bf16.msra.mxu0 %v10576_v44  ;;  %v14952_v41 = vld [vmem:[#allocation7 + $0xaf0] sm:$0xff]  ;;  %19468 = vst [vmem:[#allocation156_spill] sm:$0xff] %v14956_v46  ;;  %7640 = vmatpush1.bf16.msra.mxu1 %v10578_v42  ;;  %v14966_v32 = vld [vmem:[#allocation7 + $0xaf8] sm:$0xff]  ;;  %v14972_v46 = vpop.f32.mrb[34].mxu1  ;;  %v14974_v42 = vpop.f32.mrb[35].mxu0 }
 0x39b   : > { %6869 = vmatprep.subr.bf16.mxu0 %v10585_v6  ;;  %19469 = vst [vmem:[#allocation157_spill] sm:$0xff] %v14972_v46  ;;  %19470 = vst [vmem:[#allocation158_spill] sm:$0xff] %v14974_v42  ;;  %v19471_v6 = vld [vmem:[#allocation37_spill] sm:$0xff]  ;;  %7641 = vmatprep.subr.bf16.mxu1 %v10587_v35  ;;  %v14981_v44 = vld [vmem:[#allocation7 + $0xb10] sm:$0xff]  ;;  %v14991_v42 = vadd.f32 %v14646_v52, %v14633_v26  ;;  %v15016_v51 = vpop.f32.mrb[35].mxu1  ;;  %vm8047_vm5 = vcmp.gt.f32.partialorder %v14970_v29, 0.0 }
 0x39c   : > { %6727 = vmatmul.mubr.bf16.gmra.mrb[76].mxu0 %v19471_v6  ;;  %19472 = vst [vmem:[#allocation37_spill] sm:$0xff] %v14987_v55  ;;  %7499 = vmatmul.mubr.bf16.gmra.mrb[76].mxu1 %v19471_v6  ;;  %v19473_v35 = vld [vmem:[#allocation38_spill] sm:$0xff]  ;;  %v14997_v39 = vld [vmem:[#allocation7 + $0xb18] sm:$0xff]  ;;  %v15023_v52 = vmul.f32 0.01, %v14970_v29 }
 0x39d   : > { %6736 = vmatprep.mubr.bf16.mxu0 %v19473_v35  ;;  %v14999_v46 = vld [vmem:[#allocation7 + $0xb38] sm:$0xff]  ;;  %7508 = vmatprep.mubr.bf16.mxu1 %v19473_v35  ;;  %19474 = vst [vmem:[#allocation38_spill] sm:$0xff] %v15014_v28  ;;  %vm8050_vm2 = vcmp.gt.f32.partialorder %v14991_v42, 0.0  ;;  %v15047_v35 = vadd.f32 %v14675_v1, %v14592_v17  ;;  %v15054_v43 = vmul.f32 0.01, %v14991_v42  ;;  %v19482_v1 = vcombine.low %v14871_v34, %v14873_v63 }
 0x39e   : > { %6870 = vmatpush1.bf16.msra.mxu0 %v10584_v22  ;;  %7642 = vmatpush1.bf16.msra.mxu1 %v10586_v40  ;;  %19475 = vst [vmem:[#allocation159_spill] sm:$0xff] %v15023_v52  ;;  %v15051_v52 = vld [vmem:[#allocation7 + $0xb70] sm:$0xff]  ;;  %v15058_v40 = vadd.f32 %v14677_v60, %v14605_v48  ;;  %v15077_v60 = vmul.f32 0.01, %v15014_v28  ;;  %v19487_v34 = vcombine.low %v14875_v24, %v14881_v27 }
 0x39f   : > { %v15018_v22 = vpop.f32.mrb[36].mxu0  ;;  %6871 = vmatprep.subr.bf16.mxu0 %v10593_v37  ;;  %v15029_v6 = vpop.f32.mrb[36].mxu1  ;;  %7643 = vmatprep.subr.bf16.mxu1 %v10595_v30  ;;  %v15038_v37 = vmul.f32 0.01, %v14987_v55  ;;  %19480 = vst [vmem:[#allocation164_spill] sm:$0xff] %v15047_v35  ;;  %v15049_v30 = vld [vmem:[#allocation7 + $0xb50] sm:$0xff]  ;;  %v19488_v63 = vcombine.high %v14883_v31, %v14885_v8  ;;  %v19492_v24 = vcombine.high %v14892_v56, %v14894_v19 }
 0x3a0   : > { %19476 = vst [vmem:[#allocation160_spill] sm:$0xff] %v15029_v6  ;;  %v15031_v59 = vpop.f32.mrb[37].mxu0  ;;  %v15071_v55 = vld [vmem:[#allocation7 + $0xb58] sm:$0xff]  ;;  %19484 = vst [vmem:[#allocation167_spill] sm:$0xff] %v15077_v60  ;;  %v15083_v6 = vpop.f32.mrb[37].mxu1  ;;  %v15099_v60 = vadd.f32 %v14688_v62, %v14605_v48  ;;  %v19491_v27 = vld [vmem:[#allocation39_spill] sm:$0xff] }
 0x3a1   : > { %19477 = vst [vmem:[#allocation161_spill] sm:$0xff] %v15031_v59  ;;  %19478 = vst [vmem:[#allocation162_spill] sm:$0xff] %v15038_v37  ;;  %v15062_v37 = vadd.f32 %v14682_v33, %v14633_v26  ;;  %v15074_v59 = vmul.f32 0.01, %v15010_v21  ;;  %v15081_v33 = vadd.f32 %v14686_v54, %v14592_v17  ;;  %v15085_v0 = vpop.f32.mrb[38].mxu0  ;;  %vm8064_vm8 = vcmp.gt.f32.partialorder %v15058_v40, 0.0 }
 0x3a2   : > { %6872 = vmatpush1.bf16.msra.mxu0 %v19482_v1  ;;  %19486 = vst [vmem:[#allocation169_spill] sm:$0xff] %v15085_v0  ;;  %7644 = vmatpush1.bf16.msra.mxu1 %v19487_v34  ;;  %v8314_v54 = vmul.f32 0.01, %v15027_v15  ;;  %v15103_v28 = vpop.f32.mrb[39].mxu0  ;;  %v15114_v1 = vmul.f32 0.01, %v15043_v58  ;;  %v15203_v58 = vadd.f32 %v14714_v38, %v14633_v26 }
 0x3a3   : > { %19483 = vst [vmem:[#allocation166_spill] sm:$0xff] %v15074_v59  ;;  %19485 = vst [vmem:[#allocation168_spill] sm:$0xff] %v15081_v33  ;;  %6873 = vmatprep.subr.bf16.mxu0 %v19488_v63  ;;  %v15101_v59 = vpop.f32.mrb[38].mxu1  ;;  %7645 = vmatprep.subr.bf16.mxu1 %v19492_v24  ;;  %v15111_v63 = vld [vmem:[#allocation7 + $0xb78] sm:$0xff]  ;;  %v15117_v62 = vmul.f32 0.01, %v15047_v35 }
 0x3a4   : > { %19489 = vst [vmem:[#allocation170_spill] sm:$0xff] %v15101_v59  ;;  %19490 = vst [vmem:[#allocation171_spill] sm:$0xff] %v15103_v28  ;;  %6737 = vmatmul.mubr.bf16.gmra.mrb[80].mxu0 %v19491_v27  ;;  %v15121_v28 = vadd.f32 %v14698_v10, %v14633_v26  ;;  %v15125_v59 = vadd.f32 %v14700_v12, %v14587_v18  ;;  %7509 = vmatmul.mubr.bf16.gmra.mrb[80].mxu1 %v19491_v27  ;;  %v19496_v24 = vld [vmem:[#allocation40_spill] sm:$0xff]  ;;  %v15140_v10 = vmul.f32 0.01, %v15066_v49  ;;  %v19522_v38 = vld [vmem:[#allocation41_spill] sm:$0xff] }
 0x3a5   : > { %19493 = vst [vmem:[#allocation39_spill] sm:$0xff] %v15114_v1  ;;  %19494 = vst [vmem:[#allocation172_spill] sm:$0xff] %v15117_v62  ;;  %6746 = vmatprep.mubr.bf16.mxu0 %v19496_v24  ;;  %v15129_v34 = vld [vmem:[#allocation7 + $0xb90] sm:$0xff]  ;;  %v15134_v1 = vmul.f32 0.01, %v15058_v40  ;;  %7518 = vmatprep.mubr.bf16.mxu1 %v19496_v24  ;;  %v19500_v12 = vcombine.low %v14883_v31, %v14885_v8  ;;  %v19503_v24 = vcombine.low %v14892_v56, %v14894_v19  ;;  %v15171_v27 = vld [vmem:[#allocation7 + $0xbb8] sm:$0xff] }
 0x3a6   : > { %19495 = vst [vmem:[#allocation173_spill] sm:$0xff] %v15125_v59  ;;  %v15131_v0 = vld [vmem:[#allocation7 + $0xbb0] sm:$0xff]  ;;  %v15137_v62 = vmul.f32 0.01, %v15062_v37  ;;  %19499 = vst [vmem:[#allocation175_spill] sm:$0xff] %v15140_v10  ;;  %v19504_v31 = vcombine.high %v14896_v5, %v14908_v16  ;;  %v15178_v56 = vadd.f32 %v14706_v61, %v14605_v48  ;;  %v15212_v8 = vadd.f32 %v14716_v50, %v14587_v18 }
 0x3a7   : > { %19497 = vst [vmem:[#allocation40_spill] sm:$0xff] %v15134_v1  ;;  %6874 = vmatpush1.bf16.msra.mxu0 %v19500_v12  ;;  %v15149_v35 = vmul.f32 0.01, %v15081_v33  ;;  %v15153_v1 = vadd.f32 %v14704_v11, %v14592_v17  ;;  %v15157_v49 = vpop.f32.mrb[40].mxu0  ;;  %7646 = vmatpush1.bf16.msra.mxu1 %v19503_v24  ;;  %v15169_v11 = vld [vmem:[#allocation7 + $0xb98] sm:$0xff]  ;;  %v15191_v10 = vld [vmem:[#allocation7 + $0xbd0] sm:$0xff]  ;;  %v15216_v12 = vadd.f32 %v14720_v14, %v14592_v17 }
 0x3a8   : > { %19498 = vst [vmem:[#allocation174_spill] sm:$0xff] %v15137_v62  ;;  %v15155_v62 = vpop.f32.mrb[39].mxu1  ;;  %6875 = vmatprep.subr.bf16.mxu0 %v19504_v31  ;;  %v15182_v24 = vpop.f32.mrb[41].mxu0  ;;  %v19506_v31 = vcombine.high %v14910_v25, %v14912_v3  ;;  %v15196_v61 = vmul.f32 0.01, %v15121_v28  ;;  %19509 = vst [vmem:[#allocation181_spill] sm:$0xff] %v15203_v58  ;;  %v15234_v14 = vadd.f32 %v14722_v23, %v14605_v48 }
 0x3a9   : > { %19501 = vst [vmem:[#allocation176_spill] sm:$0xff] %v15149_v35  ;;  %19502 = vst [vmem:[#allocation177_spill] sm:$0xff] %v15153_v1  ;;  %v15174_v35 = vmul.f32 0.01, %v15099_v60  ;;  %v15180_v19 = vpop.f32.mrb[40].mxu1  ;;  %v15252_v23 = vsel %vm8050_vm2, %v14991_v42, %v15054_v43  ;;  %v19523_v42 = vcombine.high %v14938_v20, %v14940_v4  ;;  %v15293_v43 = vadd.f32 %v14738_v45, %v14605_v48  ;;  %v19534_v45 = vld [vmem:[#allocation30_spill] sm:$0xff] }
 0x3aa   : > { %7647 = vmatprep.subr.bf16.mxu1 %v19506_v31  ;;  %19507 = vst [vmem:[#allocation179_spill] sm:$0xff] %v15196_v61  ;;  %v15199_v33 = vmul.f32 0.01, %v15125_v59  ;;  %v15208_v31 = vsel %vm8058_vm3, %v15027_v15, %v8314_v54  ;;  %19511 = vst [vmem:[#allocation183_spill] sm:$0xff] %v15212_v8  ;;  %v15225_v15 = vld [vmem:[#allocation7 + $0xbd8] sm:$0xff]  ;;  %v15236_v59 = vpop.f32.mrb[41].mxu1 }
 0x3ab   : > { %19505 = vst [vmem:[#allocation178_spill] sm:$0xff] %v15174_v35  ;;  %v15193_v35 = vld [vmem:[#allocation7 + $0xbf0] sm:$0xff]  ;;  %19510 = vst [vmem:[#allocation182_spill] sm:$0xff] %v15208_v31  ;;  %v15227_v54 = vld [vmem:[#allocation7 + $0xbf8] sm:$0xff]  ;;  %v15230_v50 = vmul.f32 0.01, %v15153_v1 }
 0x3ac   : > { %19508 = vst [vmem:[#allocation180_spill] sm:$0xff] %v15199_v33  ;;  %19512 = vst [vmem:[#allocation184_spill] sm:$0xff] %v15216_v12  ;;  %v19513_v33 = vcombine.low %v14896_v5, %v14908_v16  ;;  %v15238_v5 = vpop.f32.mrb[42].mxu0  ;;  %v19516_v16 = vcombine.low %v14910_v25, %v14912_v3  ;;  %v15255_v61 = vmul.f32 0.01, %v15178_v56  ;;  %v15259_v25 = vadd.f32 %v14730_v7, %v14633_v26 }
 0x3ad   : > { %19514 = vst [vmem:[#allocation185_spill] sm:$0xff] %v15230_v50  ;;  %19515 = vst [vmem:[#allocation186_spill] sm:$0xff] %v15234_v14  ;;  %v15263_v3 = vadd.f32 %v14732_v2, %v14587_v18  ;;  %6747 = vmatmul.mubr.bf16.gmra.mrb[84].mxu0 %v19522_v38  ;;  %v15276_v7 = vmul.f32 0.01, %v15203_v58  ;;  %v15280_v2 = vadd.f32 %v14736_v53, %v14592_v17  ;;  %7519 = vmatmul.mubr.bf16.gmra.mrb[84].mxu1 %v19522_v38  ;;  %v19526_v50 = vld [vmem:[#allocation42_spill] sm:$0xff]  ;;  %v19529_v53 = vld [vmem:[#allocation29_spill] sm:$0xff] }
 0x3ae   : > { %6876 = vmatpush1.bf16.msra.mxu0 %v19513_v33  ;;  %7648 = vmatpush1.bf16.msra.mxu1 %v19516_v16  ;;  %v19517_v33 = vcombine.high %v14926_v9, %v14928_v47  ;;  %19518 = vst [vmem:[#allocation187_spill] sm:$0xff] %v15252_v23  ;;  %19519 = vst [vmem:[#allocation188_spill] sm:$0xff] %v15255_v61  ;;  %v15265_v16 = vpop.f32.mrb[42].mxu1  ;;  %v15289_v1 = vmul.f32 0.01, %v15212_v8  ;;  %v15297_v23 = vadd.f32 %v19529_v53, %v14633_v26  ;;  %v19536_v53 = vld [vmem:[#allocation131_spill] sm:$0xff] }
 0x3af   : > { %19520 = vst [vmem:[#allocation189_spill] sm:$0xff] %v15259_v25  ;;  %19521 = vst [vmem:[#allocation190_spill] sm:$0xff] %v15263_v3  ;;  %7649 = vmatprep.subr.bf16.mxu1 %v19523_v42  ;;  %6756 = vmatprep.mubr.bf16.mxu0 %v19526_v50  ;;  %v19531_v38 = vcombine.low %v14926_v9, %v14928_v47  ;;  %v15306_v61 = vmul.f32 0.01, %v15216_v12  ;;  %v15309_v31 = vmul.f32 0.01, %v15234_v14 }
 0x3b0   : > { %6877 = vmatprep.subr.bf16.mxu0 %v19517_v33  ;;  %v15267_v33 = vpop.f32.mrb[43].mxu0  ;;  %19524 = vst [vmem:[#allocation41_spill] sm:$0xff] %v15276_v7  ;;  %19525 = vst [vmem:[#allocation191_spill] sm:$0xff] %v15280_v2  ;;  %7528 = vmatprep.mubr.bf16.mxu1 %v19526_v50  ;;  %v15317_v50 = vadd.f32 %v19536_v53, %v14592_v17  ;;  %v15319_v7 = vpop.f32.mrb[43].mxu1  ;;  %v19538_v9 = vcombine.low %v14938_v20, %v14940_v4  ;;  %v15330_v42 = vmul.f32 0.01, %v15259_v25 }
 0x3b1   : > { %19527 = vst [vmem:[#allocation42_spill] sm:$0xff] %v15289_v1  ;;  %19528 = vst [vmem:[#allocation192_spill] sm:$0xff] %v15293_v43  ;;  %v15313_v1 = vadd.f32 %v19534_v45, %v14587_v18  ;;  %v15321_v47 = vpop.f32.mrb[44].mxu0  ;;  %v15333_v45 = vmul.f32 0.01, %v15263_v3  ;;  %v19542_v53 = vld [vmem:[#allocation132_spill] sm:$0xff] }
 0x3b2   : > { %19530 = vst [vmem:[#allocation29_spill] sm:$0xff] %v15297_v23  ;;  %6878 = vmatpush1.bf16.msra.mxu0 %v19531_v38  ;;  %19532 = vst [vmem:[#allocation193_spill] sm:$0xff] %v15306_v61  ;;  %7650 = vmatpush1.bf16.msra.mxu1 %v19538_v9  ;;  %v19539_v38 = vcombine.high %v14950_v36, %v14952_v41  ;;  %v15337_v61 = vadd.f32 %v19542_v53, %v14605_v48  ;;  %v15343_v4 = vpop.f32.mrb[44].mxu1  ;;  %v15345_v20 = vpop.f32.mrb[45].mxu0  ;;  %v19550_v53 = vld [vmem:[#allocation137_spill] sm:$0xff]  ;;  %vm8072_vm9 = vcmp.gt.f32.partialorder %v15099_v60, 0.0 }
 0x3b3   : > { %19533 = vst [vmem:[#allocation194_spill] sm:$0xff] %v15309_v31  ;;  %19535 = vst [vmem:[#allocation30_spill] sm:$0xff] %v15313_v1  ;;  %v19544_v31 = vld [vmem:[#allocation32_spill] sm:$0xff]  ;;  %v19546_v9 = vcombine.high %v14964_v13, %v14966_v32  ;;  %v15359_v3 = vadd.f32 %v19550_v53, %v14592_v17  ;;  %v15366_v58 = vmul.f32 0.01, %v15293_v43  ;;  %v19560_v53 = vcombine.low %v14950_v36, %v14952_v41  ;;  %v15398_v14 = vpop.f32.mrb[46].mxu0 }
 0x3b4   : > { %19537 = vst [vmem:[#allocation131_spill] sm:$0xff] %v15317_v50  ;;  %6879 = vmatprep.subr.bf16.mxu0 %v19539_v38  ;;  %19540 = vst [vmem:[#allocation195_spill] sm:$0xff] %v15330_v42  ;;  %v15341_v12 = vadd.f32 %v19544_v31, %v14633_v26  ;;  %v15351_v38 = vmul.f32 0.01, %v15280_v2  ;;  %v19552_v31 = vld [vmem:[#allocation138_spill] sm:$0xff]  ;;  %v19567_v36 = vcombine.low %v14964_v13, %v14966_v32  ;;  %v15422_v13 = vpop.f32.mrb[47].mxu0 }
 0x3b5   : > { %19541 = vst [vmem:[#allocation196_spill] sm:$0xff] %v15333_v45  ;;  %19543 = vst [vmem:[#allocation132_spill] sm:$0xff] %v15337_v61  ;;  %7651 = vmatprep.subr.bf16.mxu1 %v19546_v9  ;;  %v19548_v45 = vld [vmem:[#allocation134_spill] sm:$0xff]  ;;  %v15363_v8 = vadd.f32 %v19552_v31, %v14605_v48  ;;  %v15369_v9 = vmul.f32 0.01, %v15297_v23  ;;  %v19568_v41 = vcombine.high %v14981_v44, %v14983_v57  ;;  %vm8074_vm10 = vcmp.gt.f32.partialorder %v15121_v28, 0.0 }
 0x3b6   : > { %19545 = vst [vmem:[#allocation32_spill] sm:$0xff] %v15341_v12  ;;  %19547 = vst [vmem:[#allocation197_spill] sm:$0xff] %v15351_v38  ;;  %v15355_v42 = vadd.f32 %v19548_v45, %v14587_v18  ;;  %v19556_v38 = vld [vmem:[#allocation141_spill] sm:$0xff]  ;;  %v19558_v45 = vld [vmem:[#allocation142_spill] sm:$0xff]  ;;  %6880 = vmatpush1.bf16.msra.mxu0 %v19560_v53  ;;  %v15383_v31 = vmul.f32 0.01, %v15313_v1  ;;  %7652 = vmatpush1.bf16.msra.mxu1 %v19567_v36 }
 0x3b7   : > { %19551 = vst [vmem:[#allocation137_spill] sm:$0xff] %v15359_v3  ;;  %19553 = vst [vmem:[#allocation138_spill] sm:$0xff] %v15363_v8  ;;  %v15373_v2 = vadd.f32 %v19556_v38, %v14633_v26  ;;  %v15377_v25 = vadd.f32 %v19558_v45, %v14587_v18  ;;  %v19565_v38 = vld [vmem:[#allocation144_spill] sm:$0xff]  ;;  %v15396_v45 = vpop.f32.mrb[45].mxu1  ;;  %6881 = vmatprep.subr.bf16.mxu0 %v19568_v41  ;;  %v15407_v53 = vmul.f32 0.01, %v15337_v61 }
 0x3b8   : > { %19549 = vst [vmem:[#allocation134_spill] sm:$0xff] %v15355_v42  ;;  %19554 = vst [vmem:[#allocation198_spill] sm:$0xff] %v15366_v58  ;;  %v15386_v58 = vmul.f32 0.01, %v15317_v50  ;;  %v15394_v43 = vadd.f32 %v19565_v38, %v14605_v48  ;;  %v19571_v38 = vld [vmem:[#allocation33_spill] sm:$0xff]  ;;  %v15420_v32 = vpop.f32.mrb[46].mxu1  ;;  %v19576_v41 = vcombine.high %v14997_v39, %v14999_v46 }
 0x3b9   : > { %19555 = vst [vmem:[#allocation199_spill] sm:$0xff] %v15369_v9  ;;  %19557 = vst [vmem:[#allocation141_spill] sm:$0xff] %v15373_v2  ;;  %v19563_v9 = vld [vmem:[#allocation143_spill] sm:$0xff]  ;;  %v19582_v1 = vld [vmem:[#allocation44_spill] sm:$0xff]  ;;  %vm8066_vm11 = vcmp.gt.f32.partialorder %v15062_v37, 0.0  ;;  %vm8080_vm0 = vcmp.gt.f32.partialorder %v15178_v56, 0.0 }
 0x3ba   : > { %19559 = vst [vmem:[#allocation142_spill] sm:$0xff] %v15377_v25  ;;  %19561 = vst [vmem:[#allocation200_spill] sm:$0xff] %v15383_v31  ;;  %v15390_v23 = vadd.f32 %v19563_v9, %v14592_v17  ;;  %v15410_v9 = vmul.f32 0.01, %v15341_v12  ;;  %v19573_v31 = vld [vmem:[#allocation34_spill] sm:$0xff]  ;;  %v19575_v36 = vld [vmem:[#allocation43_spill] sm:$0xff]  ;;  %7653 = vmatprep.subr.bf16.mxu1 %v19576_v41 }
 0x3bb   : > { %19562 = vst [vmem:[#allocation201_spill] sm:$0xff] %v15386_v58  ;;  %19566 = vst [vmem:[#allocation144_spill] sm:$0xff] %v15394_v43  ;;  %v15414_v58 = vadd.f32 %v19571_v38, %v14633_v26  ;;  %v15418_v50 = vadd.f32 %v19573_v31, %v14587_v18  ;;  %6757 = vmatmul.mubr.bf16.gmra.mrb[88].mxu0 %v19575_v36  ;;  %v15432_v38 = vmul.f32 0.01, %v15359_v3  ;;  %v19580_v31 = vld [vmem:[#allocation145_spill] sm:$0xff]  ;;  %7529 = vmatmul.mubr.bf16.gmra.mrb[88].mxu1 %v19575_v36 }
 0x3bc   : > { %19564 = vst [vmem:[#allocation143_spill] sm:$0xff] %v15390_v23  ;;  %19569 = vst [vmem:[#allocation202_spill] sm:$0xff] %v15407_v53  ;;  %v15435_v53 = vmul.f32 0.01, %v15363_v8  ;;  %v15439_v12 = vadd.f32 %v19580_v31, %v14592_v17  ;;  %6766 = vmatprep.mubr.bf16.mxu0 %v19582_v1  ;;  %v15445_v41 = vmul.f32 0.01, %v15373_v2  ;;  %7538 = vmatprep.mubr.bf16.mxu1 %v19582_v1 }
 0x3bd   : > { %19570 = vst [vmem:[#allocation203_spill] sm:$0xff] %v15410_v9  ;;  %19572 = vst [vmem:[#allocation33_spill] sm:$0xff] %v15414_v58  ;;  %v15429_v9 = vmul.f32 0.01, %v15355_v42  ;;  %v19589_v36 = vcombine.low %v14981_v44, %v14983_v57  ;;  %v15463_v42 = vmul.f32 0.01, %v15390_v23  ;;  %v19596_v57 = vcombine.low %v14997_v39, %v14999_v46 }
 0x3be   : > { %19574 = vst [vmem:[#allocation34_spill] sm:$0xff] %v15418_v50  ;;  %19578 = vst [vmem:[#allocation204_spill] sm:$0xff] %v15432_v38  ;;  %v19585_v38 = vld [vmem:[#allocation146_spill] sm:$0xff]  ;;  %v15476_v2 = vpop.f32.mrb[47].mxu1  ;;  %v15478_v1 = vpop.f32.mrb[48].mxu0  ;;  %v19597_v44 = vcombine.high %v15049_v30, %v15051_v52 }
 0x3bf   : > { %19577 = vst [vmem:[#allocation43_spill] sm:$0xff] %v15429_v9  ;;  %19579 = vst [vmem:[#allocation205_spill] sm:$0xff] %v15435_v53  ;;  %v15448_v9 = vmul.f32 0.01, %v15377_v25  ;;  %v15452_v3 = vadd.f32 %v19585_v38, %v14605_v48  ;;  %v19587_v53 = vld [vmem:[#allocation148_spill] sm:$0xff]  ;;  %6882 = vmatpush1.bf16.msra.mxu0 %v19589_v36  ;;  %v19594_v25 = vld [vmem:[#allocation151_spill] sm:$0xff]  ;;  %7654 = vmatpush1.bf16.msra.mxu1 %v19596_v57 }
 0x3c0   : > { %19581 = vst [vmem:[#allocation145_spill] sm:$0xff] %v15439_v12  ;;  %19583 = vst [vmem:[#allocation44_spill] sm:$0xff] %v15445_v41  ;;  %v15456_v31 = vadd.f32 %v19587_v53, %v14633_v26  ;;  %v15466_v41 = vmul.f32 0.01, %v15394_v43  ;;  %v15474_v53 = vadd.f32 %v19594_v25, %v14592_v17  ;;  %6883 = vmatprep.subr.bf16.mxu0 %v19597_v44  ;;  %v15491_v25 = vmul.f32 0.01, %v15418_v50 }
 0x3c1   : > { %19584 = vst [vmem:[#allocation206_spill] sm:$0xff] %v15448_v9  ;;  %19586 = vst [vmem:[#allocation146_spill] sm:$0xff] %v15452_v3  ;;  %v19592_v9 = vld [vmem:[#allocation149_spill] sm:$0xff]  ;;  %v19600_v36 = vld [vmem:[#allocation152_spill] sm:$0xff]  ;;  %v15501_v39 = vpop.f32.mrb[48].mxu1  ;;  %v15503_v57 = vpop.f32.mrb[49].mxu0  ;;  %v19602_v44 = vcombine.high %v15071_v55, %v15111_v63 }
 0x3c2   : > { %19588 = vst [vmem:[#allocation148_spill] sm:$0xff] %v15456_v31  ;;  %19590 = vst [vmem:[#allocation207_spill] sm:$0xff] %v15463_v42  ;;  %v15470_v38 = vadd.f32 %v19592_v9, %v14587_v18  ;;  %v15488_v9 = vmul.f32 0.01, %v15414_v58  ;;  %v15495_v42 = vadd.f32 %v19600_v36, %v14605_v48  ;;  %v19606_v36 = vld [vmem:[#allocation153_spill] sm:$0xff]  ;;  %v15556_v61 = vpop.f32.mrb[50].mxu0 }
 0x3c3   : > { %19591 = vst [vmem:[#allocation208_spill] sm:$0xff] %v15466_v41  ;;  %19595 = vst [vmem:[#allocation151_spill] sm:$0xff] %v15474_v53  ;;  %v19601_v41 = vld [vmem:[#allocation35_spill] sm:$0xff]  ;;  %7655 = vmatprep.subr.bf16.mxu1 %v19602_v44  ;;  %v15517_v23 = vadd.f32 %v19606_v36, %v14592_v17  ;;  %v15524_v43 = vmul.f32 0.01, %v15452_v3  ;;  %v19615_v36 = vcombine.low %v15049_v30, %v15051_v52 }
 0x3c4   : > { %19593 = vst [vmem:[#allocation149_spill] sm:$0xff] %v15470_v38  ;;  %19598 = vst [vmem:[#allocation209_spill] sm:$0xff] %v15488_v9  ;;  %v15499_v46 = vadd.f32 %v19601_v41, %v14633_v26  ;;  %v15509_v9 = vmul.f32 0.01, %v15439_v12  ;;  %v19608_v41 = vld [vmem:[#allocation154_spill] sm:$0xff]  ;;  %v19622_v52 = vcombine.low %v15071_v55, %v15111_v63  ;;  %v19623_v30 = vcombine.high %v15129_v34, %v15131_v0  ;;  %v15580_v63 = vpop.f32.mrb[51].mxu0 }
 0x3c5   : > { %19599 = vst [vmem:[#allocation210_spill] sm:$0xff] %v15491_v25  ;;  %v19604_v25 = vld [vmem:[#allocation36_spill] sm:$0xff]  ;;  %v15521_v58 = vadd.f32 %v19608_v41, %v14605_v48  ;;  %19609 = vst [vmem:[#allocation153_spill] sm:$0xff] %v15524_v43  ;;  %v15527_v44 = vmul.f32 0.01, %v15456_v31  ;;  %6884 = vmatpush1.bf16.msra.mxu0 %v19615_v36 }
 0x3c6   : > { %19603 = vst [vmem:[#allocation152_spill] sm:$0xff] %v15509_v9  ;;  %v15513_v50 = vadd.f32 %v19604_v25, %v14587_v18  ;;  %19607 = vst [vmem:[#allocation36_spill] sm:$0xff] %v15517_v23  ;;  %v19611_v9 = vld [vmem:[#allocation155_spill] sm:$0xff]  ;;  %v19613_v25 = vld [vmem:[#allocation156_spill] sm:$0xff]  ;;  %v15541_v41 = vmul.f32 0.01, %v15470_v38  ;;  %7656 = vmatpush1.bf16.msra.mxu1 %v19622_v52  ;;  %6885 = vmatprep.subr.bf16.mxu0 %v19623_v30  ;;  %v19629_v30 = vcombine.high %v15169_v11, %v15171_v27 }
 0x3c7   : > { %19610 = vst [vmem:[#allocation154_spill] sm:$0xff] %v15527_v44  ;;  %v15531_v12 = vadd.f32 %v19611_v9, %v14633_v26  ;;  %v15535_v8 = vadd.f32 %v19613_v25, %v14587_v18  ;;  %v15544_v43 = vmul.f32 0.01, %v15474_v53  ;;  %v19618_v44 = vld [vmem:[#allocation157_spill] sm:$0xff]  ;;  %v19620_v9 = vld [vmem:[#allocation158_spill] sm:$0xff]  ;;  %v15554_v25 = vpop.f32.mrb[49].mxu1 }
 0x3c8   : > { %19605 = vst [vmem:[#allocation35_spill] sm:$0xff] %v15513_v50  ;;  %19616 = vst [vmem:[#allocation211_spill] sm:$0xff] %v15541_v41  ;;  %v15548_v31 = vadd.f32 %v19618_v44, %v14592_v17  ;;  %v15552_v3 = vadd.f32 %v19620_v9, %v14605_v48  ;;  %v15565_v36 = vmul.f32 0.01, %v15495_v42  ;;  %v15568_v44 = vmul.f32 0.01, %v15499_v46  ;;  %7657 = vmatprep.subr.bf16.mxu1 %v19629_v30 }
 0x3c9   : > { %19612 = vst [vmem:[#allocation155_spill] sm:$0xff] %v15531_v12  ;;  %19614 = vst [vmem:[#allocation156_spill] sm:$0xff] %v15535_v8  ;;  %v15572_v9 = vadd.f32 %v15016_v51, %v14633_v26  ;;  %v15578_v55 = vpop.f32.mrb[50].mxu1  ;;  %v19628_v52 = vld [vmem:[#allocation45_spill] sm:$0xff]  ;;  %v15587_v41 = vmul.f32 0.01, %v15513_v50 }
 0x3ca   : > { %19617 = vst [vmem:[#allocation212_spill] sm:$0xff] %v15544_v43  ;;  %19619 = vst [vmem:[#allocation157_spill] sm:$0xff] %v15548_v31  ;;  %v15576_v43 = vadd.f32 %v15018_v22, %v14587_v18  ;;  %6767 = vmatmul.mubr.bf16.gmra.mrb[92].mxu0 %v19628_v52  ;;  %v15590_v51 = vmul.f32 0.01, %v15517_v23  ;;  %v19633_v22 = vld [vmem:[#allocation160_spill] sm:$0xff]  ;;  %7539 = vmatmul.mubr.bf16.gmra.mrb[92].mxu1 %v19628_v52  ;;  %v19634_v53 = vld [vmem:[#allocation46_spill] sm:$0xff]  ;;  %v19638_v52 = vcombine.low %v15129_v34, %v15131_v0 }
 0x3cb   : > { %19621 = vst [vmem:[#allocation158_spill] sm:$0xff] %v15552_v3  ;;  %19624 = vst [vmem:[#allocation213_spill] sm:$0xff] %v15565_v36  ;;  %v15597_v36 = vadd.f32 %v19633_v22, %v14592_v17  ;;  %6776 = vmatprep.mubr.bf16.mxu0 %v19634_v53  ;;  %v15602_v38 = vmul.f32 0.01, %v15531_v12  ;;  %v15605_v30 = vmul.f32 0.01, %v15535_v8  ;;  %7548 = vmatprep.mubr.bf16.mxu1 %v19634_v53 }
 0x3cc   : > { %19625 = vst [vmem:[#allocation214_spill] sm:$0xff] %v15568_v44  ;;  %19626 = vst [vmem:[#allocation215_spill] sm:$0xff] %v15572_v9  ;;  %v15593_v44 = vmul.f32 0.01, %v15521_v58  ;;  %6886 = vmatpush1.bf16.msra.mxu0 %v19638_v52  ;;  %v15620_v22 = vmul.f32 0.01, %v15548_v31  ;;  %v19642_v53 = vcombine.low %v15169_v11, %v15171_v27  ;;  %v19643_v0 = vcombine.high %v15191_v10, %v15193_v35 }
 0x3cd   : > { %19627 = vst [vmem:[#allocation216_spill] sm:$0xff] %v15576_v43  ;;  %19630 = vst [vmem:[#allocation45_spill] sm:$0xff] %v15587_v41  ;;  %v19637_v41 = vld [vmem:[#allocation161_spill] sm:$0xff]  ;;  %v15629_v23 = vpop.f32.mrb[51].mxu1  ;;  %v19645_v52 = vld [vmem:[#allocation31_spill] sm:$0xff] }
 0x3ce   : > { %19631 = vst [vmem:[#allocation217_spill] sm:$0xff] %v15590_v51  ;;  %19632 = vst [vmem:[#allocation218_spill] sm:$0xff] %v15593_v44  ;;  %v15609_v51 = vadd.f32 %v19637_v41, %v14605_v48  ;;  %v15613_v44 = vadd.f32 %v15083_v6, %v14633_v26  ;;  %v15631_v6 = vpop.f32.mrb[52].mxu0  ;;  %7658 = vmatpush1.bf16.msra.mxu1 %v19642_v53  ;;  %6887 = vmatprep.subr.bf16.mxu0 %v19643_v0  ;;  %v19644_v34 = vld [vmem:[#allocation133_spill] sm:$0xff]  ;;  %v19647_v31 = vld [vmem:[#allocation38_spill] sm:$0xff]  ;;  %v15653_v53 = vpop.f32.mrb[52].mxu1 }
 0x3cf   : > { %19635 = vst [vmem:[#allocation160_spill] sm:$0xff] %v15602_v38  ;;  %19636 = vst [vmem:[#allocation46_spill] sm:$0xff] %v15605_v30  ;;  %v15623_v38 = vmul.f32 0.01, %v15552_v3  ;;  %v19641_v30 = vld [vmem:[#allocation169_spill] sm:$0xff]  ;;  %vm8057_vm7 = vcmp.gt.f32.partialorder %v19647_v31, 0.0 }
 0x3d0   : > { %19639 = vst [vmem:[#allocation161_spill] sm:$0xff] %v15620_v22  ;;  %v15627_v41 = vadd.f32 %v19641_v30, %v14587_v18  ;;  %v10665_v22 = vcombine.high %v19645_v52, %v19644_v34  ;;  %v15644_v30 = vmul.f32 0.01, %v15572_v9  ;;  %v15647_v8 = vmul.f32 0.01, %v15576_v43  ;;  %v19650_v27 = vld [vmem:[#allocation170_spill] sm:$0xff] }
 0x3d1   : > { %19640 = vst [vmem:[#allocation219_spill] sm:$0xff] %v15623_v38  ;;  %v19646_v38 = vld [vmem:[#allocation37_spill] sm:$0xff]  ;;  %v15651_v11 = vadd.f32 %v19650_v27, %v14592_v17  ;;  %v15655_v0 = vpop.f32.mrb[53].mxu0  ;;  %v19651_v34 = vcombine.high %v15225_v15, %v15227_v54  ;;  %v19652_v52 = vld [vmem:[#allocation136_spill] sm:$0xff]  ;;  %v19653_v50 = vld [vmem:[#allocation135_spill] sm:$0xff]  ;;  %v15671_v27 = vadd.f32 %v15155_v62, %v14633_v26  ;;  %v15691_v62 = vadd.f32 %v15180_v19, %v14592_v17 }
 0x3d2   : > { %vm8049_vm6 = vcmp.gt.f32.partialorder %v19646_v38, 0.0  ;;  %19648 = vst [vmem:[#allocation169_spill] sm:$0xff] %v15644_v30  ;;  %19649 = vst [vmem:[#allocation37_spill] sm:$0xff] %v15647_v8  ;;  %v10667_v12 = vcombine.high %v19653_v50, %v19652_v52  ;;  %v15663_v30 = vmul.f32 0.01, %v15597_v36  ;;  %v19655_v8 = vld [vmem:[#allocation171_spill] sm:$0xff]  ;;  %v19662_v50 = vcombine.low %v15191_v10, %v15193_v35 }
 0x3d3   : > { %7659 = vmatprep.subr.bf16.mxu1 %v19651_v34  ;;  %v15667_v43 = vadd.f32 %v19655_v8, %v14605_v48  ;;  %v19656_v9 = vld [vmem:[#allocation166_spill] sm:$0xff]  ;;  %v15680_v34 = vmul.f32 0.01, %v15609_v51  ;;  %v15683_v52 = vmul.f32 0.01, %v15613_v44  ;;  %v15687_v8 = vadd.f32 %v15157_v49, %v14587_v18  ;;  %19661 = vst [vmem:[#allocation221_spill] sm:$0xff] %v15691_v62 }
 0x3d4   : > { %19654 = vst [vmem:[#allocation38_spill] sm:$0xff] %v15663_v30  ;;  %v15677_v3 = vsel %vm8055_vm4, %v15010_v21, %v19656_v9  ;;  %6888 = vmatpush1.bf16.msra.mxu0 %v19662_v50  ;;  %v15697_v21 = vmul.f32 0.01, %v15627_v41  ;;  %v15701_v9 = vadd.f32 %v15182_v24, %v14605_v48  ;;  %v15705_v30 = vadd.f32 %v15236_v59, %v14633_v26  ;;  %v15707_v49 = vpop.f32.mrb[53].mxu1  ;;  %v19666_v35 = vld [vmem:[#allocation159_spill] sm:$0xff] }
 0x3d5   : > { %19657 = vst [vmem:[#allocation170_spill] sm:$0xff] %v15677_v3  ;;  %19658 = vst [vmem:[#allocation171_spill] sm:$0xff] %v15680_v34  ;;  %v19665_v19 = vcombine.low %v15225_v15, %v15227_v54  ;;  %7050 = vmatprep.subr.bf16.mxu0 %v10665_v22  ;;  %v15718_v10 = vsel %vm8047_vm5, %v14970_v29, %v19666_v35  ;;  %v15721_v24 = vmul.f32 0.01, %v15651_v11  ;;  %v15731_v15 = vpop.f32.mrb[54].mxu1  ;;  %v19671_v22 = vld [vmem:[#allocation47_spill] sm:$0xff] }
 0x3d6   : > { %19659 = vst [vmem:[#allocation166_spill] sm:$0xff] %v15683_v52  ;;  %19660 = vst [vmem:[#allocation220_spill] sm:$0xff] %v15687_v8  ;;  %v15709_v52 = vpop.f32.mrb[54].mxu0  ;;  %v15725_v59 = vadd.f32 %v15238_v5, %v14587_v18  ;;  %v15729_v50 = vadd.f32 %v15265_v16, %v14592_v17  ;;  %6777 = vmatmul.mubr.bf16.gmra.mrb[96].mxu0 %v19671_v22  ;;  %v15742_v5 = vmul.f32 0.01, %v15671_v27  ;;  %7549 = vmatmul.mubr.bf16.gmra.mrb[96].mxu1 %v19671_v22 }
 0x3d7   : > { %19663 = vst [vmem:[#allocation222_spill] sm:$0xff] %v15697_v21  ;;  %19664 = vst [vmem:[#allocation223_spill] sm:$0xff] %v15705_v30  ;;  %7660 = vmatpush1.bf16.msra.mxu1 %v19665_v19  ;;  %v15733_v54 = vpop.f32.mrb[55].mxu0  ;;  %v15739_v19 = vmul.f32 0.01, %v15667_v43  ;;  %v15746_v16 = vadd.f32 %v15267_v33, %v14605_v48  ;;  %v15750_v35 = vadd.f32 %v15319_v7, %v14633_v26 }
 0x3d8   : > { %19667 = vst [vmem:[#allocation159_spill] sm:$0xff] %v15718_v10  ;;  %19668 = vst [vmem:[#allocation224_spill] sm:$0xff] %v15721_v24  ;;  %7822 = vmatprep.subr.bf16.mxu1 %v10667_v12  ;;  %v19675_v12 = vld [vmem:[#allocation48_spill] sm:$0xff]  ;;  %v15755_v29 = vmul.f32 0.01, %v15687_v8  ;;  %v15762_v3 = vadd.f32 %v15321_v47, %v14587_v18  ;;  %v15766_v33 = vadd.f32 %v15343_v4, %v14592_v17  ;;  %v15777_v24 = vpop.f32.mrb[56].mxu0 }
 0x3d9   : > { %19669 = vst [vmem:[#allocation225_spill] sm:$0xff] %v15725_v59  ;;  %19670 = vst [vmem:[#allocation226_spill] sm:$0xff] %v15729_v50  ;;  %6786 = vmatprep.mubr.bf16.mxu0 %v19675_v12  ;;  %v15758_v10 = vmul.f32 0.01, %v15691_v62  ;;  %7558 = vmatprep.mubr.bf16.mxu1 %v19675_v12  ;;  %v15770_v7 = vmul.f32 0.01, %v15701_v9  ;;  %v15789_v12 = vadd.f32 %v15345_v20, %v14605_v48 }
 0x3da   : > { %19672 = vst [vmem:[#allocation47_spill] sm:$0xff] %v15739_v19  ;;  %19673 = vst [vmem:[#allocation227_spill] sm:$0xff] %v15742_v5  ;;  %v15773_v22 = vmul.f32 0.01, %v15705_v30  ;;  %v15782_v47 = vmul.f32 0.01, %v15725_v59  ;;  %v15854_v34 = vadd.f32 %v15501_v39, %v14592_v17  ;;  %v15875_v39 = vadd.f32 %v15554_v25, %v14633_v26 }
 0x3db   : > { %19674 = vst [vmem:[#allocation228_spill] sm:$0xff] %v15750_v35  ;;  %19676 = vst [vmem:[#allocation48_spill] sm:$0xff] %v15755_v29  ;;  %v15775_v29 = vpop.f32.mrb[55].mxu1  ;;  %v15785_v4 = vmul.f32 0.01, %v15729_v50  ;;  %v15883_v50 = vld [vmem:[#allocation7 + $0xc50] sm:$0xff]  ;;  %v15895_v25 = vadd.f32 %v15578_v55, %v14592_v17 }
 0x3dc   : > { %19677 = vst [vmem:[#allocation229_spill] sm:$0xff] %v15758_v10  ;;  %19678 = vst [vmem:[#allocation230_spill] sm:$0xff] %v15762_v3  ;;  %v15791_v10 = vpop.f32.mrb[56].mxu1  ;;  %v15799_v21 = vmul.f32 0.01, %v15750_v35  ;;  %v16008_v62 = vld [vmem:[#allocation7 + $0xc58] sm:$0xff] }
 0x3dd   : > { %19679 = vst [vmem:[#allocation231_spill] sm:$0xff] %v15766_v33  ;;  %19680 = vst [vmem:[#allocation232_spill] sm:$0xff] %v15770_v7  ;;  %v15796_v7 = vmul.f32 0.01, %v15746_v16  ;;  %v15811_v20 = vmul.f32 0.01, %v15762_v3 }
 0x3de   : > { %19681 = vst [vmem:[#allocation233_spill] sm:$0xff] %v15773_v22  ;;  %19682 = vst [vmem:[#allocation234_spill] sm:$0xff] %v15782_v47  ;;  %v15793_v22 = vpop.f32.mrb[57].mxu0  ;;  %v15803_v47 = vadd.f32 %v15396_v45, %v14633_v26  ;;  %v15814_v5 = vmul.f32 0.01, %v15766_v33  ;;  %v15822_v45 = vadd.f32 %v15422_v13, %v14605_v48  ;;  %v19697_v13 = vld [vmem:[#allocation167_spill] sm:$0xff]  ;;  %v15858_v33 = vadd.f32 %v15503_v57, %v14605_v48 }
 0x3df   : > { %19683 = vst [vmem:[#allocation235_spill] sm:$0xff] %v15785_v4  ;;  %19684 = vst [vmem:[#allocation236_spill] sm:$0xff] %v15789_v12  ;;  %v15807_v4 = vadd.f32 %v15398_v14, %v14587_v18  ;;  %v15826_v14 = vadd.f32 %v15476_v2, %v14633_v26  ;;  %v15834_v19 = vpop.f32.mrb[58].mxu0  ;;  %v15846_v2 = vsel %vm8057_vm7, %v19647_v31, %v19697_v13  ;;  %v19702_v3 = vld [vmem:[#allocation49_spill] sm:$0xff]  ;;  %v15885_v31 = vld [vmem:[#allocation7 + $0xc70] sm:$0xff] }
 0x3e0   : > { %19685 = vst [vmem:[#allocation237_spill] sm:$0xff] %v15796_v7  ;;  %19686 = vst [vmem:[#allocation238_spill] sm:$0xff] %v15799_v21  ;;  %v15818_v7 = vadd.f32 %v15420_v32, %v14592_v17  ;;  %v15830_v21 = vadd.f32 %v15478_v1, %v14587_v18  ;;  %v15850_v1 = vmul.f32 0.01, %v15789_v12  ;;  %6787 = vmatmul.mubr.bf16.gmra.mrb[100].mxu0 %v19702_v3  ;;  %v15868_v13 = vmul.f32 0.01, %v15803_v47 }
 0x3e1   : > { %19687 = vst [vmem:[#allocation239_spill] sm:$0xff] %v15803_v47  ;;  %19688 = vst [vmem:[#allocation240_spill] sm:$0xff] %v15807_v4  ;;  %v15879_v57 = vadd.f32 %v15556_v61, %v14587_v18  ;;  %7559 = vmatmul.mubr.bf16.gmra.mrb[100].mxu1 %v19702_v3  ;;  %v19707_v12 = vld [vmem:[#allocation50_spill] sm:$0xff]  ;;  %v15899_v61 = vadd.f32 %v15580_v63, %v14605_v48  ;;  %v19714_v3 = vld [vmem:[#allocation163_spill] sm:$0xff] }
 0x3e2   : > { %19689 = vst [vmem:[#allocation241_spill] sm:$0xff] %v15811_v20  ;;  %19690 = vst [vmem:[#allocation242_spill] sm:$0xff] %v15814_v5  ;;  %v15832_v20 = vpop.f32.mrb[57].mxu1  ;;  %v19695_v5 = vld [vmem:[#allocation162_spill] sm:$0xff]  ;;  %6796 = vmatprep.mubr.bf16.mxu0 %v19707_v12  ;;  %7568 = vmatprep.mubr.bf16.mxu1 %v19707_v12  ;;  %vm8063_vm12 = vcmp.gt.f32.partialorder %v19714_v3, 0.0  ;;  %v19719_v63 = vld [vmem:[#allocation168_spill] sm:$0xff] }
 0x3e3   : > { %19691 = vst [vmem:[#allocation243_spill] sm:$0xff] %v15818_v7  ;;  %19692 = vst [vmem:[#allocation244_spill] sm:$0xff] %v15822_v45  ;;  %v15840_v32 = vsel %vm8049_vm6, %v19646_v38, %v19695_v5  ;;  %v15860_v38 = vpop.f32.mrb[58].mxu1  ;;  %v15862_v5 = vpop.f32.mrb[59].mxu0  ;;  %vm8073_vm15 = vcmp.gt.f32.partialorder %v19719_v63, 0.0  ;;  %v16010_v59 = vld [vmem:[#allocation7 + $0xc78] sm:$0xff] }
 0x3e4   : > { %19693 = vst [vmem:[#allocation245_spill] sm:$0xff] %v15826_v14  ;;  %19694 = vst [vmem:[#allocation246_spill] sm:$0xff] %v15830_v21  ;;  %v15912_v55 = vpop.f32.mrb[60].mxu0  ;;  %v15917_v12 = vmul.f32 0.01, %v15854_v34  ;;  %v19750_v8 = vld [vmem:[#allocation29_spill] sm:$0xff] }
 0x3e5   : > { %19696 = vst [vmem:[#allocation162_spill] sm:$0xff] %v15840_v32  ;;  %19698 = vst [vmem:[#allocation167_spill] sm:$0xff] %v15846_v2  ;;  %v15888_v32 = vmul.f32 0.01, %v15818_v7  ;;  %v15891_v2 = vmul.f32 0.01, %v15822_v45 }
 0x3e6   : > { %19699 = vst [vmem:[#allocation247_spill] sm:$0xff] %v15850_v1  ;;  %19700 = vst [vmem:[#allocation248_spill] sm:$0xff] %v15854_v34  ;;  %v15871_v1 = vmul.f32 0.01, %v15807_v4  ;;  %v19718_v7 = vld [vmem:[#allocation164_spill] sm:$0xff]  ;;  %v19724_v45 = vld [vmem:[#allocation189_spill] sm:$0xff]  ;;  %v15941_v34 = vadd.f32 %v15629_v23, %v14633_v26  ;;  %v15960_v23 = vadd.f32 %v15655_v0, %v14605_v48 }
 0x3e7   : > { %19701 = vst [vmem:[#allocation249_spill] sm:$0xff] %v15858_v33  ;;  %19703 = vst [vmem:[#allocation49_spill] sm:$0xff] %v15868_v13  ;;  %v15905_v13 = vmul.f32 0.01, %v15826_v14  ;;  %vm8065_vm14 = vcmp.gt.f32.partialorder %v19718_v7, 0.0  ;;  %v19723_v14 = vld [vmem:[#allocation186_spill] sm:$0xff] }
 0x3e8   : > { %19704 = vst [vmem:[#allocation250_spill] sm:$0xff] %v15871_v1  ;;  %19705 = vst [vmem:[#allocation251_spill] sm:$0xff] %v15875_v39  ;;  %v19715_v1 = vld [vmem:[#allocation165_spill] sm:$0xff]  ;;  %v15920_v4 = vmul.f32 0.01, %v15858_v33  ;;  %vm8088_vm1 = vcmp.gt.f32.partialorder %v19723_v14, 0.0 }
 0x3e9   : > { %19706 = vst [vmem:[#allocation252_spill] sm:$0xff] %v15879_v57  ;;  %19708 = vst [vmem:[#allocation50_spill] sm:$0xff] %v15883_v50  ;;  %vm8071_vm13 = vcmp.gt.f32.partialorder %v19715_v1, 0.0  ;;  %vm8090_vm2 = vcmp.gt.f32.partialorder %v19724_v45, 0.0  ;;  %v15952_v50 = vmul.f32 0.01, %v15899_v61 }
 0x3ea   : > { %19709 = vst [vmem:[#allocation253_spill] sm:$0xff] %v15885_v31  ;;  %19710 = vst [vmem:[#allocation254_spill] sm:$0xff] %v15888_v32  ;;  %v15908_v32 = vmul.f32 0.01, %v15830_v21  ;;  %v19729_v21 = vld [vmem:[#allocation181_spill] sm:$0xff]  ;;  %v19743_v33 = vld [vmem:[#allocation192_spill] sm:$0xff] }
 0x3eb   : > { %19711 = vst [vmem:[#allocation255_spill] sm:$0xff] %v15891_v2  ;;  %19712 = vst [vmem:[#allocation256_spill] sm:$0xff] %v15895_v25  ;;  %v15910_v2 = vpop.f32.mrb[59].mxu1  ;;  %vm8082_vm3 = vcmp.gt.f32.partialorder %v19729_v21, 0.0  ;;  %v15949_v31 = vmul.f32 0.01, %v15895_v25 }
 0x3ec   : > { %19713 = vst [vmem:[#allocation257_spill] sm:$0xff] %v15899_v61  ;;  %19716 = vst [vmem:[#allocation163_spill] sm:$0xff] %v15905_v13  ;;  %v15922_v47 = vpop.f32.mrb[60].mxu1  ;;  %v15924_v13 = vpop.f32.mrb[61].mxu0  ;;  %v19740_v61 = vld [vmem:[#allocation177_spill] sm:$0xff]  ;;  %v19755_v35 = vld [vmem:[#allocation52_spill] sm:$0xff] }
 0x3ed   : > { %19717 = vst [vmem:[#allocation165_spill] sm:$0xff] %v15908_v32  ;;  %19720 = vst [vmem:[#allocation164_spill] sm:$0xff] %v15917_v12  ;;  %v15934_v12 = vmul.f32 0.01, %v15875_v39  ;;  %v15945_v32 = vadd.f32 %v15631_v6, %v14587_v18  ;;  %v15965_v6 = vadd.f32 %v15707_v49, %v14633_v26  ;;  %v15971_v25 = vpop.f32.mrb[61].mxu1  ;;  %vm8081_vm5 = vcmp.gt.f32.partialorder %v19740_v61, 0.0 }
 0x3ee   : > { %19721 = vst [vmem:[#allocation168_spill] sm:$0xff] %v15920_v4  ;;  %19722 = vst [vmem:[#allocation258_spill] sm:$0xff] %v15924_v13  ;;  %v15937_v4 = vmul.f32 0.01, %v15879_v57  ;;  %v19738_v57 = vld [vmem:[#allocation178_spill] sm:$0xff]  ;;  %v19742_v39 = vld [vmem:[#allocation184_spill] sm:$0xff] }
 0x3ef   : > { %19725 = vst [vmem:[#allocation186_spill] sm:$0xff] %v15934_v12  ;;  %19727 = vst [vmem:[#allocation259_spill] sm:$0xff] %v15941_v34  ;;  %v15956_v12 = vadd.f32 %v15653_v53, %v14592_v17  ;;  %v19736_v53 = vld [vmem:[#allocation40_spill] sm:$0xff]  ;;  %v15985_v49 = vsel %vm8072_vm9, %v15099_v60, %v19738_v57  ;;  %vm8089_vm7 = vcmp.gt.f32.partialorder %v19742_v39, 0.0  ;;  %v16001_v60 = vadd.f32 %v15775_v29, %v14633_v26  ;;  %v16003_v57 = vpop.f32.mrb[62].mxu1  ;;  %v19766_v30 = vld [vmem:[#allocation131_spill] sm:$0xff] }
 0x3f0   : > { %19726 = vst [vmem:[#allocation189_spill] sm:$0xff] %v15937_v4  ;;  %19728 = vst [vmem:[#allocation260_spill] sm:$0xff] %v15945_v32  ;;  %v19733_v4 = vld [vmem:[#allocation173_spill] sm:$0xff]  ;;  %v15979_v0 = vsel %vm8064_vm8, %v15058_v40, %v19736_v53  ;;  %v15997_v40 = vadd.f32 %v15733_v54, %v14605_v48  ;;  %v19751_v54 = vld [vmem:[#allocation132_spill] sm:$0xff]  ;;  %v16017_v29 = vmul.f32 0.01, %v15941_v34 }
 0x3f1   : > { %19730 = vst [vmem:[#allocation181_spill] sm:$0xff] %v15949_v31  ;;  %19731 = vst [vmem:[#allocation261_spill] sm:$0xff] %v15952_v50  ;;  %v15969_v31 = vadd.f32 %v15709_v52, %v14587_v18  ;;  %v15973_v50 = vpop.f32.mrb[62].mxu0  ;;  %v19741_v52 = vld [vmem:[#allocation183_spill] sm:$0xff]  ;;  %v16039_v34 = vmul.f32 0.01, %v15945_v32 }
 0x3f2   : > { %19732 = vst [vmem:[#allocation262_spill] sm:$0xff] %v15956_v12  ;;  %19734 = vst [vmem:[#allocation173_spill] sm:$0xff] %v15971_v25  ;;  %vm8087_vm6 = vcmp.gt.f32.partialorder %v19741_v52, 0.0  ;;  %v16005_v53 = vpop.f32.mrb[63].mxu0  ;;  %v19747_v25 = vld [vmem:[#allocation51_spill] sm:$0xff]  ;;  %v19773_v13 = vld [vmem:[#allocation144_spill] sm:$0xff] }
 0x3f3   : > { %19735 = vst [vmem:[#allocation263_spill] sm:$0xff] %v15973_v50  ;;  %19737 = vst [vmem:[#allocation40_spill] sm:$0xff] %v15979_v0  ;;  %v15993_v50 = vadd.f32 %v15731_v15, %v14592_v17  ;;  %6797 = vmatmul.mubr.bf16.gmra.mrb[104].mxu0 %v19747_v25  ;;  %7569 = vmatmul.mubr.bf16.gmra.mrb[104].mxu1 %v19747_v25  ;;  %v19756_v15 = vld [vmem:[#allocation179_spill] sm:$0xff]  ;;  %v16046_v25 = vadd.f32 %v15793_v22, %v14605_v48  ;;  %v16056_v32 = vmul.f32 0.01, %v15960_v23  ;;  %v19783_v22 = vld [vmem:[#allocation134_spill] sm:$0xff] }
 0x3f4   : > { %19739 = vst [vmem:[#allocation178_spill] sm:$0xff] %v15985_v49  ;;  %19745 = vst [vmem:[#allocation183_spill] sm:$0xff] %v16003_v57  ;;  %v16021_v57 = vadd.f32 %v15777_v24, %v14587_v18  ;;  %6806 = vmatprep.mubr.bf16.mxu0 %v19755_v35  ;;  %v16033_v0 = vsel %vm8074_vm10, %v15121_v28, %v19756_v15  ;;  %v19758_v49 = vld [vmem:[#allocation190_spill] sm:$0xff]  ;;  %v19760_v24 = vld [vmem:[#allocation32_spill] sm:$0xff]  ;;  %v16050_v28 = vadd.f32 %v15832_v20, %v14633_v26 }
 0x3f5   : > { %19744 = vst [vmem:[#allocation177_spill] sm:$0xff] %v15993_v50  ;;  %19746 = vst [vmem:[#allocation184_spill] sm:$0xff] %v16005_v53  ;;  %v16025_v53 = vadd.f32 %v15791_v10, %v14592_v17  ;;  %vm8106_vm4 = vcmp.gt.f32.partialorder %v19760_v24, 0.0  ;;  %v16042_v10 = vmul.f32 0.01, %v15956_v12  ;;  %7578 = vmatprep.mubr.bf16.mxu1 %v19755_v35  ;;  %v19765_v15 = vld [vmem:[#allocation191_spill] sm:$0xff] }
 0x3f6   : > { %19748 = vst [vmem:[#allocation192_spill] sm:$0xff] %v16008_v62  ;;  %19749 = vst [vmem:[#allocation51_spill] sm:$0xff] %v16010_v59  ;;  %v19770_v12 = vld [vmem:[#allocation174_spill] sm:$0xff]  ;;  %v19777_v62 = vld [vmem:[#allocation141_spill] sm:$0xff]  ;;  %v16088_v59 = vmul.f32 0.01, %v16001_v60 }
 0x3f7   : > { %19752 = vst [vmem:[#allocation29_spill] sm:$0xff] %v16017_v29  ;;  %19753 = vst [vmem:[#allocation132_spill] sm:$0xff] %v16021_v57  ;;  %v19759_v29 = vld [vmem:[#allocation30_spill] sm:$0xff]  ;;  %v16069_v35 = vsel %vm8066_vm11, %v15062_v37, %v19770_v12  ;;  %vm8114_vm8 = vcmp.gt.f32.partialorder %v19777_v62, 0.0  ;;  %v19779_v12 = vld [vmem:[#allocation33_spill] sm:$0xff]  ;;  %vm8136_vm11 = vcmp.gt.f32.partialorder %v15495_v42, 0.0 }
 0x3f8   : > { %19754 = vst [vmem:[#allocation264_spill] sm:$0xff] %v16025_v53  ;;  %19757 = vst [vmem:[#allocation52_spill] sm:$0xff] %v16033_v0  ;;  %v19772_v20 = vld [vmem:[#allocation138_spill] sm:$0xff]  ;;  %vm8122_vm10 = vcmp.gt.f32.partialorder %v19779_v12, 0.0  ;;  %v16105_v0 = vmul.f32 0.01, %v16050_v28 }
 0x3f9   : > { %19761 = vst [vmem:[#allocation179_spill] sm:$0xff] %v16039_v34  ;;  %19762 = vst [vmem:[#allocation190_spill] sm:$0xff] %v16042_v10  ;;  %v16059_v34 = vmul.f32 0.01, %v15965_v6  ;;  %v16061_v10 = vpop.f32.mrb[63].mxu1  ;;  %v19778_v37 = vld [vmem:[#allocation142_spill] sm:$0xff] }
 0x3fa   : > { %19763 = vst [vmem:[#allocation30_spill] sm:$0xff] %v16046_v25  ;;  %19764 = vst [vmem:[#allocation32_spill] sm:$0xff] %v16050_v28 }
 0x3fb   : > { %19767 = vst [vmem:[#allocation191_spill] sm:$0xff] %v16056_v32  ;;  %19768 = vst [vmem:[#allocation131_spill] sm:$0xff] %v16059_v34  ;;  %v16074_v32 = vmul.f32 0.01, %v15969_v31  ;;  %v16077_v34 = vmul.f32 0.01, %v15993_v50 }
 0x3fc   : > { %19769 = vst [vmem:[#allocation265_spill] sm:$0xff] %v16061_v10  ;;  %19771 = vst [vmem:[#allocation174_spill] sm:$0xff] %v16069_v35  ;;  %v16080_v10 = vmul.f32 0.01, %v15997_v40  ;;  %v16102_v35 = vmul.f32 0.01, %v16046_v25 }
 0x3fd   : > { %19774 = vst [vmem:[#allocation138_spill] sm:$0xff] %v16074_v32  ;;  %19775 = vst [vmem:[#allocation144_spill] sm:$0xff] %v16077_v34  ;;  %v16091_v32 = vmul.f32 0.01, %v16021_v57  ;;  %v16094_v34 = vmul.f32 0.01, %v16025_v53 }
 0x3fe   : > { %19776 = vst [vmem:[#allocation266_spill] sm:$0xff] %v16080_v10  ;;  %19780 = vst [vmem:[#allocation141_spill] sm:$0xff] %v16088_v59  ;;  %v16098_v10 = vadd.f32 %v15834_v19, %v14587_v18  ;;  %v19786_v50 = vld [vmem:[#allocation39_spill] sm:$0xff]  ;;  %v19791_v53 = vld [vmem:[#allocation172_spill] sm:$0xff] }
 0x3ff   : > { %19781 = vst [vmem:[#allocation142_spill] sm:$0xff] %v16091_v32  ;;  %19782 = vst [vmem:[#allocation33_spill] sm:$0xff] %v16094_v34  ;;  %v16111_v32 = vsel %vm8063_vm12, %v19714_v3, %v19786_v50  ;;  %v19788_v59 = vld [vmem:[#allocation175_spill] sm:$0xff]  ;;  %v19790_v34 = vld [vmem:[#allocation137_spill] sm:$0xff]  ;;  %v16130_v50 = vsel %vm8065_vm14, %v19718_v7, %v19791_v53 }
 0x400   : > { %19784 = vst [vmem:[#allocation134_spill] sm:$0xff] %v16102_v35  ;;  %19785 = vst [vmem:[#allocation267_spill] sm:$0xff] %v16105_v0  ;;  %v16117_v19 = vsel %vm8071_vm13, %v19715_v1, %v19788_v59  ;;  %v16122_v35 = vadd.f32 %v15860_v38, %v14592_v17  ;;  %v19793_v3 = vld [vmem:[#allocation176_spill] sm:$0xff]  ;;  %v19795_v1 = vld [vmem:[#allocation143_spill] sm:$0xff]  ;;  %v16166_v7 = vmul.f32 0.01, %v16098_v10 }
 0x401   : > { %19787 = vst [vmem:[#allocation39_spill] sm:$0xff] %v16111_v32  ;;  %19789 = vst [vmem:[#allocation175_spill] sm:$0xff] %v16117_v19  ;;  %v16136_v59 = vsel %vm8073_vm15, %v19719_v63, %v19793_v3  ;;  %vm8121_vm12 = vcmp.gt.f32.partialorder %v19795_v1, 0.0  ;;  %v19796_v57 = vld [vmem:[#allocation146_spill] sm:$0xff]  ;;  %v19797_v38 = vld [vmem:[#allocation148_spill] sm:$0xff]  ;;  %vm8138_vm15 = vcmp.gt.f32.partialorder %v15499_v46, 0.0 }
 0x402   : > { %19792 = vst [vmem:[#allocation137_spill] sm:$0xff] %v16130_v50  ;;  %19794 = vst [vmem:[#allocation172_spill] sm:$0xff] %v16136_v59  ;;  %vm8128_vm13 = vcmp.gt.f32.partialorder %v19796_v57, 0.0  ;;  %vm8130_vm9 = vcmp.gt.f32.partialorder %v19797_v38, 0.0  ;;  %v19798_v0 = vld [vmem:[#allocation53_spill] sm:$0xff]  ;;  %v19799_v53 = vld [vmem:[#allocation188_spill] sm:$0xff] }
 0x403   : > { %6807 = vmatmul.mubr.bf16.gmra.mrb[108].mxu0 %v19798_v0  ;;  %v16149_v32 = vsel %vm8080_vm0, %v15178_v56, %v19799_v53  ;;  %v19801_v63 = vld [vmem:[#allocation194_spill] sm:$0xff]  ;;  %v19803_v19 = vld [vmem:[#allocation195_spill] sm:$0xff]  ;;  %19806 = vst [vmem:[#allocation148_spill] sm:$0xff] %v16166_v7  ;;  %v16170_v56 = vadd.f32 %v15862_v5, %v14605_v48  ;;  %7579 = vmatmul.mubr.bf16.gmra.mrb[108].mxu1 %v19798_v0  ;;  %v19811_v50 = vld [vmem:[#allocation149_spill] sm:$0xff]  ;;  %vm8168_vm0 = vcmp.gt.f32.partialorder %v15667_v43, 0.0 }
 0x404   : > { %19800 = vst [vmem:[#allocation176_spill] sm:$0xff] %v16149_v32  ;;  %v16155_v3 = vsel %vm8088_vm1, %v19723_v14, %v19801_v63  ;;  %v16161_v28 = vsel %vm8090_vm2, %v19724_v45, %v19803_v19  ;;  %v19805_v25 = vld [vmem:[#allocation34_spill] sm:$0xff]  ;;  %v19808_v45 = vld [vmem:[#allocation41_spill] sm:$0xff]  ;;  %vm8135_vm1 = vcmp.gt.f32.partialorder %v19811_v50, 0.0  ;;  %v19812_v59 = vld [vmem:[#allocation151_spill] sm:$0xff]  ;;  %v16187_v5 = vadd.f32 %v15910_v2, %v14633_v26 }
 0x405   : > { %19802 = vst [vmem:[#allocation143_spill] sm:$0xff] %v16155_v3  ;;  %19804 = vst [vmem:[#allocation146_spill] sm:$0xff] %v16161_v28  ;;  %vm8127_vm14 = vcmp.gt.f32.partialorder %v19805_v25, 0.0  ;;  %v19807_v14 = vld [vmem:[#allocation54_spill] sm:$0xff]  ;;  %v16180_v19 = vsel %vm8082_vm3, %v19729_v21, %v19808_v45  ;;  %v19810_v63 = vld [vmem:[#allocation145_spill] sm:$0xff]  ;;  %v16191_v0 = vadd.f32 %v15912_v55, %v14587_v18  ;;  %vm19814_vm3 = vcmp.gt.f32.partialorder %v19733_v4, 0.0 }
 0x406   : > { %6816 = vmatprep.mubr.bf16.mxu0 %v19807_v14  ;;  %19809 = vst [vmem:[#allocation53_spill] sm:$0xff] %v16180_v19  ;;  %7588 = vmatprep.mubr.bf16.mxu1 %v19807_v14  ;;  %v19813_v45 = vld [vmem:[#allocation180_spill] sm:$0xff]  ;;  %vm8144_vm2 = vcmp.gt.f32.partialorder %v15521_v58, 0.0  ;;  %v19816_v32 = vld [vmem:[#allocation158_spill] sm:$0xff]  ;;  %v19818_v14 = vld [vmem:[#allocation185_spill] sm:$0xff] }
 0x407   : > { %v16200_v53 = vsel %vm19814_vm3, %v19733_v4, %v19813_v45  ;;  %v19817_v2 = vld [vmem:[#allocation42_spill] sm:$0xff]  ;;  %v16214_v21 = vsel %vm8081_vm5, %v19740_v61, %v19818_v14  ;;  %v19820_v19 = vld [vmem:[#allocation193_spill] sm:$0xff]  ;;  %vm19823_vm3 = vcmp.gt.f32.partialorder %v19743_v33, 0.0  ;;  %vm19828_vm5 = vcmp.gt.f32.partialorder %v19751_v54, 0.0  ;;  %v19833_v7 = vld [vmem:[#allocation156_spill] sm:$0xff] }
 0x408   : > { %19815 = vst [vmem:[#allocation188_spill] sm:$0xff] %v16200_v53  ;;  %v16208_v55 = vsel %vm8087_vm6, %v19741_v52, %v19817_v2  ;;  %19819 = vst [vmem:[#allocation194_spill] sm:$0xff] %v16214_v21  ;;  %v16220_v4 = vsel %vm8089_vm7, %v19742_v39, %v19820_v19  ;;  %v19822_v45 = vld [vmem:[#allocation198_spill] sm:$0xff]  ;;  %v19825_v52 = vld [vmem:[#allocation155_spill] sm:$0xff]  ;;  %vm19830_vm7 = vcmp.gt.f32.partialorder %v19750_v8, 0.0  ;;  %vm19851_vm6 = vcmp.gt.f32.partialorder %v19772_v20, 0.0 }
 0x409   : > { %19821 = vst [vmem:[#allocation195_spill] sm:$0xff] %v16220_v4  ;;  %v16226_v28 = vsel %vm19823_vm3, %v19743_v33, %v19822_v45  ;;  %v19826_v2 = vld [vmem:[#allocation215_spill] sm:$0xff]  ;;  %v19827_v3 = vld [vmem:[#allocation202_spill] sm:$0xff]  ;;  %v19834_v61 = vld [vmem:[#allocation157_spill] sm:$0xff]  ;;  %vm8170_vm3 = vcmp.gt.f32.partialorder %v15671_v27, 0.0 }
 0x40a   : > { %19824 = vst [vmem:[#allocation34_spill] sm:$0xff] %v16226_v28  ;;  %v16238_v39 = vsel %vm19828_vm5, %v19751_v54, %v19827_v3  ;;  %v19829_v19 = vld [vmem:[#allocation199_spill] sm:$0xff]  ;;  %v19837_v3 = vld [vmem:[#allocation196_spill] sm:$0xff]  ;;  %vm19838_vm5 = vcmp.gt.f32.partialorder %v19758_v49, 0.0  ;;  %v19850_v14 = vld [vmem:[#allocation205_spill] sm:$0xff] }
 0x40b   : > { %v16244_v33 = vsel %vm19830_vm7, %v19750_v8, %v19829_v19  ;;  %v19832_v45 = vld [vmem:[#allocation35_spill] sm:$0xff]  ;;  %v16261_v8 = vsel %vm19838_vm5, %v19758_v49, %v19837_v3  ;;  %v19840_v19 = vld [vmem:[#allocation200_spill] sm:$0xff]  ;;  %vm19841_vm7 = vcmp.gt.f32.partialorder %v19759_v29, 0.0  ;;  %v19847_v3 = vld [vmem:[#allocation201_spill] sm:$0xff]  ;;  %vm19848_vm5 = vcmp.gt.f32.partialorder %v19766_v30, 0.0 }
 0x40c   : > { %19831 = vst [vmem:[#allocation54_spill] sm:$0xff] %v16244_v33  ;;  %v19835_v21 = vld [vmem:[#allocation203_spill] sm:$0xff]  ;;  %19839 = vst [vmem:[#allocation145_spill] sm:$0xff] %v16261_v8  ;;  %v16267_v4 = vsel %vm19841_vm7, %v19759_v29, %v19840_v19  ;;  %v19843_v53 = vld [vmem:[#allocation36_spill] sm:$0xff]  ;;  %v16284_v29 = vsel %vm19848_vm5, %v19766_v30, %v19847_v3  ;;  %v16288_v19 = vmul.f32 0.01, %v16122_v35 }
 0x40d   : > { %v16255_v54 = vsel %vm8106_vm4, %v19760_v24, %v19835_v21  ;;  %19842 = vst [vmem:[#allocation149_spill] sm:$0xff] %v16267_v4  ;;  %v19844_v21 = vld [vmem:[#allocation197_spill] sm:$0xff]  ;;  %vm19845_vm4 = vcmp.gt.f32.partialorder %v19765_v15, 0.0  ;;  %19849 = vst [vmem:[#allocation180_spill] sm:$0xff] %v16284_v29  ;;  %v19856_v3 = vld [vmem:[#allocation216_spill] sm:$0xff]  ;;  %vm8162_vm7 = vcmp.gt.f32.partialorder %v15613_v44, 0.0 }
 0x40e   : > { %19836 = vst [vmem:[#allocation41_spill] sm:$0xff] %v16255_v54  ;;  %v16278_v49 = vsel %vm19845_vm4, %v19765_v15, %v19844_v21  ;;  %v16296_v15 = vsel %vm19851_vm6, %v19772_v20, %v19850_v14  ;;  %v19853_v21 = vld [vmem:[#allocation208_spill] sm:$0xff]  ;;  %vm19854_vm4 = vcmp.gt.f32.partialorder %v19773_v13, 0.0  ;;  %v19857_v24 = vld [vmem:[#allocation55_spill] sm:$0xff]  ;;  %v19862_v29 = vld [vmem:[#allocation206_spill] sm:$0xff]  ;;  %vm19863_vm6 = vcmp.gt.f32.partialorder %v19778_v37, 0.0 }
 0x40f   : > { %19846 = vst [vmem:[#allocation151_spill] sm:$0xff] %v16278_v49  ;;  %19852 = vst [vmem:[#allocation158_spill] sm:$0xff] %v16296_v15  ;;  %v16302_v30 = vsel %vm19854_vm4, %v19773_v13, %v19853_v21  ;;  %6817 = vmatmul.mubr.bf16.gmra.mrb[112].mxu0 %v19857_v24  ;;  %v19858_v14 = vld [vmem:[#allocation44_spill] sm:$0xff]  ;;  %v19860_v13 = vld [vmem:[#allocation209_spill] sm:$0xff]  ;;  %v16327_v8 = vsel %vm19863_vm6, %v19778_v37, %v19862_v29  ;;  %vm8167_vm5 = vcmp.gt.f32.partialorder %v15627_v41, 0.0  ;;  %7589 = vmatmul.mubr.bf16.gmra.mrb[112].mxu1 %v19857_v24 }
 0x410   : > { %19855 = vst [vmem:[#allocation42_spill] sm:$0xff] %v16302_v30  ;;  %v16315_v49 = vsel %vm8114_vm8, %v19777_v62, %v19858_v14  ;;  %v16321_v21 = vsel %vm8122_vm10, %v19779_v12, %v19860_v13  ;;  %19864 = vst [vmem:[#allocation198_spill] sm:$0xff] %v16327_v8  ;;  %v16332_v20 = vmul.f32 0.01, %v16170_v56  ;;  %v16335_v62 = vmul.f32 0.01, %v16187_v5 }
 0x411   : > { %19859 = vst [vmem:[#allocation185_spill] sm:$0xff] %v16315_v49  ;;  %19861 = vst [vmem:[#allocation193_spill] sm:$0xff] %v16321_v21  ;;  %v19865_v12 = vld [vmem:[#allocation56_spill] sm:$0xff]  ;;  %v19866_v13 = vld [vmem:[#allocation43_spill] sm:$0xff]  ;;  %vm19867_vm8 = vcmp.gt.f32.partialorder %v19783_v22, 0.0  ;;  %vm8169_vm10 = vcmp.gt.f32.partialorder %v15651_v11, 0.0  ;;  %v16352_v24 = vadd.f32 %v15922_v47, %v14592_v17 }
 0x412   : > { %6826 = vmatprep.mubr.bf16.mxu0 %v19865_v12  ;;  %v16345_v37 = vsel %vm19867_vm8, %v19783_v22, %v19866_v13  ;;  %v19869_v29 = vld [vmem:[#allocation258_spill] sm:$0xff]  ;;  %7598 = vmatprep.mubr.bf16.mxu1 %v19865_v12  ;;  %v19870_v13 = vld [vmem:[#allocation204_spill] sm:$0xff]  ;;  %vm19871_vm8 = vcmp.gt.f32.partialorder %v19790_v34, 0.0  ;;  %v19873_v49 = vld [vmem:[#allocation223_spill] sm:$0xff] }
 0x413   : > { %19868 = vst [vmem:[#allocation155_spill] sm:$0xff] %v16345_v37  ;;  %v16356_v15 = vadd.f32 %v19869_v29, %v14605_v48  ;;  %v16365_v14 = vsel %vm19871_vm8, %v19790_v34, %v19870_v13  ;;  %vm8178_vm4 = vcmp.gt.f32.partialorder %v19873_v49, 0.0  ;;  %v19874_v21 = vld [vmem:[#allocation228_spill] sm:$0xff]  ;;  %v19875_v47 = vld [vmem:[#allocation207_spill] sm:$0xff]  ;;  %v19877_v12 = vld [vmem:[#allocation153_spill] sm:$0xff] }
 0x414   : > { %19872 = vst [vmem:[#allocation215_spill] sm:$0xff] %v16365_v14  ;;  %vm8186_vm6 = vcmp.gt.f32.partialorder %v19874_v21, 0.0  ;;  %v16373_v29 = vsel %vm8121_vm12, %v19795_v1, %v19875_v47  ;;  %v16379_v22 = vsel %vm8128_vm13, %v19796_v57, %v19877_v12  ;;  %v19879_v37 = vld [vmem:[#allocation213_spill] sm:$0xff]  ;;  %v19881_v13 = vld [vmem:[#allocation154_spill] sm:$0xff]  ;;  %v19883_v1 = vld [vmem:[#allocation220_spill] sm:$0xff] }
 0x415   : > { %19876 = vst [vmem:[#allocation202_spill] sm:$0xff] %v16373_v29  ;;  %19878 = vst [vmem:[#allocation199_spill] sm:$0xff] %v16379_v22  ;;  %v16385_v34 = vsel %vm8136_vm11, %v15495_v42, %v19879_v37  ;;  %v16391_v8 = vsel %vm8130_vm9, %v19797_v38, %v19881_v13  ;;  %vm8175_vm12 = vcmp.gt.f32.partialorder %v19883_v1, 0.0  ;;  %v19884_v47 = vld [vmem:[#allocation225_spill] sm:$0xff]  ;;  %v19885_v30 = vld [vmem:[#allocation214_spill] sm:$0xff] }
 0x416   : > { %19880 = vst [vmem:[#allocation35_spill] sm:$0xff] %v16385_v34  ;;  %19882 = vst [vmem:[#allocation156_spill] sm:$0xff] %v16391_v8  ;;  %vm8183_vm8 = vcmp.gt.f32.partialorder %v19884_v47, 0.0  ;;  %v16403_v42 = vsel %vm8138_vm15, %v15499_v46, %v19885_v30  ;;  %v19887_v37 = vld [vmem:[#allocation210_spill] sm:$0xff]  ;;  %v19889_v13 = vld [vmem:[#allocation221_spill] sm:$0xff]  ;;  %vm19898_vm15 = vcmp.gt.f32.partialorder %v19812_v59, 0.0 }
 0x417   : > { %19886 = vst [vmem:[#allocation157_spill] sm:$0xff] %v16403_v42  ;;  %v16409_v38 = vsel %vm8127_vm14, %v19805_v25, %v19887_v37  ;;  %vm8177_vm9 = vcmp.gt.f32.partialorder %v19889_v13, 0.0  ;;  %v19890_v4 = vld [vmem:[#allocation226_spill] sm:$0xff]  ;;  %v19891_v57 = vld [vmem:[#allocation244_spill] sm:$0xff]  ;;  %v19892_v22 = vld [vmem:[#allocation211_spill] sm:$0xff]  ;;  %vm19895_vm14 = vcmp.gt.f32.partialorder %v19810_v63, 0.0 }
 0x418   : > { %19888 = vst [vmem:[#allocation203_spill] sm:$0xff] %v16409_v38  ;;  %v16420_v46 = vsel %vm8135_vm1, %v19811_v50, %v19892_v22  ;;  %v19894_v30 = vld [vmem:[#allocation152_spill] sm:$0xff]  ;;  %v19901_v22 = vld [vmem:[#allocation218_spill] sm:$0xff]  ;;  %vm19904_vm1 = vcmp.gt.f32.partialorder %v19816_v32, 0.0  ;;  %v19907_v8 = vld [vmem:[#allocation173_spill] sm:$0xff] }
 0x419   : > { %19893 = vst [vmem:[#allocation196_spill] sm:$0xff] %v16420_v46  ;;  %v16426_v25 = vsel %vm19895_vm14, %v19810_v63, %v19894_v30  ;;  %v19897_v37 = vld [vmem:[#allocation212_spill] sm:$0xff]  ;;  %v16443_v63 = vsel %vm8144_vm2, %v15521_v58, %v19901_v22  ;;  %v19903_v30 = vld [vmem:[#allocation219_spill] sm:$0xff]  ;;  %v16454_v12 = vadd.f32 %v19907_v8, %v14633_v26  ;;  %vm19909_vm2 = vcmp.gt.f32.partialorder %v19825_v52, 0.0  ;;  %v19911_v22 = vld [vmem:[#allocation169_spill] sm:$0xff] }
 0x41a   : > { %19896 = vst [vmem:[#allocation200_spill] sm:$0xff] %v16426_v25  ;;  %v16432_v34 = vsel %vm19898_vm15, %v19812_v59, %v19897_v37  ;;  %v19900_v14 = vld [vmem:[#allocation236_spill] sm:$0xff]  ;;  %19902 = vst [vmem:[#allocation197_spill] sm:$0xff] %v16443_v63  ;;  %v16449_v59 = vsel %vm19904_vm1, %v19816_v32, %v19903_v30  ;;  %v19906_v37 = vld [vmem:[#allocation239_spill] sm:$0xff]  ;;  %vm19912_vm15 = vcmp.gt.f32.partialorder %v19826_v2, 0.0  ;;  %vm19926_vm14 = vcmp.gt.f32.partialorder %v19834_v61, 0.0 }
 0x41b   : > { %19899 = vst [vmem:[#allocation36_spill] sm:$0xff] %v16432_v34  ;;  %19905 = vst [vmem:[#allocation201_spill] sm:$0xff] %v16449_v59  ;;  %v19908_v25 = vld [vmem:[#allocation160_spill] sm:$0xff]  ;;  %v16468_v32 = vsel %vm19912_vm15, %v19826_v2, %v19911_v22  ;;  %v19914_v30 = vld [vmem:[#allocation230_spill] sm:$0xff]  ;;  %vm19923_vm15 = vcmp.gt.f32.partialorder %v19833_v7, 0.0  ;;  %vm8226_vm1 = vcmp.gt.f32.partialorder %v15965_v6, 0.0 }
 0x41c   : > { %v16462_v58 = vsel %vm19909_vm2, %v19825_v52, %v19908_v25  ;;  %19913 = vst [vmem:[#allocation208_spill] sm:$0xff] %v16468_v32  ;;  %v19915_v34 = vld [vmem:[#allocation231_spill] sm:$0xff]  ;;  %v19916_v8 = vld [vmem:[#allocation240_spill] sm:$0xff]  ;;  %v19917_v38 = vld [vmem:[#allocation245_spill] sm:$0xff]  ;;  %vm19920_vm2 = vcmp.gt.f32.partialorder %v19832_v45, 0.0 }
 0x41d   : > { %19910 = vst [vmem:[#allocation205_spill] sm:$0xff] %v16462_v58  ;;  %vm8202_vm11 = vcmp.gt.f32.partialorder %v19917_v38, 0.0  ;;  %v19918_v50 = vld [vmem:[#allocation57_spill] sm:$0xff]  ;;  %v19922_v2 = vld [vmem:[#allocation46_spill] sm:$0xff]  ;;  %v19928_v42 = vld [vmem:[#allocation243_spill] sm:$0xff] }
 0x41e   : > { %6827 = vmatmul.mubr.bf16.gmra.mrb[116].mxu0 %v19918_v50  ;;  %v19919_v25 = vld [vmem:[#allocation45_spill] sm:$0xff]  ;;  %v16487_v22 = vsel %vm19923_vm15, %v19833_v7, %v19922_v2  ;;  %vm8201_vm13 = vcmp.gt.f32.partialorder %v19928_v42, 0.0  ;;  %v16498_v58 = vmul.f32 0.01, %v16191_v0  ;;  %7599 = vmatmul.mubr.bf16.gmra.mrb[116].mxu1 %v19918_v50  ;;  %v19931_v7 = vld [vmem:[#allocation58_spill] sm:$0xff]  ;;  %v19935_v32 = vld [vmem:[#allocation251_spill] sm:$0xff] }
 0x41f   : > { %v16481_v63 = vsel %vm19920_vm2, %v19832_v45, %v19919_v25  ;;  %19924 = vst [vmem:[#allocation55_spill] sm:$0xff] %v16487_v22  ;;  %v19925_v59 = vld [vmem:[#allocation161_spill] sm:$0xff]  ;;  %v19930_v45 = vld [vmem:[#allocation263_spill] sm:$0xff]  ;;  %6836 = vmatprep.mubr.bf16.mxu0 %v19931_v7  ;;  %v16521_v50 = vmul.f32 0.01, %v16356_v15  ;;  %7608 = vmatprep.mubr.bf16.mxu1 %v19931_v7  ;;  %v19943_v7 = vld [vmem:[#allocation166_spill] sm:$0xff] }
 0x420   : > { %19921 = vst [vmem:[#allocation216_spill] sm:$0xff] %v16481_v63  ;;  %v16493_v46 = vsel %vm19926_vm14, %v19834_v61, %v19925_v59  ;;  %v19929_v52 = vld [vmem:[#allocation249_spill] sm:$0xff]  ;;  %v16502_v25 = vadd.f32 %v19930_v45, %v14587_v18  ;;  %vm19933_vm14 = vcmp.gt.f32.partialorder %v19843_v53, 0.0  ;;  %v19937_v33 = vld [vmem:[#allocation259_spill] sm:$0xff]  ;;  %v16518_v18 = vmul.f32 0.01, %v16352_v24 }
 0x421   : > { %19927 = vst [vmem:[#allocation44_spill] sm:$0xff] %v16493_v46  ;;  %v19932_v61 = vld [vmem:[#allocation217_spill] sm:$0xff]  ;;  %v19938_v2 = vld [vmem:[#allocation171_spill] sm:$0xff]  ;;  %v19941_v63 = vld [vmem:[#allocation252_spill] sm:$0xff]  ;;  %v16544_v45 = vsel %vm8162_vm7, %v15613_v44, %v19943_v7  ;;  %vm8224_vm7 = vcmp.gt.f32.partialorder %v15960_v23, 0.0 }
 0x422   : > { %v16512_v59 = vsel %vm19933_vm14, %v19843_v53, %v19932_v61  ;;  %v19936_v29 = vld [vmem:[#allocation257_spill] sm:$0xff]  ;;  %vm19939_vm14 = vcmp.gt.f32.partialorder %v15609_v51, 0.0  ;;  %v19940_v61 = vld [vmem:[#allocation246_spill] sm:$0xff]  ;;  %v19942_v22 = vld [vmem:[#allocation47_spill] sm:$0xff] }
 0x423   : > { %19934 = vst [vmem:[#allocation209_spill] sm:$0xff] %v16512_v59  ;;  %vm8216_vm15 = vcmp.gt.f32.partialorder %v19936_v29, 0.0  ;;  %v16530_v53 = vsel %vm19939_vm14, %v15609_v51, %v19938_v2  ;;  %vm8207_vm2 = vcmp.gt.f32.partialorder %v19940_v61, 0.0  ;;  %v16538_v54 = vsel %vm8168_vm0, %v15667_v43, %v19942_v22  ;;  %v19944_v59 = vld [vmem:[#allocation227_spill] sm:$0xff]  ;;  %v19945_v2 = vld [vmem:[#allocation37_spill] sm:$0xff]  ;;  %v19948_v43 = vld [vmem:[#allocation248_spill] sm:$0xff] }
 0x424   : > { %v16550_v51 = vsel %vm8170_vm3, %v15671_v27, %v19944_v59  ;;  %vm19946_vm14 = vcmp.gt.f32.partialorder %v19856_v3, 0.0  ;;  %vm8209_vm0 = vcmp.gt.f32.partialorder %v19948_v43, 0.0  ;;  %v19949_v22 = vld [vmem:[#allocation256_spill] sm:$0xff]  ;;  %v19950_v28 = vld [vmem:[#allocation222_spill] sm:$0xff]  ;;  %vm19952_vm3 = vcmp.gt.f32.partialorder %v15597_v36, 0.0 }
 0x425   : > { %v16556_v46 = vsel %vm19946_vm14, %v19856_v3, %v19945_v2  ;;  %v16568_v27 = vsel %vm8167_vm5, %v15627_v41, %v19950_v28  ;;  %v19951_v59 = vld [vmem:[#allocation38_spill] sm:$0xff]  ;;  %vm8232_vm14 = vcmp.gt.f32.partialorder %v15997_v40, 0.0  ;;  %v19954_v7 = vld [vmem:[#allocation224_spill] sm:$0xff]  ;;  %vm19957_vm5 = vcmp.gt.f32.partialorder %v15701_v9, 0.0 }
 0x426   : > { %19947 = vst [vmem:[#allocation206_spill] sm:$0xff] %v16556_v46  ;;  %v16574_v3 = vsel %vm19952_vm3, %v15597_v36, %v19951_v59  ;;  %v16585_v41 = vsel %vm8169_vm10, %v15651_v11, %v19954_v7  ;;  %v19956_v28 = vld [vmem:[#allocation232_spill] sm:$0xff]  ;;  %v19959_v59 = vld [vmem:[#allocation237_spill] sm:$0xff]  ;;  %vm19960_vm3 = vcmp.gt.f32.partialorder %v15746_v16, 0.0  ;;  %v16618_v46 = vmul.f32 0.01, %v16454_v12 }
 0x427   : > { %19953 = vst [vmem:[#allocation56_spill] sm:$0xff] %v16574_v3  ;;  %19955 = vst [vmem:[#allocation43_spill] sm:$0xff] %v16585_v41  ;;  %v16591_v36 = vsel %vm19957_vm5, %v15701_v9, %v19956_v28  ;;  %v16597_v44 = vsel %vm19960_vm3, %v15746_v16, %v19959_v59  ;;  %v19962_v7 = vld [vmem:[#allocation233_spill] sm:$0xff]  ;;  %v19964_v28 = vld [vmem:[#allocation238_spill] sm:$0xff]  ;;  %vm8248_vm5 = vcmp.gt.f32.partialorder %v16170_v56, 0.0  ;;  %vm19994_vm3 = vcmp.gt.f32.partialorder %v19914_v30, 0.0 }
 0x428   : > { %19958 = vst [vmem:[#allocation258_spill] sm:$0xff] %v16591_v36  ;;  %19961 = vst [vmem:[#allocation204_spill] sm:$0xff] %v16597_v44  ;;  %v16608_v9 = vsel %vm8178_vm4, %v19873_v49, %v19962_v7  ;;  %v16614_v16 = vsel %vm8186_vm6, %v19874_v21, %v19964_v28  ;;  %v19966_v59 = vld [vmem:[#allocation260_spill] sm:$0xff]  ;;  %v19969_v7 = vld [vmem:[#allocation234_spill] sm:$0xff]  ;;  %vm8231_vm6 = vcmp.gt.f32.partialorder %v15969_v31, 0.0 }
 0x429   : > { %19963 = vst [vmem:[#allocation223_spill] sm:$0xff] %v16608_v9  ;;  %19965 = vst [vmem:[#allocation228_spill] sm:$0xff] %v16614_v16  ;;  %vm8223_vm10 = vcmp.gt.f32.partialorder %v19966_v59, 0.0  ;;  %v19967_v2 = vld [vmem:[#allocation48_spill] sm:$0xff]  ;;  %v16632_v21 = vsel %vm8183_vm8, %v19884_v47, %v19969_v7  ;;  %v19971_v28 = vld [vmem:[#allocation262_spill] sm:$0xff]  ;;  %vm19980_vm8 = vcmp.gt.f32.partialorder %v19891_v57, 0.0 }
 0x42a   : > { %v16626_v49 = vsel %vm8175_vm12, %v19883_v1, %v19967_v2  ;;  %19970 = vst [vmem:[#allocation153_spill] sm:$0xff] %v16632_v21  ;;  %vm8225_vm4 = vcmp.gt.f32.partialorder %v19971_v28, 0.0  ;;  %v19972_v36 = vld [vmem:[#allocation177_spill] sm:$0xff]  ;;  %v19973_v44 = vld [vmem:[#allocation30_spill] sm:$0xff]  ;;  %v19974_v11 = vld [vmem:[#allocation59_spill] sm:$0xff]  ;;  %vm19978_vm12 = vcmp.gt.f32.partialorder %v19890_v4, 0.0 }
 0x42b   : > { %19968 = vst [vmem:[#allocation207_spill] sm:$0xff] %v16626_v49  ;;  %6837 = vmatmul.mubr.bf16.gmra.mrb[120].mxu0 %v19974_v11  ;;  %v19975_v2 = vld [vmem:[#allocation229_spill] sm:$0xff]  ;;  %v19977_v47 = vld [vmem:[#allocation235_spill] sm:$0xff]  ;;  %v19981_v41 = vld [vmem:[#allocation32_spill] sm:$0xff]  ;;  %v16662_v1 = vmul.f32 0.01, %v16502_v25  ;;  %7609 = vmatmul.mubr.bf16.gmra.mrb[120].mxu1 %v19974_v11 }
 0x42c   : > { %v16645_v9 = vsel %vm8177_vm9, %v19889_v13, %v19975_v2  ;;  %v16651_v7 = vsel %vm19978_vm12, %v19890_v4, %v19977_v47  ;;  %v19979_v16 = vld [vmem:[#allocation255_spill] sm:$0xff]  ;;  %v19983_v4 = vld [vmem:[#allocation60_spill] sm:$0xff]  ;;  %vm19985_vm9 = vcmp.gt.f32.partialorder %v19900_v14, 0.0  ;;  %vm19998_vm12 = vcmp.gt.f32.partialorder %v19915_v34, 0.0 }
 0x42d   : > { %19976 = vst [vmem:[#allocation213_spill] sm:$0xff] %v16645_v9  ;;  %v16657_v3 = vsel %vm19980_vm8, %v19891_v57, %v19979_v16  ;;  %v19982_v13 = vld [vmem:[#allocation183_spill] sm:$0xff]  ;;  %6846 = vmatprep.mubr.bf16.mxu0 %v19983_v4  ;;  %v19986_v49 = vld [vmem:[#allocation132_spill] sm:$0xff]  ;;  %7618 = vmatprep.mubr.bf16.mxu1 %v19983_v4  ;;  %v19993_v4 = vld [vmem:[#allocation241_spill] sm:$0xff]  ;;  %vm8258_vm8 = vcmp.gt.f32.partialorder %v16454_v12, 0.0 }
 0x42e   : > { %v16666_v2 = vadd.f32 %v19982_v13, %v14592_v17  ;;  %v19984_v57 = vld [vmem:[#allocation247_spill] sm:$0xff]  ;;  %v19987_v17 = vld [vmem:[#allocation184_spill] sm:$0xff]  ;;  %v19988_v13 = vld [vmem:[#allocation265_spill] sm:$0xff] }
 0x42f   : > { %v16676_v16 = vsel %vm19985_vm9, %v19900_v14, %v19984_v57  ;;  %v16683_v11 = vadd.f32 %v19987_v17, %v14605_v48  ;;  %v16687_v21 = vadd.f32 %v19988_v13, %v14633_v26  ;;  %v19989_v57 = vld [vmem:[#allocation49_spill] sm:$0xff]  ;;  %vm19990_vm9 = vcmp.gt.f32.partialorder %v19906_v37, 0.0  ;;  %v19991_v9 = vld [vmem:[#allocation264_spill] sm:$0xff]  ;;  %v19992_v48 = vld [vmem:[#allocation163_spill] sm:$0xff] }
 0x430   : > { %v16696_v47 = vsel %vm19990_vm9, %v19906_v37, %v19989_v57  ;;  %v16704_v26 = vsel %vm8202_vm11, %v19917_v38, %v19992_v48  ;;  %v16710_v17 = vsel %vm19994_vm3, %v19914_v30, %v19993_v4  ;;  %v19995_v13 = vld [vmem:[#allocation250_spill] sm:$0xff]  ;;  %vm19996_vm9 = vcmp.gt.f32.partialorder %v19916_v8, 0.0  ;;  %v20000_v4 = vld [vmem:[#allocation168_spill] sm:$0xff] }
 0x431   : > { %v16716_v37 = vsel %vm19996_vm9, %v19916_v8, %v19995_v13  ;;  %v19997_v57 = vld [vmem:[#allocation242_spill] sm:$0xff]  ;;  %vm8256_vm11 = vcmp.gt.f32.partialorder %v16356_v15, 0.0  ;;  %vm20001_vm3 = vcmp.gt.f32.partialorder %v19929_v52, 0.0  ;;  %vm8263_vm9 = vcmp.gt.f32.partialorder %v16502_v25, 0.0  ;;  %v20012_v38 = vld [vmem:[#allocation164_spill] sm:$0xff]  ;;  %v20022_v13 = vld [vmem:[#allocation131_spill] sm:$0xff] }
 0x432   : > { %v16722_v14 = vsel %vm19998_vm12, %v19915_v34, %v19997_v57  ;;  %v19999_v48 = vld [vmem:[#allocation254_spill] sm:$0xff]  ;;  %v16740_v34 = vsel %vm20001_vm3, %v19929_v52, %v20000_v4  ;;  %vm8255_vm12 = vcmp.gt.f32.partialorder %v16191_v0, 0.0  ;;  %v20002_v57 = vld [vmem:[#allocation261_spill] sm:$0xff]  ;;  %vm20007_vm3 = vcmp.gt.f32.partialorder %v19937_v33, 0.0 }
 0x433   : > { %v16734_v8 = vsel %vm8201_vm13, %v19928_v42, %v19999_v48  ;;  %v16750_v30 = vsel %vm8216_vm15, %v19936_v29, %v20002_v57  ;;  %v20003_v42 = vld [vmem:[#allocation186_spill] sm:$0xff]  ;;  %vm20004_vm13 = vcmp.gt.f32.partialorder %v19935_v32, 0.0  ;;  %v20006_v52 = vld [vmem:[#allocation29_spill] sm:$0xff]  ;;  %vm20011_vm15 = vcmp.gt.f32.partialorder %v19941_v63, 0.0 }
 0x434   : > { %v16756_v48 = vsel %vm20004_vm13, %v19935_v32, %v20003_v42  ;;  %v16762_v4 = vsel %vm20007_vm3, %v19937_v33, %v20006_v52  ;;  %v20008_v29 = vld [vmem:[#allocation165_spill] sm:$0xff]  ;;  %vm8257_vm13 = vcmp.gt.f32.partialorder %v16352_v24, 0.0  ;;  %vm8265_vm3 = vcmp.gt.f32.partialorder %v16666_v2, 0.0 }
 0x435   : > { %20005 = vst [vmem:[#allocation154_spill] sm:$0xff] %v16756_v48  ;;  %v16772_v57 = vsel %vm8207_vm2, %v19940_v61, %v20008_v29  ;;  %v20010_v32 = vld [vmem:[#allocation189_spill] sm:$0xff]  ;;  %v8521_v33 = vmul.f32 0.01, %v16666_v2  ;;  %v16789_v61 = vsel %vm8209_vm0, %v19948_v43, %v20012_v38  ;;  %vm20014_vm2 = vcmp.gt.f32.partialorder %v19949_v22, 0.0  ;;  %v20016_v48 = vld [vmem:[#allocation191_spill] sm:$0xff] }
 0x436   : > { %20009 = vst [vmem:[#allocation220_spill] sm:$0xff] %v16772_v57  ;;  %v16778_v42 = vsel %vm20011_vm15, %v19941_v63, %v20010_v32  ;;  %v20013_v29 = vld [vmem:[#allocation181_spill] sm:$0xff]  ;;  %v16804_v52 = vsel %vm8224_vm7, %v15960_v23, %v20016_v48  ;;  %v20018_v57 = vld [vmem:[#allocation266_spill] sm:$0xff]  ;;  %vm20020_vm0 = vcmp.gt.f32.partialorder %v16001_v60, 0.0  ;;  %vm8264_vm15 = vcmp.gt.f32.partialorder %v16683_v11, 0.0 }
 0x437   : > { %v16795_v63 = vsel %vm20014_vm2, %v19949_v22, %v20013_v29  ;;  %v20015_v32 = vld [vmem:[#allocation61_spill] sm:$0xff]  ;;  %20017 = vst [vmem:[#allocation225_spill] sm:$0xff] %v16804_v52  ;;  %v16810_v43 = vsel %vm8232_vm14, %v15997_v40, %v20018_v57  ;;  %v8520_v29 = vmul.f32 0.01, %v16683_v11  ;;  %v20021_v23 = vld [vmem:[#allocation62_spill] sm:$0xff]  ;;  %v16828_v40 = vsel %vm8226_vm1, %v15965_v6, %v20022_v13  ;;  %v20026_v52 = vld [vmem:[#allocation144_spill] sm:$0xff] }
 0x438   : > { %6847 = vmatmul.mubr.bf16.gmra.mrb[124].mxu0 %v20015_v32  ;;  %v20019_v38 = vld [vmem:[#allocation141_spill] sm:$0xff]  ;;  %7619 = vmatmul.mubr.bf16.gmra.mrb[124].mxu1 %v20015_v32  ;;  %vm8266_vm7 = vcmp.gt.f32.partialorder %v16687_v21, 0.0  ;;  %v20023_v32 = vld [vmem:[#allocation179_spill] sm:$0xff]  ;;  %v20024_v48 = vld [vmem:[#allocation138_spill] sm:$0xff]  ;;  %vm20027_vm1 = vcmp.gt.f32.partialorder %v19972_v36, 0.0  ;;  %vm20029_vm14 = vcmp.gt.f32.partialorder %v19973_v44, 0.0 }
 0x439   : > { %v16816_v22 = vsel %vm20020_vm0, %v16001_v60, %v20019_v38  ;;  %6889 = vmatprep.mubr.bf16.mxu0 %v20021_v23  ;;  %v8522_v60 = vmul.f32 0.01, %v16687_v21  ;;  %7661 = vmatprep.mubr.bf16.mxu1 %v20021_v23  ;;  %v16839_v38 = vsel %vm8223_vm10, %v19966_v59, %v20023_v32  ;;  %v16845_v6 = vsel %vm8231_vm6, %v15969_v31, %v20024_v48  ;;  %v20025_v13 = vld [vmem:[#allocation190_spill] sm:$0xff]  ;;  %v20051_v31 = vld [vmem:[#allocation136_spill] sm:$0xff] }
 0x43a   : > { %v16851_v23 = vsel %vm8225_vm4, %v19971_v28, %v20025_v13  ;;  %v16857_v57 = vsel %vm20027_vm1, %v19972_v36, %v20026_v52  ;;  %v20028_v59 = vld [vmem:[#allocation134_spill] sm:$0xff]  ;;  %v16873_v28 = vsel %vm8248_vm5, %v16170_v56, %v16332_v20  ;;  %v20030_v36 = vld [vmem:[#allocation267_spill] sm:$0xff]  ;;  %vm20031_vm10 = vcmp.gt.f32.partialorder %v19981_v41, 0.0  ;;  %v20035_v20 = vld [vmem:[#allocation148_spill] sm:$0xff] }
 0x43b   : > { %v16863_v32 = vsel %vm20029_vm14, %v19973_v44, %v20028_v59  ;;  %v16879_v52 = vsel %vm20031_vm10, %v19981_v41, %v20030_v36  ;;  %vm20032_vm4 = vcmp.gt.f32.partialorder %v16187_v5, 0.0  ;;  %v20033_v59 = vld [vmem:[#allocation142_spill] sm:$0xff]  ;;  %vm20034_vm6 = vcmp.gt.f32.partialorder %v19986_v49, 0.0 }
 0x43c   : > { %v16887_v13 = vsel %vm20032_vm4, %v16187_v5, %v16335_v62  ;;  %v16893_v56 = vsel %vm20034_vm6, %v19986_v49, %v20033_v59  ;;  %vm20036_vm5 = vcmp.gt.f32.partialorder %v16098_v10, 0.0  ;;  %v20037_v5 = vld [vmem:[#allocation33_spill] sm:$0xff]  ;;  %vm20038_vm2 = vcmp.gt.f32.partialorder %v19991_v9, 0.0  ;;  %v2219_v59 = vld [vmem:[#allocation7 + $0xcb0] sm:$0xff] }
 0x43d   : > { %v16899_v41 = vsel %vm20036_vm5, %v16098_v10, %v20035_v20  ;;  %v16909_v62 = vsel %vm20038_vm2, %v19991_v9, %v20037_v5  ;;  %vm20039_vm0 = vcmp.gt.f32.partialorder %v16122_v35, 0.0  ;;  %v2215_v10 = vld [vmem:[#allocation7 + $0xc90] sm:$0xff]  ;;  %v16923_v44 = vsel %vm8256_vm11, %v16356_v15, %v16521_v50  ;;  %v2216_v5 = vld [vmem:[#allocation7 + $0xc98] sm:$0xff] }
 0x43e   : > { %v16915_v49 = vsel %vm20039_vm0, %v16122_v35, %v16288_v19  ;;  %20040 = vst [vmem:[#allocation214_spill] sm:$0xff] %v16923_v44  ;;  %v16928_v9 = vsel %vm8264_vm15, %v16683_v11, %v8520_v29  ;;  %v16934_v35 = vsel %vm8258_vm8, %v16454_v12, %v16618_v46  ;;  %v20042_v19 = vld [vmem:[#allocation63_spill] sm:$0xff]  ;;  %v2220_v20 = vld [vmem:[#allocation7 + $0xcb8] sm:$0xff]  ;;  %v16942_v15 = vsel %vm8266_vm7, %v16687_v21, %v8522_v60 }
 0x43f   : > { %20041 = vst [vmem:[#allocation210_spill] sm:$0xff] %v16934_v35  ;;  %v16948_v50 = vsel %vm8255_vm12, %v16191_v0, %v16498_v58  ;;  %v16954_v12 = vsel %vm8263_vm9, %v16502_v25, %v16662_v1  ;;  %v20045_v46 = vld [vmem:[#allocation31_spill] sm:$0xff]  ;;  %v20046_v11 = vld [vmem:[#allocation133_spill] sm:$0xff]  ;;  %v20049_v60 = vld [vmem:[#allocation192_spill] sm:$0xff]  ;;  %v10681_v1 = vcombine.high %v2215_v10, %v2219_v59  ;;  %v10680_v48 = vcombine.low %v2215_v10, %v2219_v59 }
 0x440   : > { %6890 = vmatmul.mubr.bf16.vlgmr.msra.gmra.mrb[64].mxu0 %v20042_v19  ;;  %20043 = vst [vmem:[#allocation221_spill] sm:$0xff] %v16948_v50  ;;  %20044 = vst [vmem:[#allocation226_spill] sm:$0xff] %v16954_v12  ;;  %7662 = vmatmul.mubr.bf16.vlgmr.msra.gmra.mrb[64].mxu1 %v20042_v19  ;;  %v20047_v29 = vcombine.low %v20045_v46, %v20046_v11  ;;  %v20048_v21 = vld [vmem:[#allocation51_spill] sm:$0xff]  ;;  %v20053_v25 = vld [vmem:[#allocation64_spill] sm:$0xff]  ;;  %v16974_v19 = vsel %vm8257_vm13, %v16352_v24, %v16518_v18 }
 0x441   : > { %v10674_v36 = vcombine.low %v20049_v60, %v20048_v21  ;;  %v20050_v58 = vld [vmem:[#allocation135_spill] sm:$0xff]  ;;  %6899 = vmatprep.mubr.bf16.mxu0 %v20053_v25  ;;  %20054 = vst [vmem:[#allocation244_spill] sm:$0xff] %v16974_v19  ;;  %v16979_v46 = vsel %vm8265_vm3, %v16666_v2, %v8521_v33  ;;  %7671 = vmatprep.mubr.bf16.mxu1 %v20053_v25  ;;  %v20056_v11 = vld [vmem:[#allocation50_spill] sm:$0xff]  ;;  %v2224_v33 = vld [vmem:[#allocation7 + $0xcd8] sm:$0xff] }
 0x442   : > { %7051 = vmatpush1.bf16.msra.mxu0 %v20047_v29  ;;  %v20052_v44 = vcombine.low %v20050_v58, %v20051_v31  ;;  %20055 = vst [vmem:[#allocation211_spill] sm:$0xff] %v16979_v46  ;;  %v20057_v29 = vld [vmem:[#allocation253_spill] sm:$0xff]  ;;  %v20059_v0 = vcombine.high %v20049_v60, %v20048_v21  ;;  %v2223_v24 = vld [vmem:[#allocation7 + $0xcd0] sm:$0xff]  ;;  %v20062_v60 = vld [vmem:[#allocation66_spill] sm:$0xff] }
 0x443   : > { %v20058_v31 = vcombine.high %v20056_v11, %v20057_v29  ;;  %v2227_v18 = vld [vmem:[#allocation7 + $0xcf0] sm:$0xff]  ;;  %v20060_v2 = vcombine.low %v20056_v11, %v20057_v29  ;;  %v2228_v25 = vld [vmem:[#allocation7 + $0xcf8] sm:$0xff] }
 0x444   : > { %7823 = vmatpush1.bf16.msra.mxu1 %v20052_v44  ;;  %v10683_v44 = vcombine.high %v2216_v5, %v2220_v20  ;;  %v10689_v50 = vcombine.high %v2223_v24, %v2227_v18  ;;  %v20061_v12 = vld [vmem:[#allocation65_spill] sm:$0xff]  ;;  %v10691_v58 = vcombine.high %v2224_v33, %v2228_v25  ;;  %v2231_v19 = vld [vmem:[#allocation7 + $0xd10] sm:$0xff]  ;;  %v10690_v10 = vcombine.low %v2224_v33, %v2228_v25 }
 0x445   : > { %7052 = vmatprep.subr.bf16.mxu0 %v20058_v31  ;;  %7824 = vmatprep.subr.bf16.mxu1 %v20059_v0  ;;  %v10682_v31 = vcombine.low %v2216_v5, %v2220_v20  ;;  %v2235_v21 = vld [vmem:[#allocation7 + $0xd30] sm:$0xff]  ;;  %v2232_v0 = vld [vmem:[#allocation7 + $0xd18] sm:$0xff] }
 0x446   : > { %7053 = vmatpush1.bf16.msra.mxu0 %v20060_v2  ;;  %v2236_v11 = vld [vmem:[#allocation7 + $0xd38] sm:$0xff]  ;;  %v10697_v59 = vcombine.high %v2231_v19, %v2235_v21  ;;  %v2239_v5 = vld [vmem:[#allocation7 + $0xd50] sm:$0xff] }
 0x447   : > { %7054 = vmatprep.subr.bf16.mxu0 %v10681_v1  ;;  %v10699_v20 = vcombine.high %v2232_v0, %v2236_v11  ;;  %v2243_v1 = vld [vmem:[#allocation7 + $0xd70] sm:$0xff]  ;;  %v2240_v29 = vld [vmem:[#allocation7 + $0xd58] sm:$0xff]  ;;  %v10698_v2 = vcombine.low %v2232_v0, %v2236_v11 }
 0x448   : > { %7825 = vmatpush1.bf16.msra.mxu1 %v10674_v36  ;;  %6900 = vmatmul.mubr.bf16.gmra.mrb[68].mxu0 %v20061_v12  ;;  %v10688_v36 = vcombine.low %v2223_v24, %v2227_v18  ;;  %v10705_v46 = vcombine.high %v2239_v5, %v2243_v1  ;;  %v20063_v35 = vld [vmem:[#allocation67_spill] sm:$0xff]  ;;  %v2248_v18 = vld [vmem:[#allocation7 + $0xd98] sm:$0xff] }
 0x449   : > { %7826 = vmatprep.subr.bf16.mxu1 %v10683_v44  ;;  %7672 = vmatmul.mubr.bf16.gmra.mrb[68].mxu1 %v20061_v12  ;;  %v2244_v44 = vld [vmem:[#allocation7 + $0xd78] sm:$0xff]  ;;  %v10696_v12 = vcombine.low %v2231_v19, %v2235_v21  ;;  %v2247_v24 = vld [vmem:[#allocation7 + $0xd90] sm:$0xff]  ;;  %v10704_v19 = vcombine.low %v2239_v5, %v2243_v1 }
 0x44a   : > { %6909 = vmatprep.mubr.bf16.mxu0 %v20062_v60  ;;  %7681 = vmatprep.mubr.bf16.mxu1 %v20062_v60  ;;  %v2252_v33 = vld [vmem:[#allocation7 + $0xdb8] sm:$0xff]  ;;  %v10706_v25 = vcombine.low %v2240_v29, %v2244_v44  ;;  %v2255_v60 = vld [vmem:[#allocation7 + $0xdd0] sm:$0xff] }
 0x44b   : > { %7055 = vmatpush1.bf16.msra.mxu0 %v10680_v48  ;;  %v10707_v48 = vcombine.high %v2240_v29, %v2244_v44  ;;  %v10715_v21 = vcombine.high %v2248_v18, %v2252_v33  ;;  %v2259_v0 = vld [vmem:[#allocation7 + $0xdf0] sm:$0xff]  ;;  %v2256_v11 = vld [vmem:[#allocation7 + $0xdd8] sm:$0xff]  ;;  %v20066_v29 = vld [vmem:[#allocation70_spill] sm:$0xff] }
 0x44c   : > { %7827 = vmatpush1.bf16.msra.mxu1 %v10682_v31  ;;  %7056 = vmatprep.subr.bf16.mxu0 %v10689_v50  ;;  %v2251_v50 = vld [vmem:[#allocation7 + $0xdb0] sm:$0xff]  ;;  %v2264_v44 = vld [vmem:[#allocation7 + $0xe18] sm:$0xff] }
 0x44d   : > { %7828 = vmatprep.subr.bf16.mxu1 %v10691_v58  ;;  %v20064_v58 = vld [vmem:[#allocation68_spill] sm:$0xff]  ;;  %v10713_v31 = vcombine.high %v2247_v24, %v2251_v50 }
 0x44e   : > { %v2263_v1 = vld [vmem:[#allocation7 + $0xe10] sm:$0xff] }
 0x44f   : > { %7057 = vmatpush1.bf16.msra.mxu0 %v10688_v36  ;;  %v2260_v36 = vld [vmem:[#allocation7 + $0xdf8] sm:$0xff] }
 0x450   : > { %7829 = vmatpush1.bf16.msra.mxu1 %v10690_v10  ;;  %7058 = vmatprep.subr.bf16.mxu0 %v10697_v59  ;;  %v10714_v10 = vcombine.low %v2248_v18, %v2252_v33  ;;  %v10721_v59 = vcombine.high %v2255_v60, %v2259_v0  ;;  %v10723_v5 = vcombine.high %v2256_v11, %v2260_v36  ;;  %v2275_v18 = vld [vmem:[#allocation7 + $0xe70] sm:$0xff]  ;;  %v2272_v33 = vld [vmem:[#allocation7 + $0xe58] sm:$0xff] }
 0x451   : > { %6910 = vmatmul.mubr.bf16.gmra.mrb[72].mxu0 %v20063_v35  ;;  %7830 = vmatprep.subr.bf16.mxu1 %v10699_v20  ;;  %v20065_v20 = vld [vmem:[#allocation69_spill] sm:$0xff] }
 0x452   : > { %7682 = vmatmul.mubr.bf16.gmra.mrb[72].mxu1 %v20063_v35  ;;  %6919 = vmatprep.mubr.bf16.mxu0 %v20064_v58  ;;  %v10712_v35 = vcombine.low %v2247_v24, %v2251_v50 }
 0x453   : > { %7691 = vmatprep.mubr.bf16.mxu1 %v20064_v58  ;;  %7059 = vmatpush1.bf16.msra.mxu0 %v10696_v12  ;;  %v2268_v12 = vld [vmem:[#allocation7 + $0xe38] sm:$0xff]  ;;  %v2271_v58 = vld [vmem:[#allocation7 + $0xe50] sm:$0xff] }
 0x454   : > { %7831 = vmatpush1.bf16.msra.mxu1 %v10698_v2  ;;  %7060 = vmatprep.subr.bf16.mxu0 %v10705_v46  ;;  %v2267_v46 = vld [vmem:[#allocation7 + $0xe30] sm:$0xff]  ;;  %v10720_v2 = vcombine.low %v2255_v60, %v2259_v0  ;;  %v10731_v50 = vcombine.high %v2264_v44, %v2268_v12 }
 0x455   : > { %7832 = vmatprep.subr.bf16.mxu1 %v10707_v48  ;;  %v10722_v48 = vcombine.low %v2256_v11, %v2260_v36  ;;  %v10729_v24 = vcombine.high %v2263_v1, %v2267_v46  ;;  %v2279_v0 = vld [vmem:[#allocation7 + $0xe90] sm:$0xff]  ;;  %v2280_v36 = vld [vmem:[#allocation7 + $0xe98] sm:$0xff] }
 0x456   : > { %v20068_v11 = vld [vmem:[#allocation72_spill] sm:$0xff] }
 0x457   : > { %7061 = vmatpush1.bf16.msra.mxu0 %v10704_v19  ;;  %v2276_v19 = vld [vmem:[#allocation7 + $0xe78] sm:$0xff] }
 0x458   : > { %7833 = vmatpush1.bf16.msra.mxu1 %v10706_v25  ;;  %7062 = vmatprep.subr.bf16.mxu0 %v10713_v31  ;;  %v10728_v25 = vcombine.low %v2263_v1, %v2267_v46  ;;  %v10730_v31 = vcombine.low %v2264_v44, %v2268_v12  ;;  %v10739_v60 = vcombine.high %v2272_v33, %v2276_v19  ;;  %v2291_v44 = vld [vmem:[#allocation7 + $0xef0] sm:$0xff]  ;;  %v2288_v12 = vld [vmem:[#allocation7 + $0xed8] sm:$0xff] }
 0x459   : > { %6920 = vmatmul.mubr.bf16.gmra.mrb[76].mxu0 %v20065_v20  ;;  %7834 = vmatprep.subr.bf16.mxu1 %v10715_v21  ;;  %v10737_v21 = vcombine.high %v2271_v58, %v2275_v18 }
 0x45a   : > { %7692 = vmatmul.mubr.bf16.gmra.mrb[76].mxu1 %v20065_v20  ;;  %6929 = vmatprep.mubr.bf16.mxu0 %v20066_v29  ;;  %v20067_v20 = vld [vmem:[#allocation71_spill] sm:$0xff] }
 0x45b   : > { %7701 = vmatprep.mubr.bf16.mxu1 %v20066_v29  ;;  %7063 = vmatpush1.bf16.msra.mxu0 %v10712_v35  ;;  %v2283_v35 = vld [vmem:[#allocation7 + $0xeb0] sm:$0xff] }
 0x45c   : > { %7835 = vmatpush1.bf16.msra.mxu1 %v10714_v10  ;;  %7064 = vmatprep.subr.bf16.mxu0 %v10721_v59  ;;  %v2284_v10 = vld [vmem:[#allocation7 + $0xeb8] sm:$0xff]  ;;  %v10736_v59 = vcombine.low %v2271_v58, %v2275_v18  ;;  %v10745_v1 = vcombine.high %v2279_v0, %v2283_v35  ;;  %v2287_v29 = vld [vmem:[#allocation7 + $0xed0] sm:$0xff] }
 0x45d   : > { %7836 = vmatprep.subr.bf16.mxu1 %v10723_v5  ;;  %v10738_v5 = vcombine.low %v2272_v33, %v2276_v19  ;;  %v10747_v46 = vcombine.high %v2280_v36, %v2284_v10  ;;  %v2295_v18 = vld [vmem:[#allocation7 + $0xf10] sm:$0xff]  ;;  %v20070_v33 = vld [vmem:[#allocation74_spill] sm:$0xff]  ;;  %v2296_v19 = vld [vmem:[#allocation7 + $0xf18] sm:$0xff] }
 0x45f   : > { %7065 = vmatpush1.bf16.msra.mxu0 %v10720_v2  ;;  %v2292_v2 = vld [vmem:[#allocation7 + $0xef8] sm:$0xff] }
 0x460   : > { %7837 = vmatpush1.bf16.msra.mxu1 %v10722_v48  ;;  %7066 = vmatprep.subr.bf16.mxu0 %v10729_v24  ;;  %v10744_v48 = vcombine.low %v2279_v0, %v2283_v35  ;;  %v10746_v24 = vcombine.low %v2280_v36, %v2284_v10  ;;  %v10755_v58 = vcombine.high %v2288_v12, %v2292_v2  ;;  %v2307_v36 = vld [vmem:[#allocation7 + $0xf70] sm:$0xff]  ;;  %v2304_v10 = vld [vmem:[#allocation7 + $0xf58] sm:$0xff] }
 0x461   : > { %6930 = vmatmul.mubr.bf16.gmra.mrb[80].mxu0 %v20067_v20  ;;  %7838 = vmatprep.subr.bf16.mxu1 %v10731_v50  ;;  %v10753_v50 = vcombine.high %v2287_v29, %v2291_v44 }
 0x462   : > { %7702 = vmatmul.mubr.bf16.gmra.mrb[80].mxu1 %v20067_v20  ;;  %6939 = vmatprep.mubr.bf16.mxu0 %v20068_v11  ;;  %v20069_v20 = vld [vmem:[#allocation73_spill] sm:$0xff] }
 0x463   : > { %7711 = vmatprep.mubr.bf16.mxu1 %v20068_v11  ;;  %7067 = vmatpush1.bf16.msra.mxu0 %v10728_v25  ;;  %v2299_v25 = vld [vmem:[#allocation7 + $0xf30] sm:$0xff] }
 0x464   : > { %7839 = vmatpush1.bf16.msra.mxu1 %v10730_v31  ;;  %7068 = vmatprep.subr.bf16.mxu0 %v10737_v21  ;;  %v2300_v31 = vld [vmem:[#allocation7 + $0xf38] sm:$0xff]  ;;  %v10752_v21 = vcombine.low %v2287_v29, %v2291_v44  ;;  %v10761_v0 = vcombine.high %v2295_v18, %v2299_v25  ;;  %v2303_v11 = vld [vmem:[#allocation7 + $0xf50] sm:$0xff] }
 0x465   : > { %7840 = vmatprep.subr.bf16.mxu1 %v10739_v60  ;;  %v10754_v60 = vcombine.low %v2288_v12, %v2292_v2  ;;  %v10763_v35 = vcombine.high %v2296_v19, %v2300_v31  ;;  %v2311_v44 = vld [vmem:[#allocation7 + $0xf90] sm:$0xff]  ;;  %v2312_v2 = vld [vmem:[#allocation7 + $0xf98] sm:$0xff] }
 0x466   : > { %v20072_v12 = vld [vmem:[#allocation76_spill] sm:$0xff] }
 0x467   : > { %7069 = vmatpush1.bf16.msra.mxu0 %v10736_v59  ;;  %v2308_v59 = vld [vmem:[#allocation7 + $0xf78] sm:$0xff] }
 0x468   : > { %7841 = vmatpush1.bf16.msra.mxu1 %v10738_v5  ;;  %7070 = vmatprep.subr.bf16.mxu0 %v10745_v1  ;;  %v10760_v5 = vcombine.low %v2295_v18, %v2299_v25  ;;  %v10762_v1 = vcombine.low %v2296_v19, %v2300_v31  ;;  %v10771_v29 = vcombine.high %v2304_v10, %v2308_v59  ;;  %v2323_v19 = vld [vmem:[#allocation7 + $0xff0] sm:$0xff]  ;;  %v2320_v31 = vld [vmem:[#allocation7 + $0xfd8] sm:$0xff] }
 0x469   : > { %6940 = vmatmul.mubr.bf16.gmra.mrb[84].mxu0 %v20069_v20  ;;  %7842 = vmatprep.subr.bf16.mxu1 %v10747_v46  ;;  %v10769_v46 = vcombine.high %v2303_v11, %v2307_v36 }
 0x46a   : > { %7712 = vmatmul.mubr.bf16.gmra.mrb[84].mxu1 %v20069_v20  ;;  %6949 = vmatprep.mubr.bf16.mxu0 %v20070_v33  ;;  %v20071_v20 = vld [vmem:[#allocation75_spill] sm:$0xff] }
 0x46b   : > { %7721 = vmatprep.mubr.bf16.mxu1 %v20070_v33  ;;  %7071 = vmatpush1.bf16.msra.mxu0 %v10744_v48  ;;  %v2315_v48 = vld [vmem:[#allocation7 + $0xfb0] sm:$0xff] }
 0x46c   : > { %7843 = vmatpush1.bf16.msra.mxu1 %v10746_v24  ;;  %7072 = vmatprep.subr.bf16.mxu0 %v10753_v50  ;;  %v2316_v24 = vld [vmem:[#allocation7 + $0xfb8] sm:$0xff]  ;;  %v10768_v50 = vcombine.low %v2303_v11, %v2307_v36  ;;  %v10777_v18 = vcombine.high %v2311_v44, %v2315_v48  ;;  %v2319_v33 = vld [vmem:[#allocation7 + $0xfd0] sm:$0xff]  ;;  %v20074_v36 = vld [vmem:[#allocation78_spill] sm:$0xff] }
 0x46d   : > { %7844 = vmatprep.subr.bf16.mxu1 %v10755_v58  ;;  %v10770_v58 = vcombine.low %v2304_v10, %v2308_v59  ;;  %v10779_v25 = vcombine.high %v2312_v2, %v2316_v24  ;;  %v10784_v10 = vcombine.low %v2319_v33, %v2323_v19 }
 0x46f   : > { %7073 = vmatpush1.bf16.msra.mxu0 %v10752_v21  ;;  %v2324_v21 = vld [vmem:[#allocation7 + $0xff8] sm:$0xff] }
 0x470   : > { %7845 = vmatpush1.bf16.msra.mxu1 %v10754_v60  ;;  %7074 = vmatprep.subr.bf16.mxu0 %v10761_v0  ;;  %v10776_v60 = vcombine.low %v2311_v44, %v2315_v48  ;;  %v10778_v0 = vcombine.low %v2312_v2, %v2316_v24  ;;  %v10787_v11 = vcombine.high %v2320_v31, %v2324_v21  ;;  %v20077_v44 = vld [vmem:[#allocation81_spill] sm:$0xff]  ;;  %v20078_v48 = vld [vmem:[#allocation82_spill] sm:$0xff]  ;;  %v20080_v2 = vld [vmem:[#allocation84_spill] sm:$0xff] }
 0x471   : > { %6950 = vmatmul.mubr.bf16.gmra.mrb[88].mxu0 %v20071_v20  ;;  %7846 = vmatprep.subr.bf16.mxu1 %v10763_v35  ;;  %v10785_v35 = vcombine.high %v2319_v33, %v2323_v19  ;;  %v10786_v59 = vcombine.low %v2320_v31, %v2324_v21  ;;  %v20081_v24 = vld [vmem:[#allocation85_spill] sm:$0xff]  ;;  %v20086_v33 = vld [vmem:[#allocation90_spill] sm:$0xff]  ;;  %v20087_v19 = vld [vmem:[#allocation91_spill] sm:$0xff] }
 0x472   : > { %7722 = vmatmul.mubr.bf16.gmra.mrb[88].mxu1 %v20071_v20  ;;  %6959 = vmatprep.mubr.bf16.mxu0 %v20072_v12  ;;  %v20073_v20 = vld [vmem:[#allocation77_spill] sm:$0xff]  ;;  %v20088_v31 = vld [vmem:[#allocation92_spill] sm:$0xff] }
 0x473   : > { %7731 = vmatprep.mubr.bf16.mxu1 %v20072_v12  ;;  %7075 = vmatpush1.bf16.msra.mxu0 %v10760_v5  ;;  %v12452_v5 = vld [vmem:[#allocation10 + $0x40] sm:$0xff]   ;;  %v20089_v21 = vld [vmem:[#allocation93_spill] sm:$0xff] }
 0x474   : > { %7847 = vmatpush1.bf16.msra.mxu1 %v10762_v1  ;;  %7076 = vmatprep.subr.bf16.mxu0 %v10769_v46  ;;  %v12454_v1 = vld [vmem:[#allocation10 + $0xc0] sm:$0xff]  }
 0x475   : > { %7848 = vmatprep.subr.bf16.mxu1 %v10771_v29  ;;  %v20075_v46 = vld [vmem:[#allocation79_spill] sm:$0xff]  ;;  %v20076_v29 = vld [vmem:[#allocation80_spill] sm:$0xff] }
 0x476   : > { %v20079_v12 = vld [vmem:[#allocation83_spill] sm:$0xff] }
 0x477   : > { %7077 = vmatpush1.bf16.msra.mxu0 %v10768_v50  ;;  %v20082_v50 = vld [vmem:[#allocation86_spill] sm:$0xff] }
 0x478   : > { %7849 = vmatpush1.bf16.msra.mxu1 %v10770_v58  ;;  %7078 = vmatprep.subr.bf16.mxu0 %v10777_v18  ;;  %v20083_v58 = vld [vmem:[#allocation87_spill] sm:$0xff]  ;;  %v20084_v18 = vld [vmem:[#allocation88_spill] sm:$0xff] }
 0x479   : > { %6960 = vmatmul.mubr.bf16.gmra.mrb[92].mxu0 %v20073_v20  ;;  %7850 = vmatprep.subr.bf16.mxu1 %v10779_v25  ;;  %v20085_v25 = vld [vmem:[#allocation89_spill] sm:$0xff] }
 0x47a   : > { %7732 = vmatmul.mubr.bf16.gmra.mrb[92].mxu1 %v20073_v20  ;;  %6969 = vmatprep.mubr.bf16.mxu0 %v20074_v36  ;;  %v12456_v20 = vld [vmem:[#allocation10 + $0x48] sm:$0xff]  }
 0x47b   : > { %7741 = vmatprep.mubr.bf16.mxu1 %v20074_v36  ;;  %7079 = vmatpush1.bf16.msra.mxu0 %v10776_v60  ;;  %v20090_v60 = vld [vmem:[#allocation94_spill] sm:$0xff]  ;;  %v12458_v36 = vld [vmem:[#allocation10 + $0xc8] sm:$0xff]  }
 0x47c   : > { %7851 = vmatpush1.bf16.msra.mxu1 %v10778_v0  ;;  %7080 = vmatprep.subr.bf16.mxu0 %v10785_v35  ;;  %v12453_v0 = vld [vmem:[#allocation10] sm:$0xff]  }
 0x47d   : > { %7852 = vmatprep.subr.bf16.mxu1 %v10787_v11  ;;  %v12455_v35 = vld [vmem:[#allocation10 + $0x80] sm:$0xff]  }
 0x47e   : > { %v20091_v11 = vld [vmem:[#allocation95_spill] sm:$0xff] }
 0x47f   : > { %7081 = vmatpush1.bf16.msra.mxu0 %v10784_v10  ;;  %v12457_v10 = vld [vmem:[#allocation10 + $0x8] sm:$0xff]  }
 0x480   : > { %7853 = vmatpush1.bf16.msra.mxu1 %v10786_v59  ;;  %10860 = vmatprep.subr.bf16.mxu0 %v12452_v5  ;;  %v20092_v59 = vld [vmem:[#allocation96_spill] sm:$0xff] }
 0x481   : > { %6970 = vmatmul.mubr.bf16.gmra.mrb[96].mxu0 %v20075_v46  ;;  %10972 = vmatprep.subr.bf16.mxu1 %v12454_v1  ;;  %v12459_v5 = vld [vmem:[#allocation10 + $0x88] sm:$0xff]   ;;  %v12460_v1 = vld [vmem:[#allocation10 + $0x50] sm:$0xff]  }
 0x482   : > { %7742 = vmatmul.mubr.bf16.gmra.mrb[96].mxu1 %v20075_v46  ;;  %6979 = vmatprep.mubr.bf16.mxu0 %v20076_v29  ;;  %v12462_v46 = vld [vmem:[#allocation10 + $0xd0] sm:$0xff]  }
 0x483   : > { %7751 = vmatprep.mubr.bf16.mxu1 %v20076_v29  ;;  %v12461_v29 = vld [vmem:[#allocation10 + $0x10] sm:$0xff]  }
 0x489   : > { %6980 = vmatmul.mubr.bf16.gmra.mrb[100].mxu0 %v20077_v44 }
 0x48a   : > { %7752 = vmatmul.mubr.bf16.gmra.mrb[100].mxu1 %v20077_v44  ;;  %6989 = vmatprep.mubr.bf16.mxu0 %v20078_v48  ;;  %v12463_v44 = vld [vmem:[#allocation10 + $0x90] sm:$0xff]  }
 0x48b   : > { %7761 = vmatprep.mubr.bf16.mxu1 %v20078_v48  ;;  %v12464_v48 = vld [vmem:[#allocation10 + $0x58] sm:$0xff]  }
 0x491   : > { %6990 = vmatmul.mubr.bf16.gmra.mrb[104].mxu0 %v20079_v12 }
 0x492   : > { %7762 = vmatmul.mubr.bf16.gmra.mrb[104].mxu1 %v20079_v12  ;;  %6999 = vmatprep.mubr.bf16.mxu0 %v20080_v2  ;;  %v20093_v12 = vld [vmem:[#allocation97_spill] sm:$0xff] }
 0x493   : > { %7771 = vmatprep.mubr.bf16.mxu1 %v20080_v2  ;;  %v12466_v2 = vld [vmem:[#allocation10 + $0xd8] sm:$0xff]  }
 0x499   : > { %7000 = vmatmul.mubr.bf16.gmra.mrb[108].mxu0 %v20081_v24 }
 0x49a   : > { %7772 = vmatmul.mubr.bf16.gmra.mrb[108].mxu1 %v20081_v24  ;;  %7009 = vmatprep.mubr.bf16.mxu0 %v20082_v50  ;;  %v20094_v24 = vld [vmem:[#allocation98_spill] sm:$0xff] }
 0x49b   : > { %7781 = vmatprep.mubr.bf16.mxu1 %v20082_v50  ;;  %v12465_v50 = vld [vmem:[#allocation10 + $0x18] sm:$0xff]  }
 0x4a1   : > { %7010 = vmatmul.mubr.bf16.gmra.mrb[112].mxu0 %v20083_v58 }
 0x4a2   : > { %7782 = vmatmul.mubr.bf16.gmra.mrb[112].mxu1 %v20083_v58  ;;  %7019 = vmatprep.mubr.bf16.mxu0 %v20084_v18  ;;  %v12467_v58 = vld [vmem:[#allocation10 + $0x98] sm:$0xff]  }
 0x4a3   : > { %7791 = vmatprep.mubr.bf16.mxu1 %v20084_v18  ;;  %v12468_v18 = vld [vmem:[#allocation10 + $0x60] sm:$0xff]  }
 0x4a9   : > { %7020 = vmatmul.mubr.bf16.gmra.mrb[116].mxu0 %v20085_v25 }
 0x4aa   : > { %7792 = vmatmul.mubr.bf16.gmra.mrb[116].mxu1 %v20085_v25  ;;  %7029 = vmatprep.mubr.bf16.mxu0 %v20086_v33  ;;  %v12470_v25 = vld [vmem:[#allocation10 + $0xe0] sm:$0xff]  }
 0x4ab   : > { %7801 = vmatprep.mubr.bf16.mxu1 %v20086_v33  ;;  %v12469_v33 = vld [vmem:[#allocation10 + $0x20] sm:$0xff]  }
 0x4b1   : > { %7030 = vmatmul.mubr.bf16.gmra.mrb[120].mxu0 %v20087_v19 }
 0x4b2   : > { %7802 = vmatmul.mubr.bf16.gmra.mrb[120].mxu1 %v20087_v19  ;;  %7039 = vmatprep.mubr.bf16.mxu0 %v20088_v31  ;;  %v12471_v19 = vld [vmem:[#allocation10 + $0xa0] sm:$0xff]  }
 0x4b3   : > { %7811 = vmatprep.mubr.bf16.mxu1 %v20088_v31  ;;  %v12472_v31 = vld [vmem:[#allocation10 + $0x68] sm:$0xff]  }
 0x4b9   : > { %7040 = vmatmul.mubr.bf16.gmra.mrb[124].mxu0 %v20089_v21 }
 0x4ba   : > { %7812 = vmatmul.mubr.bf16.gmra.mrb[124].mxu1 %v20089_v21  ;;  %7082 = vmatprep.mubr.bf16.mxu0 %v20090_v60  ;;  %v20095_v21 = vld [vmem:[#allocation99_spill] sm:$0xff] }
 0x4bb   : > { %7854 = vmatprep.mubr.bf16.mxu1 %v20090_v60  ;;  %v12474_v60 = vld [vmem:[#allocation10 + $0xe8] sm:$0xff]  }
 0x4c1   : > { %7083 = vmatmul.mubr.bf16.vlgmr.msra.gmra.mrb[64].mxu0 %v20091_v11 }
 0x4c2   : > { %7855 = vmatmul.mubr.bf16.vlgmr.msra.gmra.mrb[64].mxu1 %v20091_v11  ;;  %10861 = vmatpush3.bf16.msra.mxu0 %v12453_v0  ;;  %v20096_v0 = vld [vmem:[#allocation100_spill] sm:$0xff] }
 0x4c3   : > { %10973 = vmatpush3.bf16.msra.mxu1 %v12455_v35  ;;  %7092 = vmatprep.mubr.bf16.mxu0 %v20092_v59  ;;  %v12473_v35 = vld [vmem:[#allocation10 + $0x28] sm:$0xff]   ;;  %v12476_v11 = vld [vmem:[#allocation10 + $0x70] sm:$0xff]  }
 0x4c4   : > { %7864 = vmatprep.mubr.bf16.mxu1 %v20092_v59  ;;  %10862 = vmatprep.subr.bf16.mxu0 %v12456_v20  ;;  %v12475_v20 = vld [vmem:[#allocation10 + $0xa8] sm:$0xff]   ;;  %v12479_v59 = vld [vmem:[#allocation10 + $0xb0] sm:$0xff]  }
 0x4c5   : > { %10974 = vmatprep.subr.bf16.mxu1 %v12458_v36  ;;  %v12478_v36 = vld [vmem:[#allocation10 + $0xf0] sm:$0xff]  }
 0x4c6   : > { %10863 = vmatpush3.bf16.msra.mxu0 %v12457_v10  ;;  %v12477_v10 = vld [vmem:[#allocation10 + $0x30] sm:$0xff]  }
 0x4c7   : > { %10975 = vmatpush3.bf16.msra.mxu1 %v12459_v5  ;;  %10864 = vmatprep.subr.bf16.mxu0 %v12460_v1  ;;  %v12480_v5 = vld [vmem:[#allocation10 + $0x78] sm:$0xff]  }
 0x4c8   : > { %10976 = vmatprep.subr.bf16.mxu1 %v12462_v46  ;;  %v20097_v1 = vld [vmem:[#allocation101_spill] sm:$0xff] }
 0x4c9   : > { %7093 = vmatmul.mubr.bf16.gmra.mrb[68].mxu0 %v20093_v12  ;;  %v12482_v46 = vld [vmem:[#allocation10 + $0xf8] sm:$0xff]  }
 0x4ca   : > { %7865 = vmatmul.mubr.bf16.gmra.mrb[68].mxu1 %v20093_v12  ;;  %7102 = vmatprep.mubr.bf16.mxu0 %v20094_v24  ;;  %v12484_v12 = vld [vmem:[#allocation10 + $0x140] sm:$0xff]  }
 0x4cb   : > { %7874 = vmatprep.mubr.bf16.mxu1 %v20094_v24  ;;  %10865 = vmatpush3.bf16.msra.mxu0 %v12461_v29  ;;  %v20098_v29 = vld [vmem:[#allocation102_spill] sm:$0xff]  ;;  %v20099_v24 = vld [vmem:[#allocation103_spill] sm:$0xff] }
 0x4cc   : > { %10977 = vmatpush3.bf16.msra.mxu1 %v12463_v44  ;;  %10866 = vmatprep.subr.bf16.mxu0 %v12464_v48  ;;  %v12481_v44 = vld [vmem:[#allocation10 + $0x38] sm:$0xff]  }
 0x4cd   : > { %10978 = vmatprep.subr.bf16.mxu1 %v12466_v2  ;;  %v12483_v48 = vld [vmem:[#allocation10 + $0xb8] sm:$0xff]   ;;  %v12486_v2 = vld [vmem:[#allocation10 + $0x1c0] sm:$0xff]  }
 0x4cf   : > { %10867 = vmatpush3.bf16.msra.mxu0 %v12465_v50  ;;  %v20100_v50 = vld [vmem:[#allocation104_spill] sm:$0xff] }
 0x4d0   : > { %10979 = vmatpush3.bf16.msra.mxu1 %v12467_v58  ;;  %10868 = vmatprep.subr.bf16.mxu0 %v12468_v18  ;;  %v20101_v58 = vld [vmem:[#allocation105_spill] sm:$0xff]  ;;  %v20102_v18 = vld [vmem:[#allocation106_spill] sm:$0xff] }
 0x4d1   : > { %7103 = vmatmul.mubr.bf16.gmra.mrb[72].mxu0 %v20095_v21  ;;  %10980 = vmatprep.subr.bf16.mxu1 %v12470_v25  ;;  %v20103_v25 = vld [vmem:[#allocation107_spill] sm:$0xff] }
 0x4d2   : > { %7875 = vmatmul.mubr.bf16.gmra.mrb[72].mxu1 %v20095_v21  ;;  %7112 = vmatprep.mubr.bf16.mxu0 %v20096_v0  ;;  %v20107_v21 = vld [vmem:[#allocation111_spill] sm:$0xff] }
 0x4d3   : > { %7884 = vmatprep.mubr.bf16.mxu1 %v20096_v0  ;;  %10869 = vmatpush3.bf16.msra.mxu0 %v12469_v33  ;;  %v20104_v33 = vld [vmem:[#allocation108_spill] sm:$0xff]  ;;  %v20109_v0 = vld [vmem:[#allocation113_spill] sm:$0xff] }
 0x4d4   : > { %10981 = vmatpush3.bf16.msra.mxu1 %v12471_v19  ;;  %10870 = vmatprep.subr.bf16.mxu0 %v12472_v31  ;;  %v20105_v19 = vld [vmem:[#allocation109_spill] sm:$0xff]  ;;  %v20106_v31 = vld [vmem:[#allocation110_spill] sm:$0xff] }
 0x4d5   : > { %10982 = vmatprep.subr.bf16.mxu1 %v12474_v60  ;;  %v20108_v60 = vld [vmem:[#allocation112_spill] sm:$0xff] }
 0x4d7   : > { %10871 = vmatpush3.bf16.msra.mxu0 %v12473_v35  ;;  %v20110_v35 = vld [vmem:[#allocation114_spill] sm:$0xff] }
 0x4d8   : > { %10983 = vmatpush3.bf16.msra.mxu1 %v12475_v20  ;;  %10872 = vmatprep.subr.bf16.mxu0 %v12476_v11  ;;  %v20111_v20 = vld [vmem:[#allocation115_spill] sm:$0xff]  ;;  %v20112_v11 = vld [vmem:[#allocation116_spill] sm:$0xff] }
 0x4d9   : > { %7113 = vmatmul.mubr.bf16.gmra.mrb[76].mxu0 %v20097_v1  ;;  %10984 = vmatprep.subr.bf16.mxu1 %v12478_v36  ;;  %v20113_v36 = vld [vmem:[#allocation117_spill] sm:$0xff] }
 0x4da   : > { %7885 = vmatmul.mubr.bf16.gmra.mrb[76].mxu1 %v20097_v1  ;;  %7122 = vmatprep.mubr.bf16.mxu0 %v20098_v29  ;;  %v20117_v1 = vld [vmem:[#allocation121_spill] sm:$0xff] }
 0x4db   : > { %7894 = vmatprep.mubr.bf16.mxu1 %v20098_v29  ;;  %10873 = vmatpush3.bf16.msra.mxu0 %v12477_v10  ;;  %v20114_v10 = vld [vmem:[#allocation118_spill] sm:$0xff]  ;;  %v20119_v29 = vld [vmem:[#allocation123_spill] sm:$0xff] }
 0x4dc   : > { %10985 = vmatpush3.bf16.msra.mxu1 %v12479_v59  ;;  %10874 = vmatprep.subr.bf16.mxu0 %v12480_v5  ;;  %v20115_v59 = vld [vmem:[#allocation119_spill] sm:$0xff]  ;;  %v20116_v5 = vld [vmem:[#allocation120_spill] sm:$0xff] }
 0x4dd   : > { %10986 = vmatprep.subr.bf16.mxu1 %v12482_v46  ;;  %v20118_v46 = vld [vmem:[#allocation122_spill] sm:$0xff] }
 0x4df   : > { %10875 = vmatpush3.bf16.msra.mxu0 %v12481_v44  ;;  %v20120_v44 = vld [vmem:[#allocation124_spill] sm:$0xff] }
 0x4e0   : > { %10987 = vmatpush3.bf16.msra.mxu1 %v12483_v48  ;;  %11084 = vmatprep.subr.bf16.mxu0 %v12484_v12  ;;  %v20121_v48 = vld [vmem:[#allocation125_spill] sm:$0xff]  ;;  %v20122_v12 = vld [vmem:[#allocation24_spill] sm:$0xff] }
 0x4e1   : > { %7123 = vmatmul.mubr.bf16.gmra.mrb[80].mxu0 %v20099_v24  ;;  %11196 = vmatprep.subr.bf16.mxu1 %v12486_v2  ;;  %v20123_v2 = vld [vmem:[#allocation23_spill] sm:$0xff] }
 0x4e2   : > { %7895 = vmatmul.mubr.bf16.gmra.mrb[80].mxu1 %v20099_v24  ;;  %7132 = vmatprep.mubr.bf16.mxu0 %v20100_v50  ;;  %v20124_v24 = vpack.c.bf16 %v20122_v12, %v20123_v2  ;;  %v12494_v12 = vld [vmem:[#allocation10 + $0x1d0] sm:$0xff]  }
 0x4e3   : > { %7904 = vmatprep.mubr.bf16.mxu1 %v20100_v50  ;;  %v20125_v50 = vld [vmem:[#allocation25_spill] sm:$0xff] }
 0x4e4   : > { %v12493_v2 = vld [vmem:[#allocation10 + $0x110] sm:$0xff]  }
 0x4e9   : > { %7133 = vmatmul.mubr.bf16.gmra.mrb[84].mxu0 %v20101_v58 }
 0x4ea   : > { %7905 = vmatmul.mubr.bf16.gmra.mrb[84].mxu1 %v20101_v58  ;;  %7142 = vmatprep.mubr.bf16.mxu0 %v20102_v18  ;;  %v20126_v58 = vld [vmem:[#allocation26_spill] sm:$0xff] }
 0x4eb   : > { %7914 = vmatprep.mubr.bf16.mxu1 %v20102_v18  ;;  %v20127_v18 = vpack.c.bf16 %v20125_v50, %v20126_v58  ;;  %v12496_v50 = vld [vmem:[#allocation10 + $0x158] sm:$0xff]  }
 0x4ec   : > { %v20140_v58 = vld [vmem:[#allocation130_spill] sm:$0xff] }
 0x4f1   : > { %7143 = vmatmul.mubr.bf16.gmra.mrb[88].mxu0 %v20103_v25 }
 0x4f2   : > { %7915 = vmatmul.mubr.bf16.gmra.mrb[88].mxu1 %v20103_v25  ;;  %7152 = vmatprep.mubr.bf16.mxu0 %v20104_v33  ;;  %v12485_v25 = vld [vmem:[#allocation10 + $0x100] sm:$0xff]  }
 0x4f3   : > { %7924 = vmatprep.mubr.bf16.mxu1 %v20104_v33  ;;  %v12487_v33 = vld [vmem:[#allocation10 + $0x180] sm:$0xff]  }
 0x4f9   : > { %7153 = vmatmul.mubr.bf16.gmra.mrb[92].mxu0 %v20105_v19 }
 0x4fa   : > { %7925 = vmatmul.mubr.bf16.gmra.mrb[92].mxu1 %v20105_v19  ;;  %7162 = vmatprep.mubr.bf16.mxu0 %v20106_v31  ;;  %v12488_v19 = vld [vmem:[#allocation10 + $0x148] sm:$0xff]  }
 0x4fb   : > { %7934 = vmatprep.mubr.bf16.mxu1 %v20106_v31  ;;  %v20128_v31 = vld [vmem:[#allocation21_spill] sm:$0xff] }
 0x501   : > { %7163 = vmatmul.mubr.bf16.gmra.mrb[96].mxu0 %v20107_v21 }
 0x502   : > { %7935 = vmatmul.mubr.bf16.gmra.mrb[96].mxu1 %v20107_v21  ;;  %7172 = vmatprep.mubr.bf16.mxu0 %v20108_v60  ;;  %v20129_v21 = vld [vmem:[#allocation20_spill] sm:$0xff] }
 0x503   : > { %7944 = vmatprep.mubr.bf16.mxu1 %v20108_v60  ;;  %v20130_v60 = vpack.c.bf16 %v20128_v31, %v20129_v21  ;;  %v12498_v21 = vld [vmem:[#allocation10 + $0x1d8] sm:$0xff]  }
 0x509   : > { %7173 = vmatmul.mubr.bf16.gmra.mrb[100].mxu0 %v20109_v0 }
 0x50a   : > { %7945 = vmatmul.mubr.bf16.gmra.mrb[100].mxu1 %v20109_v0  ;;  %7182 = vmatprep.mubr.bf16.mxu0 %v20110_v35  ;;  %v12490_v0 = vld [vmem:[#allocation10 + $0x1c8] sm:$0xff]  }
 0x50b   : > { %7954 = vmatprep.mubr.bf16.mxu1 %v20110_v35  ;;  %v20131_v35 = vld [vmem:[#allocation126_spill] sm:$0xff] }
 0x511   : > { %7183 = vmatmul.mubr.bf16.gmra.mrb[104].mxu0 %v20111_v20 }
 0x512   : > { %7955 = vmatmul.mubr.bf16.gmra.mrb[104].mxu1 %v20111_v20  ;;  %7192 = vmatprep.mubr.bf16.mxu0 %v20112_v11  ;;  %v20132_v20 = vld [vmem:[#allocation22_spill] sm:$0xff] }
 0x513   : > { %7964 = vmatprep.mubr.bf16.mxu1 %v20112_v11  ;;  %v20133_v11 = vpack.c.bf16 %v20131_v35, %v20132_v20  ;;  %v20147_v35 = vld [vmem:[#allocation150_spill] sm:$0xff] }
 0x514   : > { %v20149_v20 = vld [vmem:[#allocation182_spill] sm:$0xff] }
 0x519   : > { %7193 = vmatmul.mubr.bf16.gmra.mrb[108].mxu0 %v20113_v36 }
 0x51a   : > { %7965 = vmatmul.mubr.bf16.gmra.mrb[108].mxu1 %v20113_v36  ;;  %7202 = vmatprep.mubr.bf16.mxu0 %v20114_v10  ;;  %v20134_v36 = vld [vmem:[#allocation27_spill] sm:$0xff] }
 0x51b   : > { %7974 = vmatprep.mubr.bf16.mxu1 %v20114_v10  ;;  %v20135_v10 = vld [vmem:[#allocation28_spill] sm:$0xff] }
 0x521   : > { %7203 = vmatmul.mubr.bf16.gmra.mrb[112].mxu0 %v20115_v59 }
 0x522   : > { %7975 = vmatmul.mubr.bf16.gmra.mrb[112].mxu1 %v20115_v59  ;;  %7212 = vmatprep.mubr.bf16.mxu0 %v20116_v5  ;;  %v20136_v59 = vpack.c.bf16 %v20134_v36, %v20135_v10  ;;  %v12497_v10 = vld [vmem:[#allocation10 + $0x118] sm:$0xff]  }
 0x523   : > { %7984 = vmatprep.mubr.bf16.mxu1 %v20116_v5  ;;  %v20137_v5 = vld [vmem:[#allocation127_spill] sm:$0xff] }
 0x529   : > { %7213 = vmatmul.mubr.bf16.gmra.mrb[116].mxu0 %v20117_v1 }
 0x52a   : > { %7985 = vmatmul.mubr.bf16.gmra.mrb[116].mxu1 %v20117_v1  ;;  %7222 = vmatprep.mubr.bf16.mxu0 %v20118_v46  ;;  %v20138_v1 = vld [vmem:[#allocation128_spill] sm:$0xff] }
 0x52b   : > { %7994 = vmatprep.mubr.bf16.mxu1 %v20118_v46  ;;  %v20139_v46 = vpack.c.bf16 %v20137_v5, %v20138_v1  ;;  %v12500_v5 = vld [vmem:[#allocation10 + $0x160] sm:$0xff]  }
 0x52c   : > { %v12502_v1 = vld [vmem:[#allocation10 + $0x1e0] sm:$0xff]  }
 0x531   : > { %7223 = vmatmul.mubr.bf16.gmra.mrb[120].mxu0 %v20119_v29 }
 0x532   : > { %7995 = vmatmul.mubr.bf16.gmra.mrb[120].mxu1 %v20119_v29  ;;  %7232 = vmatprep.mubr.bf16.mxu0 %v20120_v44  ;;  %v12489_v29 = vld [vmem:[#allocation10 + $0x108] sm:$0xff]  }
 0x533   : > { %8004 = vmatprep.mubr.bf16.mxu1 %v20120_v44  ;;  %v12491_v44 = vld [vmem:[#allocation10 + $0x188] sm:$0xff]  }
 0x539   : > { %7233 = vmatmul.mubr.bf16.gmra.mrb[124].mxu0 %v20121_v48 }
 0x53a   : > { %8005 = vmatmul.mubr.bf16.gmra.mrb[124].mxu1 %v20121_v48  ;;  %9462 = vmatprep.mubr.bf16.mxu0 %v20124_v24  ;;  %v12492_v48 = vld [vmem:[#allocation10 + $0x150] sm:$0xff]  }
 0x53b   : > { %9623 = vmatprep.mubr.bf16.mxu1 %v20127_v18  ;;  %v12495_v24 = vld [vmem:[#allocation10 + $0x190] sm:$0xff]  }
 0x53c   : > { %v20141_v18 = vld [vmem:[#allocation129_spill] sm:$0xff] }
 0x53d   : > { %v20142_v31 = vpack.c.bf16 %v20140_v58, %v20141_v18  ;;  %v12506_v18 = vld [vmem:[#allocation10 + $0x1e8] sm:$0xff]  }
 0x541   : > { %9463 = vmatmul.mubr.bf16.vlgmr.msra.gmra.mrb[128].mxu0 %v20130_v60  ;;  %v20144_v60 = vld [vmem:[#allocation140_spill] sm:$0xff] }
 0x542   : > { %9624 = vmatmul.mubr.bf16.vlgmr.msra.gmra.mrb[128].mxu1 %v20133_v11  ;;  %9470 = vmatprep.mubr.bf16.mxu0 %v20136_v59  ;;  %v20150_v11 = vld [vmem:[#allocation187_spill] sm:$0xff]  ;;  %v12499_v59 = vld [vmem:[#allocation10 + $0x198] sm:$0xff]  }
 0x543   : > { %9631 = vmatprep.mubr.bf16.mxu1 %v20139_v46  ;;  %11085 = vmatpush3.bf16.msra.mxu0 %v12485_v25  ;;  %v20143_v25 = vld [vmem:[#allocation139_spill] sm:$0xff]  ;;  %v20151_v36 = vpack.c.bf16 %v20149_v20, %v20150_v11  ;;  %v12508_v20 = vld [vmem:[#allocation10 + $0x170] sm:$0xff]  }
 0x544   : > { %11197 = vmatpush3.bf16.msra.mxu1 %v12487_v33  ;;  %11086 = vmatprep.subr.bf16.mxu0 %v12488_v19  ;;  %v20145_v33 = vpack.c.bf16 %v20143_v25, %v20144_v60  ;;  %v20146_v19 = vld [vmem:[#allocation147_spill] sm:$0xff]  ;;  %v20159_v25 = vld [vmem:[#allocation40_spill] sm:$0xff] }
 0x545   : > { %11198 = vmatprep.subr.bf16.mxu1 %v12490_v0  ;;  %v20148_v0 = vpack.c.bf16 %v20146_v19, %v20147_v35  ;;  %v12501_v46 = vld [vmem:[#allocation10 + $0x120] sm:$0xff]   ;;  %v20161_v60 = vld [vmem:[#allocation52_spill] sm:$0xff] }
 0x546   : > { %v12505_v35 = vld [vmem:[#allocation10 + $0x128] sm:$0xff]   ;;  %v12510_v11 = vld [vmem:[#allocation10 + $0x1f0] sm:$0xff]  }
 0x547   : > { %11087 = vmatpush3.bf16.msra.mxu0 %v12489_v29  ;;  %v12503_v29 = vld [vmem:[#allocation10 + $0x1a0] sm:$0xff]  }
 0x548   : > { %11199 = vmatpush3.bf16.msra.mxu1 %v12491_v44  ;;  %11088 = vmatprep.subr.bf16.mxu0 %v12492_v48  ;;  %v12504_v44 = vld [vmem:[#allocation10 + $0x168] sm:$0xff]   ;;  %v20152_v48 = vld [vmem:[#allocation170_spill] sm:$0xff] }
 0x549   : > { %9471 = vmatmul.mubr.bf16.gmra.mrb[132].mxu0 %v20142_v31  ;;  %11200 = vmatprep.subr.bf16.mxu1 %v12494_v12  ;;  %v20153_v12 = vld [vmem:[#allocation159_spill] sm:$0xff]  ;;  %v20156_v31 = vld [vmem:[#allocation162_spill] sm:$0xff] }
 0x54a   : > { %9632 = vmatmul.mubr.bf16.gmra.mrb[132].mxu1 %v20145_v33  ;;  %9478 = vmatprep.mubr.bf16.mxu0 %v20148_v0  ;;  %v20154_v58 = vpack.c.bf16 %v20152_v48, %v20153_v12  ;;  %v20162_v33 = vld [vmem:[#allocation174_spill] sm:$0xff]  ;;  %v12507_v0 = vld [vmem:[#allocation10 + $0x1a8] sm:$0xff]  }
 0x54b   : > { %9639 = vmatprep.mubr.bf16.mxu1 %v20151_v36  ;;  %11089 = vmatpush3.bf16.msra.mxu0 %v12493_v2  ;;  %v20155_v2 = vld [vmem:[#allocation167_spill] sm:$0xff]  ;;  %v20163_v19 = vpack.c.bf16 %v20161_v60, %v20162_v33  ;;  %v12509_v36 = vld [vmem:[#allocation10 + $0x130] sm:$0xff]   ;;  %v12514_v12 = vld [vmem:[#allocation10 + $0x1f8] sm:$0xff]  }
 0x54c   : > { %11201 = vmatpush3.bf16.msra.mxu1 %v12495_v24  ;;  %11090 = vmatprep.subr.bf16.mxu0 %v12496_v50  ;;  %v20157_v24 = vpack.c.bf16 %v20155_v2, %v20156_v31  ;;  %v20158_v50 = vld [vmem:[#allocation178_spill] sm:$0xff]  ;;  %v20171_v2 = vld [vmem:[#allocation176_spill] sm:$0xff] }
 0x54d   : > { %11202 = vmatprep.subr.bf16.mxu1 %v12498_v21  ;;  %v20160_v21 = vpack.c.bf16 %v20158_v50, %v20159_v25  ;;  %v20173_v31 = vld [vmem:[#allocation146_spill] sm:$0xff]  ;;  %v20176_v60 = vld [vmem:[#allocation188_spill] sm:$0xff] }
 0x54e   : > { %v12513_v25 = vld [vmem:[#allocation10 + $0x138] sm:$0xff]   ;;  %v20177_v33 = vpack.c.bf16 %v16208_v55, %v20176_v60 }
 0x54f   : > { %11091 = vmatpush3.bf16.msra.mxu0 %v12497_v10  ;;  %v12511_v10 = vld [vmem:[#allocation10 + $0x1b0] sm:$0xff]  }
 0x550   : > { %11203 = vmatpush3.bf16.msra.mxu1 %v12499_v59  ;;  %11092 = vmatprep.subr.bf16.mxu0 %v12500_v5  ;;  %v12512_v59 = vld [vmem:[#allocation10 + $0x178] sm:$0xff]   ;;  %v20164_v5 = vld [vmem:[#allocation175_spill] sm:$0xff] }
 0x551   : > { %9479 = vmatmul.mubr.bf16.gmra.mrb[136].mxu0 %v20154_v58  ;;  %11204 = vmatprep.subr.bf16.mxu1 %v12502_v1  ;;  %v20165_v1 = vld [vmem:[#allocation39_spill] sm:$0xff]  ;;  %v20168_v58 = vld [vmem:[#allocation137_spill] sm:$0xff] }
 0x552   : > { %9640 = vmatmul.mubr.bf16.gmra.mrb[136].mxu1 %v20157_v24  ;;  %9486 = vmatprep.mubr.bf16.mxu0 %v20160_v21  ;;  %v20166_v48 = vpack.c.bf16 %v20164_v5, %v20165_v1  ;;  %v20174_v24 = vld [vmem:[#allocation53_spill] sm:$0xff]  ;;  %v20184_v5 = vld [vmem:[#allocation54_spill] sm:$0xff] }
 0x553   : > { %9647 = vmatprep.mubr.bf16.mxu1 %v20163_v19  ;;  %11093 = vmatpush3.bf16.msra.mxu0 %v12501_v46  ;;  %v20167_v46 = vld [vmem:[#allocation172_spill] sm:$0xff]  ;;  %v20175_v50 = vpack.c.bf16 %v20173_v31, %v20174_v24  ;;  %v12515_v21 = vld [vmem:[#allocation10 + $0x1b8] sm:$0xff]   ;;  %v20178_v19 = vld [vmem:[#allocation195_spill] sm:$0xff] }
 0x554   : > { %11205 = vmatpush3.bf16.msra.mxu1 %v12503_v29  ;;  %11094 = vmatprep.subr.bf16.mxu0 %v12504_v44  ;;  %v20169_v29 = vpack.c.bf16 %v20167_v46, %v20168_v58  ;;  %v20170_v44 = vld [vmem:[#allocation143_spill] sm:$0xff]  ;;  %v20187_v1 = vld [vmem:[#allocation145_spill] sm:$0xff]  ;;  %v20192_v58 = vld [vmem:[#allocation42_spill] sm:$0xff] }
 0x555   : > { %11206 = vmatprep.subr.bf16.mxu1 %v12506_v18  ;;  %v20172_v18 = vpack.c.bf16 %v20170_v44, %v20171_v2  ;;  %v20190_v46 = vld [vmem:[#allocation151_spill] sm:$0xff]  ;;  %v20195_v2 = vld [vmem:[#allocation193_spill] sm:$0xff]  ;;  %v20198_v31 = vld [vmem:[#allocation198_spill] sm:$0xff] }
 0x556   : > { %v20199_v24 = vld [vmem:[#allocation155_spill] sm:$0xff] }
 0x557   : > { %11095 = vmatpush3.bf16.msra.mxu0 %v12505_v35  ;;  %v20179_v35 = vld [vmem:[#allocation194_spill] sm:$0xff] }
 0x558   : > { %11207 = vmatpush3.bf16.msra.mxu1 %v12507_v0  ;;  %11096 = vmatprep.subr.bf16.mxu0 %v12508_v20  ;;  %v20180_v0 = vpack.c.bf16 %v20178_v19, %v20179_v35  ;;  %v20181_v20 = vld [vmem:[#allocation34_spill] sm:$0xff]  ;;  %v20205_v19 = vld [vmem:[#allocation199_spill] sm:$0xff] }
 0x559   : > { %9487 = vmatmul.mubr.bf16.gmra.mrb[140].mxu0 %v20166_v48  ;;  %11208 = vmatprep.subr.bf16.mxu1 %v12510_v11  ;;  %v20182_v11 = vpack.c.bf16 %v16238_v39, %v20181_v20  ;;  %v20208_v20 = vld [vmem:[#allocation156_spill] sm:$0xff] }
 0x55a   : > { %9648 = vmatmul.mubr.bf16.gmra.mrb[140].mxu1 %v20169_v29  ;;  %9494 = vmatprep.mubr.bf16.mxu0 %v20172_v18  ;;  %v20193_v29 = vld [vmem:[#allocation158_spill] sm:$0xff]  ;;  %v20196_v18 = vld [vmem:[#allocation185_spill] sm:$0xff] }
 0x55b   : > { %9655 = vmatprep.mubr.bf16.mxu1 %v20175_v50  ;;  %11097 = vmatpush3.bf16.msra.mxu0 %v12509_v36  ;;  %v20183_v36 = vld [vmem:[#allocation41_spill] sm:$0xff]  ;;  %v20194_v44 = vpack.c.bf16 %v20192_v58, %v20193_v29  ;;  %v20197_v39 = vpack.c.bf16 %v20195_v2, %v20196_v18  ;;  %v20200_v50 = vpack.c.bf16 %v20198_v31, %v20199_v24  ;;  %v20219_v58 = vld [vmem:[#allocation208_spill] sm:$0xff]  ;;  %v20222_v2 = vld [vmem:[#allocation55_spill] sm:$0xff] }
 0x55c   : > { %11209 = vmatpush3.bf16.msra.mxu1 %v12511_v10  ;;  %11098 = vmatprep.subr.bf16.mxu0 %v12512_v59  ;;  %v20185_v10 = vpack.c.bf16 %v20183_v36, %v20184_v5  ;;  %v20186_v59 = vld [vmem:[#allocation149_spill] sm:$0xff]  ;;  %v20210_v36 = vld [vmem:[#allocation196_spill] sm:$0xff]  ;;  %v20211_v5 = vld [vmem:[#allocation203_spill] sm:$0xff] }
 0x55d   : > { %11210 = vmatprep.subr.bf16.mxu1 %v12514_v12  ;;  %v20188_v48 = vpack.c.bf16 %v20186_v59, %v20187_v1  ;;  %v20189_v12 = vld [vmem:[#allocation180_spill] sm:$0xff]  ;;  %v20220_v29 = vld [vmem:[#allocation205_spill] sm:$0xff] }
 0x55e   : > { %v20191_v55 = vpack.c.bf16 %v20189_v12, %v20190_v46  ;;  %v20213_v59 = vld [vmem:[#allocation36_spill] sm:$0xff]  ;;  %v20216_v12 = vld [vmem:[#allocation201_spill] sm:$0xff] }
 0x55f   : > { %11099 = vmatpush3.bf16.msra.mxu0 %v12513_v25  ;;  %v20201_v25 = vld [vmem:[#allocation202_spill] sm:$0xff]  ;;  %v20214_v1 = vld [vmem:[#allocation200_spill] sm:$0xff]  ;;  %v20217_v46 = vld [vmem:[#allocation197_spill] sm:$0xff] }
 0x560   : > { %11211 = vmatpush3.bf16.msra.mxu1 %v12515_v21  ;;  %v20202_v21 = vld [vmem:[#allocation215_spill] sm:$0xff]  ;;  %v20223_v18 = vld [vmem:[#allocation216_spill] sm:$0xff]  ;;  %v20226_v24 = vld [vmem:[#allocation209_spill] sm:$0xff] }
 0x561   : > { %9495 = vmatmul.mubr.bf16.gmra.mrb[144].mxu0 %v20177_v33  ;;  %v20203_v60 = vpack.c.bf16 %v20201_v25, %v20202_v21  ;;  %v20204_v33 = vld [vmem:[#allocation35_spill] sm:$0xff]  ;;  %v20225_v31 = vld [vmem:[#allocation44_spill] sm:$0xff]  ;;  %v20228_v25 = vpack.c.bf16 %v16538_v54, %v16530_v53  ;;  %v20229_v21 = vpack.c.bf16 %v16550_v51, %v16544_v45  ;;  %v20241_v53 = vld [vmem:[#allocation153_spill] sm:$0xff] }
 0x562   : > { %9656 = vmatmul.mubr.bf16.gmra.mrb[144].mxu1 %v20180_v0  ;;  %9502 = vmatprep.mubr.bf16.mxu0 %v20182_v11  ;;  %v20206_v35 = vpack.c.bf16 %v20204_v33, %v20205_v19  ;;  %v20207_v0 = vld [vmem:[#allocation157_spill] sm:$0xff]  ;;  %v20232_v19 = vld [vmem:[#allocation43_spill] sm:$0xff] }
 0x563   : > { %9663 = vmatprep.mubr.bf16.mxu1 %v20185_v10  ;;  %v20209_v11 = vpack.c.bf16 %v20207_v0, %v20208_v20  ;;  %v20212_v10 = vpack.c.bf16 %v20210_v36, %v20211_v5  ;;  %v20235_v20 = vld [vmem:[#allocation204_spill] sm:$0xff]  ;;  %v12519_v51 = vld [vmem:[#allocation8] sm:$0xff] }
 0x564   : > { %v20238_v5 = vld [vmem:[#allocation228_spill] sm:$0xff] }
 0x569   : > { %9503 = vmatmul.mubr.bf16.gmra.mrb[148].mxu0 %v20188_v48  ;;  %v20215_v48 = vpack.c.bf16 %v20213_v59, %v20214_v1  ;;  %v20242_v59 = vld [vmem:[#allocation207_spill] sm:$0xff] }
 0x56a   : > { %9664 = vmatmul.mubr.bf16.gmra.mrb[148].mxu1 %v20191_v55  ;;  %9510 = vmatprep.mubr.bf16.mxu0 %v20194_v44  ;;  %v20218_v55 = vpack.c.bf16 %v20216_v12, %v20217_v46  ;;  %v20221_v44 = vpack.c.bf16 %v20219_v58, %v20220_v29  ;;  %v20243_v45 = vpack.c.bf16 %v20241_v53, %v20242_v59  ;;  %v20244_v1 = vld [vmem:[#allocation19_spill] sm:$0xff]  ;;  %v20246_v12 = vld [vmem:[#allocation213_spill] sm:$0xff] }
 0x56b   : > { %9671 = vmatprep.mubr.bf16.mxu1 %v20197_v39  ;;  %v20224_v39 = vpack.c.bf16 %v20222_v2, %v20223_v18  ;;  %v20247_v46 = vpack.c.bf16 %v16651_v7, %v20246_v12  ;;  %v20249_v58 = vsub.s32 6, %v20244_v1  ;;  %v20251_v2 = vsub.s32 5, %v20244_v1 }
 0x56c   : > { %v20255_v53 = vpack.c.bf16 %v16750_v30, %v16740_v34 }
 0x56d   : > { %v17256_v29 = vrot.slane %v12519_v51, %v20249_v58  ;;  %v17263_v18 = vrot.slane %v12519_v51, %v20251_v2 }
 0x571   : > { %9511 = vmatmul.mubr.bf16.gmra.mrb[152].mxu0 %v20200_v50  ;;  %v20227_v50 = vpack.c.bf16 %v20225_v31, %v20226_v24 }
 0x572   : > { %9672 = vmatmul.mubr.bf16.gmra.mrb[152].mxu1 %v20203_v60  ;;  %9518 = vmatprep.mubr.bf16.mxu0 %v20206_v35  ;;  %v20230_v60 = vld [vmem:[#allocation206_spill] sm:$0xff]  ;;  %v20233_v35 = vld [vmem:[#allocation56_spill] sm:$0xff] }
 0x573   : > { %9679 = vmatprep.mubr.bf16.mxu1 %v20209_v11  ;;  %v20231_v33 = vpack.c.bf16 %v16568_v27, %v20230_v60  ;;  %v20234_v0 = vpack.c.bf16 %v20232_v19, %v20233_v35  ;;  %v20236_v11 = vld [vmem:[#allocation258_spill] sm:$0xff]  ;;  %v20245_v27 = vsub.s32 4, %v20244_v1 }
 0x574   : > { %v20237_v36 = vpack.c.bf16 %v20235_v20, %v20236_v11  ;;  %v20253_v20 = vpack.c.bf16 %v16716_v37, %v16710_v17  ;;  %v20256_v37 = vld [vmem:[#allocation154_spill] sm:$0xff] }
 0x579   : > { %9519 = vmatmul.mubr.bf16.gmra.mrb[156].mxu0 %v20212_v10  ;;  %v20239_v10 = vld [vmem:[#allocation223_spill] sm:$0xff] }
 0x57a   : > { %9680 = vmatmul.mubr.bf16.gmra.mrb[156].mxu1 %v20215_v48  ;;  %9526 = vmatprep.mubr.bf16.mxu0 %v20218_v55  ;;  %v20240_v54 = vpack.c.bf16 %v20238_v5, %v20239_v10  ;;  %v17246_v48 = vrot.slane %v12519_v51, %v20245_v27  ;;  %v20248_v55 = vpack.c.bf16 %v16657_v3, %v16676_v16  ;;  %v20252_v3 = vsub.s32 7, %v20244_v1 }
 0x57b   : > { %9687 = vmatprep.mubr.bf16.mxu1 %v20221_v44  ;;  %v20250_v44 = vpack.c.bf16 %v16704_v26, %v16696_v47 }
 0x57c   : > { %v17268_v16 = vrot.slane %v12519_v51, %v20252_v3  ;;  %v20257_v51 = vpack.c.bf16 %v16762_v4, %v20256_v37 }
 0x581   : > { %9527 = vmatmul.mubr.bf16.gmra.mrb[160].mxu0 %v20224_v39 }
 0x582   : > { %9688 = vmatmul.mubr.bf16.gmra.mrb[160].mxu1 %v20227_v50  ;;  %9534 = vmatprep.mubr.bf16.mxu0 %v20228_v25 }
 0x583   : > { %9695 = vmatprep.mubr.bf16.mxu1 %v20229_v21 }
 0x589   : > { %9535 = vmatmul.mubr.bf16.gmra.mrb[164].mxu0 %v20231_v33 }
 0x58a   : > { %9696 = vmatmul.mubr.bf16.gmra.mrb[164].mxu1 %v20234_v0  ;;  %9542 = vmatprep.mubr.bf16.mxu0 %v20237_v36 }
 0x58b   : > { %9703 = vmatprep.mubr.bf16.mxu1 %v20240_v54  ;;  %v20254_v54 = vpack.c.bf16 %v16734_v8, %v16722_v14 }
 0x591   : > { %9543 = vmatmul.mubr.bf16.gmra.mrb[168].mxu0 %v20243_v45 }
 0x592   : > { %9704 = vmatmul.mubr.bf16.gmra.mrb[168].mxu1 %v20247_v46  ;;  %9550 = vmatprep.mubr.bf16.mxu0 %v20248_v55 }
 0x593   : > { %9711 = vmatprep.mubr.bf16.mxu1 %v20250_v44 }
 0x594   : > { %v7084_v39 = vpop.f32.mrb[64].mxu0 }
 0x595   : > { %v11436_v7 = vadd.f32 %v7084_v39, %v17246_v48  ;;  %v7856_v31 = vpop.f32.mrb[64].mxu1  ;;  %v7086_v24 = vpop.f32.mrb[65].mxu0 }
 0x596   : > { %v11500_v50 = vadd.f32 %v7856_v31, %v17256_v29  ;;  %v7858_v25 = vpop.f32.mrb[65].mxu1  ;;  %v7088_v21 = vpop.f32.mrb[66].mxu0  ;;  %v11437_v47 = vadd.f32 %v7086_v24, %v17263_v18 }
 0x597   : > { %v8275_v60 = vmul.f32 0.01, %v11436_v7  ;;  %v11438_v26 = vadd.f32 %v7088_v21, %v17246_v48  ;;  %v7860_v33 = vpop.f32.mrb[66].mxu1  ;;  %v7090_v19 = vpop.f32.mrb[67].mxu0  ;;  %vm8019_vm8 = vcmp.gt.f32.partialorder %v11436_v7, 0.0  ;;  %v11501_v35 = vadd.f32 %v7858_v25, %v17268_v16  ;;  %v20258_v21 = vld [vmem:[#allocation220_spill] sm:$0xff] }
 0x598   : > { %v7862_v0 = vpop.f32.mrb[67].mxu1  ;;  %v8277_v11 = vmul.f32 0.01, %v11500_v50  ;;  %v11502_v5 = vadd.f32 %v7860_v33, %v17256_v29  ;;  %v11439_v10 = vadd.f32 %v7090_v19, %v17263_v18  ;;  %vm8021_vm12 = vcmp.gt.f32.partialorder %v11500_v50, 0.0 }
 0x599   : > { %vm8027_vm11 = vcmp.gt.f32.partialorder %v11438_v26, 0.0  ;;  %9551 = vmatmul.mubr.bf16.gmra.mrb[172].mxu0 %v20253_v20  ;;  %v8283_v36 = vmul.f32 0.01, %v11438_v26  ;;  %v17285_v59 = vsel %vm8019_vm8, %v11436_v7, %v8275_v60  ;;  %v8276_v45 = vmul.f32 0.01, %v11437_v47 }
 0x59a   : > { %9712 = vmatmul.mubr.bf16.gmra.mrb[172].mxu1 %v20254_v54  ;;  %9558 = vmatprep.mubr.bf16.mxu0 %v20255_v53  ;;  %v11503_v17 = vadd.f32 %v7862_v0, %v17268_v16  ;;  %vm8029_vm9 = vcmp.gt.f32.partialorder %v11502_v5, 0.0  ;;  %v8285_v27 = vmul.f32 0.01, %v11502_v5  ;;  %vm8028_vm13 = vcmp.gt.f32.partialorder %v11439_v10, 0.0 }
 0x59b   : > { %9719 = vmatprep.mubr.bf16.mxu1 %v20257_v51  ;;  %v17291_v1 = vsel %vm8027_vm11, %v11438_v26, %v8283_v36  ;;  %vm8020_vm3 = vcmp.gt.f32.partialorder %v11437_v47, 0.0  ;;  %v8278_v8 = vmul.f32 0.01, %v11501_v35  ;;  %v8284_v34 = vmul.f32 0.01, %v11439_v10 }
 0x59c   : > { %v7094_v14 = vpop.f32.mrb[68].mxu0  ;;  %v8787_v30 = vpack.c.bf16 %v17291_v1, %v17285_v59  ;;  %v17295_v46 = vsel %vm8021_vm12, %v11500_v50, %v8277_v11  ;;  %vm8022_vm15 = vcmp.gt.f32.partialorder %v11501_v35, 0.0  ;;  %v17297_v55 = vsel %vm8029_vm9, %v11502_v5, %v8285_v27  ;;  %v20261_v5 = vld [vmem:[#allocation225_spill] sm:$0xff] }
 0x59d   : > { %v7866_v12 = vpop.f32.mrb[68].mxu1  ;;  %v8286_v4 = vmul.f32 0.01, %v11503_v17  ;;  %v7096_v58 = vpop.f32.mrb[69].mxu0  ;;  %v8789_v2 = vpack.c.bf16 %v17297_v55, %v17295_v46  ;;  %v17304_v3 = vsel %vm8028_vm13, %v11439_v10, %v8284_v34  ;;  %vm8030_vm7 = vcmp.gt.f32.partialorder %v11503_v17, 0.0 }
 0x59e   : > { %v7868_v44 = vpop.f32.mrb[69].mxu1  ;;  %v11441_v39 = vadd.f32 %v7096_v58, %v17263_v18  ;;  %v7098_v31 = vpop.f32.mrb[70].mxu0  ;;  %v11440_v50 = vadd.f32 %v7094_v14, %v17246_v48  ;;  %v11504_v25 = vadd.f32 %v7866_v12, %v17256_v29  ;;  %v20259_v60 = vpack.c.bf16 %v16778_v42, %v20258_v21 }
 0x59f   : > { %v11505_v7 = vadd.f32 %v7868_v44, %v17268_v16  ;;  %v7870_v24 = vpop.f32.mrb[70].mxu1  ;;  %v17312_v26 = vsel %vm8020_vm3, %v11437_v47, %v8276_v45  ;;  %v17315_v33 = vsel %vm8022_vm15, %v11501_v35, %v8278_v8  ;;  %v11442_v0 = vadd.f32 %v7098_v31, %v17246_v48  ;;  %v7100_v20 = vpop.f32.mrb[71].mxu0 }
 0x5a0   : > { %vm8036_vm1 = vcmp.gt.f32.partialorder %v11441_v39, 0.0  ;;  %v8292_v19 = vmul.f32 0.01, %v11441_v39  ;;  %v7872_v11 = vpop.f32.mrb[71].mxu1  ;;  %v20260_v36 = vpack.c.bf16 %v16795_v63, %v16789_v61  ;;  %v20262_v42 = vpack.c.bf16 %v16810_v43, %v20261_v5 }
 0x5a1   : > { %9559 = vmatmul.mubr.bf16.gmra.mrb[176].mxu0 %v20259_v60  ;;  %v8788_v47 = vpack.c.bf16 %v17304_v3, %v17312_v26  ;;  %v8294_v10 = vmul.f32 0.01, %v11505_v7  ;;  %v11443_v35 = vadd.f32 %v7100_v20, %v17263_v18  ;;  %v11507_v54 = vadd.f32 %v7872_v11, %v17268_v16 }
 0x5a2   : > { %9720 = vmatmul.mubr.bf16.gmra.mrb[176].mxu1 %v20260_v36  ;;  %9566 = vmatprep.mubr.bf16.mxu0 %v20262_v42  ;;  %v20263_v53 = vpack.c.bf16 %v16816_v22, %v16828_v40  ;;  %v17332_v45 = vsel %vm8030_vm7, %v11503_v17, %v8286_v4  ;;  %vm8038_vm14 = vcmp.gt.f32.partialorder %v11505_v7, 0.0  ;;  %vm8043_vm10 = vcmp.gt.f32.partialorder %v11442_v0, 0.0 }
 0x5a3   : > { %v8299_v61 = vmul.f32 0.01, %v11442_v0  ;;  %v11506_v63 = vadd.f32 %v7870_v24, %v17256_v29  ;;  %vm8044_vm4 = vcmp.gt.f32.partialorder %v11443_v35, 0.0  ;;  %v8300_v43 = vmul.f32 0.01, %v11443_v35 }
 0x5a4   : > { %9727 = vmatprep.mubr.bf16.mxu1 %v20263_v53  ;;  %vm8046_vm6 = vcmp.gt.f32.partialorder %v11507_v54, 0.0  ;;  %v8302_v37 = vmul.f32 0.01, %v11507_v54  ;;  %vm8035_vm5 = vcmp.gt.f32.partialorder %v11440_v50, 0.0  ;;  %v8291_v51 = vmul.f32 0.01, %v11440_v50 }
 0x5a5   : > { %v7104_v27 = vpop.f32.mrb[72].mxu0  ;;  %v7876_v14 = vpop.f32.mrb[72].mxu1  ;;  %v8790_v22 = vpack.c.bf16 %v17332_v45, %v17315_v33  ;;  %v17338_v17 = vsel %vm8036_vm1, %v11441_v39, %v8292_v19  ;;  %v17340_v34 = vsel %vm8044_vm4, %v11443_v35, %v8300_v43  ;;  %v17343_v12 = vsel %vm8038_vm14, %v11505_v7, %v8294_v10 }
 0x5a6   : > { %v7106_v40 = vpop.f32.mrb[73].mxu0  ;;  %v7878_v8 = vpop.f32.mrb[73].mxu1  ;;  %v17345_v4 = vsel %vm8046_vm6, %v11507_v54, %v8302_v37  ;;  %v8301_v58 = vmul.f32 0.01, %v11506_v63  ;;  %v8796_v24 = vpack.c.bf16 %v17340_v34, %v17338_v17  ;;  %v17352_v60 = vsel %vm8043_vm10, %v11442_v0, %v8299_v61 }
 0x5a7   : > { %v7108_v44 = vpop.f32.mrb[74].mxu0  ;;  %v7880_v31 = vpop.f32.mrb[74].mxu1  ;;  %v8798_v21 = vpack.c.bf16 %v17345_v4, %v17343_v12  ;;  %v8293_v39 = vmul.f32 0.01, %v11504_v25  ;;  %vm8045_vm2 = vcmp.gt.f32.partialorder %v11506_v63, 0.0  ;;  %v20264_v7 = vpack.c.bf16 %v16845_v6, %v16839_v38 }
 0x5a8   : > { %vm8037_vm0 = vcmp.gt.f32.partialorder %v11504_v25, 0.0  ;;  %v20265_v19 = vpack.c.bf16 %v16857_v57, %v16851_v23  ;;  %v20266_v20 = vpack.c.bf16 %v16873_v28, %v16863_v32  ;;  %v17364_v11 = vsel %vm8035_vm5, %v11440_v50, %v8291_v51  ;;  %v7110_v5 = vpop.f32.mrb[75].mxu0  ;;  %v7882_v42 = vpop.f32.mrb[75].mxu1 }
 0x5a9   : > { %9567 = vmatmul.mubr.bf16.gmra.mrb[180].mxu0 %v20264_v7  ;;  %v11445_v0 = vadd.f32 %v7106_v40, %v17263_v18  ;;  %v11509_v36 = vadd.f32 %v7878_v8, %v17268_v16  ;;  %v20267_v38 = vpack.c.bf16 %v16887_v13, %v16879_v52  ;;  %v8795_v57 = vpack.c.bf16 %v17352_v60, %v17364_v11 }
 0x5aa   : > { %9728 = vmatmul.mubr.bf16.gmra.mrb[180].mxu1 %v20265_v19  ;;  %9574 = vmatprep.mubr.bf16.mxu0 %v20266_v20  ;;  %v11447_v6 = vadd.f32 %v7110_v5, %v17263_v18  ;;  %v11511_v23 = vadd.f32 %v7882_v42, %v17268_v16  ;;  %v17377_v28 = vsel %vm8045_vm2, %v11506_v63, %v8301_v58  ;;  %v20270_v19 = vld [vmem:[#allocation214_spill] sm:$0xff] }
 0x5ab   : > { %9735 = vmatprep.mubr.bf16.mxu1 %v20267_v38  ;;  %v11444_v50 = vadd.f32 %v7104_v27, %v17246_v48  ;;  %v11446_v10 = vadd.f32 %v7108_v44, %v17246_v48  ;;  %v17382_v35 = vsel %vm8037_vm0, %v11504_v25, %v8293_v39  ;;  %v11508_v54 = vadd.f32 %v7876_v14, %v17256_v29 }
 0x5ac   : > { %v17375_v32 = vpop.f32.mrb[76].mxu0  ;;  %vm8060_vm8 = vcmp.gt.f32.partialorder %v11447_v6, 0.0  ;;  %v8316_v52 = vmul.f32 0.01, %v11447_v6  ;;  %vm8062_vm11 = vcmp.gt.f32.partialorder %v11511_v23, 0.0  ;;  %v8797_v63 = vpack.c.bf16 %v17377_v28, %v17382_v35 }
 0x5ad   : > { %v8318_v13 = vmul.f32 0.01, %v11511_v23  ;;  %v8308_v53 = vmul.f32 0.01, %v11445_v0  ;;  %v8310_v61 = vmul.f32 0.01, %v11509_v36  ;;  %v11510_v51 = vadd.f32 %v7880_v31, %v17256_v29 }
 0x5ae   : > { %v7886_v43 = vpop.f32.mrb[76].mxu1  ;;  %v7116_v37 = vpop.f32.mrb[77].mxu0  ;;  %vm8052_vm12 = vcmp.gt.f32.partialorder %v11445_v0, 0.0  ;;  %vm8054_vm9 = vcmp.gt.f32.partialorder %v11509_v36, 0.0  ;;  %v8315_v40 = vmul.f32 0.01, %v11446_v10  ;;  %v20268_v44 = vpack.c.bf16 %v16899_v41, %v16893_v56 }
 0x5af   : > { %v7888_v27 = vpop.f32.mrb[77].mxu1  ;;  %v7118_v25 = vpop.f32.mrb[78].mxu0  ;;  %v17392_v14 = vsel %vm8060_vm8, %v11447_v6, %v8316_v52  ;;  %v17395_v39 = vsel %vm8062_vm11, %v11511_v23, %v8318_v13  ;;  %vm8051_vm13 = vcmp.gt.f32.partialorder %v11444_v50, 0.0  ;;  %v8307_v7 = vmul.f32 0.01, %v11444_v50  ;;  %v20272_v41 = vld [vmem:[#allocation210_spill] sm:$0xff] }
 0x5b0   : > { %v7890_v8 = vpop.f32.mrb[78].mxu1  ;;  %v7120_v58 = vpop.f32.mrb[79].mxu0  ;;  %vm8059_vm3 = vcmp.gt.f32.partialorder %v11446_v10, 0.0  ;;  %v20269_v31 = vpack.c.bf16 %v16915_v49, %v16909_v62  ;;  %v20271_v20 = vpack.c.bf16 %v16928_v9, %v20270_v19  ;;  %v8309_v5 = vmul.f32 0.01, %v11508_v54  ;;  %v20275_v13 = vld [vmem:[#allocation221_spill] sm:$0xff] }
 0x5b1   : > { %9575 = vmatmul.mubr.bf16.gmra.mrb[184].mxu0 %v20268_v44  ;;  %v11449_v56 = vadd.f32 %v7116_v37, %v17263_v18  ;;  %v20273_v42 = vpack.c.bf16 %v16942_v15, %v20272_v41  ;;  %v17408_v38 = vsel %vm8052_vm12, %v11445_v0, %v8308_v53  ;;  %v17411_v6 = vsel %vm8054_vm9, %v11509_v36, %v8310_v61  ;;  %v7892_v49 = vpop.f32.mrb[79].mxu1  ;;  %v20277_v9 = vld [vmem:[#allocation211_spill] sm:$0xff]  ;;  %v20278_v41 = vld [vmem:[#allocation244_spill] sm:$0xff] }
 0x5b2   : > { %9736 = vmatmul.mubr.bf16.gmra.mrb[184].mxu1 %v20269_v31  ;;  %9582 = vmatprep.mubr.bf16.mxu0 %v20271_v20  ;;  %v8317_v23 = vmul.f32 0.01, %v11510_v51  ;;  %v11451_v62 = vadd.f32 %v7120_v58, %v17263_v18  ;;  %vm8053_vm15 = vcmp.gt.f32.partialorder %v11508_v54, 0.0  ;;  %vm8061_vm7 = vcmp.gt.f32.partialorder %v11510_v51, 0.0 }
 0x5b3   : > { %9743 = vmatprep.mubr.bf16.mxu1 %v20273_v42  ;;  %v11515_v15 = vadd.f32 %v7892_v49, %v17268_v16  ;;  %v17424_v53 = vsel %vm8059_vm3, %v11446_v10, %v8315_v40  ;;  %v8324_v61 = vmul.f32 0.01, %v11449_v56  ;;  %v11513_v37 = vadd.f32 %v7888_v27, %v17268_v16 }
 0x5b4   : > { %v17414_v52 = vpop.f32.mrb[80].mxu0  ;;  %v11450_v58 = vadd.f32 %v7118_v25, %v17246_v48  ;;  %v17429_v44 = vsel %vm8051_vm13, %v11444_v50, %v8307_v7  ;;  %v8332_v31 = vmul.f32 0.01, %v11451_v62  ;;  %v17433_v42 = vsel %vm8053_vm15, %v11508_v54, %v8309_v5  ;;  %v20274_v25 = vld [vmem:[#allocation226_spill] sm:$0xff] }
 0x5b5   : > { %v17421_v0 = vpop.f32.mrb[80].mxu1  ;;  %v7126_v36 = vpop.f32.mrb[81].mxu0  ;;  %v17435_v49 = vsel %vm8061_vm7, %v11510_v51, %v8317_v23  ;;  %vm8068_vm1 = vcmp.gt.f32.partialorder %v11449_v56, 0.0  ;;  %vm8076_vm14 = vcmp.gt.f32.partialorder %v11451_v62, 0.0  ;;  %v8334_v10 = vmul.f32 0.01, %v11515_v15 }
 0x5b6   : > { %v7898_v19 = vpop.f32.mrb[81].mxu1  ;;  %v7128_v20 = vpop.f32.mrb[82].mxu0  ;;  %v20276_v50 = vpack.c.bf16 %v20274_v25, %v20275_v13  ;;  %v8805_v7 = vpack.c.bf16 %v17435_v49, %v17433_v42  ;;  %vm8078_vm10 = vcmp.gt.f32.partialorder %v11515_v15, 0.0  ;;  %v20279_v54 = vpack.c.bf16 %v20277_v9, %v20278_v41 }
 0x5b7   : > { %v17437_v40 = vpop.f32.mrb[82].mxu1  ;;  %v7130_v27 = vpop.f32.mrb[83].mxu0  ;;  %v11448_v51 = vadd.f32 %v17375_v32, %v17246_v48  ;;  %v11512_v5 = vadd.f32 %v7886_v43, %v17256_v29  ;;  %v8326_v23 = vmul.f32 0.01, %v11513_v37  ;;  %vm8070_vm4 = vcmp.gt.f32.partialorder %v11513_v37, 0.0 }
 0x5b8   : > { %v11514_v13 = vadd.f32 %v7890_v8, %v17256_v29  ;;  %v7902_v25 = vpop.f32.mrb[83].mxu1  ;;  %v17460_v41 = vsel %vm8068_vm1, %v11449_v56, %v8324_v61  ;;  %v17463_v3 = vsel %vm8076_vm14, %v11451_v62, %v8332_v31  ;;  %v8331_v26 = vmul.f32 0.01, %v11450_v58 }
 0x5b9   : > { %9583 = vmatmul.mubr.bf16.gmra.mrb[188].mxu0 %v20276_v50  ;;  %v8812_v33 = vpack.c.bf16 %v17463_v3, %v17460_v41  ;;  %v17470_v45 = vsel %vm8078_vm10, %v11515_v15, %v8334_v10  ;;  %vm8075_vm6 = vcmp.gt.f32.partialorder %v11450_v58, 0.0  ;;  %vm8067_vm5 = vcmp.gt.f32.partialorder %v11448_v51, 0.0 }
 0x5ba   : > { %9744 = vmatmul.mubr.bf16.gmra.mrb[188].mxu1 %v20279_v54  ;;  %9784 = vmatprep.mubr.bf16.mxu0 %v8788_v47  ;;  %v11453_v43 = vadd.f32 %v7126_v36, %v17263_v18  ;;  %v17473_v8 = vsel %vm8070_vm4, %v11513_v37, %v8326_v23  ;;  %v8325_v56 = vmul.f32 0.01, %v11512_v5  ;;  %v8333_v62 = vmul.f32 0.01, %v11514_v13 }
 0x5bb   : > { %9945 = vmatprep.mubr.bf16.mxu1 %v8790_v22  ;;  %v8323_v22 = vmul.f32 0.01, %v11448_v51  ;;  %v11455_v61 = vadd.f32 %v7130_v27, %v17263_v18  ;;  %v8814_v54 = vpack.c.bf16 %v17470_v45, %v17473_v8  ;;  %vm8069_vm2 = vcmp.gt.f32.partialorder %v11512_v5, 0.0 }
 0x5bc   : > { %v17457_v9 = vpop.f32.mrb[84].mxu0  ;;  %vm8077_vm0 = vcmp.gt.f32.partialorder %v11514_v13, 0.0  ;;  %v11519_v15 = vadd.f32 %v7902_v25, %v17268_v16  ;;  %v17489_v37 = vsel %vm8075_vm6, %v11450_v58, %v8331_v26  ;;  %v8340_v27 = vmul.f32 0.01, %v11453_v43 }
 0x5bd   : > { %v17465_v47 = vpop.f32.mrb[84].mxu1  ;;  %v7136_v32 = vpop.f32.mrb[85].mxu0  ;;  %v11517_v23 = vadd.f32 %v7898_v19, %v17268_v16  ;;  %v11454_v25 = vadd.f32 %v7128_v20, %v17246_v48  ;;  %v17503_v59 = vsel %vm8067_vm5, %v11448_v51, %v8323_v22  ;;  %v8348_v1 = vmul.f32 0.01, %v11455_v61 }
 0x5be   : > { %v17476_v31 = vpop.f32.mrb[85].mxu1  ;;  %v17478_v50 = vpop.f32.mrb[86].mxu0  ;;  %v8811_v55 = vpack.c.bf16 %v17489_v37, %v17503_v59  ;;  %v17513_v17 = vsel %vm8077_vm0, %v11514_v13, %v8333_v62  ;;  %vm8084_vm8 = vcmp.gt.f32.partialorder %v11453_v43, 0.0  ;;  %vm8092_vm11 = vcmp.gt.f32.partialorder %v11455_v61, 0.0 }
 0x5bf   : > { %v17483_v10 = vpop.f32.mrb[86].mxu1  ;;  %v7140_v36 = vpop.f32.mrb[87].mxu0  ;;  %v8350_v34 = vmul.f32 0.01, %v11519_v15  ;;  %vm8094_vm12 = vcmp.gt.f32.partialorder %v11519_v15, 0.0  ;;  %v11516_v58 = vadd.f32 %v17421_v0, %v17256_v29  ;;  %vm8086_vm9 = vcmp.gt.f32.partialorder %v11517_v23, 0.0 }
 0x5c0   : > { %v8342_v19 = vmul.f32 0.01, %v11517_v23  ;;  %v11518_v20 = vadd.f32 %v17437_v40, %v17256_v29  ;;  %v17531_v13 = vsel %vm8084_vm8, %v11453_v43, %v8340_v27  ;;  %v17533_v26 = vsel %vm8092_vm11, %v11455_v61, %v8348_v1 }
 0x5c1   : > { %9785 = vmatmul.mubr.bf16.vlgmr.msra.gmra.mrb[192].mxu0 %v8787_v30  ;;  %v7912_v30 = vpop.f32.mrb[87].mxu1  ;;  %v8347_v22 = vmul.f32 0.01, %v11454_v25  ;;  %v8820_v0 = vpack.c.bf16 %v17533_v26, %v17531_v13  ;;  %v17544_v40 = vsel %vm8094_vm12, %v11519_v15, %v8350_v34  ;;  %vm8091_vm13 = vcmp.gt.f32.partialorder %v11454_v25, 0.0 }
 0x5c2   : > { %9946 = vmatmul.mubr.bf16.vlgmr.msra.gmra.mrb[192].mxu1 %v8789_v2  ;;  %9792 = vmatprep.mubr.bf16.mxu0 %v8796_v24  ;;  %v17510_v2 = vsel %vm8069_vm2, %v11512_v5, %v8325_v56  ;;  %v20280_v43 = vpack.c.bf16 %v17392_v14, %v17408_v38  ;;  %v11457_v61 = vadd.f32 %v7136_v32, %v17263_v18  ;;  %v8349_v15 = vmul.f32 0.01, %v11518_v20 }
 0x5c3   : > { %9953 = vmatprep.mubr.bf16.mxu1 %v8798_v21  ;;  %v8813_v24 = vpack.c.bf16 %v17513_v17, %v17510_v2  ;;  %v11452_v21 = vadd.f32 %v17414_v52, %v17246_v48  ;;  %v20281_v60 = vpack.c.bf16 %v17395_v39, %v17411_v6  ;;  %v17557_v11 = vsel %vm8086_vm9, %v11517_v23, %v8342_v19 }
 0x5c4   : > { %v17505_v46 = vpop.f32.mrb[88].mxu0  ;;  %v11459_v28 = vadd.f32 %v7140_v36, %v17263_v18  ;;  %v8822_v14 = vpack.c.bf16 %v17544_v40, %v17557_v11  ;;  %vm8085_vm15 = vcmp.gt.f32.partialorder %v11516_v58, 0.0  ;;  %vm8093_vm7 = vcmp.gt.f32.partialorder %v11518_v20, 0.0 }
 0x5c5   : > { %v17515_v12 = vpop.f32.mrb[88].mxu1  ;;  %v17517_v4 = vpop.f32.mrb[89].mxu0  ;;  %vm8083_vm3 = vcmp.gt.f32.partialorder %v11452_v21, 0.0  ;;  %v8339_v62 = vmul.f32 0.01, %v11452_v21  ;;  %v11523_v38 = vadd.f32 %v7912_v30, %v17268_v16  ;;  %v17570_v6 = vsel %vm8091_vm13, %v11454_v25, %v8347_v22 }
 0x5c6   : > { %v17527_v51 = vpop.f32.mrb[89].mxu1  ;;  %v17529_v5 = vpop.f32.mrb[90].mxu0  ;;  %v8356_v27 = vmul.f32 0.01, %v11457_v61  ;;  %v11521_v36 = vadd.f32 %v17476_v31, %v17268_v16  ;;  %v11458_v23 = vadd.f32 %v17478_v50, %v17246_v48  ;;  %v8364_v34 = vmul.f32 0.01, %v11459_v28 }
 0x5c7   : > { %v17535_v56 = vpop.f32.mrb[90].mxu1  ;;  %v17537_v52 = vpop.f32.mrb[91].mxu0  ;;  %v17577_v1 = vsel %vm8083_vm3, %v11452_v21, %v8339_v62  ;;  %v17587_v22 = vsel %vm8093_vm7, %v11518_v20, %v8349_v15  ;;  %vm8100_vm1 = vcmp.gt.f32.partialorder %v11457_v61, 0.0  ;;  %vm8108_vm14 = vcmp.gt.f32.partialorder %v11459_v28, 0.0 }
 0x5c8   : > { %v7922_v35 = vpop.f32.mrb[91].mxu1  ;;  %v8366_v31 = vmul.f32 0.01, %v11523_v38  ;;  %v20282_v21 = vpack.c.bf16 %v17424_v53, %v17429_v44  ;;  %vm8110_vm10 = vcmp.gt.f32.partialorder %v11523_v38, 0.0  ;;  %v11520_v20 = vadd.f32 %v17465_v47, %v17256_v29 }
 0x5c9   : > { %9793 = vmatmul.mubr.bf16.gmra.mrb[196].mxu0 %v8795_v57  ;;  %v8341_v57 = vmul.f32 0.01, %v11516_v58  ;;  %v8358_v53 = vmul.f32 0.01, %v11521_v36  ;;  %vm8102_vm4 = vcmp.gt.f32.partialorder %v11521_v36, 0.0  ;;  %v11522_v44 = vadd.f32 %v17483_v10, %v17256_v29 }
 0x5ca   : > { %9954 = vmatmul.mubr.bf16.gmra.mrb[196].mxu1 %v8797_v63  ;;  %9800 = vmatprep.mubr.bf16.mxu0 %v20280_v43  ;;  %v8819_v43 = vpack.c.bf16 %v17570_v6, %v17577_v1  ;;  %v8363_v41 = vmul.f32 0.01, %v11458_v23  ;;  %v17630_v45 = vsel %vm8110_vm10, %v11523_v38, %v8366_v31  ;;  %vm8107_vm6 = vcmp.gt.f32.partialorder %v11458_v23, 0.0 }
 0x5cb   : > { %9961 = vmatprep.mubr.bf16.mxu1 %v20281_v60  ;;  %v17585_v25 = vsel %vm8085_vm15, %v11516_v58, %v8341_v57  ;;  %v11456_v58 = vadd.f32 %v17457_v9, %v17246_v48  ;;  %v17621_v9 = vsel %vm8108_vm14, %v11459_v28, %v8364_v34  ;;  %v17634_v10 = vsel %vm8102_vm4, %v11521_v36, %v8358_v53 }
 0x5cc   : > { %v17560_v63 = vpop.f32.mrb[92].mxu0  ;;  %v8821_v62 = vpack.c.bf16 %v17587_v22, %v17585_v25  ;;  %v8365_v57 = vmul.f32 0.01, %v11522_v44  ;;  %v11463_v15 = vadd.f32 %v17537_v52, %v17263_v18  ;;  %v8830_v38 = vpack.c.bf16 %v17630_v45, %v17634_v10 }
 0x5cd   : > { %v17565_v32 = vpop.f32.mrb[92].mxu1  ;;  %v17567_v39 = vpop.f32.mrb[93].mxu0  ;;  %vm8099_vm5 = vcmp.gt.f32.partialorder %v11456_v58, 0.0  ;;  %v8355_v8 = vmul.f32 0.01, %v11456_v58  ;;  %vm8101_vm2 = vcmp.gt.f32.partialorder %v11520_v20, 0.0  ;;  %v11527_v34 = vadd.f32 %v7922_v35, %v17268_v16 }
 0x5ce   : > { %v17579_v19 = vpop.f32.mrb[93].mxu1  ;;  %v17581_v30 = vpop.f32.mrb[94].mxu0  ;;  %vm8109_vm0 = vcmp.gt.f32.partialorder %v11522_v44, 0.0  ;;  %v17653_v52 = vsel %vm8107_vm6, %v11458_v23, %v8363_v41  ;;  %v17657_v36 = vadd.f32 %v17505_v46, %v17246_v48  ;;  %v11525_v37 = vadd.f32 %v17527_v51, %v17268_v16 }
 0x5cf   : > { %v17589_v60 = vpop.f32.mrb[94].mxu1  ;;  %v17591_v50 = vpop.f32.mrb[95].mxu0  ;;  %v11462_v59 = vadd.f32 %v17529_v5, %v17246_v48  ;;  %v17673_v46 = vsel %vm8099_vm5, %v11456_v58, %v8355_v8  ;;  %v17685_v5 = vsel %vm8109_vm0, %v11522_v44, %v8365_v57  ;;  %vm8124_vm11 = vcmp.gt.f32.partialorder %v11463_v15, 0.0 }
 0x5d0   : > { %v17613_v42 = vpop.f32.mrb[95].mxu1  ;;  %v8382_v13 = vmul.f32 0.01, %v11527_v34  ;;  %vm8115_vm12 = vcmp.gt.f32.partialorder %v17657_v36, 0.0  ;;  %v11524_v11 = vadd.f32 %v17515_v12, %v17256_v29  ;;  %vm8126_vm9 = vcmp.gt.f32.partialorder %v11527_v34, 0.0 }
 0x5d1   : > { %9801 = vmatmul.mubr.bf16.gmra.mrb[200].mxu0 %v20282_v21  ;;  %vm8118_vm13 = vcmp.gt.f32.partialorder %v11525_v37, 0.0  ;;  %v8374_v23 = vmul.f32 0.01, %v11525_v37  ;;  %v11526_v21 = vadd.f32 %v17535_v56, %v17256_v29  ;;  %v8379_v58 = vmul.f32 0.01, %v11462_v59 }
 0x5d2   : > { %9962 = vmatmul.mubr.bf16.gmra.mrb[200].mxu1 %v8805_v7  ;;  %9808 = vmatprep.mubr.bf16.mxu0 %v8812_v33  ;;  %v17618_v7 = vsel %vm8100_vm1, %v11457_v61, %v8356_v27  ;;  %v8357_v61 = vmul.f32 0.01, %v11520_v20  ;;  %v17711_v45 = vadd.f32 %v17565_v32, %v17256_v29  ;;  %v17715_v56 = vadd.f32 %v17567_v39, %v17263_v18 }
 0x5d3   : > { %9969 = vmatprep.mubr.bf16.mxu1 %v8814_v54  ;;  %v8828_v33 = vpack.c.bf16 %v17621_v9, %v17618_v7  ;;  %v11461_v54 = vadd.f32 %v17517_v4, %v17263_v18  ;;  %vm8117_vm3 = vcmp.gt.f32.partialorder %v11524_v11, 0.0  ;;  %vm8123_vm15 = vcmp.gt.f32.partialorder %v11462_v59, 0.0 }
 0x5d4   : > { %v17615_v49 = vpop.f32.mrb[96].mxu0  ;;  %v17682_v51 = vsel %vm8101_vm2, %v11520_v20, %v8357_v61  ;;  %v17701_v20 = vadd.f32 %v17560_v63, %v17246_v48  ;;  %v17727_v32 = vadd.f32 %v17579_v19, %v17268_v16  ;;  %v17731_v39 = vadd.f32 %v17581_v30, %v17246_v48 }
 0x5d5   : > { %v17623_v3 = vpop.f32.mrb[96].mxu1  ;;  %v17625_v47 = vpop.f32.mrb[97].mxu0  ;;  %v8372_v35 = vmul.f32 0.01, %v11461_v54  ;;  %vm8116_vm8 = vcmp.gt.f32.partialorder %v11461_v54, 0.0  ;;  %v8829_v40 = vpack.c.bf16 %v17685_v5, %v17682_v51  ;;  %vm8125_vm7 = vcmp.gt.f32.partialorder %v11526_v21, 0.0 }
 0x5d6   : > { %v17638_v28 = vpop.f32.mrb[97].mxu1  ;;  %v17640_v27 = vpop.f32.mrb[98].mxu0  ;;  %v8373_v6 = vmul.f32 0.01, %v11524_v11  ;;  %v11467_v1 = vadd.f32 %v17591_v50, %v17263_v18  ;;  %v8630_v19 = vsel %vm8118_vm13, %v11525_v37, %v8374_v23  ;;  %v17743_v30 = vmul.f32 0.01, %v17701_v20 }
 0x5d7   : > { %v17645_v31 = vpop.f32.mrb[98].mxu1  ;;  %v17647_v4 = vpop.f32.mrb[99].mxu0  ;;  %v8628_v41 = vsel %vm8116_vm8, %v11461_v54, %v8372_v35  ;;  %v8638_v54 = vsel %vm8126_vm9, %v11527_v34, %v8382_v13  ;;  %vm8132_vm1 = vcmp.gt.f32.partialorder %v17715_v56, 0.0  ;;  %v11531_v50 = vadd.f32 %v17613_v42, %v17268_v16 }
 0x5d8   : > { %v17675_v2 = vpop.f32.mrb[99].mxu1  ;;  %v8838_v22 = vpack.c.bf16 %v8638_v54, %v8630_v19  ;;  %v8388_v57 = vmul.f32 0.01, %v17715_v56  ;;  %vm8134_vm14 = vcmp.gt.f32.partialorder %v17727_v32, 0.0  ;;  %vm8139_vm10 = vcmp.gt.f32.partialorder %v17731_v39, 0.0 }
 0x5d9   : > { %9809 = vmatmul.mubr.bf16.gmra.mrb[204].mxu0 %v8811_v55  ;;  %v8380_v55 = vmul.f32 0.01, %v11463_v15  ;;  %v8396_v42 = vmul.f32 0.01, %v11467_v1  ;;  %v17772_v34 = vadd.f32 %v17615_v49, %v17246_v48  ;;  %vm8131_vm4 = vcmp.gt.f32.partialorder %v17701_v20, 0.0 }
 0x5da   : > { %9970 = vmatmul.mubr.bf16.gmra.mrb[204].mxu1 %v8813_v24  ;;  %9816 = vmatprep.mubr.bf16.mxu0 %v8820_v0  ;;  %v8827_v24 = vpack.c.bf16 %v17653_v52, %v17673_v46  ;;  %v17780_v37 = vadd.f32 %v17623_v3, %v17256_v29  ;;  %v8629_v13 = vsel %vm8117_vm3, %v11524_v11, %v8373_v6  ;;  %vm8133_vm6 = vcmp.gt.f32.partialorder %v17711_v45, 0.0 }
 0x5db   : > { %9977 = vmatprep.mubr.bf16.mxu1 %v8822_v14  ;;  %v8371_v14 = vmul.f32 0.01, %v17657_v36  ;;  %v8636_v12 = vsel %vm8124_vm11, %v11463_v15, %v8380_v55  ;;  %v8390_v15 = vmul.f32 0.01, %v17727_v32  ;;  %vm8140_vm5 = vcmp.gt.f32.partialorder %v11467_v1, 0.0 }
 0x5dc   : > { %v17677_v17 = vpop.f32.mrb[100].mxu0  ;;  %v8836_v10 = vpack.c.bf16 %v8636_v12, %v8628_v41  ;;  %v8395_v11 = vmul.f32 0.01, %v17731_v39  ;;  %vm8142_vm2 = vcmp.gt.f32.partialorder %v11531_v50, 0.0  ;;  %v17816_v46 = vmul.f32 0.01, %v17772_v34 }
 0x5dd   : > { %v17687_v26 = vpop.f32.mrb[100].mxu1  ;;  %v17689_v0 = vpop.f32.mrb[101].mxu0  ;;  %v8627_v35 = vsel %vm8115_vm12, %v17657_v36, %v8371_v14  ;;  %v8398_v36 = vmul.f32 0.01, %v11531_v50  ;;  %v17792_v14 = vadd.f32 %v17625_v47, %v17263_v18  ;;  %v17808_v47 = vadd.f32 %v17640_v27, %v17246_v48 }
 0x5de   : > { %v17703_v53 = vpop.f32.mrb[101].mxu1  ;;  %v17705_v44 = vpop.f32.mrb[102].mxu0  ;;  %v17823_v27 = vmul.f32 0.01, %v17780_v37  ;;  %v8652_v41 = vsel %vm8140_vm5, %v11467_v1, %v8396_v42  ;;  %v17843_v12 = vadd.f32 %v17675_v2, %v17268_v16  ;;  %v17856_v1 = vadd.f32 %v17677_v17, %v17246_v48 }
 0x5df   : > { %v17717_v8 = vpop.f32.mrb[102].mxu1  ;;  %v17719_v63 = vpop.f32.mrb[103].mxu0  ;;  %vm8148_vm8 = vcmp.gt.f32.partialorder %v17792_v14, 0.0  ;;  %v8654_v6 = vsel %vm8142_vm2, %v11531_v50, %v8398_v36  ;;  %v17860_v2 = vadd.f32 %v17687_v26, %v17256_v29  ;;  %v17871_v50 = vadd.f32 %v17703_v53, %v17268_v16 }
 0x5e0   : > { %v17745_v61 = vpop.f32.mrb[103].mxu1  ;;  %v8646_v17 = vsel %vm8134_vm14, %v17727_v32, %v8390_v15  ;;  %vm8158_vm9 = vcmp.gt.f32.partialorder %v17843_v12, 0.0  ;;  %v17890_v32 = vadd.f32 %v17717_v8, %v17256_v29  ;;  %v17894_v15 = vadd.f32 %v17719_v63, %v17263_v18 }
 0x5e1   : > { %9817 = vmatmul.mubr.bf16.gmra.mrb[208].mxu0 %v8819_v43  ;;  %v8381_v43 = vmul.f32 0.01, %v11526_v21  ;;  %v8846_v53 = vpack.c.bf16 %v8654_v6, %v8646_v17  ;;  %vm8155_vm13 = vcmp.gt.f32.partialorder %v17808_v47, 0.0  ;;  %v17906_v8 = vmul.f32 0.01, %v17856_v1 }
 0x5e2   : > { %9978 = vmatmul.mubr.bf16.gmra.mrb[208].mxu1 %v8821_v62  ;;  %9824 = vmatprep.mubr.bf16.mxu0 %v8828_v33  ;;  %v17750_v62 = vmul.f32 0.01, %v17711_v45  ;;  %v17760_v33 = vsel %vm8123_vm15, %v11462_v59, %v8379_v58  ;;  %v17913_v63 = vadd.f32 %v17745_v61, %v17268_v16  ;;  %vm8147_vm3 = vcmp.gt.f32.partialorder %v17772_v34, 0.0 }
 0x5e3   : > { %9985 = vmatprep.mubr.bf16.mxu1 %v8830_v38  ;;  %v17768_v38 = vadd.f32 %v17589_v60, %v17256_v29  ;;  %v8835_v60 = vpack.c.bf16 %v17760_v33, %v8627_v35  ;;  %v8637_v49 = vsel %vm8125_vm7, %v11526_v21, %v8381_v43  ;;  %v17804_v21 = vadd.f32 %v17638_v28, %v17268_v16 }
 0x5e4   : > { %v17747_v25 = vpop.f32.mrb[104].mxu0  ;;  %v8837_v58 = vpack.c.bf16 %v8637_v49, %v8629_v13  ;;  %v17820_v28 = vadd.f32 %v17645_v31, %v17256_v29  ;;  %v17839_v31 = vmul.f32 0.01, %v17792_v14  ;;  %v17881_v33 = vadd.f32 %v17705_v44, %v17246_v48 }
 0x5e5   : > { %v17755_v7 = vpop.f32.mrb[104].mxu1  ;;  %v17757_v9 = vpop.f32.mrb[105].mxu0  ;;  %vm8141_vm0 = vcmp.gt.f32.partialorder %v17768_v38, 0.0  ;;  %v8397_v52 = vmul.f32 0.01, %v17768_v38  ;;  %vm8150_vm11 = vcmp.gt.f32.partialorder %v17804_v21, 0.0  ;;  %v8651_v44 = vsel %vm8139_vm10, %v17731_v39, %v8395_v11 }
 0x5e6   : > { %v17782_v59 = vpop.f32.mrb[105].mxu1  ;;  %v17784_v55 = vpop.f32.mrb[106].mxu0  ;;  %v17849_v19 = vmul.f32 0.01, %v17804_v21  ;;  %v17863_v43 = vmul.f32 0.01, %v17820_v28  ;;  %v17923_v36 = vadd.f32 %v17747_v25, %v17246_v48  ;;  %v8643_v11 = vsel %vm8131_vm4, %v17701_v20, %v17743_v30 }
 0x5e7   : > { %v17794_v3 = vpop.f32.mrb[106].mxu1  ;;  %v17796_v23 = vpop.f32.mrb[107].mxu0  ;;  %v8414_v13 = vmul.f32 0.01, %v17843_v12  ;;  %v17909_v49 = vmul.f32 0.01, %v17860_v2  ;;  %v8645_v25 = vsel %vm8133_vm6, %v17711_v45, %v17750_v62  ;;  %v17950_v6 = vadd.f32 %v17755_v7, %v17256_v29 }
 0x5e8   : > { %v17829_v51 = vpop.f32.mrb[107].mxu1  ;;  %v17919_v39 = vmul.f32 0.01, %v17871_v50  ;;  %v17931_v61 = vmul.f32 0.01, %v17881_v33  ;;  %vm8149_vm15 = vcmp.gt.f32.partialorder %v17780_v37, 0.0 }
 0x5e9   : > { %9825 = vmatmul.mubr.bf16.gmra.mrb[212].mxu0 %v8827_v24  ;;  %v17827_v24 = vadd.f32 %v17647_v4, %v17263_v18  ;;  %20283 = vst [vmem:[#allocation152_spill] sm:$0xff] %v17909_v49  ;;  %vm8157_vm7 = vcmp.gt.f32.partialorder %v17820_v28, 0.0  ;;  %v17943_v20 = vmul.f32 0.01, %v17890_v32  ;;  %v17946_v30 = vmul.f32 0.01, %v17894_v15 }
 0x5ea   : > { %9986 = vmatmul.mubr.bf16.gmra.mrb[212].mxu1 %v8829_v40  ;;  %9832 = vmatprep.mubr.bf16.mxu0 %v8836_v10  ;;  %v8644_v40 = vsel %vm8132_vm1, %v17715_v56, %v8388_v57  ;;  %v17852_v56 = vmul.f32 0.01, %v17808_v47  ;;  %v17968_v7 = vmul.f32 0.01, %v17923_v36  ;;  %vm8172_vm14 = vcmp.gt.f32.partialorder %v17894_v15, 0.0 }
 0x5eb   : > { %9993 = vmatprep.mubr.bf16.mxu1 %v8838_v22  ;;  %v8844_v54 = vpack.c.bf16 %v8652_v41, %v8644_v40  ;;  %v17867_v22 = vadd.f32 %v17689_v0, %v17263_v18  ;;  %vm8156_vm12 = vcmp.gt.f32.partialorder %v17827_v24, 0.0  ;;  %v8412_v26 = vmul.f32 0.01, %v17827_v24  ;;  %20284 = vst [vmem:[#allocation212_spill] sm:$0xff] %v17943_v20 }
 0x5ec   : > { %v17831_v5 = vpop.f32.mrb[108].mxu0  ;;  %v8843_v41 = vpack.c.bf16 %v8651_v44, %v8643_v11  ;;  %v17965_v44 = vadd.f32 %v17784_v55, %v17246_v48  ;;  %20285 = vst [vmem:[#allocation236_spill] sm:$0xff] %v17968_v7  ;;  %v17972_v11 = vadd.f32 %v17794_v3, %v17256_v29  ;;  %v8660_v3 = vsel %vm8148_vm8, %v17792_v14, %v17839_v31 }
 0x5ed   : > { %v7966_v4 = vpop.f32.mrb[108].mxu1  ;;  %v17845_v10 = vpop.f32.mrb[109].mxu0  ;;  %vm8164_vm1 = vcmp.gt.f32.partialorder %v17867_v22, 0.0  ;;  %v8670_v14 = vsel %vm8158_vm9, %v17843_v12, %v8414_v13  ;;  %vm8174_vm10 = vcmp.gt.f32.partialorder %v17913_v63, 0.0  ;;  %vm8166_vm4 = vcmp.gt.f32.partialorder %v17871_v50, 0.0 }
 0x5ee   : > { %v17883_v0 = vpop.f32.mrb[109].mxu1  ;;  %v17885_v57 = vpop.f32.mrb[110].mxu0  ;;  %v17987_v55 = vadd.f32 %v7966_v4, %v17256_v29  ;;  %v18024_v12 = vmul.f32 0.01, %v17972_v11  ;;  %vm8163_vm6 = vcmp.gt.f32.partialorder %v17856_v1, 0.0  ;;  %vm8165_vm5 = vcmp.gt.f32.partialorder %v17860_v2, 0.0 }
 0x5ef   : > { %v17896_v42 = vpop.f32.mrb[110].mxu1  ;;  %v17898_v35 = vpop.f32.mrb[111].mxu0  ;;  %vm8171_vm2 = vcmp.gt.f32.partialorder %v17881_v33, 0.0 }
 0x5f0   : > { %20288 = vst [vmem:[#allocation239_spill] sm:$0xff] %v18024_v12 }
 0x5f1   : > { %9833 = vmatmul.mubr.bf16.gmra.mrb[216].mxu0 %v8835_v60  ;;  %v17916_v60 = vmul.f32 0.01, %v17867_v22 }
 0x5f2   : > { %9994 = vmatmul.mubr.bf16.gmra.mrb[216].mxu1 %v8837_v58  ;;  %9840 = vmatprep.mubr.bf16.mxu0 %v8844_v54  ;;  %v7972_v58 = vpop.f32.mrb[111].mxu1  ;;  %v8653_v54 = vsel %vm8141_vm0, %v17768_v38, %v8397_v52  ;;  %v17957_v38 = vadd.f32 %v17757_v9, %v17263_v18  ;;  %v17961_v52 = vadd.f32 %v17782_v59, %v17268_v16  ;;  %vm8173_vm0 = vcmp.gt.f32.partialorder %v17890_v32, 0.0 }
 0x5f3   : > { %10001 = vmatprep.mubr.bf16.mxu1 %v8846_v53  ;;  %v8845_v62 = vpack.c.bf16 %v8653_v54, %v8645_v25  ;;  %v17953_v53 = vmul.f32 0.01, %v17913_v63  ;;  %v17976_v25 = vadd.f32 %v17796_v23, %v17263_v18  ;;  %v17980_v9 = vadd.f32 %v17829_v51, %v17268_v16 }
 0x5f4   : > { %v7204_v40 = vpop.f32.mrb[112].mxu0  ;;  %v17984_v59 = vadd.f32 %v17831_v5, %v17246_v48  ;;  %v8668_v23 = vsel %vm8156_vm12, %v17827_v24, %v8412_v26  ;;  %v17999_v51 = vmul.f32 0.01, %v17950_v6  ;;  %v18003_v5 = vadd.f32 %v17845_v10, %v17263_v18 }
 0x5f5   : > { %v7976_v17 = vpop.f32.mrb[112].mxu1  ;;  %v7206_v45 = vpop.f32.mrb[113].mxu0  ;;  %v8852_v49 = vpack.c.bf16 %v8668_v23, %v8660_v3  ;;  %v18010_v24 = vmul.f32 0.01, %v17957_v38  ;;  %v18013_v31 = vmul.f32 0.01, %v17961_v52  ;;  %v18020_v10 = vadd.f32 %v17883_v0, %v17268_v16 }
 0x5f6   : > { %v7978_v54 = vpop.f32.mrb[113].mxu1  ;;  %v7208_v7 = vpop.f32.mrb[114].mxu0  ;;  %20286 = vst [vmem:[#allocation218_spill] sm:$0xff] %v17999_v51  ;;  %v18016_v26 = vmul.f32 0.01, %v17965_v44  ;;  %v8662_v3 = vsel %vm8150_vm11, %v17804_v21, %v17849_v19  ;;  %v18044_v23 = vadd.f32 %v17885_v57, %v17246_v48  ;;  %v18055_v21 = vadd.f32 %v17898_v35, %v17263_v18 }
 0x5f7   : > { %v7980_v4 = vpop.f32.mrb[114].mxu1  ;;  %v7210_v20 = vpop.f32.mrb[115].mxu0  ;;  %v18027_v13 = vmul.f32 0.01, %v17976_v25  ;;  %v18037_v0 = vmul.f32 0.01, %v17984_v59  ;;  %v8854_v51 = vpack.c.bf16 %v8670_v14, %v8662_v3  ;;  %v8667_v57 = vsel %vm8155_vm13, %v17808_v47, %v17852_v56 }
 0x5f8   : > { %20287 = vst [vmem:[#allocation219_spill] sm:$0xff] %v18016_v26  ;;  %v7982_v12 = vpop.f32.mrb[115].mxu1  ;;  %v18062_v14 = vmul.f32 0.01, %v18020_v10  ;;  %v18065_v3 = vadd.f32 %v7972_v58, %v17268_v16  ;;  %v18074_v35 = vadd.f32 %v7206_v45, %v17263_v18  ;;  %v18080_v47 = vadd.f32 %v7208_v7, %v17246_v48 }
 0x5f9   : > { %9841 = vmatmul.mubr.bf16.gmra.mrb[220].mxu0 %v8843_v41  ;;  %v18030_v41 = vmul.f32 0.01, %v17980_v9  ;;  %20290 = vst [vmem:[#allocation160_spill] sm:$0xff] %v18037_v0  ;;  %v18071_v0 = vadd.f32 %v7976_v17, %v17256_v29  ;;  %v8659_v56 = vsel %vm8147_vm3, %v17772_v34, %v17816_v46  ;;  %v18087_v58 = vmul.f32 0.01, %v18044_v23 }
 0x5fa   : > { %10002 = vmatmul.mubr.bf16.gmra.mrb[220].mxu1 %v8845_v62  ;;  %9848 = vmatprep.mubr.bf16.mxu0 %v8852_v49  ;;  %v18040_v62 = vmul.f32 0.01, %v17987_v55  ;;  %v18047_v49 = vmul.f32 0.01, %v18003_v5  ;;  %v8661_v45 = vsel %vm8149_vm15, %v17780_v37, %v17823_v27  ;;  %v8669_v7 = vsel %vm8157_vm7, %v17820_v28, %v17863_v43 }
 0x5fb   : > { %20289 = vst [vmem:[#allocation173_spill] sm:$0xff] %v18030_v41  ;;  %v18051_v41 = vadd.f32 %v17896_v42, %v17256_v29  ;;  %v18068_v42 = vadd.f32 %v7204_v40, %v17246_v48  ;;  %10009 = vmatprep.mubr.bf16.mxu1 %v8854_v51  ;;  %20293 = vst [vmem:[#allocation231_spill] sm:$0xff] %v18087_v58  ;;  %v8851_v51 = vpack.c.bf16 %v8667_v57, %v8659_v56 }
 0x5fc   : > { %20291 = vst [vmem:[#allocation169_spill] sm:$0xff] %v18040_v62  ;;  %v7214_v26 = vpop.f32.mrb[116].mxu0  ;;  %20292 = vst [vmem:[#allocation230_spill] sm:$0xff] %v18047_v49  ;;  %v18077_v49 = vadd.f32 %v7978_v54, %v17268_v16  ;;  %v18101_v34 = vmul.f32 0.01, %v18055_v21  ;;  %v18104_v46 = vadd.f32 %v7980_v4, %v17256_v29  ;;  %v8853_v58 = vpack.c.bf16 %v8669_v7, %v8661_v45 }
 0x5fd   : > { %v7986_v19 = vpop.f32.mrb[116].mxu1  ;;  %v7216_v62 = vpop.f32.mrb[117].mxu0  ;;  %v18098_v54 = vmul.f32 0.01, %v18051_v41  ;;  %v18111_v37 = vmul.f32 0.01, %v18065_v3  ;;  %v18131_v7 = vadd.f32 %v7210_v20, %v17263_v18  ;;  %v8684_v20 = vsel %vm8172_vm14, %v17894_v15, %v17946_v30 }
 0x5fe   : > { %v7988_v40 = vpop.f32.mrb[117].mxu1  ;;  %v7218_v17 = vpop.f32.mrb[118].mxu0  ;;  %v18114_v28 = vmul.f32 0.01, %v18068_v42  ;;  %v18117_v27 = vmul.f32 0.01, %v18071_v0 }
 0x5ff   : > { %20294 = vst [vmem:[#allocation240_spill] sm:$0xff] %v18098_v54  ;;  %v7990_v57 = vpop.f32.mrb[118].mxu1  ;;  %v7220_v56 = vpop.f32.mrb[119].mxu0  ;;  %vm8180_vm8 = vcmp.gt.f32.partialorder %v17957_v38, 0.0  ;;  %vm8188_vm11 = vcmp.gt.f32.partialorder %v17976_v25, 0.0  ;;  %vm8182_vm12 = vcmp.gt.f32.partialorder %v17961_v52, 0.0  ;;  %v18162_v15 = vadd.f32 %v7988_v40, %v17268_v16 }
 0x600   : > { %20295 = vst [vmem:[#allocation245_spill] sm:$0xff] %v18114_v28  ;;  %20296 = vst [vmem:[#allocation57_spill] sm:$0xff] %v18117_v27  ;;  %v18122_v43 = vmul.f32 0.01, %v18074_v35  ;;  %v18125_v4 = vmul.f32 0.01, %v18077_v49  ;;  %v18138_v27 = vadd.f32 %v7214_v26, %v17246_v48  ;;  %v18165_v30 = vadd.f32 %v7218_v17, %v17246_v48 }
 0x601   : > { %9849 = vmatmul.mubr.bf16.gmra.mrb[224].mxu0 %v8851_v51  ;;  %v18128_v45 = vmul.f32 0.01, %v18080_v47  ;;  %v18135_v51 = vadd.f32 %v7982_v12, %v17268_v16  ;;  %v7992_v28 = vpop.f32.mrb[119].mxu1  ;;  %v18152_v12 = vadd.f32 %v7986_v19, %v17256_v29  ;;  %v8678_v19 = vsel %vm8166_vm4, %v17871_v50, %v17919_v39 }
 0x602   : > { %20297 = vst [vmem:[#allocation45_spill] sm:$0xff] %v18122_v43  ;;  %20298 = vst [vmem:[#allocation46_spill] sm:$0xff] %v18125_v4  ;;  %10010 = vmatmul.mubr.bf16.gmra.mrb[224].mxu1 %v8853_v58  ;;  %v8676_v4 = vsel %vm8164_vm1, %v17867_v22, %v17916_v60  ;;  %v8686_v43 = vsel %vm8174_vm10, %v17913_v63, %v17953_v53  ;;  %v18159_v60 = vadd.f32 %v7216_v62, %v17263_v18 }
 0x603   : > { %20299 = vst [vmem:[#allocation161_spill] sm:$0xff] %v18128_v45  ;;  %v18149_v45 = vmul.f32 0.01, %v18104_v46  ;;  %v8860_v26 = vpack.c.bf16 %v8684_v20, %v8676_v4  ;;  %v18172_v4 = vadd.f32 %v7990_v57, %v17256_v29  ;;  %v18175_v63 = vadd.f32 %v7220_v56, %v17263_v18 }
 0x604   : > { %v7224_v58 = vpop.f32.mrb[120].mxu0  ;;  %v18178_v53 = vadd.f32 %v7992_v28, %v17268_v16  ;;  %v8862_v62 = vpack.c.bf16 %v8686_v43, %v8678_v19  ;;  %v18181_v17 = vmul.f32 0.01, %v18131_v7  ;;  %vm8190_vm9 = vcmp.gt.f32.partialorder %v17980_v9, 0.0 }
 0x605   : > { %20300 = vst [vmem:[#allocation243_spill] sm:$0xff] %v18149_v45  ;;  %v7996_v54 = vpop.f32.mrb[120].mxu1  ;;  %v7226_v22 = vpop.f32.mrb[121].mxu0  ;;  %9856 = vmatprep.mubr.bf16.mxu0 %v8860_v26  ;;  %v18184_v45 = vmul.f32 0.01, %v18135_v51  ;;  %vm8187_vm13 = vcmp.gt.f32.partialorder %v17965_v44, 0.0 }
 0x606   : > { %v7998_v40 = vpop.f32.mrb[121].mxu1  ;;  %v7228_v20 = vpop.f32.mrb[122].mxu0  ;;  %20301 = vst [vmem:[#allocation249_spill] sm:$0xff] %v18181_v17  ;;  %v18188_v57 = vmul.f32 0.01, %v18138_v27  ;;  %10017 = vmatprep.mubr.bf16.mxu1 %v8862_v62  ;;  %vm8179_vm3 = vcmp.gt.f32.partialorder %v17923_v36, 0.0 }
 0x607   : > { %20302 = vst [vmem:[#allocation263_spill] sm:$0xff] %v18184_v45  ;;  %v8000_v50 = vpop.f32.mrb[122].mxu1  ;;  %v7230_v39 = vpop.f32.mrb[123].mxu0  ;;  %v18191_v56 = vmul.f32 0.01, %v18152_v12  ;;  %v18204_v45 = vadd.f32 %v7224_v58, %v17246_v48  ;;  %vm8181_vm15 = vcmp.gt.f32.partialorder %v17950_v6, 0.0  ;;  %v18222_v58 = vadd.f32 %v7226_v22, %v17263_v18 }
 0x608   : > { %20303 = vst [vmem:[#allocation58_spill] sm:$0xff] %v18188_v57  ;;  %v8002_v28 = vpop.f32.mrb[123].mxu1  ;;  %v18195_v43 = vmul.f32 0.01, %v18159_v60  ;;  %v18198_v26 = vmul.f32 0.01, %v18162_v15  ;;  %v8683_v22 = vsel %vm8171_vm2, %v17881_v33, %v17931_v61  ;;  %v8692_v33 = vsel %vm8180_vm8, %v17957_v38, %v18010_v24 }
 0x609   : > { %20304 = vst [vmem:[#allocation217_spill] sm:$0xff] %v18191_v56  ;;  %v18201_v19 = vmul.f32 0.01, %v18165_v30  ;;  %v18209_v62 = vmul.f32 0.01, %v18172_v4  ;;  %vm8189_vm7 = vcmp.gt.f32.partialorder %v17972_v11, 0.0  ;;  %v8694_v38 = vsel %vm8182_vm12, %v17961_v52, %v18013_v31 }
 0x60a   : > { %20305 = vst [vmem:[#allocation251_spill] sm:$0xff] %v18195_v43  ;;  %20306 = vst [vmem:[#allocation257_spill] sm:$0xff] %v18198_v26  ;;  %v18212_v56 = vmul.f32 0.01, %v18175_v63  ;;  %v18215_v57 = vmul.f32 0.01, %v18178_v53  ;;  %v18218_v26 = vadd.f32 %v7996_v54, %v17256_v29  ;;  %v18228_v43 = vadd.f32 %v7228_v20, %v17246_v48 }
 0x60b   : > { %20307 = vst [vmem:[#allocation259_spill] sm:$0xff] %v18201_v19  ;;  %20308 = vst [vmem:[#allocation171_spill] sm:$0xff] %v18209_v62  ;;  %v18225_v19 = vadd.f32 %v7998_v40, %v17268_v16  ;;  %v18231_v62 = vadd.f32 %v8000_v50, %v17256_v29  ;;  %vm8196_vm1 = vcmp.gt.f32.partialorder %v18003_v5, 0.0  ;;  %vm8198_vm14 = vcmp.gt.f32.partialorder %v18020_v10, 0.0  ;;  %v20311_v40 = vld [vmem:[#allocation152_spill] sm:$0xff] }
 0x60c   : > { %20309 = vst [vmem:[#allocation246_spill] sm:$0xff] %v18212_v56  ;;  %20310 = vst [vmem:[#allocation252_spill] sm:$0xff] %v18215_v57  ;;  %vm8204_vm10 = vcmp.gt.f32.partialorder %v18055_v21, 0.0  ;;  %v8675_v54 = vsel %vm8163_vm6, %v17856_v1, %v17906_v8  ;;  %v8677_v20 = vsel %vm8165_vm5, %v17860_v2, %v20311_v40  ;;  %v20312_v50 = vld [vmem:[#allocation212_spill] sm:$0xff]  ;;  %v7234_v56 = vpop.f32.mrb[124].mxu0  ;;  %vm8206_vm4 = vcmp.gt.f32.partialorder %v18065_v3, 0.0 }
 0x60d   : > { %v8685_v57 = vsel %vm8173_vm0, %v17890_v32, %v20312_v50  ;;  %v8006_v17 = vpop.f32.mrb[124].mxu1  ;;  %v8859_v1 = vpack.c.bf16 %v8683_v22, %v8675_v54  ;;  %v8700_v2 = vsel %vm8188_vm11, %v17976_v25, %v18027_v13  ;;  %v7236_v61 = vpop.f32.mrb[125].mxu0  ;;  %vm8195_vm6 = vcmp.gt.f32.partialorder %v17984_v59, 0.0  ;;  %v20314_v13 = vld [vmem:[#allocation173_spill] sm:$0xff] }
 0x60e   : > { %v8861_v8 = vpack.c.bf16 %v8685_v57, %v8677_v20  ;;  %v8008_v40 = vpop.f32.mrb[125].mxu1  ;;  %v18263_v32 = vadd.f32 %v7230_v39, %v17263_v18  ;;  %v18266_v54 = vadd.f32 %v8002_v28, %v17268_v16  ;;  %v8868_v57 = vpack.c.bf16 %v8700_v2, %v8692_v33  ;;  %v7238_v24 = vpop.f32.mrb[126].mxu0 }
 0x60f   : > { %v8010_v22 = vpop.f32.mrb[126].mxu1  ;;  %vm8197_vm5 = vcmp.gt.f32.partialorder %v17987_v55, 0.0  ;;  %vm8203_vm2 = vcmp.gt.f32.partialorder %v18044_v23, 0.0  ;;  %vm8205_vm0 = vcmp.gt.f32.partialorder %v18051_v41, 0.0  ;;  %v18276_v25 = vmul.f32 0.01, %v18204_v45  ;;  %9857 = vmatmul.mubr.bf16.gmra.mrb[228].mxu0 %v8859_v1 }
 0x610   : > { %10018 = vmatmul.mubr.bf16.gmra.mrb[228].mxu1 %v8861_v8  ;;  %v8702_v39 = vsel %vm8190_vm9, %v17980_v9, %v20314_v13  ;;  %v18283_v52 = vadd.f32 %v7234_v56, %v17246_v48  ;;  %v18286_v31 = vadd.f32 %v8006_v17, %v17256_v29  ;;  %v7240_v28 = vpop.f32.mrb[127].mxu0  ;;  %v8012_v20 = vpop.f32.mrb[127].mxu1  ;;  %v18290_v50 = vmul.f32 0.01, %v18218_v26  ;;  %9864 = vmatprep.mubr.bf16.mxu0 %v8868_v57 }
 0x611   : > { %20313 = vst [vmem:[#allocation47_spill] sm:$0xff] %v18276_v25  ;;  %v8870_v1 = vpack.c.bf16 %v8702_v39, %v8694_v38  ;;  %v18293_v8 = vadd.f32 %v7236_v61, %v17263_v18  ;;  %v18296_v9 = vadd.f32 %v8008_v40, %v17268_v16  ;;  %v18302_v17 = vmul.f32 0.01, %v18222_v58  ;;  %v20327_v25 = vld [vmem:[#allocation239_spill] sm:$0xff] }
 0x612   : > { %20315 = vst [vmem:[#allocation166_spill] sm:$0xff] %v18290_v50  ;;  %v18305_v56 = vmul.f32 0.01, %v18225_v19  ;;  %v18308_v33 = vmul.f32 0.01, %v18228_v43  ;;  %v18311_v2 = vadd.f32 %v7238_v24, %v17246_v48  ;;  %vm8211_vm9 = vcmp.gt.f32.partialorder %v18068_v42, 0.0 }
 0x613   : > { %v18314_v61 = vmul.f32 0.01, %v18231_v62  ;;  %v18317_v40 = vmul.f32 0.01, %v18263_v32  ;;  %v18320_v57 = vmul.f32 0.01, %v18266_v54  ;;  %10025 = vmatprep.mubr.bf16.mxu1 %v8870_v1  ;;  %v18332_v24 = vadd.f32 %v8010_v22, %v17256_v29 }
 0x614   : > { %20316 = vst [vmem:[#allocation227_spill] sm:$0xff] %v18308_v33  ;;  %v18326_v38 = vmul.f32 0.01, %v18283_v52  ;;  %v18329_v48 = vmul.f32 0.01, %v18286_v31  ;;  %v18335_v13 = vadd.f32 %v7240_v28, %v17263_v18  ;;  %v10876_v39 = vpop.f32.mrb[128].mxu0  ;;  %v18354_v22 = vadd.f32 %v8012_v20, %v17268_v16 }
 0x615   : > { %20317 = vst [vmem:[#allocation37_spill] sm:$0xff] %v18314_v61  ;;  %20318 = vst [vmem:[#allocation248_spill] sm:$0xff] %v18320_v57  ;;  %vm8221_vm8 = vcmp.gt.f32.partialorder %v18104_v46, 0.0  ;;  %v18339_v1 = vmul.f32 0.01, %v18293_v8  ;;  %v20323_v50 = vld [vmem:[#allocation219_spill] sm:$0xff]  ;;  %v8701_v16 = vsel %vm8189_vm7, %v17972_v11, %v20327_v25  ;;  %v8716_v11 = vsel %vm8204_vm10, %v18055_v21, %v18101_v34 }
 0x616   : > { %20319 = vst [vmem:[#allocation256_spill] sm:$0xff] %v18326_v38  ;;  %20320 = vst [vmem:[#allocation222_spill] sm:$0xff] %v18329_v48  ;;  %v18342_v61 = vmul.f32 0.01, %v18296_v9  ;;  %v8699_v48 = vsel %vm8187_vm13, %v17965_v44, %v20323_v50  ;;  %v10988_v38 = vpop.f32.mrb[128].mxu1  ;;  %v10877_v29 = vpop.f32.mrb[129].mxu0  ;;  %v8710_v25 = vsel %vm8198_vm14, %v18020_v10, %v18062_v14 }
 0x617   : > { %20321 = vst [vmem:[#allocation38_spill] sm:$0xff] %v18339_v1  ;;  %vm8228_vm11 = vcmp.gt.f32.partialorder %v18159_v60, 0.0  ;;  %v18351_v18 = vmul.f32 0.01, %v18311_v2  ;;  %v20325_v28 = vld [vmem:[#allocation236_spill] sm:$0xff]  ;;  %v20326_v1 = vld [vmem:[#allocation218_spill] sm:$0xff] }
 0x618   : > { %20322 = vst [vmem:[#allocation224_spill] sm:$0xff] %v18342_v61  ;;  %v8691_v61 = vsel %vm8179_vm3, %v17923_v36, %v20325_v28  ;;  %v8693_v44 = vsel %vm8181_vm15, %v17950_v6, %v20326_v1  ;;  %v18365_v50 = vmul.f32 0.01, %v18332_v24  ;;  %v18368_v33 = vmul.f32 0.01, %v18335_v13  ;;  %v10989_v20 = vpop.f32.mrb[129].mxu1 }
 0x619   : > { %20324 = vst [vmem:[#allocation232_spill] sm:$0xff] %v18351_v18  ;;  %v8867_v18 = vpack.c.bf16 %v8699_v48, %v8691_v61  ;;  %v10879_v57 = vpop.f32.mrb[130].mxu0  ;;  %vm8227_vm13 = vcmp.gt.f32.partialorder %v18138_v27, 0.0  ;;  %vm8230_vm3 = vcmp.gt.f32.partialorder %v18162_v15, 0.0  ;;  %vm8238_vm12 = vcmp.gt.f32.partialorder %v18178_v53, 0.0  ;;  %v20328_v6 = vld [vmem:[#allocation230_spill] sm:$0xff] }
 0x61a   : > { %v8869_v36 = vpack.c.bf16 %v8701_v16, %v8693_v44  ;;  %v8708_v61 = vsel %vm8196_vm1, %v18003_v5, %v20328_v6  ;;  %v18390_v48 = vld [vmem:[#allocation11] ss:$0 sm:$0xff]  ;;  %v10991_v1 = vpop.f32.mrb[130].mxu1  ;;  %v10880_v28 = vpop.f32.mrb[131].mxu0  ;;  %vm8229_vm7 = vcmp.gt.f32.partialorder %v18152_v12, 0.0  ;;  %v8718_v5 = vsel %vm8206_vm4, %v18065_v3, %v18111_v37  ;;  %v20329_v6 = vld [vmem:[#allocation160_spill] sm:$0xff] }
 0x61b   : > { %9865 = vmatmul.mubr.bf16.gmra.mrb[232].mxu0 %v8867_v18  ;;  %v8876_v44 = vpack.c.bf16 %v8716_v11, %v8708_v61  ;;  %v10878_v16 = vadd.f32 %v10877_v29, %v10876_v39  ;;  %v10990_v21 = vadd.f32 %v10989_v20, %v10988_v38  ;;  %v10992_v34 = vpop.f32.mrb[131].mxu1  ;;  %vm8237_vm1 = vcmp.gt.f32.partialorder %v18172_v4, 0.0  ;;  %v20330_v38 = vld [vmem:[#allocation231_spill] sm:$0xff]  ;;  %v20331_v29 = vld [vmem:[#allocation169_spill] sm:$0xff]  ;;  %v20332_v20 = vld [vmem:[#allocation240_spill] sm:$0xff] }
 0x61c   : > { %vm8244_vm14 = vcmp.gt.f32.partialorder %v18222_v58, 0.0  ;;  %vm8252_vm15 = vcmp.gt.f32.partialorder %v18263_v32, 0.0  ;;  %10026 = vmatmul.mubr.bf16.gmra.mrb[232].mxu1 %v8869_v36  ;;  %v8878_v10 = vpack.c.bf16 %v8718_v5, %v8710_v25  ;;  %v10881_v14 = vadd.f32 %v10880_v28, %v10879_v57 }
 0x61d   : > { %v10993_v18 = vadd.f32 %v10992_v34, %v10991_v1  ;;  %v8707_v3 = vsel %vm8195_vm6, %v17984_v59, %v20329_v6  ;;  %9872 = vmatprep.mubr.bf16.mxu0 %v8876_v44  ;;  %v9465_v37 = vadd.f32 %v10878_v16, %v18390_v48  ;;  %v8715_v39 = vsel %vm8203_vm2, %v18044_v23, %v20330_v38  ;;  %v20333_v23 = vld [vmem:[#allocation45_spill] sm:$0xff]  ;;  %v20337_v44 = vld [vmem:[#allocation46_spill] sm:$0xff]  ;;  %v20339_v16 = vld [vmem:[#allocation263_spill] sm:$0xff]  ;;  %v10994_v34 = vpop.f32.mrb[132].mxu1 }
 0x61e   : > { %v8709_v57 = vsel %vm8197_vm5, %v17987_v55, %v20331_v29  ;;  %v8717_v59 = vsel %vm8205_vm0, %v18051_v41, %v20332_v20  ;;  %10033 = vmatprep.mubr.bf16.mxu1 %v8878_v10  ;;  %v9468_v36 = vadd.f32 %v10881_v14, %v18390_v48  ;;  %v8875_v61 = vpack.c.bf16 %v8715_v39, %v8707_v3  ;;  %v10882_v55 = vpop.f32.mrb[132].mxu0  ;;  %v20335_v41 = vld [vmem:[#allocation249_spill] sm:$0xff]  ;;  %v10995_v3 = vpop.f32.mrb[133].mxu1 }
 0x61f   : > { %v8877_v11 = vpack.c.bf16 %v8717_v59, %v8709_v57  ;;  %vm20334_vm2 = vcmp.gt.f32.partialorder %v18074_v35, 0.0  ;;  %v18427_v1 = vadd.f32 %v10990_v21, %v9465_v37  ;;  %vm20336_vm0 = vcmp.gt.f32.partialorder %v18131_v7, 0.0  ;;  %v10883_v10 = vpop.f32.mrb[133].mxu0  ;;  %v10997_v38 = vpop.f32.mrb[134].mxu1  ;;  %v20341_v29 = vld [vmem:[#allocation245_spill] sm:$0xff] }
 0x620   : > { %v8724_v25 = vsel %vm20334_vm2, %v18074_v35, %v20333_v23  ;;  %v8732_v28 = vsel %vm20336_vm0, %v18131_v7, %v20335_v41  ;;  %vm20338_vm4 = vcmp.gt.f32.partialorder %v18077_v49, 0.0  ;;  %vm20340_vm6 = vcmp.gt.f32.partialorder %v18135_v51, 0.0  ;;  %v20342_v57 = vld [vmem:[#allocation161_spill] sm:$0xff] }
 0x621   : > { %v8726_v5 = vsel %vm20338_vm4, %v18077_v49, %v20337_v44  ;;  %v8734_v35 = vsel %vm20340_vm6, %v18135_v51, %v20339_v16  ;;  %vm8253_vm2 = vcmp.gt.f32.partialorder %v18231_v62, 0.0  ;;  %vm8260_vm5 = vcmp.gt.f32.partialorder %v18293_v8, 0.0  ;;  %v10885_v49 = vpop.f32.mrb[134].mxu0 }
 0x622   : > { %v18444_v21 = vadd.f32 %v10993_v18, %v9468_v36  ;;  %v8884_v7 = vpack.c.bf16 %v8732_v28, %v8724_v25  ;;  %v8886_v14 = vpack.c.bf16 %v8734_v35, %v8726_v5  ;;  %v10884_v6 = vadd.f32 %v10883_v10, %v10882_v55  ;;  %v10886_v39 = vpop.f32.mrb[135].mxu0  ;;  %v20344_v18 = vld [vmem:[#allocation57_spill] sm:$0xff]  ;;  %v10998_v25 = vpop.f32.mrb[135].mxu1  ;;  %v20347_v28 = vld [vmem:[#allocation251_spill] sm:$0xff]  ;;  %v20348_v5 = vld [vmem:[#allocation246_spill] sm:$0xff] }
 0x623   : > { %v10996_v37 = vadd.f32 %v10995_v3, %v10994_v34  ;;  %v8723_v51 = vsel %vm8211_vm9, %v18068_v42, %v20341_v29  ;;  %vm20343_vm4 = vcmp.gt.f32.partialorder %v18080_v47, 0.0  ;;  %vm20345_vm6 = vcmp.gt.f32.partialorder %v18071_v0, 0.0  ;;  %v20346_v42 = vld [vmem:[#allocation243_spill] sm:$0xff]  ;;  %9873 = vmatmul.mubr.bf16.gmra.mrb[236].mxu0 %v8875_v61  ;;  %v20350_v10 = vld [vmem:[#allocation257_spill] sm:$0xff]  ;;  %v20352_v3 = vld [vmem:[#allocation58_spill] sm:$0xff] }
 0x624   : > { %v8731_v20 = vsel %vm20343_vm4, %v18080_v47, %v20342_v57  ;;  %v8725_v59 = vsel %vm20345_vm6, %v18071_v0, %v20344_v18  ;;  %vm8262_vm0 = vcmp.gt.f32.partialorder %v18296_v9, 0.0  ;;  %v9473_v36 = vadd.f32 %v10884_v6, %v18390_v48  ;;  %10034 = vmatmul.mubr.bf16.gmra.mrb[236].mxu1 %v8877_v11  ;;  %9880 = vmatprep.mubr.bf16.mxu0 %v8884_v7  ;;  %v20351_v6 = vld [vmem:[#allocation252_spill] sm:$0xff]  ;;  %v20353_v7 = vld [vmem:[#allocation259_spill] sm:$0xff] }
 0x625   : > { %v10887_v23 = vadd.f32 %v10886_v39, %v10885_v49  ;;  %v8883_v55 = vpack.c.bf16 %v8731_v20, %v8723_v51  ;;  %v8733_v41 = vsel %vm8221_vm8, %v18104_v46, %v20346_v42  ;;  %vm8259_vm9 = vcmp.gt.f32.partialorder %v18283_v52, 0.0  ;;  %10041 = vmatprep.mubr.bf16.mxu1 %v8886_v14  ;;  %v20356_v51 = vld [vmem:[#allocation171_spill] sm:$0xff] }
 0x626   : > { %vm8267_vm4 = vcmp.gt.f32.partialorder %v18311_v2, 0.0  ;;  %v10999_v0 = vadd.f32 %v10998_v25, %v10997_v38  ;;  %v8885_v47 = vpack.c.bf16 %v8733_v41, %v8725_v59  ;;  %v8740_v44 = vsel %vm8228_vm11, %v18159_v60, %v20347_v28  ;;  %v20358_v25 = vld [vmem:[#allocation248_spill] sm:$0xff] }
 0x627   : > { %vm20349_vm6 = vcmp.gt.f32.partialorder %v18175_v63, 0.0  ;;  %vm8261_vm10 = vcmp.gt.f32.partialorder %v18286_v31, 0.0  ;;  %v8526_v46 = vmul.f32 0.01, %v18354_v22  ;;  %v18477_v35 = vadd.f32 %v10996_v37, %v9473_v36  ;;  %v10888_v37 = vpop.f32.mrb[136].mxu0 }
 0x628   : > { %v8748_v16 = vsel %vm20349_vm6, %v18175_v63, %v20348_v5  ;;  %v9476_v61 = vadd.f32 %v10887_v23, %v18390_v48  ;;  %v8742_v60 = vsel %vm8230_vm3, %v18162_v15, %v20350_v10  ;;  %v8750_v63 = vsel %vm8238_vm12, %v18178_v53, %v20351_v6  ;;  %v20355_v53 = vld [vmem:[#allocation217_spill] sm:$0xff]  ;;  %v10889_v29 = vpop.f32.mrb[137].mxu0  ;;  %v20367_v6 = vld [vmem:[#allocation38_spill] sm:$0xff] }
 0x629   : > { %v8892_v34 = vpack.c.bf16 %v8748_v16, %v8740_v44  ;;  %v18492_v11 = vsel %vm8227_vm13, %v18138_v27, %v20352_v3  ;;  %vm20354_vm8 = vcmp.gt.f32.partialorder %v18165_v30, 0.0  ;;  %v8894_v15 = vpack.c.bf16 %v8750_v63, %v8742_v60  ;;  %v11000_v27 = vpop.f32.mrb[136].mxu1  ;;  %v10891_v36 = vpop.f32.mrb[138].mxu0  ;;  %v20366_v60 = vld [vmem:[#allocation37_spill] sm:$0xff] }
 0x62a   : > { %v18498_v14 = vsel %vm20354_vm8, %v18165_v30, %v20353_v7  ;;  %v18500_v49 = vadd.f32 %v10999_v0, %v9476_v61  ;;  %v8741_v39 = vsel %vm8229_vm7, %v18152_v12, %v20355_v53  ;;  %v8749_v30 = vsel %vm8237_vm1, %v18172_v4, %v20356_v51  ;;  %v11001_v59 = vpop.f32.mrb[137].mxu1  ;;  %v10892_v41 = vpop.f32.mrb[139].mxu0  ;;  %v20371_v7 = vld [vmem:[#allocation256_spill] sm:$0xff] }
 0x62b   : > { %v8891_v38 = vpack.c.bf16 %v18498_v14, %v18492_v11  ;;  %v8756_v57 = vsel %vm8244_vm14, %v18222_v58, %v18302_v17  ;;  %v8764_v20 = vsel %vm8252_vm15, %v18263_v32, %v18317_v40  ;;  %vm20357_vm11 = vcmp.gt.f32.partialorder %v18225_v19, 0.0  ;;  %v11003_v42 = vpop.f32.mrb[138].mxu1  ;;  %v20360_v32 = vld [vmem:[#allocation47_spill] sm:$0xff]  ;;  %9881 = vmatmul.mubr.bf16.gmra.mrb[240].mxu0 %v8883_v55  ;;  %v20369_v11 = vld [vmem:[#allocation224_spill] sm:$0xff] }
 0x62c   : > { %v8758_v12 = vsel %vm20357_vm11, %v18225_v19, %v18305_v56  ;;  %v10890_v18 = vadd.f32 %v10889_v29, %v10888_v37  ;;  %v8893_v23 = vpack.c.bf16 %v8749_v30, %v8741_v39  ;;  %v8900_v4 = vpack.c.bf16 %v8764_v20, %v8756_v57  ;;  %v20362_v19 = vld [vmem:[#allocation227_spill] sm:$0xff]  ;;  %v11004_v5 = vpop.f32.mrb[139].mxu1  ;;  %10042 = vmatmul.mubr.bf16.gmra.mrb[240].mxu1 %v8885_v47  ;;  %v10894_v47 = vpop.f32.mrb[140].mxu0 }
 0x62d   : > { %vm20359_vm12 = vcmp.gt.f32.partialorder %v18266_v54, 0.0  ;;  %v11002_v17 = vadd.f32 %v11001_v59, %v11000_v27  ;;  %vm20361_vm13 = vcmp.gt.f32.partialorder %v18204_v45, 0.0  ;;  %vm20363_vm3 = vcmp.gt.f32.partialorder %v18228_v43, 0.0  ;;  %9888 = vmatprep.mubr.bf16.mxu0 %v8892_v34  ;;  %10049 = vmatprep.mubr.bf16.mxu1 %v8894_v15  ;;  %v20372_v15 = vld [vmem:[#allocation232_spill] sm:$0xff]  ;;  %v11006_v53 = vpop.f32.mrb[140].mxu1  ;;  %v20373_v27 = vld [vmem:[#allocation222_spill] sm:$0xff] }
 0x62e   : > { %v8766_v58 = vsel %vm20359_vm12, %v18266_v54, %v20358_v25  ;;  %v8755_v40 = vsel %vm20361_vm13, %v18204_v45, %v20360_v32  ;;  %v8763_v56 = vsel %vm20363_vm3, %v18228_v43, %v20362_v19  ;;  %v9481_v28 = vadd.f32 %v10890_v18, %v18390_v48  ;;  %v20364_v54 = vld [vmem:[#allocation166_spill] sm:$0xff] }
 0x62f   : > { %v8902_v0 = vpack.c.bf16 %v8766_v58, %v8758_v12  ;;  %v10893_v44 = vadd.f32 %v10892_v41, %v10891_v36  ;;  %v8899_v16 = vpack.c.bf16 %v8763_v56, %v8755_v40  ;;  %vm20365_vm15 = vcmp.gt.f32.partialorder %v18218_v26, 0.0 }
 0x630   : > { %v8757_v61 = vsel %vm20365_vm15, %v18218_v26, %v20364_v54  ;;  %v11005_v10 = vadd.f32 %v11004_v5, %v11003_v42  ;;  %v8765_v45 = vsel %vm8253_vm2, %v18231_v62, %v20366_v60  ;;  %v8772_v43 = vsel %vm8260_vm5, %v18293_v8, %v20367_v6 }
 0x631   : > { %vm20368_vm7 = vcmp.gt.f32.partialorder %v18335_v13, 0.0  ;;  %vm8269_vm1 = vcmp.gt.f32.partialorder %v18332_v24, 0.0  ;;  %v18554_v26 = vadd.f32 %v11002_v17, %v9481_v28  ;;  %v9484_v55 = vadd.f32 %v10893_v44, %v18390_v48 }
 0x632   : > { %v8780_v63 = vsel %vm20368_vm7, %v18335_v13, %v18368_v33  ;;  %v8901_v3 = vpack.c.bf16 %v8765_v45, %v8757_v61  ;;  %v8774_v8 = vsel %vm8262_vm0, %v18296_v9, %v20369_v11  ;;  %vm20370_vm14 = vcmp.gt.f32.partialorder %v18354_v22, 0.0  ;;  %v10895_v9 = vpop.f32.mrb[141].mxu0 }
 0x633   : > { %v8908_v62 = vpack.c.bf16 %v8780_v63, %v8772_v43  ;;  %v8782_v33 = vsel %vm20370_vm14, %v18354_v22, %v8526_v46  ;;  %v18564_v13 = vadd.f32 %v11005_v10, %v9484_v55  ;;  %v8771_v14 = vsel %vm8259_vm9, %v18283_v52, %v20371_v7  ;;  %v11007_v52 = vpop.f32.mrb[141].mxu1  ;;  %v10897_v51 = vpop.f32.mrb[142].mxu0  ;;  %9889 = vmatmul.mubr.bf16.gmra.mrb[244].mxu0 %v8891_v38 }
 0x634   : > { %v8910_v34 = vpack.c.bf16 %v8782_v33, %v8774_v8  ;;  %v8779_v37 = vsel %vm8267_vm4, %v18311_v2, %v20372_v15  ;;  %v8773_v22 = vsel %vm8261_vm10, %v18286_v31, %v20373_v27  ;;  %v8781_v46 = vsel %vm8269_vm1, %v18332_v24, %v18365_v50  ;;  %v11009_v20 = vpop.f32.mrb[142].mxu1  ;;  %v10898_v2 = vpop.f32.mrb[143].mxu0  ;;  %10050 = vmatmul.mubr.bf16.gmra.mrb[244].mxu1 %v8893_v23 }
 0x635   : > { %v8907_v39 = vpack.c.bf16 %v8779_v37, %v8771_v14  ;;  %v10896_v29 = vadd.f32 %v10895_v9, %v10894_v47  ;;  %v8909_v30 = vpack.c.bf16 %v8781_v46, %v8773_v22  ;;  %v11008_v57 = vadd.f32 %v11007_v52, %v11006_v53  ;;  %v11010_v59 = vpop.f32.mrb[143].mxu1  ;;  %9896 = vmatprep.mubr.bf16.mxu0 %v8900_v4  ;;  %v10900_v50 = vpop.f32.mrb[144].mxu0 }
 0x636   : > { %v10899_v18 = vadd.f32 %v10898_v2, %v10897_v51  ;;  %v11011_v36 = vadd.f32 %v11010_v59, %v11009_v20  ;;  %10057 = vmatprep.mubr.bf16.mxu1 %v8902_v0  ;;  %v11012_v58 = vpop.f32.mrb[144].mxu1  ;;  %v10901_v17 = vpop.f32.mrb[145].mxu0 }
 0x637   : > { %v9489_v12 = vadd.f32 %v10896_v29, %v18390_v48  ;;  %v10902_v42 = vadd.f32 %v10901_v17, %v10900_v50  ;;  %v11013_v41 = vpop.f32.mrb[145].mxu1  ;;  %v10903_v32 = vpop.f32.mrb[146].mxu0 }
 0x638   : > { %v9492_v25 = vadd.f32 %v10899_v18, %v18390_v48  ;;  %v11014_v40 = vadd.f32 %v11013_v41, %v11012_v58  ;;  %v11015_v19 = vpop.f32.mrb[146].mxu1  ;;  %v10904_v56 = vpop.f32.mrb[147].mxu0 }
 0x639   : > { %v18583_v31 = vadd.f32 %v11008_v57, %v9489_v12  ;;  %v9497_v38 = vadd.f32 %v10902_v42, %v18390_v48  ;;  %v10905_v23 = vadd.f32 %v10904_v56, %v10903_v32  ;;  %v11016_v4 = vpop.f32.mrb[147].mxu1 }
 0x63a   : > { %v18586_v24 = vadd.f32 %v11011_v36, %v9492_v25  ;;  %v11017_v28 = vadd.f32 %v11016_v4, %v11015_v19 }
 0x63b   : > { %9897 = vmatmul.mubr.bf16.gmra.mrb[248].mxu0 %v8899_v16  ;;  %v18589_v0 = vadd.f32 %v11014_v40, %v9497_v38  ;;  %v9500_v44 = vadd.f32 %v10905_v23, %v18390_v48 }
 0x63c   : > { %10058 = vmatmul.mubr.bf16.gmra.mrb[248].mxu1 %v8901_v3  ;;  %9904 = vmatprep.mubr.bf16.mxu0 %v8908_v62  ;;  %v10906_v54 = vpop.f32.mrb[148].mxu0 }
 0x63d   : > { %10065 = vmatprep.mubr.bf16.mxu1 %v8910_v34  ;;  %v18592_v5 = vadd.f32 %v11017_v28, %v9500_v44  ;;  %v11018_v61 = vpop.f32.mrb[148].mxu1  ;;  %v10907_v10 = vpop.f32.mrb[149].mxu0 }
 0x63e   : > { %v10908_v60 = vadd.f32 %v10907_v10, %v10906_v54  ;;  %v11019_v45 = vpop.f32.mrb[149].mxu1  ;;  %v10909_v6 = vpop.f32.mrb[150].mxu0 }
 0x63f   : > { %v11020_v43 = vadd.f32 %v11019_v45, %v11018_v61  ;;  %v11021_v63 = vpop.f32.mrb[150].mxu1  ;;  %v10910_v55 = vpop.f32.mrb[151].mxu0 }
 0x640   : > { %v9505_v16 = vadd.f32 %v10908_v60, %v18390_v48  ;;  %v10911_v3 = vadd.f32 %v10910_v55, %v10909_v6  ;;  %v11022_v62 = vpop.f32.mrb[151].mxu1 }
 0x641   : > { %v11023_v11 = vadd.f32 %v11022_v62, %v11021_v63 }
 0x642   : > { %v18595_v8 = vadd.f32 %v11020_v43, %v9505_v16  ;;  %v9508_v33 = vadd.f32 %v10911_v3, %v18390_v48 }
 0x643   : > { %9905 = vmatmul.mubr.bf16.gmra.mrb[252].mxu0 %v8907_v39 }
 0x644   : > { %10066 = vmatmul.mubr.bf16.gmra.mrb[252].mxu1 %v8909_v30  ;;  %v18598_v47 = vadd.f32 %v11023_v11, %v9508_v33  ;;  %v10912_v34 = vpop.f32.mrb[152].mxu0 }
 0x645   : > { %v11024_v7 = vpop.f32.mrb[152].mxu1  ;;  %v10913_v14 = vpop.f32.mrb[153].mxu0 }
 0x646   : > { %v10914_v15 = vadd.f32 %v10913_v14, %v10912_v34  ;;  %v11025_v37 = vpop.f32.mrb[153].mxu1  ;;  %v10915_v53 = vpop.f32.mrb[154].mxu0 }
 0x647   : > { %v11026_v9 = vadd.f32 %v11025_v37, %v11024_v7  ;;  %v11027_v27 = vpop.f32.mrb[154].mxu1  ;;  %v10916_v22 = vpop.f32.mrb[155].mxu0 }
 0x648   : > { %v9513_v46 = vadd.f32 %v10914_v15, %v18390_v48  ;;  %v10917_v39 = vadd.f32 %v10916_v22, %v10915_v53  ;;  %v11028_v29 = vpop.f32.mrb[155].mxu1 }
 0x649   : > { %v11029_v52 = vadd.f32 %v11028_v29, %v11027_v27 }
 0x64a   : > { %v18601_v51 = vadd.f32 %v11026_v9, %v9513_v46  ;;  %v9516_v30 = vadd.f32 %v10917_v39, %v18390_v48 }
 0x64c   : > { %v18604_v57 = vadd.f32 %v11029_v52, %v9516_v30  ;;  %v10918_v20 = vpop.f32.mrb[156].mxu0 }
 0x64d   : > { %v11030_v2 = vpop.f32.mrb[156].mxu1  ;;  %v10919_v12 = vpop.f32.mrb[157].mxu0 }
 0x64e   : > { %v10920_v18 = vadd.f32 %v10919_v12, %v10918_v20  ;;  %v11031_v59 = vpop.f32.mrb[157].mxu1  ;;  %v10921_v36 = vpop.f32.mrb[158].mxu0 }
 0x64f   : > { %v11032_v25 = vadd.f32 %v11031_v59, %v11030_v2  ;;  %v11033_v50 = vpop.f32.mrb[158].mxu1  ;;  %v10922_v58 = vpop.f32.mrb[159].mxu0 }
 0x650   : > { %v9521_v17 = vadd.f32 %v10920_v18, %v18390_v48  ;;  %v10923_v42 = vadd.f32 %v10922_v58, %v10921_v36  ;;  %v11034_v41 = vpop.f32.mrb[159].mxu1 }
 0x651   : > { %v11035_v32 = vadd.f32 %v11034_v41, %v11033_v50 }
 0x652   : > { %v18607_v40 = vadd.f32 %v11032_v25, %v9521_v17  ;;  %v9524_v19 = vadd.f32 %v10923_v42, %v18390_v48 }
 0x654   : > { %v18610_v56 = vadd.f32 %v11035_v32, %v9524_v19  ;;  %v10924_v38 = vpop.f32.mrb[160].mxu0 }
 0x655   : > { %v11036_v23 = vpop.f32.mrb[160].mxu1  ;;  %v10925_v4 = vpop.f32.mrb[161].mxu0 }
 0x656   : > { %v10926_v28 = vadd.f32 %v10925_v4, %v10924_v38  ;;  %v11037_v44 = vpop.f32.mrb[161].mxu1  ;;  %v10927_v54 = vpop.f32.mrb[162].mxu0 }
 0x657   : > { %v11038_v61 = vadd.f32 %v11037_v44, %v11036_v23  ;;  %v11039_v10 = vpop.f32.mrb[162].mxu1  ;;  %v10928_v60 = vpop.f32.mrb[163].mxu0 }
 0x658   : > { %v9529_v45 = vadd.f32 %v10926_v28, %v18390_v48  ;;  %v10929_v6 = vadd.f32 %v10928_v60, %v10927_v54  ;;  %v11040_v43 = vpop.f32.mrb[163].mxu1 }
 0x659   : > { %v11041_v63 = vadd.f32 %v11040_v43, %v11039_v10 }
 0x65a   : > { %v18613_v55 = vadd.f32 %v11038_v61, %v9529_v45  ;;  %v9532_v16 = vadd.f32 %v10929_v6, %v18390_v48 }
 0x65c   : > { %v18616_v3 = vadd.f32 %v11041_v63, %v9532_v16  ;;  %v10930_v62 = vpop.f32.mrb[164].mxu0 }
 0x65d   : > { %v11042_v11 = vpop.f32.mrb[164].mxu1  ;;  %v10931_v33 = vpop.f32.mrb[165].mxu0 }
 0x65e   : > { %v10932_v34 = vadd.f32 %v10931_v33, %v10930_v62  ;;  %v11043_v7 = vpop.f32.mrb[165].mxu1  ;;  %v10933_v14 = vpop.f32.mrb[166].mxu0 }
 0x65f   : > { %v11044_v15 = vadd.f32 %v11043_v7, %v11042_v11  ;;  %v11045_v37 = vpop.f32.mrb[166].mxu1  ;;  %v10934_v53 = vpop.f32.mrb[167].mxu0 }
 0x660   : > { %v9537_v9 = vadd.f32 %v10932_v34, %v18390_v48  ;;  %v10935_v27 = vadd.f32 %v10934_v53, %v10933_v14  ;;  %v11046_v22 = vpop.f32.mrb[167].mxu1 }
 0x661   : > { %v11047_v46 = vadd.f32 %v11046_v22, %v11045_v37 }
 0x662   : > { %v18619_v39 = vadd.f32 %v11044_v15, %v9537_v9  ;;  %v9540_v29 = vadd.f32 %v10935_v27, %v18390_v48 }
 0x664   : > { %v18622_v52 = vadd.f32 %v11047_v46, %v9540_v29  ;;  %v10936_v30 = vpop.f32.mrb[168].mxu0 }
 0x665   : > { %v11048_v20 = vpop.f32.mrb[168].mxu1  ;;  %v10937_v2 = vpop.f32.mrb[169].mxu0 }
 0x666   : > { %v10938_v12 = vadd.f32 %v10937_v2, %v10936_v30  ;;  %v11049_v18 = vpop.f32.mrb[169].mxu1  ;;  %v10939_v59 = vpop.f32.mrb[170].mxu0 }
 0x667   : > { %v11050_v36 = vadd.f32 %v11049_v18, %v11048_v20  ;;  %v11051_v25 = vpop.f32.mrb[170].mxu1  ;;  %v10940_v50 = vpop.f32.mrb[171].mxu0 }
 0x668   : > { %v9545_v58 = vadd.f32 %v10938_v12, %v18390_v48  ;;  %v10941_v17 = vadd.f32 %v10940_v50, %v10939_v59  ;;  %v11052_v42 = vpop.f32.mrb[171].mxu1 }
 0x669   : > { %v11053_v41 = vadd.f32 %v11052_v42, %v11051_v25 }
 0x66a   : > { %v18625_v32 = vadd.f32 %v11050_v36, %v9545_v58  ;;  %v9548_v19 = vadd.f32 %v10941_v17, %v18390_v48 }
 0x66c   : > { %v18628_v38 = vadd.f32 %v11053_v41, %v9548_v19  ;;  %v10942_v23 = vpop.f32.mrb[172].mxu0 }
 0x66d   : > { %v11054_v4 = vpop.f32.mrb[172].mxu1  ;;  %v10943_v28 = vpop.f32.mrb[173].mxu0 }
 0x66e   : > { %v10944_v44 = vadd.f32 %v10943_v28, %v10942_v23  ;;  %v11055_v54 = vpop.f32.mrb[173].mxu1  ;;  %v10945_v61 = vpop.f32.mrb[174].mxu0 }
 0x66f   : > { %v11056_v10 = vadd.f32 %v11055_v54, %v11054_v4  ;;  %v11057_v60 = vpop.f32.mrb[174].mxu1  ;;  %v10946_v45 = vpop.f32.mrb[175].mxu0 }
 0x670   : > { %v9553_v6 = vadd.f32 %v10944_v44, %v18390_v48  ;;  %v10947_v43 = vadd.f32 %v10946_v45, %v10945_v61  ;;  %v11058_v63 = vpop.f32.mrb[175].mxu1 }
 0x671   : > { %v11059_v16 = vadd.f32 %v11058_v63, %v11057_v60 }
 0x672   : > { %v18631_v62 = vadd.f32 %v11056_v10, %v9553_v6  ;;  %v9556_v11 = vadd.f32 %v10947_v43, %v18390_v48 }
 0x674   : > { %v18634_v33 = vadd.f32 %v11059_v16, %v9556_v11  ;;  %v10948_v34 = vpop.f32.mrb[176].mxu0 }
 0x675   : > { %v11060_v7 = vpop.f32.mrb[176].mxu1  ;;  %v10949_v14 = vpop.f32.mrb[177].mxu0 }
 0x676   : > { %v10950_v15 = vadd.f32 %v10949_v14, %v10948_v34  ;;  %v11061_v37 = vpop.f32.mrb[177].mxu1  ;;  %v10951_v53 = vpop.f32.mrb[178].mxu0 }
 0x677   : > { %v11062_v9 = vadd.f32 %v11061_v37, %v11060_v7  ;;  %v11063_v27 = vpop.f32.mrb[178].mxu1  ;;  %v10952_v22 = vpop.f32.mrb[179].mxu0 }
 0x678   : > { %v9561_v46 = vadd.f32 %v10950_v15, %v18390_v48  ;;  %v10953_v29 = vadd.f32 %v10952_v22, %v10951_v53  ;;  %v11064_v30 = vpop.f32.mrb[179].mxu1 }
 0x679   : > { %v11065_v20 = vadd.f32 %v11064_v30, %v11063_v27 }
 0x67a   : > { %v18637_v2 = vadd.f32 %v11062_v9, %v9561_v46  ;;  %v9564_v12 = vadd.f32 %v10953_v29, %v18390_v48 }
 0x67c   : > { %v18640_v18 = vadd.f32 %v11065_v20, %v9564_v12  ;;  %v10954_v59 = vpop.f32.mrb[180].mxu0 }
 0x67d   : > { %v11066_v36 = vpop.f32.mrb[180].mxu1  ;;  %v10955_v25 = vpop.f32.mrb[181].mxu0 }
 0x67e   : > { %v10956_v50 = vadd.f32 %v10955_v25, %v10954_v59  ;;  %v11067_v58 = vpop.f32.mrb[181].mxu1  ;;  %v10957_v17 = vpop.f32.mrb[182].mxu0 }
 0x67f   : > { %v11068_v42 = vadd.f32 %v11067_v58, %v11066_v36  ;;  %v11069_v41 = vpop.f32.mrb[182].mxu1  ;;  %v10958_v19 = vpop.f32.mrb[183].mxu0 }
 0x680   : > { %v9569_v23 = vadd.f32 %v10956_v50, %v18390_v48  ;;  %v10959_v4 = vadd.f32 %v10958_v19, %v10957_v17  ;;  %v11070_v28 = vpop.f32.mrb[183].mxu1 }
 0x681   : > { %v11071_v44 = vadd.f32 %v11070_v28, %v11069_v41 }
 0x682   : > { %v18643_v54 = vadd.f32 %v11068_v42, %v9569_v23  ;;  %v9572_v61 = vadd.f32 %v10959_v4, %v18390_v48 }
 0x684   : > { %v18646_v10 = vadd.f32 %v11071_v44, %v9572_v61  ;;  %v10960_v60 = vpop.f32.mrb[184].mxu0 }
 0x685   : > { %v11072_v45 = vpop.f32.mrb[184].mxu1  ;;  %v10961_v6 = vpop.f32.mrb[185].mxu0 }
 0x686   : > { %v10962_v43 = vadd.f32 %v10961_v6, %v10960_v60  ;;  %v11073_v63 = vpop.f32.mrb[185].mxu1  ;;  %v10963_v16 = vpop.f32.mrb[186].mxu0 }
 0x687   : > { %v11074_v11 = vadd.f32 %v11073_v63, %v11072_v45  ;;  %v11075_v34 = vpop.f32.mrb[186].mxu1  ;;  %v10964_v7 = vpop.f32.mrb[187].mxu0 }
 0x688   : > { %v9577_v14 = vadd.f32 %v10962_v43, %v18390_v48  ;;  %v10965_v15 = vadd.f32 %v10964_v7, %v10963_v16  ;;  %v11076_v37 = vpop.f32.mrb[187].mxu1 }
 0x689   : > { %v11077_v53 = vadd.f32 %v11076_v37, %v11075_v34 }
 0x68a   : > { %v18649_v9 = vadd.f32 %v11074_v11, %v9577_v14  ;;  %v9580_v27 = vadd.f32 %v10965_v15, %v18390_v48 }
 0x68c   : > { %v18652_v22 = vadd.f32 %v11077_v53, %v9580_v27  ;;  %v10966_v46 = vpop.f32.mrb[188].mxu0 }
 0x68d   : > { %v11078_v29 = vpop.f32.mrb[188].mxu1  ;;  %v10967_v30 = vpop.f32.mrb[189].mxu0 }
 0x68e   : > { %v10968_v20 = vadd.f32 %v10967_v30, %v10966_v46  ;;  %v11079_v12 = vpop.f32.mrb[189].mxu1  ;;  %v10969_v59 = vpop.f32.mrb[190].mxu0 }
 0x68f   : > { %v11080_v36 = vadd.f32 %v11079_v12, %v11078_v29  ;;  %v11081_v25 = vpop.f32.mrb[190].mxu1  ;;  %v10970_v50 = vpop.f32.mrb[191].mxu0 }
 0x690   : > { %v9585_v58 = vadd.f32 %v10968_v20, %v18390_v48  ;;  %v10971_v17 = vadd.f32 %v10970_v50, %v10969_v59  ;;  %v11082_v42 = vpop.f32.mrb[191].mxu1 }
 0x691   : > { %v11083_v41 = vadd.f32 %v11082_v42, %v11081_v25 }
 0x692   : > { %v18655_v19 = vadd.f32 %v11080_v36, %v9585_v58  ;;  %v9588_v23 = vadd.f32 %v10971_v17, %v18390_v48 }
 0x694   : > { %v18658_v4 = vadd.f32 %v11083_v41, %v9588_v23  ;;  %v11100_v28 = vpop.f32.mrb[192].mxu0 }
 0x695   : > { %v11212_v44 = vpop.f32.mrb[192].mxu1  ;;  %v11101_v61 = vpop.f32.mrb[193].mxu0 }
 0x696   : > { %v11102_v60 = vadd.f32 %v11101_v61, %v11100_v28  ;;  %v11213_v45 = vpop.f32.mrb[193].mxu1  ;;  %v11103_v6 = vpop.f32.mrb[194].mxu0 }
 0x697   : > { %v11214_v43 = vadd.f32 %v11213_v45, %v11212_v44  ;;  %v11215_v63 = vpop.f32.mrb[194].mxu1  ;;  %v11104_v16 = vpop.f32.mrb[195].mxu0 }
 0x698   : > { %v9787_v11 = vadd.f32 %v11102_v60, %v18427_v1  ;;  %v11105_v34 = vadd.f32 %v11104_v16, %v11103_v6  ;;  %v11216_v7 = vpop.f32.mrb[195].mxu1 }
 0x699   : > { %v11217_v14 = vadd.f32 %v11216_v7, %v11215_v63 }
 0x69a   : > { %v9948_v15 = vadd.f32 %v11214_v43, %v9787_v11  ;;  %v9790_v48 = vadd.f32 %v11105_v34, %v18444_v21 }
 0x69c   : > { %10074 = vst [vmem:[%s18663_s29] sm:$0xff] %v9948_v15  ;;  %v9951_v37 = vadd.f32 %v11217_v14, %v9790_v48  ;;  %v11106_v53 = vpop.f32.mrb[196].mxu0 }
 0x69d   : > { %v11218_v27 = vpop.f32.mrb[196].mxu1  ;;  %v11107_v46 = vpop.f32.mrb[197].mxu0 }
 0x69e   : > { %10075 = vst [vmem:[%s18663_s29 + $0x8] sm:$0xff] %v9951_v37  ;;  %v11108_v29 = vadd.f32 %v11107_v46, %v11106_v53  ;;  %v11219_v30 = vpop.f32.mrb[197].mxu1  ;;  %v11109_v1 = vpop.f32.mrb[198].mxu0 }
 0x69f   : > { %v11220_v20 = vadd.f32 %v11219_v30, %v11218_v27  ;;  %v11221_v12 = vpop.f32.mrb[198].mxu1  ;;  %v11110_v59 = vpop.f32.mrb[199].mxu0 }
 0x6a0   : > { %v9795_v21 = vadd.f32 %v11108_v29, %v18477_v35  ;;  %v11111_v36 = vadd.f32 %v11110_v59, %v11109_v1  ;;  %v11222_v25 = vpop.f32.mrb[199].mxu1 }
 0x6a1   : > { %v11223_v50 = vadd.f32 %v11222_v25, %v11221_v12 }
 0x6a2   : > { %v9956_v58 = vadd.f32 %v11220_v20, %v9795_v21  ;;  %v9798_v17 = vadd.f32 %v11111_v36, %v18500_v49 }
 0x6a4   : > { %10076 = vst [vmem:[%s18663_s29 + $0x10] sm:$0xff] %v9956_v58  ;;  %v9959_v42 = vadd.f32 %v11223_v50, %v9798_v17  ;;  %v11112_v41 = vpop.f32.mrb[200].mxu0 }
 0x6a5   : > { %v11224_v23 = vpop.f32.mrb[200].mxu1  ;;  %v11113_v28 = vpop.f32.mrb[201].mxu0 }
 0x6a6   : > { %10077 = vst [vmem:[%s18663_s29 + $0x18] sm:$0xff] %v9959_v42  ;;  %v11114_v44 = vadd.f32 %v11113_v28, %v11112_v41  ;;  %v11225_v61 = vpop.f32.mrb[201].mxu1  ;;  %v11115_v60 = vpop.f32.mrb[202].mxu0 }
 0x6a7   : > { %v11226_v45 = vadd.f32 %v11225_v61, %v11224_v23  ;;  %v11227_v6 = vpop.f32.mrb[202].mxu1  ;;  %v11116_v35 = vpop.f32.mrb[203].mxu0 }
 0x6a8   : > { %v9803_v43 = vadd.f32 %v11114_v44, %v18554_v26  ;;  %v11117_v63 = vadd.f32 %v11116_v35, %v11115_v60  ;;  %v11228_v16 = vpop.f32.mrb[203].mxu1 }
 0x6a9   : > { %v11229_v11 = vadd.f32 %v11228_v16, %v11227_v6 }
 0x6aa   : > { %v9964_v49 = vadd.f32 %v11226_v45, %v9803_v43  ;;  %v9806_v34 = vadd.f32 %v11117_v63, %v18564_v13 }
 0x6ac   : > { %10078 = vst [vmem:[%s18663_s29 + $0x20] sm:$0xff] %v9964_v49  ;;  %v9967_v7 = vadd.f32 %v11229_v11, %v9806_v34  ;;  %v11118_v14 = vpop.f32.mrb[204].mxu0 }
 0x6ad   : > { %v11230_v15 = vpop.f32.mrb[204].mxu1  ;;  %v11119_v48 = vpop.f32.mrb[205].mxu0 }
 0x6ae   : > { %10079 = vst [vmem:[%s18663_s29 + $0x28] sm:$0xff] %v9967_v7  ;;  %v11120_v37 = vadd.f32 %v11119_v48, %v11118_v14  ;;  %v11231_v53 = vpop.f32.mrb[205].mxu1  ;;  %v11121_v27 = vpop.f32.mrb[206].mxu0 }
 0x6af   : > { %v11232_v46 = vadd.f32 %v11231_v53, %v11230_v15  ;;  %v11233_v29 = vpop.f32.mrb[206].mxu1  ;;  %v11122_v26 = vpop.f32.mrb[207].mxu0 }
 0x6b0   : > { %v9811_v30 = vadd.f32 %v11120_v37, %v18583_v31  ;;  %v11123_v1 = vadd.f32 %v11122_v26, %v11121_v27  ;;  %v11234_v20 = vpop.f32.mrb[207].mxu1 }
 0x6b1   : > { %v11235_v12 = vadd.f32 %v11234_v20, %v11233_v29 }
 0x6b2   : > { %v9972_v13 = vadd.f32 %v11232_v46, %v9811_v30  ;;  %v9814_v59 = vadd.f32 %v11123_v1, %v18586_v24 }
 0x6b4   : > { %10080 = vst [vmem:[%s18663_s29 + $0x30] sm:$0xff] %v9972_v13  ;;  %v9975_v21 = vadd.f32 %v11235_v12, %v9814_v59  ;;  %v11124_v36 = vpop.f32.mrb[208].mxu0 }
 0x6b5   : > { %v11236_v25 = vpop.f32.mrb[208].mxu1  ;;  %v11125_v50 = vpop.f32.mrb[209].mxu0 }
 0x6b6   : > { %10081 = vst [vmem:[%s18663_s29 + $0x38] sm:$0xff] %v9975_v21  ;;  %v11126_v58 = vadd.f32 %v11125_v50, %v11124_v36  ;;  %v11237_v17 = vpop.f32.mrb[209].mxu1  ;;  %v11127_v42 = vpop.f32.mrb[210].mxu0 }
 0x6b7   : > { %v11238_v41 = vadd.f32 %v11237_v17, %v11236_v25  ;;  %v11239_v23 = vpop.f32.mrb[210].mxu1  ;;  %v11128_v31 = vpop.f32.mrb[211].mxu0 }
 0x6b8   : > { %v9819_v28 = vadd.f32 %v11126_v58, %v18589_v0  ;;  %v11129_v44 = vadd.f32 %v11128_v31, %v11127_v42  ;;  %v11240_v61 = vpop.f32.mrb[211].mxu1 }
 0x6b9   : > { %v11241_v60 = vadd.f32 %v11240_v61, %v11239_v23 }
 0x6ba   : > { %v9980_v24 = vadd.f32 %v11238_v41, %v9819_v28  ;;  %v9822_v45 = vadd.f32 %v11129_v44, %v18592_v5 }
 0x6bc   : > { %10082 = vst [vmem:[%s18663_s29 + $0x40] sm:$0xff] %v9980_v24  ;;  %v9983_v6 = vadd.f32 %v11241_v60, %v9822_v45  ;;  %v11130_v35 = vpop.f32.mrb[212].mxu0 }
 0x6bd   : > { %v11242_v43 = vpop.f32.mrb[212].mxu1  ;;  %v11131_v63 = vpop.f32.mrb[213].mxu0 }
 0x6be   : > { %10083 = vst [vmem:[%s18663_s29 + $0x48] sm:$0xff] %v9983_v6  ;;  %v11132_v16 = vadd.f32 %v11131_v63, %v11130_v35  ;;  %v11243_v11 = vpop.f32.mrb[213].mxu1  ;;  %v11133_v49 = vpop.f32.mrb[214].mxu0 }
 0x6bf   : > { %v11244_v34 = vadd.f32 %v11243_v11, %v11242_v43  ;;  %v11245_v7 = vpop.f32.mrb[214].mxu1  ;;  %v11134_v0 = vpop.f32.mrb[215].mxu0 }
 0x6c0   : > { %v9827_v14 = vadd.f32 %v11132_v16, %v18595_v8  ;;  %v11135_v15 = vadd.f32 %v11134_v0, %v11133_v49  ;;  %v11246_v48 = vpop.f32.mrb[215].mxu1 }
 0x6c1   : > { %v11247_v37 = vadd.f32 %v11246_v48, %v11245_v7 }
 0x6c2   : > { %v9988_v5 = vadd.f32 %v11244_v34, %v9827_v14  ;;  %v9830_v53 = vadd.f32 %v11135_v15, %v18598_v47 }
 0x6c4   : > { %10084 = vst [vmem:[%s18663_s29 + $0x50] sm:$0xff] %v9988_v5  ;;  %v9991_v27 = vadd.f32 %v11247_v37, %v9830_v53  ;;  %v11136_v46 = vpop.f32.mrb[216].mxu0 }
 0x6c5   : > { %v11248_v29 = vpop.f32.mrb[216].mxu1  ;;  %v11137_v26 = vpop.f32.mrb[217].mxu0 }
 0x6c6   : > { %10085 = vst [vmem:[%s18663_s29 + $0x58] sm:$0xff] %v9991_v27  ;;  %v11138_v30 = vadd.f32 %v11137_v26, %v11136_v46  ;;  %v11249_v1 = vpop.f32.mrb[217].mxu1  ;;  %v11139_v20 = vpop.f32.mrb[218].mxu0 }
 0x6c7   : > { %v11250_v12 = vadd.f32 %v11249_v1, %v11248_v29  ;;  %v11251_v13 = vpop.f32.mrb[218].mxu1  ;;  %v11140_v8 = vpop.f32.mrb[219].mxu0 }
 0x6c8   : > { %v9835_v59 = vadd.f32 %v11138_v30, %v18601_v51  ;;  %v11141_v21 = vadd.f32 %v11140_v8, %v11139_v20  ;;  %v11252_v36 = vpop.f32.mrb[219].mxu1 }
 0x6c9   : > { %v11253_v25 = vadd.f32 %v11252_v36, %v11251_v13 }
 0x6ca   : > { %v9996_v47 = vadd.f32 %v11250_v12, %v9835_v59  ;;  %v9838_v50 = vadd.f32 %v11141_v21, %v18604_v57 }
 0x6cc   : > { %10086 = vst [vmem:[%s18663_s29 + $0x60] sm:$0xff] %v9996_v47  ;;  %v9999_v58 = vadd.f32 %v11253_v25, %v9838_v50  ;;  %v11142_v17 = vpop.f32.mrb[220].mxu0 }
 0x6cd   : > { %v11254_v42 = vpop.f32.mrb[220].mxu1  ;;  %v11143_v41 = vpop.f32.mrb[221].mxu0 }
 0x6ce   : > { %10087 = vst [vmem:[%s18663_s29 + $0x68] sm:$0xff] %v9999_v58  ;;  %v11144_v23 = vadd.f32 %v11143_v41, %v11142_v17  ;;  %v11255_v31 = vpop.f32.mrb[221].mxu1  ;;  %v11145_v28 = vpop.f32.mrb[222].mxu0 }
 0x6cf   : > { %v11256_v44 = vadd.f32 %v11255_v31, %v11254_v42  ;;  %v11257_v61 = vpop.f32.mrb[222].mxu1  ;;  %v11146_v51 = vpop.f32.mrb[223].mxu0 }
 0x6d0   : > { %v9843_v60 = vadd.f32 %v11144_v23, %v18607_v40  ;;  %v11147_v24 = vadd.f32 %v11146_v51, %v11145_v28  ;;  %v11258_v45 = vpop.f32.mrb[223].mxu1 }
 0x6d1   : > { %v11259_v6 = vadd.f32 %v11258_v45, %v11257_v61 }
 0x6d2   : > { %v10004_v57 = vadd.f32 %v11256_v44, %v9843_v60  ;;  %v9846_v35 = vadd.f32 %v11147_v24, %v18610_v56 }
 0x6d4   : > { %10088 = vst [vmem:[%s18663_s29 + $0x70] sm:$0xff] %v10004_v57  ;;  %v10007_v43 = vadd.f32 %v11259_v6, %v9846_v35  ;;  %v11148_v63 = vpop.f32.mrb[224].mxu0 }
 0x6d5   : > { %v11260_v16 = vpop.f32.mrb[224].mxu1  ;;  %v11149_v11 = vpop.f32.mrb[225].mxu0 }
 0x6d6   : > { %10089 = vst [vmem:[%s18663_s29 + $0x78] sm:$0xff] %v10007_v43  ;;  %v11150_v49 = vadd.f32 %v11149_v11, %v11148_v63  ;;  %v11261_v34 = vpop.f32.mrb[225].mxu1  ;;  %v11151_v7 = vpop.f32.mrb[226].mxu0 }
 0x6d7   : > { %v11262_v0 = vadd.f32 %v11261_v34, %v11260_v16  ;;  %v11263_v14 = vpop.f32.mrb[226].mxu1  ;;  %v11152_v40 = vpop.f32.mrb[227].mxu0 }
 0x6d8   : > { %v9851_v15 = vadd.f32 %v11150_v49, %v18613_v55  ;;  %v11153_v48 = vadd.f32 %v11152_v40, %v11151_v7  ;;  %v11264_v37 = vpop.f32.mrb[227].mxu1 }
 0x6d9   : > { %v11265_v5 = vadd.f32 %v11264_v37, %v11263_v14 }
 0x6da   : > { %v10012_v56 = vadd.f32 %v11262_v0, %v9851_v15  ;;  %v9854_v53 = vadd.f32 %v11153_v48, %v18616_v3 }
 0x6dc   : > { %10090 = vst [vmem:[%s18663_s29 + $0x80] sm:$0xff] %v10012_v56  ;;  %v10015_v27 = vadd.f32 %v11265_v5, %v9854_v53 }
 0x6de   : > { %10091 = vst [vmem:[%s18663_s29 + $0x88] sm:$0xff] %v10015_v27 }
 0x6e2   : > { %v11154_v46 = vpop.f32.mrb[228].mxu0 }
 0x6e3   : > { %v11266_v29 = vpop.f32.mrb[228].mxu1  ;;  %v11155_v26 = vpop.f32.mrb[229].mxu0 }
 0x6e4   : > { %v11267_v30 = vpop.f32.mrb[229].mxu1  ;;  %v11156_v1 = vadd.f32 %v11155_v26, %v11154_v46  ;;  %v11157_v12 = vpop.f32.mrb[230].mxu0 }
 0x6e5   : > { %v11268_v20 = vadd.f32 %v11267_v30, %v11266_v29  ;;  %v11269_v13 = vpop.f32.mrb[230].mxu1  ;;  %v11158_v55 = vpop.f32.mrb[231].mxu0 }
 0x6e6   : > { %v11270_v8 = vpop.f32.mrb[231].mxu1  ;;  %v9859_v59 = vadd.f32 %v11156_v1, %v18619_v39  ;;  %v11159_v21 = vadd.f32 %v11158_v55, %v11157_v12 }
 0x6e7   : > { %v11271_v36 = vadd.f32 %v11270_v8, %v11269_v13 }
 0x6e8   : > { %v10020_v3 = vadd.f32 %v11268_v20, %v9859_v59  ;;  %v9862_v25 = vadd.f32 %v11159_v21, %v18622_v52 }
 0x6ea   : > { %10092 = vst [vmem:[%s18663_s29 + $0x90] sm:$0xff] %v10020_v3  ;;  %v10023_v47 = vadd.f32 %v11271_v36, %v9862_v25 }
 0x6ec   : > { %10093 = vst [vmem:[%s18663_s29 + $0x98] sm:$0xff] %v10023_v47 }
 0x6ee   : > { %v11160_v50 = vpop.f32.mrb[232].mxu0 }
 0x6ef   : > { %v11272_v58 = vpop.f32.mrb[232].mxu1  ;;  %v11161_v17 = vpop.f32.mrb[233].mxu0 }
 0x6f0   : > { %v11162_v42 = vadd.f32 %v11161_v17, %v11160_v50  ;;  %v11273_v41 = vpop.f32.mrb[233].mxu1  ;;  %v11163_v23 = vpop.f32.mrb[234].mxu0 }
 0x6f1   : > { %v11274_v31 = vadd.f32 %v11273_v41, %v11272_v58  ;;  %v11275_v28 = vpop.f32.mrb[234].mxu1  ;;  %v11164_v44 = vpop.f32.mrb[235].mxu0 }
 0x6f2   : > { %v9867_v39 = vadd.f32 %v11162_v42, %v18625_v32  ;;  %v11165_v61 = vadd.f32 %v11164_v44, %v11163_v23  ;;  %v11276_v51 = vpop.f32.mrb[235].mxu1 }
 0x6f3   : > { %v11277_v60 = vadd.f32 %v11276_v51, %v11275_v28 }
 0x6f4   : > { %v10028_v52 = vadd.f32 %v11274_v31, %v9867_v39  ;;  %v9870_v24 = vadd.f32 %v11165_v61, %v18628_v38 }
 0x6f6   : > { %10094 = vst [vmem:[%s18663_s29 + $0xa0] sm:$0xff] %v10028_v52  ;;  %v10031_v45 = vadd.f32 %v11277_v60, %v9870_v24  ;;  %v11166_v6 = vpop.f32.mrb[236].mxu0 }
 0x6f7   : > { %v11278_v57 = vpop.f32.mrb[236].mxu1  ;;  %v11167_v35 = vpop.f32.mrb[237].mxu0 }
 0x6f8   : > { %10095 = vst [vmem:[%s18663_s29 + $0xa8] sm:$0xff] %v10031_v45  ;;  %v11168_v43 = vadd.f32 %v11167_v35, %v11166_v6  ;;  %v11279_v63 = vpop.f32.mrb[237].mxu1  ;;  %v11169_v16 = vpop.f32.mrb[238].mxu0 }
 0x6f9   : > { %v11280_v11 = vadd.f32 %v11279_v63, %v11278_v57  ;;  %v11281_v49 = vpop.f32.mrb[238].mxu1  ;;  %v11170_v32 = vpop.f32.mrb[239].mxu0 }
 0x6fa   : > { %v9875_v34 = vadd.f32 %v11168_v43, %v18631_v62  ;;  %v11171_v7 = vadd.f32 %v11170_v32, %v11169_v16  ;;  %v11282_v0 = vpop.f32.mrb[239].mxu1 }
 0x6fb   : > { %v11283_v14 = vadd.f32 %v11282_v0, %v11281_v49 }
 0x6fc   : > { %v10036_v38 = vadd.f32 %v11280_v11, %v9875_v34  ;;  %v9878_v40 = vadd.f32 %v11171_v7, %v18634_v33 }
 0x6fe   : > { %10096 = vst [vmem:[%s18663_s29 + $0xb0] sm:$0xff] %v10036_v38  ;;  %v10039_v15 = vadd.f32 %v11283_v14, %v9878_v40  ;;  %v11172_v48 = vpop.f32.mrb[240].mxu0 }
 0x6ff   : > { %v11284_v37 = vpop.f32.mrb[240].mxu1  ;;  %v11173_v5 = vpop.f32.mrb[241].mxu0 }
 0x700   : > { %10097 = vst [vmem:[%s18663_s29 + $0xb8] sm:$0xff] %v10039_v15  ;;  %v11174_v56 = vadd.f32 %v11173_v5, %v11172_v48  ;;  %v11285_v53 = vpop.f32.mrb[241].mxu1  ;;  %v11175_v27 = vpop.f32.mrb[242].mxu0 }
 0x701   : > { %v11286_v46 = vadd.f32 %v11285_v53, %v11284_v37  ;;  %v11287_v29 = vpop.f32.mrb[242].mxu1  ;;  %v11176_v62 = vpop.f32.mrb[243].mxu0 }
 0x702   : > { %v9883_v26 = vadd.f32 %v11174_v56, %v18637_v2  ;;  %v11177_v30 = vadd.f32 %v11176_v62, %v11175_v27  ;;  %v11288_v1 = vpop.f32.mrb[243].mxu1 }
 0x703   : > { %v11289_v20 = vadd.f32 %v11288_v1, %v11287_v29 }
 0x704   : > { %v10044_v33 = vadd.f32 %v11286_v46, %v9883_v26  ;;  %v9886_v12 = vadd.f32 %v11177_v30, %v18640_v18 }
 0x706   : > { %10098 = vst [vmem:[%s18663_s29 + $0xc0] sm:$0xff] %v10044_v33  ;;  %v10047_v13 = vadd.f32 %v11289_v20, %v9886_v12  ;;  %v11178_v55 = vpop.f32.mrb[244].mxu0 }
 0x707   : > { %v11290_v8 = vpop.f32.mrb[244].mxu1  ;;  %v11179_v59 = vpop.f32.mrb[245].mxu0 }
 0x708   : > { %10099 = vst [vmem:[%s18663_s29 + $0xc8] sm:$0xff] %v10047_v13  ;;  %v11180_v21 = vadd.f32 %v11179_v59, %v11178_v55  ;;  %v11291_v36 = vpop.f32.mrb[245].mxu1  ;;  %v11181_v3 = vpop.f32.mrb[246].mxu0 }
 0x709   : > { %v11292_v25 = vadd.f32 %v11291_v36, %v11290_v8  ;;  %v11293_v47 = vpop.f32.mrb[246].mxu1  ;;  %v11182_v2 = vpop.f32.mrb[247].mxu0 }
 0x70a   : > { %v9891_v50 = vadd.f32 %v11180_v21, %v18643_v54  ;;  %v11183_v58 = vadd.f32 %v11182_v2, %v11181_v3  ;;  %v11294_v17 = vpop.f32.mrb[247].mxu1 }
 0x70b   : > { %v11295_v42 = vadd.f32 %v11294_v17, %v11293_v47 }
 0x70c   : > { %v10052_v18 = vadd.f32 %v11292_v25, %v9891_v50  ;;  %v9894_v41 = vadd.f32 %v11183_v58, %v18646_v10 }
 0x70e   : > { %10100 = vst [vmem:[%s18663_s29 + $0xd0] sm:$0xff] %v10052_v18  ;;  %v10055_v23 = vadd.f32 %v11295_v42, %v9894_v41  ;;  %v11184_v31 = vpop.f32.mrb[248].mxu0 }
 0x70f   : > { %v11296_v28 = vpop.f32.mrb[248].mxu1  ;;  %v11185_v44 = vpop.f32.mrb[249].mxu0 }
 0x710   : > { %10101 = vst [vmem:[%s18663_s29 + $0xd8] sm:$0xff] %v10055_v23  ;;  %v11186_v39 = vadd.f32 %v11185_v44, %v11184_v31  ;;  %v11297_v61 = vpop.f32.mrb[249].mxu1  ;;  %v11187_v51 = vpop.f32.mrb[250].mxu0 }
 0x711   : > { %v11298_v60 = vadd.f32 %v11297_v61, %v11296_v28  ;;  %v11299_v52 = vpop.f32.mrb[250].mxu1  ;;  %v11188_v54 = vpop.f32.mrb[251].mxu0 }
 0x712   : > { %v9899_v24 = vadd.f32 %v11186_v39, %v18649_v9  ;;  %v11189_v45 = vadd.f32 %v11188_v54, %v11187_v51  ;;  %v11300_v6 = vpop.f32.mrb[251].mxu1 }
 0x713   : > { %v11301_v57 = vadd.f32 %v11300_v6, %v11299_v52 }
 0x714   : > { %v10060_v10 = vadd.f32 %v11298_v60, %v9899_v24  ;;  %v9902_v35 = vadd.f32 %v11189_v45, %v18652_v22 }
 0x716   : > { %10102 = vst [vmem:[%s18663_s29 + $0xe0] sm:$0xff] %v10060_v10  ;;  %v10063_v43 = vadd.f32 %v11301_v57, %v9902_v35  ;;  %v11190_v63 = vpop.f32.mrb[252].mxu0 }
 0x717   : > { %v11302_v16 = vpop.f32.mrb[252].mxu1  ;;  %v11191_v11 = vpop.f32.mrb[253].mxu0 }
 0x718   : > { %10103 = vst [vmem:[%s18663_s29 + $0xe8] sm:$0xff] %v10063_v43  ;;  %v11192_v49 = vadd.f32 %v11191_v11, %v11190_v63  ;;  %v11303_v32 = vpop.f32.mrb[253].mxu1  ;;  %v11193_v34 = vpop.f32.mrb[254].mxu0 }
 0x719   : > { %v11304_v9 = vadd.f32 %v11303_v32, %v11302_v16  ;;  %v11305_v7 = vpop.f32.mrb[254].mxu1  ;;  %v11194_v0 = vpop.f32.mrb[255].mxu0 }
 0x71a   : > { %v9907_v14 = vadd.f32 %v11192_v49, %v18655_v19  ;;  %v11195_v22 = vadd.f32 %v11194_v0, %v11193_v34  ;;  %v11306_v38 = vpop.f32.mrb[255].mxu1 }
 0x71b   : > { %v11307_v40 = vadd.f32 %v11306_v38, %v11305_v7 }
 0x71c   : > { %v10068_v15 = vadd.f32 %v11304_v9, %v9907_v14  ;;  %v9910_v48 = vadd.f32 %v11195_v22, %v18658_v4 }
 0x71e   : > { %10104 = vst [vmem:[%s18663_s29 + $0xf0] sm:$0xff] %v10068_v15  ;;  %v10071_v19 = vadd.f32 %v11307_v40, %v9910_v48 }
 0x720   : > { %10105 = vst [vmem:[%s18663_s29 + $0xf8] sm:$0xff] %v10071_v19 }
 0x721   : > { %12703 = shalt.err (!%p12700_p8)
}
 0x722   : > { %s12704_s9 = scalar_lea.hbm %s18730_s15, 4096  ;;  %s12708_s28 = scalar_lea.hbm %s18789_s6, 8192 }
 0x723   : > { %p12705_p3 = scmp.ne.s32.totalorder %s18730_s15, %s12704_s9  ;;  %p12709_p13 = scmp.lt.u32.totalorder %s18730_s15, %s18789_s6 }
 0x724   : > { %p12710_p12 = scmp.lt.u32.totalorder %s12708_s28, %s12704_s9  ;;  %p12712_p2 = scmp.lt.u32.totalorder %s12704_s9, %s18730_s15 }
 0x725   : > { %p12706_p11 = pnand %p12705_p3, %p20374_p9 }
 0x726   : > { %p12711_p4 = por %p12710_p12, %p12709_p13 }
 0x727   : > { %p12707_p6 = pneg %p12706_p11 }
 0x728   : > { %p12713_p10 = por %p12712_p2, %p12711_p4 }
 0x72a   : > { %p12714_p1 = pnand %p12713_p10, %p12707_p6 }
 0x72c   : > { %12717 = shalt.err (!%p12714_p1)
}
 0x72d   : > { %s12798_s8 = smov 128   ;;  %s12799_s13 = smov 8  }
 0x72e   : > { %12354 = dma.vmem_to_hbm [thread:$0]  (%p20374_p9), %s18732_s11, 4096, %s18730_s15, %s10107_s30, %s12798_s8, %s12798_s8, %s12799_s13  }
 0x72f PF: > { %s10137_s24 = sand.u32 1, %s12764_s21   ;;  %p20375_p0 = scmp.ne.s32.totalorder %s19277_s20, 0 }
 0x730   : > { %p20376_p7 = scmp.ge.s32.totalorder %s12784_s26, 2  ;;  %s10138_s18 = scalar_lea.sflag [#allocation4], %s10137_s24 }
 0x732   : > { %p12377_p5 = pnand %p20376_p7, %p20375_p0 }
 0x734   : > { %12759 = dma.done.wait (!%p12377_p5), %s10138_s18, 4096  }
 0x735   : > { %12761 = vsyncadd (!%p12377_p5), %s10138_s18, 4294963200  ;;  %s25_s26 = sadd.s32 1, %s12784_s26   ;;  %s20377_s21 = smov %s12768_s22 }
 0x736   : > { %p22_p8 = scmp.ge.s32.totalorder %s25_s26, 4   ;;  %s20378_s22 = smov %s12772_s23 }
 0x737   : > { %s20379_s23 = smov %s13032_s19  ;;  %s20380_s24 = smov %s12780_s25 }
 0x738   : > { %s20381_s25 = smov %s20383_s27  ;;  %24 = sbr.rel (!%p22_p8) target bundleno = 11 (0xb), region = 110 }
 0x73f   :  { %10143 = vsyncpa [#allocation3], 1 }
 0x740   :  { %10145 = vsyncpa [#allocation3 + $0x1], 1 }
 0x741   :  { %10146 = vsyncpa [#allocation6], 1 }
 0x742   :  { %10147 = vsyncpa [#allocation9], 1 }
 0x743   :  { %10148 = vsyncpa [#allocation12], 1 }
 0x744   :  { %10149 = vsyncpa [#allocation4], 1 }
 0x745   :  { %10151 = vsyncpa [#allocation4 + $0x1], 1 }

</bundles_post_ra>
